<compile_context>
chip_gen: v5e
topology: v5e:2x2
jax: 0.10.0
libtpu: 0.0.40
codegen_flags: <defaults>
</compile_context>

<pallas_src>
import jax
import jax.numpy as jnp
from jax.experimental import pallas as pl
from jax.experimental.pallas import tpu as pltpu

# Static problem sizes implied by the PyTorch module (fc1 expects 64*73 inputs).
L_IN = 300
K1, C1 = 5, 128
K2, C2 = 3, 64
L1 = L_IN - (K1 - 1)        # 296  conv1 output length
P1 = L1 // 2                # 148  pool1 output length
L2 = P1 - (K2 - 1)          # 146  conv2 output length
P2 = L2 // 2                # 73   pool2 output length
F = C2 * P2                 # 4672 flattened features
NQ = P2 // 2                # 36   paired flatten groups (position 72 is the tail)


# ------------------------------ fused kernel ---------------------------------

def _cnn1_kernel(x_ref, w1_ref, t1_ref, w2s_ref, t2_ref, w1f_hbm,
                 b1f_ref, w2f_ref, b2f_ref, out_ref,
                 w1f_vmem, act1_ref, pool1_ref, act2_ref, flat_ref, dma_sem):
    # Kick off the big FC1-weight DMA (HBM -> VMEM) immediately so it overlaps
    # with the conv/pool compute of this sample; wait only right before FC1.
    w1f_copy = pltpu.make_async_copy(w1f_hbm, w1f_vmem, dma_sem)
    w1f_copy.start()

    # ---- conv1 (C_in = 1, K = 5): 5 shifted broadcast-MACs on the VPU ------
    # BN1 scale is folded into w1 on the host; only the additive shift remains.
    acc1 = x_ref[0, 0:L1, :] * w1_ref[0:1, :]              # (296,1)*(1,128)
    for k in range(1, K1):
        acc1 = acc1 + x_ref[0, k:k + L1, :] * w1_ref[k:k + 1, :]
    act1_ref[...] = jnp.tanh(acc1 + t1_ref[...])            # (296, 128)

    # ---- pool1: strided pairwise max, materialized once ---------------------
    pool1_ref[...] = jnp.maximum(act1_ref[pl.ds(0, P1, stride=2), :],
                                 act1_ref[pl.ds(1, P1, stride=2), :])  # (148,128)

    # ---- conv2: the 3 taps fused into ONE lane-stacked MXU matmul -----------
    big = jnp.concatenate(
        [pool1_ref[k:k + L2, :].astype(jnp.bfloat16) for k in range(K2)],
        axis=1)                                              # (146, 384) bf16
    z = jnp.dot(big, w2s_ref[...], preferred_element_type=jnp.float32)
    act2_ref[...] = jnp.tanh(z + t2_ref[...])                # (146, 64)

    # ---- pool2 + flatten (flat index = 64*p + c, matches permuted w1f) ------
    colA = jnp.maximum(act2_ref[pl.ds(0, NQ + 1, stride=4), :],
                       act2_ref[pl.ds(1, NQ + 1, stride=4), :])   # (37,64): p even
    colB = jnp.maximum(act2_ref[pl.ds(2, NQ, stride=4), :],
                       act2_ref[pl.ds(3, NQ, stride=4), :])       # (36,64): p odd
    flat2d = jnp.concatenate([colA[0:NQ, :], colB], axis=1)       # (36, 128)
    for q in range(NQ):                        # 36 lane-dense (1,128) stores
        flat_ref[0:1, 2 * C2 * q:2 * C2 * (q + 1)] = flat2d[q:q + 1, :]
    flat_ref[0:1, F - C2:F] = colA[NQ:NQ + 1, :]                  # last position

    # ---- FC head: (1,4672)@(4672,256) -> tanh -> (1,256)@(256,4) ------------
    w1f_copy.wait()
    h = jnp.tanh(jnp.dot(flat_ref[...].astype(jnp.bfloat16), w1f_vmem[...],
                         preferred_element_type=jnp.float32) + b1f_ref[...])
    logits = (jnp.dot(h.astype(jnp.bfloat16), w2f_ref[...],
                      preferred_element_type=jnp.float32) + b2f_ref[...])
    out_ref[0] = logits.astype(out_ref.dtype)


# --------------------------- host-side param folding --------------------------

def _fold_params(raw, eps=1e-5):
    """Fold conv bias + eval-mode BN (scale into weights, shift separate) and
    pre-transpose / pre-stack weights into the kernel's lane-dense layouts."""
    s1 = raw["bn1_g"] / jnp.sqrt(raw["bn1_v"] + eps)          # (128,)
    s2 = raw["bn2_g"] / jnp.sqrt(raw["bn2_v"] + eps)          # (64,)

    w1 = jnp.transpose(raw["conv1_w"][:, 0, :], (1, 0)) * s1[None, :]   # (5,128) f32
    t1 = (raw["bn1_b"] + (raw["conv1_b"] - raw["bn1_m"]) * s1)[None, :]

    # conv2 weight -> (k, c_in, c_out), scale by s2, stack taps along K -> (384,64)
    w2 = jnp.transpose(raw["conv2_w"], (2, 1, 0)) * s2[None, None, :]
    w2s = w2.reshape(K2 * C1, C2).astype(jnp.bfloat16)
    t2 = (raw["bn2_b"] + (raw["conv2_b"] - raw["bn2_m"]) * s2)[None, :]

    # kernel flatten index is 64*p + c; PyTorch's view(-1, 64*73) uses c*73 + p.
    w1f = jnp.transpose(raw["fc1_w"].reshape(256, C2, P2),
                        (2, 1, 0)).reshape(F, 256).astype(jnp.bfloat16)

    return {
        "w1": w1, "t1": t1, "w2s": w2s, "t2": t2, "w1f": w1f,
        "b1f": raw["fc1_b"][None, :],
        "w2f": jnp.transpose(raw["fc2_w"], (1, 0)).astype(jnp.bfloat16),
        "b2f": raw["fc2_b"][None, :],
    }


@jax.jit
def cnn1_forward(x, raw_params):
    """x: (B, 1, 300) float32 (PyTorch NCL layout). Returns (B, 4) float32."""
    B = x.shape[0]
    p = _fold_params(raw_params)
    xk = jnp.transpose(x, (0, 2, 1))     # (B, 300, 1): length along sublanes

    out = pl.pallas_call(
        _cnn1_kernel,
        out_shape=jax.ShapeDtypeStruct((B, 1, 4), jnp.float32),
        grid=(B,),
        in_specs=[
            pl.BlockSpec((1, L_IN, 1), lambda b: (b, 0, 0)),     # x (per sample)
            pl.BlockSpec((K1, C1), lambda b: (0, 0)),            # w1 (BN-scaled)
            pl.BlockSpec((1, C1), lambda b: (0, 0)),             # t1
            pl.BlockSpec((K2 * C1, C2), lambda b: (0, 0)),       # w2 stacked, bf16
            pl.BlockSpec((1, C2), lambda b: (0, 0)),             # t2
            pl.BlockSpec(memory_space=pl.ANY),                   # w1f stays in HBM
            pl.BlockSpec((1, 256), lambda b: (0, 0)),            # b1f
            pl.BlockSpec((256, 4), lambda b: (0, 0)),            # w2f, bf16
            pl.BlockSpec((1, 4), lambda b: (0, 0)),              # b2f
        ],
        out_specs=pl.BlockSpec((1, 1, 4), lambda b: (b, 0, 0)),
        scratch_shapes=[
            pltpu.VMEM((F, 256), jnp.bfloat16),    # w1f landing buffer (manual DMA)
            pltpu.VMEM((L1, C1), jnp.float32),     # conv1 activation
            pltpu.VMEM((P1, C1), jnp.float32),     # pool1
            pltpu.VMEM((L2, C2), jnp.float32),     # conv2 activation
            pltpu.VMEM((1, F), jnp.float32),       # flattened features
            pltpu.SemaphoreType.DMA,               # w1f copy completion
        ],
        compiler_params=pltpu.CompilerParams(
            dimension_semantics=("parallel",),
            vmem_limit_bytes=32 * 1024 * 1024),
    )(xk, p["w1"], p["t1"], p["w2s"], p["t2"], p["w1f"],
      p["b1f"], p["w2f"], p["b2f"])
    return out.reshape(B, 4)


# ------------------------------- parameter init --------------------------------

def init_raw_params(key):
    ks = jax.random.split(key, 16)

    def u(k, shape, fan_in):
        b = 1.0 / (fan_in ** 0.5)
        return jax.random.uniform(k, shape, jnp.float32, -b, b)

    return {
        "conv1_w": u(ks[0], (128, 1, 5), 5),
        "conv1_b": u(ks[1], (128,), 5),
        "bn1_g": 1.0 + 0.1 * jax.random.normal(ks[2], (128,), jnp.float32),
        "bn1_b": 0.1 * jax.random.normal(ks[3], (128,), jnp.float32),
        "bn1_m": 0.1 * jax.random.normal(ks[4], (128,), jnp.float32),
        "bn1_v": jax.random.uniform(ks[5], (128,), jnp.float32, 0.5, 1.5),
        "conv2_w": u(ks[6], (64, 128, 3), 128 * 3),
        "conv2_b": u(ks[7], (64,), 128 * 3),
        "bn2_g": 1.0 + 0.1 * jax.random.normal(ks[8], (64,), jnp.float32),
        "bn2_b": 0.1 * jax.random.normal(ks[9], (64,), jnp.float32),
        "bn2_m": 0.1 * jax.random.normal(ks[10], (64,), jnp.float32),
        "bn2_v": jax.random.uniform(ks[11], (64,), jnp.float32, 0.5, 1.5),
        "fc1_w": u(ks[12], (256, 64 * 73), 64 * 73),
        "fc1_b": u(ks[13], (256,), 64 * 73),
        "fc2_w": u(ks[14], (4, 256), 256),
        "fc2_b": u(ks[15], (4,), 256),
    }


# ------------------------------ pure-JAX reference -----------------------------

def reference_forward(x, raw, eps=1e-5):
    hp = jax.lax.Precision.HIGHEST

    def conv1d(xx, w, b):
        K = w.shape[2]
        L_out = xx.shape[2] - K + 1
        out = jnp.zeros((xx.shape[0], w.shape[0], L_out), jnp.float32)
        for k in range(K):
            out = out + jnp.einsum("bcl,oc->bol", xx[:, :, k:k + L_out],
                                   w[:, :, k], precision=hp)
        return out + b[None, :, None]

    def bn(xx, g, beta, m, v):
        return ((xx - m[None, :, None]) / jnp.sqrt(v[None, :, None] + eps)
                * g[None, :, None] + beta[None, :, None])

    def maxpool2(xx):
        Bq, C, L = xx.shape
        return jnp.max(xx[:, :, :(L // 2) * 2].reshape(Bq, C, L // 2, 2), axis=-1)

    a = jnp.tanh(bn(conv1d(x, raw["conv1_w"], raw["conv1_b"]),
                    raw["bn1_g"], raw["bn1_b"], raw["bn1_m"], raw["bn1_v"]))
    a = maxpool2(a)
    a = jnp.tanh(bn(conv1d(a, raw["conv2_w"], raw["conv2_b"]),
                    raw["bn2_g"], raw["bn2_b"], raw["bn2_m"], raw["bn2_v"]))
    a = maxpool2(a)
    f = a.reshape(a.shape[0], -1)
    h = jnp.tanh(jnp.dot(f, raw["fc1_w"].T, precision=hp) + raw["fc1_b"])
    return jnp.dot(h, raw["fc2_w"].T, precision=hp) + raw["fc2_b"]


# ------------------------------------ main --------------------------------------

if __name__ == "__main__":
    key = jax.random.PRNGKey(0)
    key, kx = jax.random.split(key)
    B, L = 2, 300                      # 300 -> conv/pool chain -> 64 * 73 features
    x = jax.random.normal(kx, (B, 1, L), jnp.float32)

    raw = init_raw_params(key)

    out = cnn1_forward(x, raw)
    out = jax.block_until_ready(out)
    assert out.shape == (B, 4), out.shape

    ref = reference_forward(x, raw)
    err = float(jnp.max(jnp.abs(out - ref)))
    assert jnp.allclose(out, ref, atol=3e-2, rtol=3e-2), (
        "mismatch vs reference: max abs err = %f" % err)

    print("KERNEL_OK")
</pallas_src>

<mosaic_0001>
module attributes {stable_mosaic.version = 11 : i64} {
  func.func @_cnn1_kernel(%arg0: i32, %arg1: memref<1x300x1xf32, #tpu.memory_space<vmem>>, %arg2: memref<5x128xf32, #tpu.memory_space<vmem>>, %arg3: memref<1x128xf32, #tpu.memory_space<vmem>>, %arg4: memref<384x64xbf16, #tpu.memory_space<vmem>>, %arg5: memref<1x64xf32, #tpu.memory_space<vmem>>, %arg6: memref<4672x256xbf16, #tpu.memory_space<any>>, %arg7: memref<1x256xf32, #tpu.memory_space<vmem>>, %arg8: memref<256x4xbf16, #tpu.memory_space<vmem>>, %arg9: memref<1x4xf32, #tpu.memory_space<vmem>>, %arg10: memref<1x1x4xf32, #tpu.memory_space<vmem>>, %arg11: memref<4672x256xbf16, #tpu.memory_space<vmem>>, %arg12: memref<296x128xf32, #tpu.memory_space<vmem>>, %arg13: memref<148x128xf32, #tpu.memory_space<vmem>>, %arg14: memref<146x64xf32, #tpu.memory_space<vmem>>, %arg15: memref<1x4672xf32, #tpu.memory_space<vmem>>, %arg16: memref<!tpu.dma_semaphore, #tpu.memory_space<semaphore_mem>>) attributes {dimension_semantics = [#tpu.dimension_semantics<parallel>], iteration_bounds = array<i64: 2>, scalar_prefetch = 0 : i64, scratch_operands = 6 : i64, tpu.core_type = #tpu.core_type<tc>, window_params = [{transform_indices = @transform_0, window_bounds = array<i64: 1, 300, 1>}, {pipeline_mode = #tpu.pipeline_mode<synchronous>, transform_indices = @transform_1, window_bounds = array<i64: 5, 128>}, {pipeline_mode = #tpu.pipeline_mode<synchronous>, transform_indices = @transform_2, window_bounds = array<i64: 1, 128>}, {pipeline_mode = #tpu.pipeline_mode<synchronous>, transform_indices = @transform_3, window_bounds = array<i64: 384, 64>}, {pipeline_mode = #tpu.pipeline_mode<synchronous>, transform_indices = @transform_4, window_bounds = array<i64: 1, 64>}, {}, {pipeline_mode = #tpu.pipeline_mode<synchronous>, transform_indices = @transform_6, window_bounds = array<i64: 1, 256>}, {pipeline_mode = #tpu.pipeline_mode<synchronous>, transform_indices = @transform_7, window_bounds = array<i64: 256, 4>}, {pipeline_mode = #tpu.pipeline_mode<synchronous>, transform_indices = @transform_8, window_bounds = array<i64: 1, 4>}, {transform_indices = @transform_9, window_bounds = array<i64: 1, 1, 4>}]} {
    tpu.enqueue_dma source(%arg6 : memref<4672x256xbf16, #tpu.memory_space<any>>) target(%arg11 : memref<4672x256xbf16, #tpu.memory_space<vmem>>) target_semaphore(%arg16 : memref<!tpu.dma_semaphore, #tpu.memory_space<semaphore_mem>>)
    %c0 = arith.constant 0 : index
    %c0_0 = arith.constant 0 : index
    %c0_1 = arith.constant 0 : index
    %0 = vector.load %arg1[%c0, %c0_0, %c0_1] : memref<1x300x1xf32, #tpu.memory_space<vmem>>, vector<1x296x1xf32>
    %1 = vector.shape_cast %0 : vector<1x296x1xf32> to vector<296x1xf32>
    %c0_2 = arith.constant 0 : index
    %c0_3 = arith.constant 0 : index
    %2 = vector.load %arg2[%c0_2, %c0_3] : memref<5x128xf32, #tpu.memory_space<vmem>>, vector<1x128xf32>
    %3 = vector.broadcast %1 : vector<296x1xf32> to vector<296x128xf32>
    %4 = vector.broadcast %2 : vector<1x128xf32> to vector<296x128xf32>
    %5 = arith.mulf %3, %4 : vector<296x128xf32>
    %c0_4 = arith.constant 0 : index
    %c1 = arith.constant 1 : index
    %c0_5 = arith.constant 0 : index
    %6 = vector.load %arg1[%c0_4, %c1, %c0_5] : memref<1x300x1xf32, #tpu.memory_space<vmem>>, vector<1x296x1xf32>
    %7 = vector.shape_cast %6 : vector<1x296x1xf32> to vector<296x1xf32>
    %c1_6 = arith.constant 1 : index
    %c0_7 = arith.constant 0 : index
    %8 = vector.load %arg2[%c1_6, %c0_7] : memref<5x128xf32, #tpu.memory_space<vmem>>, vector<1x128xf32>
    %9 = vector.broadcast %7 : vector<296x1xf32> to vector<296x128xf32>
    %10 = vector.broadcast %8 : vector<1x128xf32> to vector<296x128xf32>
    %11 = arith.mulf %9, %10 : vector<296x128xf32>
    %12 = arith.addf %5, %11 : vector<296x128xf32>
    %c0_8 = arith.constant 0 : index
    %c2 = arith.constant 2 : index
    %c0_9 = arith.constant 0 : index
    %13 = vector.load %arg1[%c0_8, %c2, %c0_9] : memref<1x300x1xf32, #tpu.memory_space<vmem>>, vector<1x296x1xf32>
    %14 = vector.shape_cast %13 : vector<1x296x1xf32> to vector<296x1xf32>
    %c2_10 = arith.constant 2 : index
    %c0_11 = arith.constant 0 : index
    %15 = vector.load %arg2[%c2_10, %c0_11] : memref<5x128xf32, #tpu.memory_space<vmem>>, vector<1x128xf32>
    %16 = vector.broadcast %14 : vector<296x1xf32> to vector<296x128xf32>
    %17 = vector.broadcast %15 : vector<1x128xf32> to vector<296x128xf32>
    %18 = arith.mulf %16, %17 : vector<296x128xf32>
    %19 = arith.addf %12, %18 : vector<296x128xf32>
    %c0_12 = arith.constant 0 : index
    %c3 = arith.constant 3 : index
    %c0_13 = arith.constant 0 : index
    %20 = vector.load %arg1[%c0_12, %c3, %c0_13] : memref<1x300x1xf32, #tpu.memory_space<vmem>>, vector<1x296x1xf32>
    %21 = vector.shape_cast %20 : vector<1x296x1xf32> to vector<296x1xf32>
    %c3_14 = arith.constant 3 : index
    %c0_15 = arith.constant 0 : index
    %22 = vector.load %arg2[%c3_14, %c0_15] : memref<5x128xf32, #tpu.memory_space<vmem>>, vector<1x128xf32>
    %23 = vector.broadcast %21 : vector<296x1xf32> to vector<296x128xf32>
    %24 = vector.broadcast %22 : vector<1x128xf32> to vector<296x128xf32>
    %25 = arith.mulf %23, %24 : vector<296x128xf32>
    %26 = arith.addf %19, %25 : vector<296x128xf32>
    %c0_16 = arith.constant 0 : index
    %c4 = arith.constant 4 : index
    %c0_17 = arith.constant 0 : index
    %27 = vector.load %arg1[%c0_16, %c4, %c0_17] : memref<1x300x1xf32, #tpu.memory_space<vmem>>, vector<1x296x1xf32>
    %28 = vector.shape_cast %27 : vector<1x296x1xf32> to vector<296x1xf32>
    %c4_18 = arith.constant 4 : index
    %c0_19 = arith.constant 0 : index
    %29 = vector.load %arg2[%c4_18, %c0_19] : memref<5x128xf32, #tpu.memory_space<vmem>>, vector<1x128xf32>
    %30 = vector.broadcast %28 : vector<296x1xf32> to vector<296x128xf32>
    %31 = vector.broadcast %29 : vector<1x128xf32> to vector<296x128xf32>
    %32 = arith.mulf %30, %31 : vector<296x128xf32>
    %33 = arith.addf %26, %32 : vector<296x128xf32>
    %c0_20 = arith.constant 0 : index
    %c0_21 = arith.constant 0 : index
    %34 = vector.load %arg3[%c0_20, %c0_21] : memref<1x128xf32, #tpu.memory_space<vmem>>, vector<1x128xf32>
    %35 = vector.broadcast %34 : vector<1x128xf32> to vector<296x128xf32>
    %36 = arith.addf %33, %35 : vector<296x128xf32>
    %37 = math.tanh %36 : vector<296x128xf32>
    %c0_22 = arith.constant 0 : index
    %c0_23 = arith.constant 0 : index
    %38 = vector.load %arg12[%c0_22, %c0_23] : memref<296x128xf32, #tpu.memory_space<vmem>>, vector<296x128xf32>
    tpu.vector_store %arg12[%c0_22, %c0_23], %37 {strides = array<i32>} : memref<296x128xf32, #tpu.memory_space<vmem>>, vector<296x128xf32>,
    %c0_24 = arith.constant 0 : index
    %c0_25 = arith.constant 0 : index
    %39 = tpu.strided_load %arg12[%c0_24, %c0_25] {strides = array<i32: 2, 1>} : memref<296x128xf32, #tpu.memory_space<vmem>>, vector<148x128xf32>
    %c1_26 = arith.constant 1 : index
    %c0_27 = arith.constant 0 : index
    %40 = tpu.strided_load %arg12[%c1_26, %c0_27] {strides = array<i32: 2, 1>} : memref<296x128xf32, #tpu.memory_space<vmem>>, vector<148x128xf32>
    %41 = arith.maximumf %39, %40 : vector<148x128xf32>
    %c0_28 = arith.constant 0 : index
    %c0_29 = arith.constant 0 : index
    %42 = vector.load %arg13[%c0_28, %c0_29] : memref<148x128xf32, #tpu.memory_space<vmem>>, vector<148x128xf32>
    tpu.vector_store %arg13[%c0_28, %c0_29], %41 {strides = array<i32>} : memref<148x128xf32, #tpu.memory_space<vmem>>, vector<148x128xf32>,
    %c0_30 = arith.constant 0 : index
    %c0_31 = arith.constant 0 : index
    %43 = vector.load %arg13[%c0_30, %c0_31] : memref<148x128xf32, #tpu.memory_space<vmem>>, vector<146x128xf32>
    %44 = arith.truncf %43 : vector<146x128xf32> to vector<146x128xbf16>
    %c1_32 = arith.constant 1 : index
    %c0_33 = arith.constant 0 : index
    %45 = vector.load %arg13[%c1_32, %c0_33] : memref<148x128xf32, #tpu.memory_space<vmem>>, vector<146x128xf32>
    %46 = arith.truncf %45 : vector<146x128xf32> to vector<146x128xbf16>
    %c2_34 = arith.constant 2 : index
    %c0_35 = arith.constant 0 : index
    %47 = vector.load %arg13[%c2_34, %c0_35] : memref<148x128xf32, #tpu.memory_space<vmem>>, vector<146x128xf32>
    %48 = arith.truncf %47 : vector<146x128xf32> to vector<146x128xbf16>
    %49 = tpu.concatenate %44, %46, %48 in 1 : vector<146x128xbf16>, vector<146x128xbf16>, vector<146x128xbf16> -> vector<146x384xbf16>
    %c0_36 = arith.constant 0 : index
    %c0_37 = arith.constant 0 : index
    %50 = vector.load %arg4[%c0_36, %c0_37] : memref<384x64xbf16, #tpu.memory_space<vmem>>, vector<384x64xbf16>
    %cst = arith.constant dense<0.000000e+00> : vector<146x64xf32>
    %51 = tpu.matmul %49, %50, %cst {dimension_numbers = #tpu.dot_dimension_numbers<[1], [0], [0], [1], [0, 0, 1, 1], [], []>} : vector<146x384xbf16>, vector<384x64xbf16>, vector<146x64xf32> -> vector<146x64xf32>
    %c0_38 = arith.constant 0 : index
    %c0_39 = arith.constant 0 : index
    %52 = vector.load %arg5[%c0_38, %c0_39] : memref<1x64xf32, #tpu.memory_space<vmem>>, vector<1x64xf32>
    %53 = vector.broadcast %52 : vector<1x64xf32> to vector<146x64xf32>
    %54 = arith.addf %51, %53 : vector<146x64xf32>
    %55 = math.tanh %54 : vector<146x64xf32>
    %c0_40 = arith.constant 0 : index
    %c0_41 = arith.constant 0 : index
    %56 = vector.load %arg14[%c0_40, %c0_41] : memref<146x64xf32, #tpu.memory_space<vmem>>, vector<146x64xf32>
    tpu.vector_store %arg14[%c0_40, %c0_41], %55 {strides = array<i32>} : memref<146x64xf32, #tpu.memory_space<vmem>>, vector<146x64xf32>,
    %c0_42 = arith.constant 0 : index
    %c0_43 = arith.constant 0 : index
    %57 = tpu.strided_load %arg14[%c0_42, %c0_43] {strides = array<i32: 4, 1>} : memref<146x64xf32, #tpu.memory_space<vmem>>, vector<37x64xf32>
    %c1_44 = arith.constant 1 : index
    %c0_45 = arith.constant 0 : index
    %58 = tpu.strided_load %arg14[%c1_44, %c0_45] {strides = array<i32: 4, 1>} : memref<146x64xf32, #tpu.memory_space<vmem>>, vector<37x64xf32>
    %59 = arith.maximumf %57, %58 : vector<37x64xf32>
    %c2_46 = arith.constant 2 : index
    %c0_47 = arith.constant 0 : index
    %60 = tpu.strided_load %arg14[%c2_46, %c0_47] {strides = array<i32: 4, 1>} : memref<146x64xf32, #tpu.memory_space<vmem>>, vector<36x64xf32>
    %c3_48 = arith.constant 3 : index
    %c0_49 = arith.constant 0 : index
    %61 = tpu.strided_load %arg14[%c3_48, %c0_49] {strides = array<i32: 4, 1>} : memref<146x64xf32, #tpu.memory_space<vmem>>, vector<36x64xf32>
    %62 = arith.maximumf %60, %61 : vector<36x64xf32>
    %63 = vector.extract_strided_slice %59 {offsets = [0, 0], sizes = [36, 64], strides = [1, 1]} : vector<37x64xf32> to vector<36x64xf32>
    %64 = tpu.concatenate %63, %62 in 1 : vector<36x64xf32>, vector<36x64xf32> -> vector<36x128xf32>
    %65 = vector.extract_strided_slice %64 {offsets = [0, 0], sizes = [1, 128], strides = [1, 1]} : vector<36x128xf32> to vector<1x128xf32>
    %c0_50 = arith.constant 0 : index
    %c0_51 = arith.constant 0 : index
    %66 = vector.load %arg15[%c0_50, %c0_51] : memref<1x4672xf32, #tpu.memory_space<vmem>>, vector<1x128xf32>
    tpu.vector_store %arg15[%c0_50, %c0_51], %65 {strides = array<i32>} : memref<1x4672xf32, #tpu.memory_space<vmem>>, vector<1x128xf32>,
    %67 = vector.extract_strided_slice %64 {offsets = [1, 0], sizes = [1, 128], strides = [1, 1]} : vector<36x128xf32> to vector<1x128xf32>
    %c0_52 = arith.constant 0 : index
    %c128 = arith.constant 128 : index
    %68 = vector.load %arg15[%c0_52, %c128] : memref<1x4672xf32, #tpu.memory_space<vmem>>, vector<1x128xf32>
    tpu.vector_store %arg15[%c0_52, %c128], %67 {strides = array<i32>} : memref<1x4672xf32, #tpu.memory_space<vmem>>, vector<1x128xf32>,
    %69 = vector.extract_strided_slice %64 {offsets = [2, 0], sizes = [1, 128], strides = [1, 1]} : vector<36x128xf32> to vector<1x128xf32>
    %c0_53 = arith.constant 0 : index
    %c256 = arith.constant 256 : index
    %70 = vector.load %arg15[%c0_53, %c256] : memref<1x4672xf32, #tpu.memory_space<vmem>>, vector<1x128xf32>
    tpu.vector_store %arg15[%c0_53, %c256], %69 {strides = array<i32>} : memref<1x4672xf32, #tpu.memory_space<vmem>>, vector<1x128xf32>,
    %71 = vector.extract_strided_slice %64 {offsets = [3, 0], sizes = [1, 128], strides = [1, 1]} : vector<36x128xf32> to vector<1x128xf32>
    %c0_54 = arith.constant 0 : index
    %c384 = arith.constant 384 : index
    %72 = vector.load %arg15[%c0_54, %c384] : memref<1x4672xf32, #tpu.memory_space<vmem>>, vector<1x128xf32>
    tpu.vector_store %arg15[%c0_54, %c384], %71 {strides = array<i32>} : memref<1x4672xf32, #tpu.memory_space<vmem>>, vector<1x128xf32>,
    %73 = vector.extract_strided_slice %64 {offsets = [4, 0], sizes = [1, 128], strides = [1, 1]} : vector<36x128xf32> to vector<1x128xf32>
    %c0_55 = arith.constant 0 : index
    %c512 = arith.constant 512 : index
    %74 = vector.load %arg15[%c0_55, %c512] : memref<1x4672xf32, #tpu.memory_space<vmem>>, vector<1x128xf32>
    tpu.vector_store %arg15[%c0_55, %c512], %73 {strides = array<i32>} : memref<1x4672xf32, #tpu.memory_space<vmem>>, vector<1x128xf32>,
    %75 = vector.extract_strided_slice %64 {offsets = [5, 0], sizes = [1, 128], strides = [1, 1]} : vector<36x128xf32> to vector<1x128xf32>
    %c0_56 = arith.constant 0 : index
    %c640 = arith.constant 640 : index
    %76 = vector.load %arg15[%c0_56, %c640] : memref<1x4672xf32, #tpu.memory_space<vmem>>, vector<1x128xf32>
    tpu.vector_store %arg15[%c0_56, %c640], %75 {strides = array<i32>} : memref<1x4672xf32, #tpu.memory_space<vmem>>, vector<1x128xf32>,
    %77 = vector.extract_strided_slice %64 {offsets = [6, 0], sizes = [1, 128], strides = [1, 1]} : vector<36x128xf32> to vector<1x128xf32>
    %c0_57 = arith.constant 0 : index
    %c768 = arith.constant 768 : index
    %78 = vector.load %arg15[%c0_57, %c768] : memref<1x4672xf32, #tpu.memory_space<vmem>>, vector<1x128xf32>
    tpu.vector_store %arg15[%c0_57, %c768], %77 {strides = array<i32>} : memref<1x4672xf32, #tpu.memory_space<vmem>>, vector<1x128xf32>,
    %79 = vector.extract_strided_slice %64 {offsets = [7, 0], sizes = [1, 128], strides = [1, 1]} : vector<36x128xf32> to vector<1x128xf32>
    %c0_58 = arith.constant 0 : index
    %c896 = arith.constant 896 : index
    %80 = vector.load %arg15[%c0_58, %c896] : memref<1x4672xf32, #tpu.memory_space<vmem>>, vector<1x128xf32>
    tpu.vector_store %arg15[%c0_58, %c896], %79 {strides = array<i32>} : memref<1x4672xf32, #tpu.memory_space<vmem>>, vector<1x128xf32>,
    %81 = vector.extract_strided_slice %64 {offsets = [8, 0], sizes = [1, 128], strides = [1, 1]} : vector<36x128xf32> to vector<1x128xf32>
    %c0_59 = arith.constant 0 : index
    %c1024 = arith.constant 1024 : index
    %82 = vector.load %arg15[%c0_59, %c1024] : memref<1x4672xf32, #tpu.memory_space<vmem>>, vector<1x128xf32>
    tpu.vector_store %arg15[%c0_59, %c1024], %81 {strides = array<i32>} : memref<1x4672xf32, #tpu.memory_space<vmem>>, vector<1x128xf32>,
    %83 = vector.extract_strided_slice %64 {offsets = [9, 0], sizes = [1, 128], strides = [1, 1]} : vector<36x128xf32> to vector<1x128xf32>
    %c0_60 = arith.constant 0 : index
    %c1152 = arith.constant 1152 : index
    %84 = vector.load %arg15[%c0_60, %c1152] : memref<1x4672xf32, #tpu.memory_space<vmem>>, vector<1x128xf32>
    tpu.vector_store %arg15[%c0_60, %c1152], %83 {strides = array<i32>} : memref<1x4672xf32, #tpu.memory_space<vmem>>, vector<1x128xf32>,
    %85 = vector.extract_strided_slice %64 {offsets = [10, 0], sizes = [1, 128], strides = [1, 1]} : vector<36x128xf32> to vector<1x128xf32>
    %c0_61 = arith.constant 0 : index
    %c1280 = arith.constant 1280 : index
    %86 = vector.load %arg15[%c0_61, %c1280] : memref<1x4672xf32, #tpu.memory_space<vmem>>, vector<1x128xf32>
    tpu.vector_store %arg15[%c0_61, %c1280], %85 {strides = array<i32>} : memref<1x4672xf32, #tpu.memory_space<vmem>>, vector<1x128xf32>,
    %87 = vector.extract_strided_slice %64 {offsets = [11, 0], sizes = [1, 128], strides = [1, 1]} : vector<36x128xf32> to vector<1x128xf32>
    %c0_62 = arith.constant 0 : index
    %c1408 = arith.constant 1408 : index
    %88 = vector.load %arg15[%c0_62, %c1408] : memref<1x4672xf32, #tpu.memory_space<vmem>>, vector<1x128xf32>
    tpu.vector_store %arg15[%c0_62, %c1408], %87 {strides = array<i32>} : memref<1x4672xf32, #tpu.memory_space<vmem>>, vector<1x128xf32>,
    %89 = vector.extract_strided_slice %64 {offsets = [12, 0], sizes = [1, 128], strides = [1, 1]} : vector<36x128xf32> to vector<1x128xf32>
    %c0_63 = arith.constant 0 : index
    %c1536 = arith.constant 1536 : index
    %90 = vector.load %arg15[%c0_63, %c1536] : memref<1x4672xf32, #tpu.memory_space<vmem>>, vector<1x128xf32>
    tpu.vector_store %arg15[%c0_63, %c1536], %89 {strides = array<i32>} : memref<1x4672xf32, #tpu.memory_space<vmem>>, vector<1x128xf32>,
    %91 = vector.extract_strided_slice %64 {offsets = [13, 0], sizes = [1, 128], strides = [1, 1]} : vector<36x128xf32> to vector<1x128xf32>
    %c0_64 = arith.constant 0 : index
    %c1664 = arith.constant 1664 : index
    %92 = vector.load %arg15[%c0_64, %c1664] : memref<1x4672xf32, #tpu.memory_space<vmem>>, vector<1x128xf32>
    tpu.vector_store %arg15[%c0_64, %c1664], %91 {strides = array<i32>} : memref<1x4672xf32, #tpu.memory_space<vmem>>, vector<1x128xf32>,
    %93 = vector.extract_strided_slice %64 {offsets = [14, 0], sizes = [1, 128], strides = [1, 1]} : vector<36x128xf32> to vector<1x128xf32>
    %c0_65 = arith.constant 0 : index
    %c1792 = arith.constant 1792 : index
    %94 = vector.load %arg15[%c0_65, %c1792] : memref<1x4672xf32, #tpu.memory_space<vmem>>, vector<1x128xf32>
    tpu.vector_store %arg15[%c0_65, %c1792], %93 {strides = array<i32>} : memref<1x4672xf32, #tpu.memory_space<vmem>>, vector<1x128xf32>,
    %95 = vector.extract_strided_slice %64 {offsets = [15, 0], sizes = [1, 128], strides = [1, 1]} : vector<36x128xf32> to vector<1x128xf32>
    %c0_66 = arith.constant 0 : index
    %c1920 = arith.constant 1920 : index
    %96 = vector.load %arg15[%c0_66, %c1920] : memref<1x4672xf32, #tpu.memory_space<vmem>>, vector<1x128xf32>
    tpu.vector_store %arg15[%c0_66, %c1920], %95 {strides = array<i32>} : memref<1x4672xf32, #tpu.memory_space<vmem>>, vector<1x128xf32>,
    %97 = vector.extract_strided_slice %64 {offsets = [16, 0], sizes = [1, 128], strides = [1, 1]} : vector<36x128xf32> to vector<1x128xf32>
    %c0_67 = arith.constant 0 : index
    %c2048 = arith.constant 2048 : index
    %98 = vector.load %arg15[%c0_67, %c2048] : memref<1x4672xf32, #tpu.memory_space<vmem>>, vector<1x128xf32>
    tpu.vector_store %arg15[%c0_67, %c2048], %97 {strides = array<i32>} : memref<1x4672xf32, #tpu.memory_space<vmem>>, vector<1x128xf32>,
    %99 = vector.extract_strided_slice %64 {offsets = [17, 0], sizes = [1, 128], strides = [1, 1]} : vector<36x128xf32> to vector<1x128xf32>
    %c0_68 = arith.constant 0 : index
    %c2176 = arith.constant 2176 : index
    %100 = vector.load %arg15[%c0_68, %c2176] : memref<1x4672xf32, #tpu.memory_space<vmem>>, vector<1x128xf32>
    tpu.vector_store %arg15[%c0_68, %c2176], %99 {strides = array<i32>} : memref<1x4672xf32, #tpu.memory_space<vmem>>, vector<1x128xf32>,
    %101 = vector.extract_strided_slice %64 {offsets = [18, 0], sizes = [1, 128], strides = [1, 1]} : vector<36x128xf32> to vector<1x128xf32>
    %c0_69 = arith.constant 0 : index
    %c2304 = arith.constant 2304 : index
    %102 = vector.load %arg15[%c0_69, %c2304] : memref<1x4672xf32, #tpu.memory_space<vmem>>, vector<1x128xf32>
    tpu.vector_store %arg15[%c0_69, %c2304], %101 {strides = array<i32>} : memref<1x4672xf32, #tpu.memory_space<vmem>>, vector<1x128xf32>,
    %103 = vector.extract_strided_slice %64 {offsets = [19, 0], sizes = [1, 128], strides = [1, 1]} : vector<36x128xf32> to vector<1x128xf32>
    %c0_70 = arith.constant 0 : index
    %c2432 = arith.constant 2432 : index
    %104 = vector.load %arg15[%c0_70, %c2432] : memref<1x4672xf32, #tpu.memory_space<vmem>>, vector<1x128xf32>
    tpu.vector_store %arg15[%c0_70, %c2432], %103 {strides = array<i32>} : memref<1x4672xf32, #tpu.memory_space<vmem>>, vector<1x128xf32>,
    %105 = vector.extract_strided_slice %64 {offsets = [20, 0], sizes = [1, 128], strides = [1, 1]} : vector<36x128xf32> to vector<1x128xf32>
    %c0_71 = arith.constant 0 : index
    %c2560 = arith.constant 2560 : index
    %106 = vector.load %arg15[%c0_71, %c2560] : memref<1x4672xf32, #tpu.memory_space<vmem>>, vector<1x128xf32>
    tpu.vector_store %arg15[%c0_71, %c2560], %105 {strides = array<i32>} : memref<1x4672xf32, #tpu.memory_space<vmem>>, vector<1x128xf32>,
    %107 = vector.extract_strided_slice %64 {offsets = [21, 0], sizes = [1, 128], strides = [1, 1]} : vector<36x128xf32> to vector<1x128xf32>
    %c0_72 = arith.constant 0 : index
    %c2688 = arith.constant 2688 : index
    %108 = vector.load %arg15[%c0_72, %c2688] : memref<1x4672xf32, #tpu.memory_space<vmem>>, vector<1x128xf32>
    tpu.vector_store %arg15[%c0_72, %c2688], %107 {strides = array<i32>} : memref<1x4672xf32, #tpu.memory_space<vmem>>, vector<1x128xf32>,
    %109 = vector.extract_strided_slice %64 {offsets = [22, 0], sizes = [1, 128], strides = [1, 1]} : vector<36x128xf32> to vector<1x128xf32>
    %c0_73 = arith.constant 0 : index
    %c2816 = arith.constant 2816 : index
    %110 = vector.load %arg15[%c0_73, %c2816] : memref<1x4672xf32, #tpu.memory_space<vmem>>, vector<1x128xf32>
    tpu.vector_store %arg15[%c0_73, %c2816], %109 {strides = array<i32>} : memref<1x4672xf32, #tpu.memory_space<vmem>>, vector<1x128xf32>,
    %111 = vector.extract_strided_slice %64 {offsets = [23, 0], sizes = [1, 128], strides = [1, 1]} : vector<36x128xf32> to vector<1x128xf32>
    %c0_74 = arith.constant 0 : index
    %c2944 = arith.constant 2944 : index
    %112 = vector.load %arg15[%c0_74, %c2944] : memref<1x4672xf32, #tpu.memory_space<vmem>>, vector<1x128xf32>
    tpu.vector_store %arg15[%c0_74, %c2944], %111 {strides = array<i32>} : memref<1x4672xf32, #tpu.memory_space<vmem>>, vector<1x128xf32>,
    %113 = vector.extract_strided_slice %64 {offsets = [24, 0], sizes = [1, 128], strides = [1, 1]} : vector<36x128xf32> to vector<1x128xf32>
    %c0_75 = arith.constant 0 : index
    %c3072 = arith.constant 3072 : index
    %114 = vector.load %arg15[%c0_75, %c3072] : memref<1x4672xf32, #tpu.memory_space<vmem>>, vector<1x128xf32>
    tpu.vector_store %arg15[%c0_75, %c3072], %113 {strides = array<i32>} : memref<1x4672xf32, #tpu.memory_space<vmem>>, vector<1x128xf32>,
    %115 = vector.extract_strided_slice %64 {offsets = [25, 0], sizes = [1, 128], strides = [1, 1]} : vector<36x128xf32> to vector<1x128xf32>
    %c0_76 = arith.constant 0 : index
    %c3200 = arith.constant 3200 : index
    %116 = vector.load %arg15[%c0_76, %c3200] : memref<1x4672xf32, #tpu.memory_space<vmem>>, vector<1x128xf32>
    tpu.vector_store %arg15[%c0_76, %c3200], %115 {strides = array<i32>} : memref<1x4672xf32, #tpu.memory_space<vmem>>, vector<1x128xf32>,
    %117 = vector.extract_strided_slice %64 {offsets = [26, 0], sizes = [1, 128], strides = [1, 1]} : vector<36x128xf32> to vector<1x128xf32>
    %c0_77 = arith.constant 0 : index
    %c3328 = arith.constant 3328 : index
    %118 = vector.load %arg15[%c0_77, %c3328] : memref<1x4672xf32, #tpu.memory_space<vmem>>, vector<1x128xf32>
    tpu.vector_store %arg15[%c0_77, %c3328], %117 {strides = array<i32>} : memref<1x4672xf32, #tpu.memory_space<vmem>>, vector<1x128xf32>,
    %119 = vector.extract_strided_slice %64 {offsets = [27, 0], sizes = [1, 128], strides = [1, 1]} : vector<36x128xf32> to vector<1x128xf32>
    %c0_78 = arith.constant 0 : index
    %c3456 = arith.constant 3456 : index
    %120 = vector.load %arg15[%c0_78, %c3456] : memref<1x4672xf32, #tpu.memory_space<vmem>>, vector<1x128xf32>
    tpu.vector_store %arg15[%c0_78, %c3456], %119 {strides = array<i32>} : memref<1x4672xf32, #tpu.memory_space<vmem>>, vector<1x128xf32>,
    %121 = vector.extract_strided_slice %64 {offsets = [28, 0], sizes = [1, 128], strides = [1, 1]} : vector<36x128xf32> to vector<1x128xf32>
    %c0_79 = arith.constant 0 : index
    %c3584 = arith.constant 3584 : index
    %122 = vector.load %arg15[%c0_79, %c3584] : memref<1x4672xf32, #tpu.memory_space<vmem>>, vector<1x128xf32>
    tpu.vector_store %arg15[%c0_79, %c3584], %121 {strides = array<i32>} : memref<1x4672xf32, #tpu.memory_space<vmem>>, vector<1x128xf32>,
    %123 = vector.extract_strided_slice %64 {offsets = [29, 0], sizes = [1, 128], strides = [1, 1]} : vector<36x128xf32> to vector<1x128xf32>
    %c0_80 = arith.constant 0 : index
    %c3712 = arith.constant 3712 : index
    %124 = vector.load %arg15[%c0_80, %c3712] : memref<1x4672xf32, #tpu.memory_space<vmem>>, vector<1x128xf32>
    tpu.vector_store %arg15[%c0_80, %c3712], %123 {strides = array<i32>} : memref<1x4672xf32, #tpu.memory_space<vmem>>, vector<1x128xf32>,
    %125 = vector.extract_strided_slice %64 {offsets = [30, 0], sizes = [1, 128], strides = [1, 1]} : vector<36x128xf32> to vector<1x128xf32>
    %c0_81 = arith.constant 0 : index
    %c3840 = arith.constant 3840 : index
    %126 = vector.load %arg15[%c0_81, %c3840] : memref<1x4672xf32, #tpu.memory_space<vmem>>, vector<1x128xf32>
    tpu.vector_store %arg15[%c0_81, %c3840], %125 {strides = array<i32>} : memref<1x4672xf32, #tpu.memory_space<vmem>>, vector<1x128xf32>,
    %127 = vector.extract_strided_slice %64 {offsets = [31, 0], sizes = [1, 128], strides = [1, 1]} : vector<36x128xf32> to vector<1x128xf32>
    %c0_82 = arith.constant 0 : index
    %c3968 = arith.constant 3968 : index
    %128 = vector.load %arg15[%c0_82, %c3968] : memref<1x4672xf32, #tpu.memory_space<vmem>>, vector<1x128xf32>
    tpu.vector_store %arg15[%c0_82, %c3968], %127 {strides = array<i32>} : memref<1x4672xf32, #tpu.memory_space<vmem>>, vector<1x128xf32>,
    %129 = vector.extract_strided_slice %64 {offsets = [32, 0], sizes = [1, 128], strides = [1, 1]} : vector<36x128xf32> to vector<1x128xf32>
    %c0_83 = arith.constant 0 : index
    %c4096 = arith.constant 4096 : index
    %130 = vector.load %arg15[%c0_83, %c4096] : memref<1x4672xf32, #tpu.memory_space<vmem>>, vector<1x128xf32>
    tpu.vector_store %arg15[%c0_83, %c4096], %129 {strides = array<i32>} : memref<1x4672xf32, #tpu.memory_space<vmem>>, vector<1x128xf32>,
    %131 = vector.extract_strided_slice %64 {offsets = [33, 0], sizes = [1, 128], strides = [1, 1]} : vector<36x128xf32> to vector<1x128xf32>
    %c0_84 = arith.constant 0 : index
    %c4224 = arith.constant 4224 : index
    %132 = vector.load %arg15[%c0_84, %c4224] : memref<1x4672xf32, #tpu.memory_space<vmem>>, vector<1x128xf32>
    tpu.vector_store %arg15[%c0_84, %c4224], %131 {strides = array<i32>} : memref<1x4672xf32, #tpu.memory_space<vmem>>, vector<1x128xf32>,
    %133 = vector.extract_strided_slice %64 {offsets = [34, 0], sizes = [1, 128], strides = [1, 1]} : vector<36x128xf32> to vector<1x128xf32>
    %c0_85 = arith.constant 0 : index
    %c4352 = arith.constant 4352 : index
    %134 = vector.load %arg15[%c0_85, %c4352] : memref<1x4672xf32, #tpu.memory_space<vmem>>, vector<1x128xf32>
    tpu.vector_store %arg15[%c0_85, %c4352], %133 {strides = array<i32>} : memref<1x4672xf32, #tpu.memory_space<vmem>>, vector<1x128xf32>,
    %135 = vector.extract_strided_slice %64 {offsets = [35, 0], sizes = [1, 128], strides = [1, 1]} : vector<36x128xf32> to vector<1x128xf32>
    %c0_86 = arith.constant 0 : index
    %c4480 = arith.constant 4480 : index
    %136 = vector.load %arg15[%c0_86, %c4480] : memref<1x4672xf32, #tpu.memory_space<vmem>>, vector<1x128xf32>
    tpu.vector_store %arg15[%c0_86, %c4480], %135 {strides = array<i32>} : memref<1x4672xf32, #tpu.memory_space<vmem>>, vector<1x128xf32>,
    %137 = vector.extract_strided_slice %59 {offsets = [36, 0], sizes = [1, 64], strides = [1, 1]} : vector<37x64xf32> to vector<1x64xf32>
    %c0_87 = arith.constant 0 : index
    %c4608 = arith.constant 4608 : index
    %138 = vector.load %arg15[%c0_87, %c4608] : memref<1x4672xf32, #tpu.memory_space<vmem>>, vector<1x64xf32>
    tpu.vector_store %arg15[%c0_87, %c4608], %137 {strides = array<i32>} : memref<1x4672xf32, #tpu.memory_space<vmem>>, vector<1x64xf32>,
    tpu.wait_dma2 semaphore(%arg16 : memref<!tpu.dma_semaphore, #tpu.memory_space<semaphore_mem>>) src(%arg6 : memref<4672x256xbf16, #tpu.memory_space<any>>) dst(%arg11 : memref<4672x256xbf16, #tpu.memory_space<vmem>>)
    %c0_88 = arith.constant 0 : index
    %c0_89 = arith.constant 0 : index
    %139 = vector.load %arg15[%c0_88, %c0_89] : memref<1x4672xf32, #tpu.memory_space<vmem>>, vector<1x4672xf32>
    %140 = arith.truncf %139 : vector<1x4672xf32> to vector<1x4672xbf16>
    %c0_90 = arith.constant 0 : index
    %c0_91 = arith.constant 0 : index
    %141 = vector.load %arg11[%c0_90, %c0_91] : memref<4672x256xbf16, #tpu.memory_space<vmem>>, vector<4672x256xbf16>
    %cst_92 = arith.constant dense<0.000000e+00> : vector<1x256xf32>
    %142 = tpu.matmul %140, %141, %cst_92 {dimension_numbers = #tpu.dot_dimension_numbers<[1], [0], [0], [1], [0, 0, 1, 1], [], []>} : vector<1x4672xbf16>, vector<4672x256xbf16>, vector<1x256xf32> -> vector<1x256xf32>
    %c0_93 = arith.constant 0 : index
    %c0_94 = arith.constant 0 : index
    %143 = vector.load %arg7[%c0_93, %c0_94] : memref<1x256xf32, #tpu.memory_space<vmem>>, vector<1x256xf32>
    %144 = arith.addf %142, %143 : vector<1x256xf32>
    %145 = math.tanh %144 : vector<1x256xf32>
    %146 = arith.truncf %145 : vector<1x256xf32> to vector<1x256xbf16>
    %c0_95 = arith.constant 0 : index
    %c0_96 = arith.constant 0 : index
    %147 = vector.load %arg8[%c0_95, %c0_96] : memref<256x4xbf16, #tpu.memory_space<vmem>>, vector<256x4xbf16>
    %cst_97 = arith.constant dense<0.000000e+00> : vector<1x4xf32>
    %148 = tpu.matmul %146, %147, %cst_97 {dimension_numbers = #tpu.dot_dimension_numbers<[1], [0], [0], [1], [0, 0, 1, 1], [], []>} : vector<1x256xbf16>, vector<256x4xbf16>, vector<1x4xf32> -> vector<1x4xf32>
    %c0_98 = arith.constant 0 : index
    %c0_99 = arith.constant 0 : index
    %149 = vector.load %arg9[%c0_98, %c0_99] : memref<1x4xf32, #tpu.memory_space<vmem>>, vector<1x4xf32>
    %150 = arith.addf %148, %149 : vector<1x4xf32>
    %c0_100 = arith.constant 0 : index
    %c0_101 = arith.constant 0 : index
    %c0_102 = arith.constant 0 : index
    %151 = vector.load %arg10[%c0_100, %c0_101, %c0_102] : memref<1x1x4xf32, #tpu.memory_space<vmem>>, vector<1x1x4xf32>
    %152 = vector.shape_cast %151 : vector<1x1x4xf32> to vector<1x4xf32>
    %153 = vector.shape_cast %150 : vector<1x4xf32> to vector<1x1x4xf32>
    tpu.vector_store %arg10[%c0_100, %c0_101, %c0_102], %153 {strides = array<i32>} : memref<1x1x4xf32, #tpu.memory_space<vmem>>, vector<1x1x4xf32>,
    return
  }
  func.func @transform_0(%arg0: i32) -> (i32, i32, i32) {
    %c0_i32 = arith.constant 0 : i32
    %c0_i32_0 = arith.constant 0 : i32
    %c0_i32_1 = arith.constant 0 : i32
    return %arg0, %c0_i32, %c0_i32_0 : i32, i32, i32
  }
  func.func @transform_1(%arg0: i32) -> (i32, i32) {
    %c0_i32 = arith.constant 0 : i32
    %c0_i32_0 = arith.constant 0 : i32
    %c0_i32_1 = arith.constant 0 : i32
    return %c0_i32, %c0_i32_0 : i32, i32
  }
  func.func @transform_2(%arg0: i32) -> (i32, i32) {
    %c0_i32 = arith.constant 0 : i32
    %c0_i32_0 = arith.constant 0 : i32
    %c0_i32_1 = arith.constant 0 : i32
    return %c0_i32, %c0_i32_0 : i32, i32
  }
  func.func @transform_3(%arg0: i32) -> (i32, i32) {
    %c0_i32 = arith.constant 0 : i32
    %c0_i32_0 = arith.constant 0 : i32
    %c0_i32_1 = arith.constant 0 : i32
    return %c0_i32, %c0_i32_0 : i32, i32
  }
  func.func @transform_4(%arg0: i32) -> (i32, i32) {
    %c0_i32 = arith.constant 0 : i32
    %c0_i32_0 = arith.constant 0 : i32
    %c0_i32_1 = arith.constant 0 : i32
    return %c0_i32, %c0_i32_0 : i32, i32
  }
  func.func @transform_6(%arg0: i32) -> (i32, i32) {
    %c0_i32 = arith.constant 0 : i32
    %c0_i32_0 = arith.constant 0 : i32
    %c0_i32_1 = arith.constant 0 : i32
    return %c0_i32, %c0_i32_0 : i32, i32
  }
  func.func @transform_7(%arg0: i32) -> (i32, i32) {
    %c0_i32 = arith.constant 0 : i32
    %c0_i32_0 = arith.constant 0 : i32
    %c0_i32_1 = arith.constant 0 : i32
    return %c0_i32, %c0_i32_0 : i32, i32
  }
  func.func @transform_8(%arg0: i32) -> (i32, i32) {
    %c0_i32 = arith.constant 0 : i32
    %c0_i32_0 = arith.constant 0 : i32
    %c0_i32_1 = arith.constant 0 : i32
    return %c0_i32, %c0_i32_0 : i32, i32
  }
  func.func @transform_9(%arg0: i32) -> (i32, i32, i32) {
    %c0_i32 = arith.constant 0 : i32
    %c0_i32_0 = arith.constant 0 : i32
    %c0_i32_1 = arith.constant 0 : i32
    return %arg0, %c0_i32, %c0_i32_0 : i32, i32, i32
  }
}

</mosaic_0001>

<bundles_post_ra>
// kernel: cnn1_forward.1
= control target key start
LH: loop header
LB: loop body
LE: loop exit
PB: predicated region body
PF: predicated region fallthrough
CT: control target
= control target key end

     0   :  { %14 = vsyncpa [#allocation9], 0  ;;  %s15725_s0 = inlined_call_operand.vmem [shape: f32[2,300,1], index: 0, kind: input, shape index: {}]   ;;  %s15726_s1 = inlined_call_operand.vmem [shape: f32[5,128], index: 1, kind: input, shape index: {}]   ;;  %s15727_s2 = inlined_call_operand.vmem [shape: f32[1,128], index: 2, kind: input, shape index: {}]   ;;  %s15728_s3 = inlined_call_operand.vmem [shape: bf16[384,64], index: 3, kind: input, shape index: {}]   ;;  %s15729_s4 = inlined_call_operand.vmem [shape: f32[1,64], index: 4, kind: input, shape index: {}]   ;;  %s15730_s5 = inlined_call_operand.vmem [shape: bf16[4672,256], index: 5, kind: input, shape index: {}]   ;;  %s15731_s6 = inlined_call_operand.vmem [shape: f32[1,256], index: 6, kind: input, shape index: {}]   ;;  %s15732_s7 = inlined_call_operand.vmem [shape: bf16[256,4], index: 7, kind: input, shape index: {}]   ;;  %s15733_s8 = inlined_call_operand.vmem [shape: f32[1,4], index: 8, kind: input, shape index: {}]   ;;  %s15734_s9 = inlined_call_operand.hbm [shape: f32[2,1,4], index: 9, kind: output, shape index: {}]  }
   0x1   :  { %16 = vsyncpa [#allocation9 + $0x1], 0  ;;  %s12385_s30 = smov 0   ;;  %s12387_s10 = smov 0  }
   0x2   :  { %s12389_s11 = smov 0   ;;  %s12391_s12 = smov 0  }
   0x3 LB: > { %s12406_s13 = sadd.s32 4294967295, %s12331_s12   ;;  %s8958_s14 = sadd.s32 4294967294, %s12331_s12   ;;  %s12331_s12 = sphi %s12391_s12, %s15807_s12   ;;  %s12327_s11 = sphi %s12389_s11, %s15806_s11   ;;  %s12323_s10 = sphi %s12387_s10, %s15805_s10   ;;  %s12319_s30 = sphi %s12385_s30, %s15804_s30  }
   0x4   : > { %s12410_s15 = sadd.s32 1, %s12331_s12   ;;  %s202_s16 = sadd.s32 1, %s12327_s11 }
   0x5   : > { %s199_s17 = ssub.s32 %s12331_s12, %s12410_s15  ;;  %p212_p0 = scmp.ne.s32.totalorder %s12327_s11, %s12323_s10 }
   0x6   : > { %p200_p1 = scmp.eq.s32.totalorder %s199_s17, 0  ;;  %p213_p2 = scmp.eq.s32.totalorder %s12406_s13, 1 }
   0x7   : > { %p218_p3 = scmp.ne.s32.totalorder %s12323_s10, %s12319_s30  ;;  %p219_p4 = scmp.eq.s32.totalorder %s8958_s14, 1 }
   0x8   : > { %s12421_s18 = scalar_select %p200_p1, %s12327_s11, %s202_s16  }
   0x9   : > { %p12423_p5 = por %p213_p2, %p212_p0  ;;  %p12427_p6 = por %p219_p4, %p218_p3 }
   0xa   : > { %p8961_p7 = scmp.ge.s32.totalorder %s12331_s12, 1  ;;  %p266_p8 = scmp.lt.s32.totalorder %s12331_s12, 3 }
   0xc   : > { %p267_p9 = pnand %p8961_p7, %p266_p8 }
   0xe   : > { %270 = sbr.rel (%p267_p9) target bundleno = 2580 (0xa14), region = 52 }
  0x13   : > { %p299_p10 = scmp.lt.s32.totalorder %s12406_s13, 1  ;;  %v315_v0 = vld [vmem:[%s15730_s5] sm:$0xff]  ;;  %v317_v1 = vld [vmem:[%s15730_s5 + $0x8] sm:$0xff]  ;;  %v319_v2 = vld [vmem:[%s15730_s5 + $0x10] sm:$0xff] }
  0x14   : > { %316 = vst [vmem:[#allocation2] sm:$0xff] %v315_v0  ;;  %v321_v3 = vld [vmem:[%s15730_s5 + $0x18] sm:$0xff]  ;;  %v323_v4 = vld [vmem:[%s15730_s5 + $0x20] sm:$0xff]  ;;  %v325_v5 = vld [vmem:[%s15730_s5 + $0x28] sm:$0xff] }
  0x15   : > { %s300_s14 = scalar_select %p299_p10, %s12406_s13, 1  ;;  %318 = vst [vmem:[#allocation2 + $0x8] sm:$0xff] %v317_v1  ;;  %v327_v6 = vld [vmem:[%s15730_s5 + $0x30] sm:$0xff]  ;;  %v329_v7 = vld [vmem:[%s15730_s5 + $0x38] sm:$0xff]  ;;  %v331_v8 = vld [vmem:[%s15730_s5 + $0x40] sm:$0xff] }
  0x16   : > { %320 = vst [vmem:[#allocation2 + $0x10] sm:$0xff] %v319_v2  ;;  %v333_v9 = vld [vmem:[%s15730_s5 + $0x48] sm:$0xff]  ;;  %v335_v10 = vld [vmem:[%s15730_s5 + $0x50] sm:$0xff]  ;;  %v337_v11 = vld [vmem:[%s15730_s5 + $0x58] sm:$0xff] }
  0x17   : > { %s12088_s24 = smul.u32 304, %s300_s14  ;;  %322 = vst [vmem:[#allocation2 + $0x18] sm:$0xff] %v321_v3  ;;  %v339_v12 = vld [vmem:[%s15730_s5 + $0x60] sm:$0xff]  ;;  %v341_v13 = vld [vmem:[%s15730_s5 + $0x68] sm:$0xff]  ;;  %v343_v14 = vld [vmem:[%s15730_s5 + $0x70] sm:$0xff] }
  0x18   : > { %324 = vst [vmem:[#allocation2 + $0x20] sm:$0xff] %v323_v4  ;;  %v345_v15 = vld [vmem:[%s15730_s5 + $0x78] sm:$0xff]  ;;  %v347_v16 = vld [vmem:[%s15730_s5 + $0x80] sm:$0xff]  ;;  %v349_v17 = vld [vmem:[%s15730_s5 + $0x88] sm:$0xff] }
  0x19   : > { %s12463_s16 = scalar_lea.vmem %s15725_s0, %s12088_s24  ;;  %326 = vst [vmem:[#allocation2 + $0x28] sm:$0xff] %v325_v5  ;;  %v351_v18 = vld [vmem:[%s15730_s5 + $0x90] sm:$0xff]  ;;  %v353_v19 = vld [vmem:[%s15730_s5 + $0x98] sm:$0xff]  ;;  %v355_v20 = vld [vmem:[%s15730_s5 + $0xa0] sm:$0xff]  ;;  %s15738_s24 = sand.u32 1, %s12323_s10  }
  0x1a   : > { %328 = vst [vmem:[#allocation2 + $0x30] sm:$0xff] %v327_v6  ;;  %v357_v21 = vld [vmem:[%s15730_s5 + $0xa8] sm:$0xff]  ;;  %v359_v22 = vld [vmem:[%s15730_s5 + $0xb0] sm:$0xff]  ;;  %v361_v23 = vld [vmem:[%s15730_s5 + $0xb8] sm:$0xff]  ;;  %s14195_s28 = scalar_lea.vmem [#allocation8], %s15738_s24 }
  0x1b   : > { %330 = vst [vmem:[#allocation2 + $0x38] sm:$0xff] %v329_v7  ;;  %v363_v24 = vld [vmem:[%s15730_s5 + $0xc0] sm:$0xff]  ;;  %v365_v25 = vld [vmem:[%s15730_s5 + $0xc8] sm:$0xff]  ;;  %v367_v26 = vld [vmem:[%s15730_s5 + $0xd0] sm:$0xff] }
  0x1c   : > { %332 = vst [vmem:[#allocation2 + $0x40] sm:$0xff] %v331_v8  ;;  %v369_v27 = vld [vmem:[%s15730_s5 + $0xd8] sm:$0xff]  ;;  %v371_v28 = vld [vmem:[%s15730_s5 + $0xe0] sm:$0xff]  ;;  %v373_v29 = vld [vmem:[%s15730_s5 + $0xe8] sm:$0xff] }
  0x1d   : > { %334 = vst [vmem:[#allocation2 + $0x48] sm:$0xff] %v333_v9  ;;  %v375_v30 = vld [vmem:[%s15730_s5 + $0xf0] sm:$0xff]  ;;  %v377_v31 = vld [vmem:[%s15730_s5 + $0xf8] sm:$0xff]  ;;  %v379_v32 = vld [vmem:[%s15730_s5 + $0x100] sm:$0xff] }
  0x1e   : > { %336 = vst [vmem:[#allocation2 + $0x50] sm:$0xff] %v335_v10  ;;  %v381_v33 = vld [vmem:[%s15730_s5 + $0x108] sm:$0xff]  ;;  %v383_v34 = vld [vmem:[%s15730_s5 + $0x110] sm:$0xff]  ;;  %v385_v35 = vld [vmem:[%s15730_s5 + $0x118] sm:$0xff] }
  0x1f   : > { %338 = vst [vmem:[#allocation2 + $0x58] sm:$0xff] %v337_v11  ;;  %v387_v36 = vld [vmem:[%s15730_s5 + $0x120] sm:$0xff]  ;;  %v389_v37 = vld [vmem:[%s15730_s5 + $0x128] sm:$0xff]  ;;  %v391_v38 = vld [vmem:[%s15730_s5 + $0x130] sm:$0xff] }
  0x20   : > { %340 = vst [vmem:[#allocation2 + $0x60] sm:$0xff] %v339_v12  ;;  %v393_v39 = vld [vmem:[%s15730_s5 + $0x138] sm:$0xff]  ;;  %v395_v40 = vld [vmem:[%s15730_s5 + $0x140] sm:$0xff]  ;;  %v397_v41 = vld [vmem:[%s15730_s5 + $0x148] sm:$0xff] }
  0x21   : > { %342 = vst [vmem:[#allocation2 + $0x68] sm:$0xff] %v341_v13  ;;  %v399_v42 = vld [vmem:[%s15730_s5 + $0x150] sm:$0xff]  ;;  %v401_v43 = vld [vmem:[%s15730_s5 + $0x158] sm:$0xff]  ;;  %v403_v44 = vld [vmem:[%s15730_s5 + $0x160] sm:$0xff] }
  0x22   : > { %344 = vst [vmem:[#allocation2 + $0x70] sm:$0xff] %v343_v14  ;;  %v405_v45 = vld [vmem:[%s15730_s5 + $0x168] sm:$0xff]  ;;  %v407_v46 = vld [vmem:[%s15730_s5 + $0x170] sm:$0xff]  ;;  %v409_v47 = vld [vmem:[%s15730_s5 + $0x178] sm:$0xff] }
  0x23   : > { %346 = vst [vmem:[#allocation2 + $0x78] sm:$0xff] %v345_v15  ;;  %v411_v48 = vld [vmem:[%s15730_s5 + $0x180] sm:$0xff]  ;;  %v413_v49 = vld [vmem:[%s15730_s5 + $0x188] sm:$0xff]  ;;  %v415_v50 = vld [vmem:[%s15730_s5 + $0x190] sm:$0xff] }
  0x24   : > { %348 = vst [vmem:[#allocation2 + $0x80] sm:$0xff] %v347_v16  ;;  %v417_v51 = vld [vmem:[%s15730_s5 + $0x198] sm:$0xff]  ;;  %v419_v52 = vld [vmem:[%s15730_s5 + $0x1a0] sm:$0xff]  ;;  %v421_v53 = vld [vmem:[%s15730_s5 + $0x1a8] sm:$0xff] }
  0x25   : > { %350 = vst [vmem:[#allocation2 + $0x88] sm:$0xff] %v349_v17  ;;  %v423_v54 = vld [vmem:[%s15730_s5 + $0x1b0] sm:$0xff]  ;;  %v425_v55 = vld [vmem:[%s15730_s5 + $0x1b8] sm:$0xff]  ;;  %v427_v56 = vld [vmem:[%s15730_s5 + $0x1c0] sm:$0xff] }
  0x26   : > { %352 = vst [vmem:[#allocation2 + $0x90] sm:$0xff] %v351_v18  ;;  %v429_v57 = vld [vmem:[%s15730_s5 + $0x1c8] sm:$0xff]  ;;  %v431_v58 = vld [vmem:[%s15730_s5 + $0x1d0] sm:$0xff]  ;;  %v433_v59 = vld [vmem:[%s15730_s5 + $0x1d8] sm:$0xff] }
  0x27   : > { %354 = vst [vmem:[#allocation2 + $0x98] sm:$0xff] %v353_v19  ;;  %v435_v60 = vld [vmem:[%s15730_s5 + $0x1e0] sm:$0xff]  ;;  %v437_v61 = vld [vmem:[%s15730_s5 + $0x1e8] sm:$0xff]  ;;  %v439_v62 = vld [vmem:[%s15730_s5 + $0x1f0] sm:$0xff] }
  0x28   : > { %356 = vst [vmem:[#allocation2 + $0xa0] sm:$0xff] %v355_v20  ;;  %v441_v63 = vld [vmem:[%s15730_s5 + $0x1f8] sm:$0xff]  ;;  %v443_v0 = vld [vmem:[%s15730_s5 + $0x200] sm:$0xff]  ;;  %v445_v1 = vld [vmem:[%s15730_s5 + $0x208] sm:$0xff] }
  0x29   : > { %358 = vst [vmem:[#allocation2 + $0xa8] sm:$0xff] %v357_v21  ;;  %v447_v2 = vld [vmem:[%s15730_s5 + $0x210] sm:$0xff]  ;;  %v449_v3 = vld [vmem:[%s15730_s5 + $0x218] sm:$0xff]  ;;  %v451_v4 = vld [vmem:[%s15730_s5 + $0x220] sm:$0xff] }
  0x2a   : > { %360 = vst [vmem:[#allocation2 + $0xb0] sm:$0xff] %v359_v22  ;;  %v453_v5 = vld [vmem:[%s15730_s5 + $0x228] sm:$0xff]  ;;  %v455_v6 = vld [vmem:[%s15730_s5 + $0x230] sm:$0xff]  ;;  %v457_v7 = vld [vmem:[%s15730_s5 + $0x238] sm:$0xff] }
  0x2b   : > { %362 = vst [vmem:[#allocation2 + $0xb8] sm:$0xff] %v361_v23  ;;  %v459_v8 = vld [vmem:[%s15730_s5 + $0x240] sm:$0xff]  ;;  %v461_v9 = vld [vmem:[%s15730_s5 + $0x248] sm:$0xff]  ;;  %v463_v10 = vld [vmem:[%s15730_s5 + $0x250] sm:$0xff] }
  0x2c   : > { %364 = vst [vmem:[#allocation2 + $0xc0] sm:$0xff] %v363_v24  ;;  %v465_v11 = vld [vmem:[%s15730_s5 + $0x258] sm:$0xff]  ;;  %v467_v12 = vld [vmem:[%s15730_s5 + $0x260] sm:$0xff]  ;;  %v469_v13 = vld [vmem:[%s15730_s5 + $0x268] sm:$0xff] }
  0x2d   : > { %366 = vst [vmem:[#allocation2 + $0xc8] sm:$0xff] %v365_v25  ;;  %v471_v14 = vld [vmem:[%s15730_s5 + $0x270] sm:$0xff]  ;;  %v473_v15 = vld [vmem:[%s15730_s5 + $0x278] sm:$0xff]  ;;  %v475_v16 = vld [vmem:[%s15730_s5 + $0x280] sm:$0xff] }
  0x2e   : > { %368 = vst [vmem:[#allocation2 + $0xd0] sm:$0xff] %v367_v26  ;;  %v477_v17 = vld [vmem:[%s15730_s5 + $0x288] sm:$0xff]  ;;  %v479_v18 = vld [vmem:[%s15730_s5 + $0x290] sm:$0xff]  ;;  %v481_v19 = vld [vmem:[%s15730_s5 + $0x298] sm:$0xff] }
  0x2f   : > { %370 = vst [vmem:[#allocation2 + $0xd8] sm:$0xff] %v369_v27  ;;  %v483_v20 = vld [vmem:[%s15730_s5 + $0x2a0] sm:$0xff]  ;;  %v485_v21 = vld [vmem:[%s15730_s5 + $0x2a8] sm:$0xff]  ;;  %v487_v22 = vld [vmem:[%s15730_s5 + $0x2b0] sm:$0xff] }
  0x30   : > { %372 = vst [vmem:[#allocation2 + $0xe0] sm:$0xff] %v371_v28  ;;  %v489_v23 = vld [vmem:[%s15730_s5 + $0x2b8] sm:$0xff]  ;;  %v491_v24 = vld [vmem:[%s15730_s5 + $0x2c0] sm:$0xff]  ;;  %v493_v25 = vld [vmem:[%s15730_s5 + $0x2c8] sm:$0xff] }
  0x31   : > { %374 = vst [vmem:[#allocation2 + $0xe8] sm:$0xff] %v373_v29  ;;  %v495_v26 = vld [vmem:[%s15730_s5 + $0x2d0] sm:$0xff]  ;;  %v497_v27 = vld [vmem:[%s15730_s5 + $0x2d8] sm:$0xff]  ;;  %v499_v28 = vld [vmem:[%s15730_s5 + $0x2e0] sm:$0xff] }
  0x32   : > { %376 = vst [vmem:[#allocation2 + $0xf0] sm:$0xff] %v375_v30  ;;  %v501_v29 = vld [vmem:[%s15730_s5 + $0x2e8] sm:$0xff]  ;;  %v503_v30 = vld [vmem:[%s15730_s5 + $0x2f0] sm:$0xff] }
  0x33   : > { %378 = vst [vmem:[#allocation2 + $0xf8] sm:$0xff] %v377_v31  ;;  %v505_v31 = vld [vmem:[%s15730_s5 + $0x2f8] sm:$0xff] }
  0x34   : > { %380 = vst [vmem:[#allocation2 + $0x100] sm:$0xff] %v379_v32  ;;  %v507_v32 = vld [vmem:[%s15730_s5 + $0x300] sm:$0xff] }
  0x35   : > { %382 = vst [vmem:[#allocation2 + $0x108] sm:$0xff] %v381_v33  ;;  %v509_v33 = vld [vmem:[%s15730_s5 + $0x308] sm:$0xff] }
  0x36   : > { %384 = vst [vmem:[#allocation2 + $0x110] sm:$0xff] %v383_v34  ;;  %v511_v34 = vld [vmem:[%s15730_s5 + $0x310] sm:$0xff] }
  0x37   : > { %386 = vst [vmem:[#allocation2 + $0x118] sm:$0xff] %v385_v35  ;;  %v513_v35 = vld [vmem:[%s15730_s5 + $0x318] sm:$0xff] }
  0x38   : > { %388 = vst [vmem:[#allocation2 + $0x120] sm:$0xff] %v387_v36  ;;  %v515_v36 = vld [vmem:[%s15730_s5 + $0x320] sm:$0xff] }
  0x39   : > { %390 = vst [vmem:[#allocation2 + $0x128] sm:$0xff] %v389_v37  ;;  %v517_v37 = vld [vmem:[%s15730_s5 + $0x328] sm:$0xff] }
  0x3a   : > { %392 = vst [vmem:[#allocation2 + $0x130] sm:$0xff] %v391_v38  ;;  %v519_v38 = vld [vmem:[%s15730_s5 + $0x330] sm:$0xff] }
  0x3b   : > { %394 = vst [vmem:[#allocation2 + $0x138] sm:$0xff] %v393_v39  ;;  %v521_v39 = vld [vmem:[%s15730_s5 + $0x338] sm:$0xff] }
  0x3c   : > { %396 = vst [vmem:[#allocation2 + $0x140] sm:$0xff] %v395_v40  ;;  %v523_v40 = vld [vmem:[%s15730_s5 + $0x340] sm:$0xff] }
  0x3d   : > { %398 = vst [vmem:[#allocation2 + $0x148] sm:$0xff] %v397_v41  ;;  %v525_v41 = vld [vmem:[%s15730_s5 + $0x348] sm:$0xff] }
  0x3e   : > { %400 = vst [vmem:[#allocation2 + $0x150] sm:$0xff] %v399_v42  ;;  %v527_v42 = vld [vmem:[%s15730_s5 + $0x350] sm:$0xff] }
  0x3f   : > { %402 = vst [vmem:[#allocation2 + $0x158] sm:$0xff] %v401_v43  ;;  %v529_v43 = vld [vmem:[%s15730_s5 + $0x358] sm:$0xff] }
  0x40   : > { %404 = vst [vmem:[#allocation2 + $0x160] sm:$0xff] %v403_v44  ;;  %v531_v44 = vld [vmem:[%s15730_s5 + $0x360] sm:$0xff] }
  0x41   : > { %406 = vst [vmem:[#allocation2 + $0x168] sm:$0xff] %v405_v45  ;;  %v533_v45 = vld [vmem:[%s15730_s5 + $0x368] sm:$0xff] }
  0x42   : > { %408 = vst [vmem:[#allocation2 + $0x170] sm:$0xff] %v407_v46  ;;  %v535_v46 = vld [vmem:[%s15730_s5 + $0x370] sm:$0xff] }
  0x43   : > { %410 = vst [vmem:[#allocation2 + $0x178] sm:$0xff] %v409_v47  ;;  %v537_v47 = vld [vmem:[%s15730_s5 + $0x378] sm:$0xff] }
  0x44   : > { %412 = vst [vmem:[#allocation2 + $0x180] sm:$0xff] %v411_v48  ;;  %v539_v48 = vld [vmem:[%s15730_s5 + $0x380] sm:$0xff] }
  0x45   : > { %414 = vst [vmem:[#allocation2 + $0x188] sm:$0xff] %v413_v49  ;;  %v541_v49 = vld [vmem:[%s15730_s5 + $0x388] sm:$0xff] }
  0x46   : > { %416 = vst [vmem:[#allocation2 + $0x190] sm:$0xff] %v415_v50  ;;  %v543_v50 = vld [vmem:[%s15730_s5 + $0x390] sm:$0xff] }
  0x47   : > { %418 = vst [vmem:[#allocation2 + $0x198] sm:$0xff] %v417_v51  ;;  %v545_v51 = vld [vmem:[%s15730_s5 + $0x398] sm:$0xff] }
  0x48   : > { %420 = vst [vmem:[#allocation2 + $0x1a0] sm:$0xff] %v419_v52  ;;  %v547_v52 = vld [vmem:[%s15730_s5 + $0x3a0] sm:$0xff] }
  0x49   : > { %422 = vst [vmem:[#allocation2 + $0x1a8] sm:$0xff] %v421_v53  ;;  %v549_v53 = vld [vmem:[%s15730_s5 + $0x3a8] sm:$0xff] }
  0x4a   : > { %424 = vst [vmem:[#allocation2 + $0x1b0] sm:$0xff] %v423_v54  ;;  %v551_v54 = vld [vmem:[%s15730_s5 + $0x3b0] sm:$0xff] }
  0x4b   : > { %426 = vst [vmem:[#allocation2 + $0x1b8] sm:$0xff] %v425_v55  ;;  %v553_v55 = vld [vmem:[%s15730_s5 + $0x3b8] sm:$0xff] }
  0x4c   : > { %428 = vst [vmem:[#allocation2 + $0x1c0] sm:$0xff] %v427_v56  ;;  %v555_v56 = vld [vmem:[%s15730_s5 + $0x3c0] sm:$0xff] }
  0x4d   : > { %430 = vst [vmem:[#allocation2 + $0x1c8] sm:$0xff] %v429_v57  ;;  %v557_v57 = vld [vmem:[%s15730_s5 + $0x3c8] sm:$0xff] }
  0x4e   : > { %432 = vst [vmem:[#allocation2 + $0x1d0] sm:$0xff] %v431_v58  ;;  %v559_v58 = vld [vmem:[%s15730_s5 + $0x3d0] sm:$0xff] }
  0x4f   : > { %434 = vst [vmem:[#allocation2 + $0x1d8] sm:$0xff] %v433_v59  ;;  %v561_v59 = vld [vmem:[%s15730_s5 + $0x3d8] sm:$0xff] }
  0x50   : > { %436 = vst [vmem:[#allocation2 + $0x1e0] sm:$0xff] %v435_v60  ;;  %v563_v60 = vld [vmem:[%s15730_s5 + $0x3e0] sm:$0xff] }
  0x51   : > { %438 = vst [vmem:[#allocation2 + $0x1e8] sm:$0xff] %v437_v61  ;;  %v565_v61 = vld [vmem:[%s15730_s5 + $0x3e8] sm:$0xff] }
  0x52   : > { %440 = vst [vmem:[#allocation2 + $0x1f0] sm:$0xff] %v439_v62  ;;  %v567_v62 = vld [vmem:[%s15730_s5 + $0x3f0] sm:$0xff] }
  0x53   : > { %442 = vst [vmem:[#allocation2 + $0x1f8] sm:$0xff] %v441_v63  ;;  %v569_v63 = vld [vmem:[%s15730_s5 + $0x3f8] sm:$0xff] }
  0x54   : > { %444 = vst [vmem:[#allocation2 + $0x200] sm:$0xff] %v443_v0  ;;  %v571_v0 = vld [vmem:[%s15730_s5 + $0x400] sm:$0xff] }
  0x55   : > { %446 = vst [vmem:[#allocation2 + $0x208] sm:$0xff] %v445_v1  ;;  %v573_v1 = vld [vmem:[%s15730_s5 + $0x408] sm:$0xff] }
  0x56   : > { %448 = vst [vmem:[#allocation2 + $0x210] sm:$0xff] %v447_v2  ;;  %v575_v2 = vld [vmem:[%s15730_s5 + $0x410] sm:$0xff] }
  0x57   : > { %450 = vst [vmem:[#allocation2 + $0x218] sm:$0xff] %v449_v3  ;;  %v577_v3 = vld [vmem:[%s15730_s5 + $0x418] sm:$0xff] }
  0x58   : > { %452 = vst [vmem:[#allocation2 + $0x220] sm:$0xff] %v451_v4  ;;  %v579_v4 = vld [vmem:[%s15730_s5 + $0x420] sm:$0xff] }
  0x59   : > { %454 = vst [vmem:[#allocation2 + $0x228] sm:$0xff] %v453_v5  ;;  %v581_v5 = vld [vmem:[%s15730_s5 + $0x428] sm:$0xff] }
  0x5a   : > { %456 = vst [vmem:[#allocation2 + $0x230] sm:$0xff] %v455_v6  ;;  %v583_v6 = vld [vmem:[%s15730_s5 + $0x430] sm:$0xff] }
  0x5b   : > { %458 = vst [vmem:[#allocation2 + $0x238] sm:$0xff] %v457_v7  ;;  %v585_v7 = vld [vmem:[%s15730_s5 + $0x438] sm:$0xff] }
  0x5c   : > { %460 = vst [vmem:[#allocation2 + $0x240] sm:$0xff] %v459_v8  ;;  %v587_v8 = vld [vmem:[%s15730_s5 + $0x440] sm:$0xff] }
  0x5d   : > { %462 = vst [vmem:[#allocation2 + $0x248] sm:$0xff] %v461_v9  ;;  %v589_v9 = vld [vmem:[%s15730_s5 + $0x448] sm:$0xff] }
  0x5e   : > { %464 = vst [vmem:[#allocation2 + $0x250] sm:$0xff] %v463_v10  ;;  %v591_v10 = vld [vmem:[%s15730_s5 + $0x450] sm:$0xff] }
  0x5f   : > { %466 = vst [vmem:[#allocation2 + $0x258] sm:$0xff] %v465_v11  ;;  %v593_v11 = vld [vmem:[%s15730_s5 + $0x458] sm:$0xff] }
  0x60   : > { %468 = vst [vmem:[#allocation2 + $0x260] sm:$0xff] %v467_v12  ;;  %v595_v12 = vld [vmem:[%s15730_s5 + $0x460] sm:$0xff] }
  0x61   : > { %470 = vst [vmem:[#allocation2 + $0x268] sm:$0xff] %v469_v13  ;;  %v597_v13 = vld [vmem:[%s15730_s5 + $0x468] sm:$0xff] }
  0x62   : > { %472 = vst [vmem:[#allocation2 + $0x270] sm:$0xff] %v471_v14  ;;  %v599_v14 = vld [vmem:[%s15730_s5 + $0x470] sm:$0xff] }
  0x63   : > { %474 = vst [vmem:[#allocation2 + $0x278] sm:$0xff] %v473_v15  ;;  %v601_v15 = vld [vmem:[%s15730_s5 + $0x478] sm:$0xff] }
  0x64   : > { %476 = vst [vmem:[#allocation2 + $0x280] sm:$0xff] %v475_v16  ;;  %v603_v16 = vld [vmem:[%s15730_s5 + $0x480] sm:$0xff] }
  0x65   : > { %478 = vst [vmem:[#allocation2 + $0x288] sm:$0xff] %v477_v17  ;;  %v605_v17 = vld [vmem:[%s15730_s5 + $0x488] sm:$0xff] }
  0x66   : > { %480 = vst [vmem:[#allocation2 + $0x290] sm:$0xff] %v479_v18  ;;  %v607_v18 = vld [vmem:[%s15730_s5 + $0x490] sm:$0xff] }
  0x67   : > { %482 = vst [vmem:[#allocation2 + $0x298] sm:$0xff] %v481_v19  ;;  %v609_v19 = vld [vmem:[%s15730_s5 + $0x498] sm:$0xff] }
  0x68   : > { %484 = vst [vmem:[#allocation2 + $0x2a0] sm:$0xff] %v483_v20  ;;  %v611_v20 = vld [vmem:[%s15730_s5 + $0x4a0] sm:$0xff] }
  0x69   : > { %486 = vst [vmem:[#allocation2 + $0x2a8] sm:$0xff] %v485_v21  ;;  %v613_v21 = vld [vmem:[%s15730_s5 + $0x4a8] sm:$0xff] }
  0x6a   : > { %488 = vst [vmem:[#allocation2 + $0x2b0] sm:$0xff] %v487_v22  ;;  %v615_v22 = vld [vmem:[%s15730_s5 + $0x4b0] sm:$0xff] }
  0x6b   : > { %490 = vst [vmem:[#allocation2 + $0x2b8] sm:$0xff] %v489_v23  ;;  %v617_v23 = vld [vmem:[%s15730_s5 + $0x4b8] sm:$0xff] }
  0x6c   : > { %492 = vst [vmem:[#allocation2 + $0x2c0] sm:$0xff] %v491_v24  ;;  %v619_v24 = vld [vmem:[%s15730_s5 + $0x4c0] sm:$0xff] }
  0x6d   : > { %494 = vst [vmem:[#allocation2 + $0x2c8] sm:$0xff] %v493_v25  ;;  %v621_v25 = vld [vmem:[%s15730_s5 + $0x4c8] sm:$0xff] }
  0x6e   : > { %496 = vst [vmem:[#allocation2 + $0x2d0] sm:$0xff] %v495_v26  ;;  %v623_v26 = vld [vmem:[%s15730_s5 + $0x4d0] sm:$0xff] }
  0x6f   : > { %498 = vst [vmem:[#allocation2 + $0x2d8] sm:$0xff] %v497_v27  ;;  %v625_v27 = vld [vmem:[%s15730_s5 + $0x4d8] sm:$0xff] }
  0x70   : > { %500 = vst [vmem:[#allocation2 + $0x2e0] sm:$0xff] %v499_v28  ;;  %v627_v28 = vld [vmem:[%s15730_s5 + $0x4e0] sm:$0xff] }
  0x71   : > { %502 = vst [vmem:[#allocation2 + $0x2e8] sm:$0xff] %v501_v29  ;;  %v629_v29 = vld [vmem:[%s15730_s5 + $0x4e8] sm:$0xff] }
  0x72   : > { %504 = vst [vmem:[#allocation2 + $0x2f0] sm:$0xff] %v503_v30  ;;  %v631_v30 = vld [vmem:[%s15730_s5 + $0x4f0] sm:$0xff] }
  0x73   : > { %506 = vst [vmem:[#allocation2 + $0x2f8] sm:$0xff] %v505_v31  ;;  %v633_v31 = vld [vmem:[%s15730_s5 + $0x4f8] sm:$0xff] }
  0x74   : > { %508 = vst [vmem:[#allocation2 + $0x300] sm:$0xff] %v507_v32  ;;  %v635_v32 = vld [vmem:[%s15730_s5 + $0x500] sm:$0xff] }
  0x75   : > { %510 = vst [vmem:[#allocation2 + $0x308] sm:$0xff] %v509_v33  ;;  %v637_v33 = vld [vmem:[%s15730_s5 + $0x508] sm:$0xff] }
  0x76   : > { %512 = vst [vmem:[#allocation2 + $0x310] sm:$0xff] %v511_v34  ;;  %v639_v34 = vld [vmem:[%s15730_s5 + $0x510] sm:$0xff] }
  0x77   : > { %514 = vst [vmem:[#allocation2 + $0x318] sm:$0xff] %v513_v35  ;;  %v641_v35 = vld [vmem:[%s15730_s5 + $0x518] sm:$0xff] }
  0x78   : > { %516 = vst [vmem:[#allocation2 + $0x320] sm:$0xff] %v515_v36  ;;  %v643_v36 = vld [vmem:[%s15730_s5 + $0x520] sm:$0xff] }
  0x79   : > { %518 = vst [vmem:[#allocation2 + $0x328] sm:$0xff] %v517_v37  ;;  %v645_v37 = vld [vmem:[%s15730_s5 + $0x528] sm:$0xff] }
  0x7a   : > { %520 = vst [vmem:[#allocation2 + $0x330] sm:$0xff] %v519_v38  ;;  %v647_v38 = vld [vmem:[%s15730_s5 + $0x530] sm:$0xff] }
  0x7b   : > { %522 = vst [vmem:[#allocation2 + $0x338] sm:$0xff] %v521_v39  ;;  %v649_v39 = vld [vmem:[%s15730_s5 + $0x538] sm:$0xff] }
  0x7c   : > { %524 = vst [vmem:[#allocation2 + $0x340] sm:$0xff] %v523_v40  ;;  %v651_v40 = vld [vmem:[%s15730_s5 + $0x540] sm:$0xff] }
  0x7d   : > { %526 = vst [vmem:[#allocation2 + $0x348] sm:$0xff] %v525_v41  ;;  %v653_v41 = vld [vmem:[%s15730_s5 + $0x548] sm:$0xff] }
  0x7e   : > { %528 = vst [vmem:[#allocation2 + $0x350] sm:$0xff] %v527_v42  ;;  %v655_v42 = vld [vmem:[%s15730_s5 + $0x550] sm:$0xff] }
  0x7f   : > { %530 = vst [vmem:[#allocation2 + $0x358] sm:$0xff] %v529_v43  ;;  %v657_v43 = vld [vmem:[%s15730_s5 + $0x558] sm:$0xff] }
  0x80   : > { %532 = vst [vmem:[#allocation2 + $0x360] sm:$0xff] %v531_v44  ;;  %v659_v44 = vld [vmem:[%s15730_s5 + $0x560] sm:$0xff] }
  0x81   : > { %534 = vst [vmem:[#allocation2 + $0x368] sm:$0xff] %v533_v45  ;;  %v661_v45 = vld [vmem:[%s15730_s5 + $0x568] sm:$0xff] }
  0x82   : > { %536 = vst [vmem:[#allocation2 + $0x370] sm:$0xff] %v535_v46  ;;  %v663_v46 = vld [vmem:[%s15730_s5 + $0x570] sm:$0xff] }
  0x83   : > { %538 = vst [vmem:[#allocation2 + $0x378] sm:$0xff] %v537_v47  ;;  %v665_v47 = vld [vmem:[%s15730_s5 + $0x578] sm:$0xff] }
  0x84   : > { %540 = vst [vmem:[#allocation2 + $0x380] sm:$0xff] %v539_v48  ;;  %v667_v48 = vld [vmem:[%s15730_s5 + $0x580] sm:$0xff] }
  0x85   : > { %542 = vst [vmem:[#allocation2 + $0x388] sm:$0xff] %v541_v49  ;;  %v669_v49 = vld [vmem:[%s15730_s5 + $0x588] sm:$0xff] }
  0x86   : > { %544 = vst [vmem:[#allocation2 + $0x390] sm:$0xff] %v543_v50  ;;  %v671_v50 = vld [vmem:[%s15730_s5 + $0x590] sm:$0xff] }
  0x87   : > { %546 = vst [vmem:[#allocation2 + $0x398] sm:$0xff] %v545_v51  ;;  %v673_v51 = vld [vmem:[%s15730_s5 + $0x598] sm:$0xff] }
  0x88   : > { %548 = vst [vmem:[#allocation2 + $0x3a0] sm:$0xff] %v547_v52  ;;  %v675_v52 = vld [vmem:[%s15730_s5 + $0x5a0] sm:$0xff] }
  0x89   : > { %550 = vst [vmem:[#allocation2 + $0x3a8] sm:$0xff] %v549_v53  ;;  %v677_v53 = vld [vmem:[%s15730_s5 + $0x5a8] sm:$0xff] }
  0x8a   : > { %552 = vst [vmem:[#allocation2 + $0x3b0] sm:$0xff] %v551_v54  ;;  %v679_v54 = vld [vmem:[%s15730_s5 + $0x5b0] sm:$0xff] }
  0x8b   : > { %554 = vst [vmem:[#allocation2 + $0x3b8] sm:$0xff] %v553_v55  ;;  %v681_v55 = vld [vmem:[%s15730_s5 + $0x5b8] sm:$0xff] }
  0x8c   : > { %556 = vst [vmem:[#allocation2 + $0x3c0] sm:$0xff] %v555_v56  ;;  %v683_v56 = vld [vmem:[%s15730_s5 + $0x5c0] sm:$0xff] }
  0x8d   : > { %558 = vst [vmem:[#allocation2 + $0x3c8] sm:$0xff] %v557_v57  ;;  %v685_v57 = vld [vmem:[%s15730_s5 + $0x5c8] sm:$0xff] }
  0x8e   : > { %560 = vst [vmem:[#allocation2 + $0x3d0] sm:$0xff] %v559_v58  ;;  %v687_v58 = vld [vmem:[%s15730_s5 + $0x5d0] sm:$0xff] }
  0x8f   : > { %562 = vst [vmem:[#allocation2 + $0x3d8] sm:$0xff] %v561_v59  ;;  %v689_v59 = vld [vmem:[%s15730_s5 + $0x5d8] sm:$0xff] }
  0x90   : > { %564 = vst [vmem:[#allocation2 + $0x3e0] sm:$0xff] %v563_v60  ;;  %v691_v60 = vld [vmem:[%s15730_s5 + $0x5e0] sm:$0xff] }
  0x91   : > { %566 = vst [vmem:[#allocation2 + $0x3e8] sm:$0xff] %v565_v61  ;;  %v693_v61 = vld [vmem:[%s15730_s5 + $0x5e8] sm:$0xff] }
  0x92   : > { %568 = vst [vmem:[#allocation2 + $0x3f0] sm:$0xff] %v567_v62  ;;  %v695_v62 = vld [vmem:[%s15730_s5 + $0x5f0] sm:$0xff] }
  0x93   : > { %570 = vst [vmem:[#allocation2 + $0x3f8] sm:$0xff] %v569_v63  ;;  %v697_v63 = vld [vmem:[%s15730_s5 + $0x5f8] sm:$0xff] }
  0x94   : > { %572 = vst [vmem:[#allocation2 + $0x400] sm:$0xff] %v571_v0  ;;  %v699_v0 = vld [vmem:[%s15730_s5 + $0x600] sm:$0xff] }
  0x95   : > { %574 = vst [vmem:[#allocation2 + $0x408] sm:$0xff] %v573_v1  ;;  %v701_v1 = vld [vmem:[%s15730_s5 + $0x608] sm:$0xff] }
  0x96   : > { %576 = vst [vmem:[#allocation2 + $0x410] sm:$0xff] %v575_v2  ;;  %v703_v2 = vld [vmem:[%s15730_s5 + $0x610] sm:$0xff] }
  0x97   : > { %578 = vst [vmem:[#allocation2 + $0x418] sm:$0xff] %v577_v3  ;;  %v705_v3 = vld [vmem:[%s15730_s5 + $0x618] sm:$0xff] }
  0x98   : > { %580 = vst [vmem:[#allocation2 + $0x420] sm:$0xff] %v579_v4  ;;  %v707_v4 = vld [vmem:[%s15730_s5 + $0x620] sm:$0xff] }
  0x99   : > { %582 = vst [vmem:[#allocation2 + $0x428] sm:$0xff] %v581_v5  ;;  %v709_v5 = vld [vmem:[%s15730_s5 + $0x628] sm:$0xff] }
  0x9a   : > { %584 = vst [vmem:[#allocation2 + $0x430] sm:$0xff] %v583_v6  ;;  %v711_v6 = vld [vmem:[%s15730_s5 + $0x630] sm:$0xff] }
  0x9b   : > { %586 = vst [vmem:[#allocation2 + $0x438] sm:$0xff] %v585_v7  ;;  %v713_v7 = vld [vmem:[%s15730_s5 + $0x638] sm:$0xff] }
  0x9c   : > { %588 = vst [vmem:[#allocation2 + $0x440] sm:$0xff] %v587_v8  ;;  %v715_v8 = vld [vmem:[%s15730_s5 + $0x640] sm:$0xff] }
  0x9d   : > { %590 = vst [vmem:[#allocation2 + $0x448] sm:$0xff] %v589_v9  ;;  %v717_v9 = vld [vmem:[%s15730_s5 + $0x648] sm:$0xff] }
  0x9e   : > { %592 = vst [vmem:[#allocation2 + $0x450] sm:$0xff] %v591_v10  ;;  %v719_v10 = vld [vmem:[%s15730_s5 + $0x650] sm:$0xff] }
  0x9f   : > { %594 = vst [vmem:[#allocation2 + $0x458] sm:$0xff] %v593_v11  ;;  %v721_v11 = vld [vmem:[%s15730_s5 + $0x658] sm:$0xff] }
  0xa0   : > { %596 = vst [vmem:[#allocation2 + $0x460] sm:$0xff] %v595_v12  ;;  %v723_v12 = vld [vmem:[%s15730_s5 + $0x660] sm:$0xff] }
  0xa1   : > { %598 = vst [vmem:[#allocation2 + $0x468] sm:$0xff] %v597_v13  ;;  %v725_v13 = vld [vmem:[%s15730_s5 + $0x668] sm:$0xff] }
  0xa2   : > { %600 = vst [vmem:[#allocation2 + $0x470] sm:$0xff] %v599_v14  ;;  %v727_v14 = vld [vmem:[%s15730_s5 + $0x670] sm:$0xff] }
  0xa3   : > { %602 = vst [vmem:[#allocation2 + $0x478] sm:$0xff] %v601_v15  ;;  %v729_v15 = vld [vmem:[%s15730_s5 + $0x678] sm:$0xff] }
  0xa4   : > { %604 = vst [vmem:[#allocation2 + $0x480] sm:$0xff] %v603_v16  ;;  %v731_v16 = vld [vmem:[%s15730_s5 + $0x680] sm:$0xff] }
  0xa5   : > { %606 = vst [vmem:[#allocation2 + $0x488] sm:$0xff] %v605_v17  ;;  %v733_v17 = vld [vmem:[%s15730_s5 + $0x688] sm:$0xff] }
  0xa6   : > { %608 = vst [vmem:[#allocation2 + $0x490] sm:$0xff] %v607_v18  ;;  %v735_v18 = vld [vmem:[%s15730_s5 + $0x690] sm:$0xff] }
  0xa7   : > { %610 = vst [vmem:[#allocation2 + $0x498] sm:$0xff] %v609_v19  ;;  %v737_v19 = vld [vmem:[%s15730_s5 + $0x698] sm:$0xff] }
  0xa8   : > { %612 = vst [vmem:[#allocation2 + $0x4a0] sm:$0xff] %v611_v20  ;;  %v739_v20 = vld [vmem:[%s15730_s5 + $0x6a0] sm:$0xff] }
  0xa9   : > { %614 = vst [vmem:[#allocation2 + $0x4a8] sm:$0xff] %v613_v21  ;;  %v741_v21 = vld [vmem:[%s15730_s5 + $0x6a8] sm:$0xff] }
  0xaa   : > { %616 = vst [vmem:[#allocation2 + $0x4b0] sm:$0xff] %v615_v22  ;;  %v743_v22 = vld [vmem:[%s15730_s5 + $0x6b0] sm:$0xff] }
  0xab   : > { %618 = vst [vmem:[#allocation2 + $0x4b8] sm:$0xff] %v617_v23  ;;  %v745_v23 = vld [vmem:[%s15730_s5 + $0x6b8] sm:$0xff] }
  0xac   : > { %620 = vst [vmem:[#allocation2 + $0x4c0] sm:$0xff] %v619_v24  ;;  %v747_v24 = vld [vmem:[%s15730_s5 + $0x6c0] sm:$0xff] }
  0xad   : > { %622 = vst [vmem:[#allocation2 + $0x4c8] sm:$0xff] %v621_v25  ;;  %v749_v25 = vld [vmem:[%s15730_s5 + $0x6c8] sm:$0xff] }
  0xae   : > { %624 = vst [vmem:[#allocation2 + $0x4d0] sm:$0xff] %v623_v26  ;;  %v751_v26 = vld [vmem:[%s15730_s5 + $0x6d0] sm:$0xff] }
  0xaf   : > { %626 = vst [vmem:[#allocation2 + $0x4d8] sm:$0xff] %v625_v27  ;;  %v753_v27 = vld [vmem:[%s15730_s5 + $0x6d8] sm:$0xff] }
  0xb0   : > { %628 = vst [vmem:[#allocation2 + $0x4e0] sm:$0xff] %v627_v28  ;;  %v755_v28 = vld [vmem:[%s15730_s5 + $0x6e0] sm:$0xff] }
  0xb1   : > { %630 = vst [vmem:[#allocation2 + $0x4e8] sm:$0xff] %v629_v29  ;;  %v757_v29 = vld [vmem:[%s15730_s5 + $0x6e8] sm:$0xff] }
  0xb2   : > { %632 = vst [vmem:[#allocation2 + $0x4f0] sm:$0xff] %v631_v30  ;;  %v759_v30 = vld [vmem:[%s15730_s5 + $0x6f0] sm:$0xff] }
  0xb3   : > { %634 = vst [vmem:[#allocation2 + $0x4f8] sm:$0xff] %v633_v31  ;;  %v761_v31 = vld [vmem:[%s15730_s5 + $0x6f8] sm:$0xff] }
  0xb4   : > { %636 = vst [vmem:[#allocation2 + $0x500] sm:$0xff] %v635_v32  ;;  %v763_v32 = vld [vmem:[%s15730_s5 + $0x700] sm:$0xff] }
  0xb5   : > { %638 = vst [vmem:[#allocation2 + $0x508] sm:$0xff] %v637_v33  ;;  %v765_v33 = vld [vmem:[%s15730_s5 + $0x708] sm:$0xff] }
  0xb6   : > { %640 = vst [vmem:[#allocation2 + $0x510] sm:$0xff] %v639_v34  ;;  %v767_v34 = vld [vmem:[%s15730_s5 + $0x710] sm:$0xff] }
  0xb7   : > { %642 = vst [vmem:[#allocation2 + $0x518] sm:$0xff] %v641_v35  ;;  %v769_v35 = vld [vmem:[%s15730_s5 + $0x718] sm:$0xff] }
  0xb8   : > { %644 = vst [vmem:[#allocation2 + $0x520] sm:$0xff] %v643_v36  ;;  %v771_v36 = vld [vmem:[%s15730_s5 + $0x720] sm:$0xff] }
  0xb9   : > { %646 = vst [vmem:[#allocation2 + $0x528] sm:$0xff] %v645_v37  ;;  %v773_v37 = vld [vmem:[%s15730_s5 + $0x728] sm:$0xff] }
  0xba   : > { %648 = vst [vmem:[#allocation2 + $0x530] sm:$0xff] %v647_v38  ;;  %v775_v38 = vld [vmem:[%s15730_s5 + $0x730] sm:$0xff] }
  0xbb   : > { %650 = vst [vmem:[#allocation2 + $0x538] sm:$0xff] %v649_v39  ;;  %v777_v39 = vld [vmem:[%s15730_s5 + $0x738] sm:$0xff] }
  0xbc   : > { %652 = vst [vmem:[#allocation2 + $0x540] sm:$0xff] %v651_v40  ;;  %v779_v40 = vld [vmem:[%s15730_s5 + $0x740] sm:$0xff] }
  0xbd   : > { %654 = vst [vmem:[#allocation2 + $0x548] sm:$0xff] %v653_v41  ;;  %v781_v41 = vld [vmem:[%s15730_s5 + $0x748] sm:$0xff] }
  0xbe   : > { %656 = vst [vmem:[#allocation2 + $0x550] sm:$0xff] %v655_v42  ;;  %v783_v42 = vld [vmem:[%s15730_s5 + $0x750] sm:$0xff] }
  0xbf   : > { %658 = vst [vmem:[#allocation2 + $0x558] sm:$0xff] %v657_v43  ;;  %v785_v43 = vld [vmem:[%s15730_s5 + $0x758] sm:$0xff] }
  0xc0   : > { %660 = vst [vmem:[#allocation2 + $0x560] sm:$0xff] %v659_v44  ;;  %v787_v44 = vld [vmem:[%s15730_s5 + $0x760] sm:$0xff] }
  0xc1   : > { %662 = vst [vmem:[#allocation2 + $0x568] sm:$0xff] %v661_v45  ;;  %v789_v45 = vld [vmem:[%s15730_s5 + $0x768] sm:$0xff] }
  0xc2   : > { %664 = vst [vmem:[#allocation2 + $0x570] sm:$0xff] %v663_v46  ;;  %v791_v46 = vld [vmem:[%s15730_s5 + $0x770] sm:$0xff] }
  0xc3   : > { %666 = vst [vmem:[#allocation2 + $0x578] sm:$0xff] %v665_v47  ;;  %v793_v47 = vld [vmem:[%s15730_s5 + $0x778] sm:$0xff] }
  0xc4   : > { %668 = vst [vmem:[#allocation2 + $0x580] sm:$0xff] %v667_v48  ;;  %v795_v48 = vld [vmem:[%s15730_s5 + $0x780] sm:$0xff] }
  0xc5   : > { %670 = vst [vmem:[#allocation2 + $0x588] sm:$0xff] %v669_v49  ;;  %v797_v49 = vld [vmem:[%s15730_s5 + $0x788] sm:$0xff] }
  0xc6   : > { %672 = vst [vmem:[#allocation2 + $0x590] sm:$0xff] %v671_v50  ;;  %v799_v50 = vld [vmem:[%s15730_s5 + $0x790] sm:$0xff] }
  0xc7   : > { %674 = vst [vmem:[#allocation2 + $0x598] sm:$0xff] %v673_v51  ;;  %v801_v51 = vld [vmem:[%s15730_s5 + $0x798] sm:$0xff] }
  0xc8   : > { %676 = vst [vmem:[#allocation2 + $0x5a0] sm:$0xff] %v675_v52  ;;  %v803_v52 = vld [vmem:[%s15730_s5 + $0x7a0] sm:$0xff] }
  0xc9   : > { %678 = vst [vmem:[#allocation2 + $0x5a8] sm:$0xff] %v677_v53  ;;  %v805_v53 = vld [vmem:[%s15730_s5 + $0x7a8] sm:$0xff] }
  0xca   : > { %680 = vst [vmem:[#allocation2 + $0x5b0] sm:$0xff] %v679_v54  ;;  %v807_v54 = vld [vmem:[%s15730_s5 + $0x7b0] sm:$0xff] }
  0xcb   : > { %682 = vst [vmem:[#allocation2 + $0x5b8] sm:$0xff] %v681_v55  ;;  %v809_v55 = vld [vmem:[%s15730_s5 + $0x7b8] sm:$0xff] }
  0xcc   : > { %684 = vst [vmem:[#allocation2 + $0x5c0] sm:$0xff] %v683_v56  ;;  %v811_v56 = vld [vmem:[%s15730_s5 + $0x7c0] sm:$0xff] }
  0xcd   : > { %686 = vst [vmem:[#allocation2 + $0x5c8] sm:$0xff] %v685_v57  ;;  %v813_v57 = vld [vmem:[%s15730_s5 + $0x7c8] sm:$0xff] }
  0xce   : > { %688 = vst [vmem:[#allocation2 + $0x5d0] sm:$0xff] %v687_v58  ;;  %v815_v58 = vld [vmem:[%s15730_s5 + $0x7d0] sm:$0xff] }
  0xcf   : > { %690 = vst [vmem:[#allocation2 + $0x5d8] sm:$0xff] %v689_v59  ;;  %v817_v59 = vld [vmem:[%s15730_s5 + $0x7d8] sm:$0xff] }
  0xd0   : > { %692 = vst [vmem:[#allocation2 + $0x5e0] sm:$0xff] %v691_v60  ;;  %v819_v60 = vld [vmem:[%s15730_s5 + $0x7e0] sm:$0xff] }
  0xd1   : > { %694 = vst [vmem:[#allocation2 + $0x5e8] sm:$0xff] %v693_v61  ;;  %v821_v61 = vld [vmem:[%s15730_s5 + $0x7e8] sm:$0xff] }
  0xd2   : > { %696 = vst [vmem:[#allocation2 + $0x5f0] sm:$0xff] %v695_v62  ;;  %v823_v62 = vld [vmem:[%s15730_s5 + $0x7f0] sm:$0xff] }
  0xd3   : > { %698 = vst [vmem:[#allocation2 + $0x5f8] sm:$0xff] %v697_v63  ;;  %v825_v63 = vld [vmem:[%s15730_s5 + $0x7f8] sm:$0xff] }
  0xd4   : > { %700 = vst [vmem:[#allocation2 + $0x600] sm:$0xff] %v699_v0  ;;  %v827_v0 = vld [vmem:[%s15730_s5 + $0x800] sm:$0xff] }
  0xd5   : > { %702 = vst [vmem:[#allocation2 + $0x608] sm:$0xff] %v701_v1  ;;  %v829_v1 = vld [vmem:[%s15730_s5 + $0x808] sm:$0xff] }
  0xd6   : > { %704 = vst [vmem:[#allocation2 + $0x610] sm:$0xff] %v703_v2  ;;  %v831_v2 = vld [vmem:[%s15730_s5 + $0x810] sm:$0xff] }
  0xd7   : > { %706 = vst [vmem:[#allocation2 + $0x618] sm:$0xff] %v705_v3  ;;  %v833_v3 = vld [vmem:[%s15730_s5 + $0x818] sm:$0xff] }
  0xd8   : > { %708 = vst [vmem:[#allocation2 + $0x620] sm:$0xff] %v707_v4  ;;  %v835_v4 = vld [vmem:[%s15730_s5 + $0x820] sm:$0xff] }
  0xd9   : > { %710 = vst [vmem:[#allocation2 + $0x628] sm:$0xff] %v709_v5  ;;  %v837_v5 = vld [vmem:[%s15730_s5 + $0x828] sm:$0xff] }
  0xda   : > { %712 = vst [vmem:[#allocation2 + $0x630] sm:$0xff] %v711_v6  ;;  %v839_v6 = vld [vmem:[%s15730_s5 + $0x830] sm:$0xff] }
  0xdb   : > { %714 = vst [vmem:[#allocation2 + $0x638] sm:$0xff] %v713_v7  ;;  %v841_v7 = vld [vmem:[%s15730_s5 + $0x838] sm:$0xff] }
  0xdc   : > { %716 = vst [vmem:[#allocation2 + $0x640] sm:$0xff] %v715_v8  ;;  %v843_v8 = vld [vmem:[%s15730_s5 + $0x840] sm:$0xff] }
  0xdd   : > { %718 = vst [vmem:[#allocation2 + $0x648] sm:$0xff] %v717_v9  ;;  %v845_v9 = vld [vmem:[%s15730_s5 + $0x848] sm:$0xff] }
  0xde   : > { %720 = vst [vmem:[#allocation2 + $0x650] sm:$0xff] %v719_v10  ;;  %v847_v10 = vld [vmem:[%s15730_s5 + $0x850] sm:$0xff] }
  0xdf   : > { %722 = vst [vmem:[#allocation2 + $0x658] sm:$0xff] %v721_v11  ;;  %v849_v11 = vld [vmem:[%s15730_s5 + $0x858] sm:$0xff] }
  0xe0   : > { %724 = vst [vmem:[#allocation2 + $0x660] sm:$0xff] %v723_v12  ;;  %v851_v12 = vld [vmem:[%s15730_s5 + $0x860] sm:$0xff] }
  0xe1   : > { %726 = vst [vmem:[#allocation2 + $0x668] sm:$0xff] %v725_v13  ;;  %v853_v13 = vld [vmem:[%s15730_s5 + $0x868] sm:$0xff] }
  0xe2   : > { %728 = vst [vmem:[#allocation2 + $0x670] sm:$0xff] %v727_v14  ;;  %v855_v14 = vld [vmem:[%s15730_s5 + $0x870] sm:$0xff] }
  0xe3   : > { %730 = vst [vmem:[#allocation2 + $0x678] sm:$0xff] %v729_v15  ;;  %v857_v15 = vld [vmem:[%s15730_s5 + $0x878] sm:$0xff] }
  0xe4   : > { %732 = vst [vmem:[#allocation2 + $0x680] sm:$0xff] %v731_v16  ;;  %v859_v16 = vld [vmem:[%s15730_s5 + $0x880] sm:$0xff] }
  0xe5   : > { %734 = vst [vmem:[#allocation2 + $0x688] sm:$0xff] %v733_v17  ;;  %v861_v17 = vld [vmem:[%s15730_s5 + $0x888] sm:$0xff] }
  0xe6   : > { %736 = vst [vmem:[#allocation2 + $0x690] sm:$0xff] %v735_v18  ;;  %v863_v18 = vld [vmem:[%s15730_s5 + $0x890] sm:$0xff] }
  0xe7   : > { %738 = vst [vmem:[#allocation2 + $0x698] sm:$0xff] %v737_v19  ;;  %v865_v19 = vld [vmem:[%s15730_s5 + $0x898] sm:$0xff] }
  0xe8   : > { %740 = vst [vmem:[#allocation2 + $0x6a0] sm:$0xff] %v739_v20  ;;  %v867_v20 = vld [vmem:[%s15730_s5 + $0x8a0] sm:$0xff] }
  0xe9   : > { %742 = vst [vmem:[#allocation2 + $0x6a8] sm:$0xff] %v741_v21  ;;  %v869_v21 = vld [vmem:[%s15730_s5 + $0x8a8] sm:$0xff] }
  0xea   : > { %744 = vst [vmem:[#allocation2 + $0x6b0] sm:$0xff] %v743_v22  ;;  %v871_v22 = vld [vmem:[%s15730_s5 + $0x8b0] sm:$0xff] }
  0xeb   : > { %746 = vst [vmem:[#allocation2 + $0x6b8] sm:$0xff] %v745_v23  ;;  %v873_v23 = vld [vmem:[%s15730_s5 + $0x8b8] sm:$0xff] }
  0xec   : > { %748 = vst [vmem:[#allocation2 + $0x6c0] sm:$0xff] %v747_v24  ;;  %v875_v24 = vld [vmem:[%s15730_s5 + $0x8c0] sm:$0xff] }
  0xed   : > { %750 = vst [vmem:[#allocation2 + $0x6c8] sm:$0xff] %v749_v25  ;;  %v877_v25 = vld [vmem:[%s15730_s5 + $0x8c8] sm:$0xff] }
  0xee   : > { %752 = vst [vmem:[#allocation2 + $0x6d0] sm:$0xff] %v751_v26  ;;  %v879_v26 = vld [vmem:[%s15730_s5 + $0x8d0] sm:$0xff] }
  0xef   : > { %754 = vst [vmem:[#allocation2 + $0x6d8] sm:$0xff] %v753_v27  ;;  %v881_v27 = vld [vmem:[%s15730_s5 + $0x8d8] sm:$0xff] }
  0xf0   : > { %756 = vst [vmem:[#allocation2 + $0x6e0] sm:$0xff] %v755_v28  ;;  %v883_v28 = vld [vmem:[%s15730_s5 + $0x8e0] sm:$0xff] }
  0xf1   : > { %758 = vst [vmem:[#allocation2 + $0x6e8] sm:$0xff] %v757_v29  ;;  %v885_v29 = vld [vmem:[%s15730_s5 + $0x8e8] sm:$0xff] }
  0xf2   : > { %760 = vst [vmem:[#allocation2 + $0x6f0] sm:$0xff] %v759_v30  ;;  %v887_v30 = vld [vmem:[%s15730_s5 + $0x8f0] sm:$0xff] }
  0xf3   : > { %762 = vst [vmem:[#allocation2 + $0x6f8] sm:$0xff] %v761_v31  ;;  %v889_v31 = vld [vmem:[%s15730_s5 + $0x8f8] sm:$0xff] }
  0xf4   : > { %764 = vst [vmem:[#allocation2 + $0x700] sm:$0xff] %v763_v32  ;;  %v891_v32 = vld [vmem:[%s15730_s5 + $0x900] sm:$0xff] }
  0xf5   : > { %766 = vst [vmem:[#allocation2 + $0x708] sm:$0xff] %v765_v33  ;;  %v893_v33 = vld [vmem:[%s15730_s5 + $0x908] sm:$0xff] }
  0xf6   : > { %768 = vst [vmem:[#allocation2 + $0x710] sm:$0xff] %v767_v34  ;;  %v895_v34 = vld [vmem:[%s15730_s5 + $0x910] sm:$0xff] }
  0xf7   : > { %770 = vst [vmem:[#allocation2 + $0x718] sm:$0xff] %v769_v35  ;;  %v897_v35 = vld [vmem:[%s15730_s5 + $0x918] sm:$0xff] }
  0xf8   : > { %772 = vst [vmem:[#allocation2 + $0x720] sm:$0xff] %v771_v36  ;;  %v899_v36 = vld [vmem:[%s15730_s5 + $0x920] sm:$0xff] }
  0xf9   : > { %774 = vst [vmem:[#allocation2 + $0x728] sm:$0xff] %v773_v37  ;;  %v901_v37 = vld [vmem:[%s15730_s5 + $0x928] sm:$0xff] }
  0xfa   : > { %776 = vst [vmem:[#allocation2 + $0x730] sm:$0xff] %v775_v38  ;;  %v903_v38 = vld [vmem:[%s15730_s5 + $0x930] sm:$0xff] }
  0xfb   : > { %778 = vst [vmem:[#allocation2 + $0x738] sm:$0xff] %v777_v39  ;;  %v905_v39 = vld [vmem:[%s15730_s5 + $0x938] sm:$0xff] }
  0xfc   : > { %780 = vst [vmem:[#allocation2 + $0x740] sm:$0xff] %v779_v40  ;;  %v907_v40 = vld [vmem:[%s15730_s5 + $0x940] sm:$0xff] }
  0xfd   : > { %782 = vst [vmem:[#allocation2 + $0x748] sm:$0xff] %v781_v41  ;;  %v909_v41 = vld [vmem:[%s15730_s5 + $0x948] sm:$0xff] }
  0xfe   : > { %784 = vst [vmem:[#allocation2 + $0x750] sm:$0xff] %v783_v42  ;;  %v911_v42 = vld [vmem:[%s15730_s5 + $0x950] sm:$0xff] }
  0xff   : > { %786 = vst [vmem:[#allocation2 + $0x758] sm:$0xff] %v785_v43  ;;  %v913_v43 = vld [vmem:[%s15730_s5 + $0x958] sm:$0xff] }
 0x100   : > { %788 = vst [vmem:[#allocation2 + $0x760] sm:$0xff] %v787_v44  ;;  %v915_v44 = vld [vmem:[%s15730_s5 + $0x960] sm:$0xff] }
 0x101   : > { %790 = vst [vmem:[#allocation2 + $0x768] sm:$0xff] %v789_v45  ;;  %v917_v45 = vld [vmem:[%s15730_s5 + $0x968] sm:$0xff] }
 0x102   : > { %792 = vst [vmem:[#allocation2 + $0x770] sm:$0xff] %v791_v46  ;;  %v919_v46 = vld [vmem:[%s15730_s5 + $0x970] sm:$0xff] }
 0x103   : > { %794 = vst [vmem:[#allocation2 + $0x778] sm:$0xff] %v793_v47  ;;  %v921_v47 = vld [vmem:[%s15730_s5 + $0x978] sm:$0xff] }
 0x104   : > { %796 = vst [vmem:[#allocation2 + $0x780] sm:$0xff] %v795_v48  ;;  %v923_v48 = vld [vmem:[%s15730_s5 + $0x980] sm:$0xff] }
 0x105   : > { %798 = vst [vmem:[#allocation2 + $0x788] sm:$0xff] %v797_v49  ;;  %v925_v49 = vld [vmem:[%s15730_s5 + $0x988] sm:$0xff] }
 0x106   : > { %800 = vst [vmem:[#allocation2 + $0x790] sm:$0xff] %v799_v50  ;;  %v927_v50 = vld [vmem:[%s15730_s5 + $0x990] sm:$0xff] }
 0x107   : > { %802 = vst [vmem:[#allocation2 + $0x798] sm:$0xff] %v801_v51  ;;  %v929_v51 = vld [vmem:[%s15730_s5 + $0x998] sm:$0xff] }
 0x108   : > { %804 = vst [vmem:[#allocation2 + $0x7a0] sm:$0xff] %v803_v52  ;;  %v931_v52 = vld [vmem:[%s15730_s5 + $0x9a0] sm:$0xff] }
 0x109   : > { %806 = vst [vmem:[#allocation2 + $0x7a8] sm:$0xff] %v805_v53  ;;  %v933_v53 = vld [vmem:[%s15730_s5 + $0x9a8] sm:$0xff] }
 0x10a   : > { %808 = vst [vmem:[#allocation2 + $0x7b0] sm:$0xff] %v807_v54  ;;  %v935_v54 = vld [vmem:[%s15730_s5 + $0x9b0] sm:$0xff] }
 0x10b   : > { %810 = vst [vmem:[#allocation2 + $0x7b8] sm:$0xff] %v809_v55  ;;  %v937_v55 = vld [vmem:[%s15730_s5 + $0x9b8] sm:$0xff] }
 0x10c   : > { %812 = vst [vmem:[#allocation2 + $0x7c0] sm:$0xff] %v811_v56  ;;  %v939_v56 = vld [vmem:[%s15730_s5 + $0x9c0] sm:$0xff] }
 0x10d   : > { %814 = vst [vmem:[#allocation2 + $0x7c8] sm:$0xff] %v813_v57  ;;  %v941_v57 = vld [vmem:[%s15730_s5 + $0x9c8] sm:$0xff] }
 0x10e   : > { %816 = vst [vmem:[#allocation2 + $0x7d0] sm:$0xff] %v815_v58  ;;  %v943_v58 = vld [vmem:[%s15730_s5 + $0x9d0] sm:$0xff] }
 0x10f   : > { %818 = vst [vmem:[#allocation2 + $0x7d8] sm:$0xff] %v817_v59  ;;  %v945_v59 = vld [vmem:[%s15730_s5 + $0x9d8] sm:$0xff] }
 0x110   : > { %820 = vst [vmem:[#allocation2 + $0x7e0] sm:$0xff] %v819_v60  ;;  %v947_v60 = vld [vmem:[%s15730_s5 + $0x9e0] sm:$0xff] }
 0x111   : > { %822 = vst [vmem:[#allocation2 + $0x7e8] sm:$0xff] %v821_v61  ;;  %v949_v61 = vld [vmem:[%s15730_s5 + $0x9e8] sm:$0xff] }
 0x112   : > { %824 = vst [vmem:[#allocation2 + $0x7f0] sm:$0xff] %v823_v62  ;;  %v951_v62 = vld [vmem:[%s15730_s5 + $0x9f0] sm:$0xff] }
 0x113   : > { %826 = vst [vmem:[#allocation2 + $0x7f8] sm:$0xff] %v825_v63  ;;  %v953_v63 = vld [vmem:[%s15730_s5 + $0x9f8] sm:$0xff] }
 0x114   : > { %828 = vst [vmem:[#allocation2 + $0x800] sm:$0xff] %v827_v0  ;;  %v955_v0 = vld [vmem:[%s15730_s5 + $0xa00] sm:$0xff] }
 0x115   : > { %830 = vst [vmem:[#allocation2 + $0x808] sm:$0xff] %v829_v1  ;;  %v957_v1 = vld [vmem:[%s15730_s5 + $0xa08] sm:$0xff] }
 0x116   : > { %832 = vst [vmem:[#allocation2 + $0x810] sm:$0xff] %v831_v2  ;;  %v959_v2 = vld [vmem:[%s15730_s5 + $0xa10] sm:$0xff] }
 0x117   : > { %834 = vst [vmem:[#allocation2 + $0x818] sm:$0xff] %v833_v3  ;;  %v961_v3 = vld [vmem:[%s15730_s5 + $0xa18] sm:$0xff] }
 0x118   : > { %836 = vst [vmem:[#allocation2 + $0x820] sm:$0xff] %v835_v4  ;;  %v963_v4 = vld [vmem:[%s15730_s5 + $0xa20] sm:$0xff] }
 0x119   : > { %838 = vst [vmem:[#allocation2 + $0x828] sm:$0xff] %v837_v5  ;;  %v965_v5 = vld [vmem:[%s15730_s5 + $0xa28] sm:$0xff] }
 0x11a   : > { %840 = vst [vmem:[#allocation2 + $0x830] sm:$0xff] %v839_v6  ;;  %v967_v6 = vld [vmem:[%s15730_s5 + $0xa30] sm:$0xff] }
 0x11b   : > { %842 = vst [vmem:[#allocation2 + $0x838] sm:$0xff] %v841_v7  ;;  %v969_v7 = vld [vmem:[%s15730_s5 + $0xa38] sm:$0xff] }
 0x11c   : > { %844 = vst [vmem:[#allocation2 + $0x840] sm:$0xff] %v843_v8  ;;  %v971_v8 = vld [vmem:[%s15730_s5 + $0xa40] sm:$0xff] }
 0x11d   : > { %846 = vst [vmem:[#allocation2 + $0x848] sm:$0xff] %v845_v9  ;;  %v973_v9 = vld [vmem:[%s15730_s5 + $0xa48] sm:$0xff] }
 0x11e   : > { %848 = vst [vmem:[#allocation2 + $0x850] sm:$0xff] %v847_v10  ;;  %v975_v10 = vld [vmem:[%s15730_s5 + $0xa50] sm:$0xff] }
 0x11f   : > { %850 = vst [vmem:[#allocation2 + $0x858] sm:$0xff] %v849_v11  ;;  %v977_v11 = vld [vmem:[%s15730_s5 + $0xa58] sm:$0xff] }
 0x120   : > { %852 = vst [vmem:[#allocation2 + $0x860] sm:$0xff] %v851_v12  ;;  %v979_v12 = vld [vmem:[%s15730_s5 + $0xa60] sm:$0xff] }
 0x121   : > { %854 = vst [vmem:[#allocation2 + $0x868] sm:$0xff] %v853_v13  ;;  %v981_v13 = vld [vmem:[%s15730_s5 + $0xa68] sm:$0xff] }
 0x122   : > { %856 = vst [vmem:[#allocation2 + $0x870] sm:$0xff] %v855_v14  ;;  %v983_v14 = vld [vmem:[%s15730_s5 + $0xa70] sm:$0xff] }
 0x123   : > { %858 = vst [vmem:[#allocation2 + $0x878] sm:$0xff] %v857_v15  ;;  %v985_v15 = vld [vmem:[%s15730_s5 + $0xa78] sm:$0xff] }
 0x124   : > { %860 = vst [vmem:[#allocation2 + $0x880] sm:$0xff] %v859_v16  ;;  %v987_v16 = vld [vmem:[%s15730_s5 + $0xa80] sm:$0xff] }
 0x125   : > { %862 = vst [vmem:[#allocation2 + $0x888] sm:$0xff] %v861_v17  ;;  %v989_v17 = vld [vmem:[%s15730_s5 + $0xa88] sm:$0xff] }
 0x126   : > { %864 = vst [vmem:[#allocation2 + $0x890] sm:$0xff] %v863_v18  ;;  %v991_v18 = vld [vmem:[%s15730_s5 + $0xa90] sm:$0xff] }
 0x127   : > { %866 = vst [vmem:[#allocation2 + $0x898] sm:$0xff] %v865_v19  ;;  %v993_v19 = vld [vmem:[%s15730_s5 + $0xa98] sm:$0xff] }
 0x128   : > { %868 = vst [vmem:[#allocation2 + $0x8a0] sm:$0xff] %v867_v20  ;;  %v995_v20 = vld [vmem:[%s15730_s5 + $0xaa0] sm:$0xff] }
 0x129   : > { %870 = vst [vmem:[#allocation2 + $0x8a8] sm:$0xff] %v869_v21  ;;  %v997_v21 = vld [vmem:[%s15730_s5 + $0xaa8] sm:$0xff] }
 0x12a   : > { %872 = vst [vmem:[#allocation2 + $0x8b0] sm:$0xff] %v871_v22  ;;  %v999_v22 = vld [vmem:[%s15730_s5 + $0xab0] sm:$0xff] }
 0x12b   : > { %874 = vst [vmem:[#allocation2 + $0x8b8] sm:$0xff] %v873_v23  ;;  %v1001_v23 = vld [vmem:[%s15730_s5 + $0xab8] sm:$0xff] }
 0x12c   : > { %876 = vst [vmem:[#allocation2 + $0x8c0] sm:$0xff] %v875_v24  ;;  %v1003_v24 = vld [vmem:[%s15730_s5 + $0xac0] sm:$0xff] }
 0x12d   : > { %878 = vst [vmem:[#allocation2 + $0x8c8] sm:$0xff] %v877_v25  ;;  %v1005_v25 = vld [vmem:[%s15730_s5 + $0xac8] sm:$0xff] }
 0x12e   : > { %880 = vst [vmem:[#allocation2 + $0x8d0] sm:$0xff] %v879_v26  ;;  %v1007_v26 = vld [vmem:[%s15730_s5 + $0xad0] sm:$0xff] }
 0x12f   : > { %882 = vst [vmem:[#allocation2 + $0x8d8] sm:$0xff] %v881_v27  ;;  %v1009_v27 = vld [vmem:[%s15730_s5 + $0xad8] sm:$0xff] }
 0x130   : > { %884 = vst [vmem:[#allocation2 + $0x8e0] sm:$0xff] %v883_v28  ;;  %v1011_v28 = vld [vmem:[%s15730_s5 + $0xae0] sm:$0xff] }
 0x131   : > { %886 = vst [vmem:[#allocation2 + $0x8e8] sm:$0xff] %v885_v29  ;;  %v1013_v29 = vld [vmem:[%s15730_s5 + $0xae8] sm:$0xff] }
 0x132   : > { %888 = vst [vmem:[#allocation2 + $0x8f0] sm:$0xff] %v887_v30  ;;  %v1015_v30 = vld [vmem:[%s15730_s5 + $0xaf0] sm:$0xff] }
 0x133   : > { %890 = vst [vmem:[#allocation2 + $0x8f8] sm:$0xff] %v889_v31  ;;  %v1017_v31 = vld [vmem:[%s15730_s5 + $0xaf8] sm:$0xff] }
 0x134   : > { %892 = vst [vmem:[#allocation2 + $0x900] sm:$0xff] %v891_v32  ;;  %v1019_v32 = vld [vmem:[%s15730_s5 + $0xb00] sm:$0xff] }
 0x135   : > { %894 = vst [vmem:[#allocation2 + $0x908] sm:$0xff] %v893_v33  ;;  %v1021_v33 = vld [vmem:[%s15730_s5 + $0xb08] sm:$0xff] }
 0x136   : > { %896 = vst [vmem:[#allocation2 + $0x910] sm:$0xff] %v895_v34  ;;  %v1023_v34 = vld [vmem:[%s15730_s5 + $0xb10] sm:$0xff] }
 0x137   : > { %898 = vst [vmem:[#allocation2 + $0x918] sm:$0xff] %v897_v35  ;;  %v1025_v35 = vld [vmem:[%s15730_s5 + $0xb18] sm:$0xff] }
 0x138   : > { %900 = vst [vmem:[#allocation2 + $0x920] sm:$0xff] %v899_v36  ;;  %v1027_v36 = vld [vmem:[%s15730_s5 + $0xb20] sm:$0xff] }
 0x139   : > { %902 = vst [vmem:[#allocation2 + $0x928] sm:$0xff] %v901_v37  ;;  %v1029_v37 = vld [vmem:[%s15730_s5 + $0xb28] sm:$0xff] }
 0x13a   : > { %904 = vst [vmem:[#allocation2 + $0x930] sm:$0xff] %v903_v38  ;;  %v1031_v38 = vld [vmem:[%s15730_s5 + $0xb30] sm:$0xff] }
 0x13b   : > { %906 = vst [vmem:[#allocation2 + $0x938] sm:$0xff] %v905_v39  ;;  %v1033_v39 = vld [vmem:[%s15730_s5 + $0xb38] sm:$0xff] }
 0x13c   : > { %908 = vst [vmem:[#allocation2 + $0x940] sm:$0xff] %v907_v40  ;;  %v1035_v40 = vld [vmem:[%s15730_s5 + $0xb40] sm:$0xff] }
 0x13d   : > { %910 = vst [vmem:[#allocation2 + $0x948] sm:$0xff] %v909_v41  ;;  %v1037_v41 = vld [vmem:[%s15730_s5 + $0xb48] sm:$0xff] }
 0x13e   : > { %912 = vst [vmem:[#allocation2 + $0x950] sm:$0xff] %v911_v42  ;;  %v1039_v42 = vld [vmem:[%s15730_s5 + $0xb50] sm:$0xff] }
 0x13f   : > { %914 = vst [vmem:[#allocation2 + $0x958] sm:$0xff] %v913_v43  ;;  %v1041_v43 = vld [vmem:[%s15730_s5 + $0xb58] sm:$0xff] }
 0x140   : > { %916 = vst [vmem:[#allocation2 + $0x960] sm:$0xff] %v915_v44  ;;  %v1043_v44 = vld [vmem:[%s15730_s5 + $0xb60] sm:$0xff] }
 0x141   : > { %918 = vst [vmem:[#allocation2 + $0x968] sm:$0xff] %v917_v45  ;;  %v1045_v45 = vld [vmem:[%s15730_s5 + $0xb68] sm:$0xff] }
 0x142   : > { %920 = vst [vmem:[#allocation2 + $0x970] sm:$0xff] %v919_v46  ;;  %v1047_v46 = vld [vmem:[%s15730_s5 + $0xb70] sm:$0xff] }
 0x143   : > { %922 = vst [vmem:[#allocation2 + $0x978] sm:$0xff] %v921_v47  ;;  %v1049_v47 = vld [vmem:[%s15730_s5 + $0xb78] sm:$0xff] }
 0x144   : > { %924 = vst [vmem:[#allocation2 + $0x980] sm:$0xff] %v923_v48  ;;  %v1051_v48 = vld [vmem:[%s15730_s5 + $0xb80] sm:$0xff] }
 0x145   : > { %926 = vst [vmem:[#allocation2 + $0x988] sm:$0xff] %v925_v49  ;;  %v1053_v49 = vld [vmem:[%s15730_s5 + $0xb88] sm:$0xff] }
 0x146   : > { %928 = vst [vmem:[#allocation2 + $0x990] sm:$0xff] %v927_v50  ;;  %v1055_v50 = vld [vmem:[%s15730_s5 + $0xb90] sm:$0xff] }
 0x147   : > { %930 = vst [vmem:[#allocation2 + $0x998] sm:$0xff] %v929_v51  ;;  %v1057_v51 = vld [vmem:[%s15730_s5 + $0xb98] sm:$0xff] }
 0x148   : > { %932 = vst [vmem:[#allocation2 + $0x9a0] sm:$0xff] %v931_v52  ;;  %v1059_v52 = vld [vmem:[%s15730_s5 + $0xba0] sm:$0xff] }
 0x149   : > { %934 = vst [vmem:[#allocation2 + $0x9a8] sm:$0xff] %v933_v53  ;;  %v1061_v53 = vld [vmem:[%s15730_s5 + $0xba8] sm:$0xff] }
 0x14a   : > { %936 = vst [vmem:[#allocation2 + $0x9b0] sm:$0xff] %v935_v54  ;;  %v1063_v54 = vld [vmem:[%s15730_s5 + $0xbb0] sm:$0xff] }
 0x14b   : > { %938 = vst [vmem:[#allocation2 + $0x9b8] sm:$0xff] %v937_v55  ;;  %v1065_v55 = vld [vmem:[%s15730_s5 + $0xbb8] sm:$0xff] }
 0x14c   : > { %940 = vst [vmem:[#allocation2 + $0x9c0] sm:$0xff] %v939_v56  ;;  %v1067_v56 = vld [vmem:[%s15730_s5 + $0xbc0] sm:$0xff] }
 0x14d   : > { %942 = vst [vmem:[#allocation2 + $0x9c8] sm:$0xff] %v941_v57  ;;  %v1069_v57 = vld [vmem:[%s15730_s5 + $0xbc8] sm:$0xff] }
 0x14e   : > { %944 = vst [vmem:[#allocation2 + $0x9d0] sm:$0xff] %v943_v58  ;;  %v1071_v58 = vld [vmem:[%s15730_s5 + $0xbd0] sm:$0xff] }
 0x14f   : > { %946 = vst [vmem:[#allocation2 + $0x9d8] sm:$0xff] %v945_v59  ;;  %v1073_v59 = vld [vmem:[%s15730_s5 + $0xbd8] sm:$0xff] }
 0x150   : > { %948 = vst [vmem:[#allocation2 + $0x9e0] sm:$0xff] %v947_v60  ;;  %v1075_v60 = vld [vmem:[%s15730_s5 + $0xbe0] sm:$0xff] }
 0x151   : > { %950 = vst [vmem:[#allocation2 + $0x9e8] sm:$0xff] %v949_v61  ;;  %v1077_v61 = vld [vmem:[%s15730_s5 + $0xbe8] sm:$0xff] }
 0x152   : > { %952 = vst [vmem:[#allocation2 + $0x9f0] sm:$0xff] %v951_v62  ;;  %v1079_v62 = vld [vmem:[%s15730_s5 + $0xbf0] sm:$0xff] }
 0x153   : > { %954 = vst [vmem:[#allocation2 + $0x9f8] sm:$0xff] %v953_v63  ;;  %v1081_v63 = vld [vmem:[%s15730_s5 + $0xbf8] sm:$0xff] }
 0x154   : > { %956 = vst [vmem:[#allocation2 + $0xa00] sm:$0xff] %v955_v0  ;;  %v1083_v0 = vld [vmem:[%s15730_s5 + $0xc00] sm:$0xff] }
 0x155   : > { %958 = vst [vmem:[#allocation2 + $0xa08] sm:$0xff] %v957_v1  ;;  %v1085_v1 = vld [vmem:[%s15730_s5 + $0xc08] sm:$0xff] }
 0x156   : > { %960 = vst [vmem:[#allocation2 + $0xa10] sm:$0xff] %v959_v2  ;;  %v1087_v2 = vld [vmem:[%s15730_s5 + $0xc10] sm:$0xff] }
 0x157   : > { %962 = vst [vmem:[#allocation2 + $0xa18] sm:$0xff] %v961_v3  ;;  %v1089_v3 = vld [vmem:[%s15730_s5 + $0xc18] sm:$0xff] }
 0x158   : > { %964 = vst [vmem:[#allocation2 + $0xa20] sm:$0xff] %v963_v4  ;;  %v1091_v4 = vld [vmem:[%s15730_s5 + $0xc20] sm:$0xff] }
 0x159   : > { %966 = vst [vmem:[#allocation2 + $0xa28] sm:$0xff] %v965_v5  ;;  %v1093_v5 = vld [vmem:[%s15730_s5 + $0xc28] sm:$0xff] }
 0x15a   : > { %968 = vst [vmem:[#allocation2 + $0xa30] sm:$0xff] %v967_v6  ;;  %v1095_v6 = vld [vmem:[%s15730_s5 + $0xc30] sm:$0xff] }
 0x15b   : > { %970 = vst [vmem:[#allocation2 + $0xa38] sm:$0xff] %v969_v7  ;;  %v1097_v7 = vld [vmem:[%s15730_s5 + $0xc38] sm:$0xff] }
 0x15c   : > { %972 = vst [vmem:[#allocation2 + $0xa40] sm:$0xff] %v971_v8  ;;  %v1099_v8 = vld [vmem:[%s15730_s5 + $0xc40] sm:$0xff] }
 0x15d   : > { %974 = vst [vmem:[#allocation2 + $0xa48] sm:$0xff] %v973_v9  ;;  %v1101_v9 = vld [vmem:[%s15730_s5 + $0xc48] sm:$0xff] }
 0x15e   : > { %976 = vst [vmem:[#allocation2 + $0xa50] sm:$0xff] %v975_v10  ;;  %v1103_v10 = vld [vmem:[%s15730_s5 + $0xc50] sm:$0xff] }
 0x15f   : > { %978 = vst [vmem:[#allocation2 + $0xa58] sm:$0xff] %v977_v11  ;;  %v1105_v11 = vld [vmem:[%s15730_s5 + $0xc58] sm:$0xff] }
 0x160   : > { %980 = vst [vmem:[#allocation2 + $0xa60] sm:$0xff] %v979_v12  ;;  %v1107_v12 = vld [vmem:[%s15730_s5 + $0xc60] sm:$0xff] }
 0x161   : > { %982 = vst [vmem:[#allocation2 + $0xa68] sm:$0xff] %v981_v13  ;;  %v1109_v13 = vld [vmem:[%s15730_s5 + $0xc68] sm:$0xff] }
 0x162   : > { %984 = vst [vmem:[#allocation2 + $0xa70] sm:$0xff] %v983_v14  ;;  %v1111_v14 = vld [vmem:[%s15730_s5 + $0xc70] sm:$0xff] }
 0x163   : > { %986 = vst [vmem:[#allocation2 + $0xa78] sm:$0xff] %v985_v15  ;;  %v1113_v15 = vld [vmem:[%s15730_s5 + $0xc78] sm:$0xff] }
 0x164   : > { %988 = vst [vmem:[#allocation2 + $0xa80] sm:$0xff] %v987_v16  ;;  %v1115_v16 = vld [vmem:[%s15730_s5 + $0xc80] sm:$0xff] }
 0x165   : > { %990 = vst [vmem:[#allocation2 + $0xa88] sm:$0xff] %v989_v17  ;;  %v1117_v17 = vld [vmem:[%s15730_s5 + $0xc88] sm:$0xff] }
 0x166   : > { %992 = vst [vmem:[#allocation2 + $0xa90] sm:$0xff] %v991_v18  ;;  %v1119_v18 = vld [vmem:[%s15730_s5 + $0xc90] sm:$0xff] }
 0x167   : > { %994 = vst [vmem:[#allocation2 + $0xa98] sm:$0xff] %v993_v19  ;;  %v1121_v19 = vld [vmem:[%s15730_s5 + $0xc98] sm:$0xff] }
 0x168   : > { %996 = vst [vmem:[#allocation2 + $0xaa0] sm:$0xff] %v995_v20  ;;  %v1123_v20 = vld [vmem:[%s15730_s5 + $0xca0] sm:$0xff] }
 0x169   : > { %998 = vst [vmem:[#allocation2 + $0xaa8] sm:$0xff] %v997_v21  ;;  %v1125_v21 = vld [vmem:[%s15730_s5 + $0xca8] sm:$0xff] }
 0x16a   : > { %1000 = vst [vmem:[#allocation2 + $0xab0] sm:$0xff] %v999_v22  ;;  %v1127_v22 = vld [vmem:[%s15730_s5 + $0xcb0] sm:$0xff] }
 0x16b   : > { %1002 = vst [vmem:[#allocation2 + $0xab8] sm:$0xff] %v1001_v23  ;;  %v1129_v23 = vld [vmem:[%s15730_s5 + $0xcb8] sm:$0xff] }
 0x16c   : > { %1004 = vst [vmem:[#allocation2 + $0xac0] sm:$0xff] %v1003_v24  ;;  %v1131_v24 = vld [vmem:[%s15730_s5 + $0xcc0] sm:$0xff] }
 0x16d   : > { %1006 = vst [vmem:[#allocation2 + $0xac8] sm:$0xff] %v1005_v25  ;;  %v1133_v25 = vld [vmem:[%s15730_s5 + $0xcc8] sm:$0xff] }
 0x16e   : > { %1008 = vst [vmem:[#allocation2 + $0xad0] sm:$0xff] %v1007_v26  ;;  %v1135_v26 = vld [vmem:[%s15730_s5 + $0xcd0] sm:$0xff] }
 0x16f   : > { %1010 = vst [vmem:[#allocation2 + $0xad8] sm:$0xff] %v1009_v27  ;;  %v1137_v27 = vld [vmem:[%s15730_s5 + $0xcd8] sm:$0xff] }
 0x170   : > { %1012 = vst [vmem:[#allocation2 + $0xae0] sm:$0xff] %v1011_v28  ;;  %v1139_v28 = vld [vmem:[%s15730_s5 + $0xce0] sm:$0xff] }
 0x171   : > { %1014 = vst [vmem:[#allocation2 + $0xae8] sm:$0xff] %v1013_v29  ;;  %v1141_v29 = vld [vmem:[%s15730_s5 + $0xce8] sm:$0xff] }
 0x172   : > { %1016 = vst [vmem:[#allocation2 + $0xaf0] sm:$0xff] %v1015_v30  ;;  %v1143_v30 = vld [vmem:[%s15730_s5 + $0xcf0] sm:$0xff] }
 0x173   : > { %1018 = vst [vmem:[#allocation2 + $0xaf8] sm:$0xff] %v1017_v31  ;;  %v1145_v31 = vld [vmem:[%s15730_s5 + $0xcf8] sm:$0xff] }
 0x174   : > { %1020 = vst [vmem:[#allocation2 + $0xb00] sm:$0xff] %v1019_v32  ;;  %v1147_v32 = vld [vmem:[%s15730_s5 + $0xd00] sm:$0xff] }
 0x175   : > { %1022 = vst [vmem:[#allocation2 + $0xb08] sm:$0xff] %v1021_v33  ;;  %v1149_v33 = vld [vmem:[%s15730_s5 + $0xd08] sm:$0xff] }
 0x176   : > { %1024 = vst [vmem:[#allocation2 + $0xb10] sm:$0xff] %v1023_v34  ;;  %v1151_v34 = vld [vmem:[%s15730_s5 + $0xd10] sm:$0xff] }
 0x177   : > { %1026 = vst [vmem:[#allocation2 + $0xb18] sm:$0xff] %v1025_v35  ;;  %v1153_v35 = vld [vmem:[%s15730_s5 + $0xd18] sm:$0xff] }
 0x178   : > { %1028 = vst [vmem:[#allocation2 + $0xb20] sm:$0xff] %v1027_v36  ;;  %v1155_v36 = vld [vmem:[%s15730_s5 + $0xd20] sm:$0xff] }
 0x179   : > { %1030 = vst [vmem:[#allocation2 + $0xb28] sm:$0xff] %v1029_v37  ;;  %v1157_v37 = vld [vmem:[%s15730_s5 + $0xd28] sm:$0xff] }
 0x17a   : > { %1032 = vst [vmem:[#allocation2 + $0xb30] sm:$0xff] %v1031_v38  ;;  %v1159_v38 = vld [vmem:[%s15730_s5 + $0xd30] sm:$0xff] }
 0x17b   : > { %1034 = vst [vmem:[#allocation2 + $0xb38] sm:$0xff] %v1033_v39  ;;  %v1161_v39 = vld [vmem:[%s15730_s5 + $0xd38] sm:$0xff] }
 0x17c   : > { %1036 = vst [vmem:[#allocation2 + $0xb40] sm:$0xff] %v1035_v40  ;;  %v1163_v40 = vld [vmem:[%s15730_s5 + $0xd40] sm:$0xff] }
 0x17d   : > { %1038 = vst [vmem:[#allocation2 + $0xb48] sm:$0xff] %v1037_v41  ;;  %v1165_v41 = vld [vmem:[%s15730_s5 + $0xd48] sm:$0xff] }
 0x17e   : > { %1040 = vst [vmem:[#allocation2 + $0xb50] sm:$0xff] %v1039_v42  ;;  %v1167_v42 = vld [vmem:[%s15730_s5 + $0xd50] sm:$0xff] }
 0x17f   : > { %1042 = vst [vmem:[#allocation2 + $0xb58] sm:$0xff] %v1041_v43  ;;  %v1169_v43 = vld [vmem:[%s15730_s5 + $0xd58] sm:$0xff] }
 0x180   : > { %1044 = vst [vmem:[#allocation2 + $0xb60] sm:$0xff] %v1043_v44  ;;  %v1171_v44 = vld [vmem:[%s15730_s5 + $0xd60] sm:$0xff] }
 0x181   : > { %1046 = vst [vmem:[#allocation2 + $0xb68] sm:$0xff] %v1045_v45  ;;  %v1173_v45 = vld [vmem:[%s15730_s5 + $0xd68] sm:$0xff] }
 0x182   : > { %1048 = vst [vmem:[#allocation2 + $0xb70] sm:$0xff] %v1047_v46  ;;  %v1175_v46 = vld [vmem:[%s15730_s5 + $0xd70] sm:$0xff] }
 0x183   : > { %1050 = vst [vmem:[#allocation2 + $0xb78] sm:$0xff] %v1049_v47  ;;  %v1177_v47 = vld [vmem:[%s15730_s5 + $0xd78] sm:$0xff] }
 0x184   : > { %1052 = vst [vmem:[#allocation2 + $0xb80] sm:$0xff] %v1051_v48  ;;  %v1179_v48 = vld [vmem:[%s15730_s5 + $0xd80] sm:$0xff] }
 0x185   : > { %1054 = vst [vmem:[#allocation2 + $0xb88] sm:$0xff] %v1053_v49  ;;  %v1181_v49 = vld [vmem:[%s15730_s5 + $0xd88] sm:$0xff] }
 0x186   : > { %1056 = vst [vmem:[#allocation2 + $0xb90] sm:$0xff] %v1055_v50  ;;  %v1183_v50 = vld [vmem:[%s15730_s5 + $0xd90] sm:$0xff] }
 0x187   : > { %1058 = vst [vmem:[#allocation2 + $0xb98] sm:$0xff] %v1057_v51  ;;  %v1185_v51 = vld [vmem:[%s15730_s5 + $0xd98] sm:$0xff] }
 0x188   : > { %1060 = vst [vmem:[#allocation2 + $0xba0] sm:$0xff] %v1059_v52  ;;  %v1187_v52 = vld [vmem:[%s15730_s5 + $0xda0] sm:$0xff] }
 0x189   : > { %1062 = vst [vmem:[#allocation2 + $0xba8] sm:$0xff] %v1061_v53  ;;  %v1189_v53 = vld [vmem:[%s15730_s5 + $0xda8] sm:$0xff] }
 0x18a   : > { %1064 = vst [vmem:[#allocation2 + $0xbb0] sm:$0xff] %v1063_v54  ;;  %v1191_v54 = vld [vmem:[%s15730_s5 + $0xdb0] sm:$0xff] }
 0x18b   : > { %1066 = vst [vmem:[#allocation2 + $0xbb8] sm:$0xff] %v1065_v55  ;;  %v1193_v55 = vld [vmem:[%s15730_s5 + $0xdb8] sm:$0xff] }
 0x18c   : > { %1068 = vst [vmem:[#allocation2 + $0xbc0] sm:$0xff] %v1067_v56  ;;  %v1195_v56 = vld [vmem:[%s15730_s5 + $0xdc0] sm:$0xff] }
 0x18d   : > { %1070 = vst [vmem:[#allocation2 + $0xbc8] sm:$0xff] %v1069_v57  ;;  %v1197_v57 = vld [vmem:[%s15730_s5 + $0xdc8] sm:$0xff] }
 0x18e   : > { %1072 = vst [vmem:[#allocation2 + $0xbd0] sm:$0xff] %v1071_v58  ;;  %v1199_v58 = vld [vmem:[%s15730_s5 + $0xdd0] sm:$0xff] }
 0x18f   : > { %1074 = vst [vmem:[#allocation2 + $0xbd8] sm:$0xff] %v1073_v59  ;;  %v1201_v59 = vld [vmem:[%s15730_s5 + $0xdd8] sm:$0xff] }
 0x190   : > { %1076 = vst [vmem:[#allocation2 + $0xbe0] sm:$0xff] %v1075_v60  ;;  %v1203_v60 = vld [vmem:[%s15730_s5 + $0xde0] sm:$0xff] }
 0x191   : > { %1078 = vst [vmem:[#allocation2 + $0xbe8] sm:$0xff] %v1077_v61  ;;  %v1205_v61 = vld [vmem:[%s15730_s5 + $0xde8] sm:$0xff] }
 0x192   : > { %1080 = vst [vmem:[#allocation2 + $0xbf0] sm:$0xff] %v1079_v62  ;;  %v1207_v62 = vld [vmem:[%s15730_s5 + $0xdf0] sm:$0xff] }
 0x193   : > { %1082 = vst [vmem:[#allocation2 + $0xbf8] sm:$0xff] %v1081_v63  ;;  %v1209_v63 = vld [vmem:[%s15730_s5 + $0xdf8] sm:$0xff] }
 0x194   : > { %1084 = vst [vmem:[#allocation2 + $0xc00] sm:$0xff] %v1083_v0  ;;  %v1211_v0 = vld [vmem:[%s15730_s5 + $0xe00] sm:$0xff] }
 0x195   : > { %1086 = vst [vmem:[#allocation2 + $0xc08] sm:$0xff] %v1085_v1  ;;  %v1213_v1 = vld [vmem:[%s15730_s5 + $0xe08] sm:$0xff] }
 0x196   : > { %1088 = vst [vmem:[#allocation2 + $0xc10] sm:$0xff] %v1087_v2  ;;  %v1215_v2 = vld [vmem:[%s15730_s5 + $0xe10] sm:$0xff] }
 0x197   : > { %1090 = vst [vmem:[#allocation2 + $0xc18] sm:$0xff] %v1089_v3  ;;  %v1217_v3 = vld [vmem:[%s15730_s5 + $0xe18] sm:$0xff] }
 0x198   : > { %1092 = vst [vmem:[#allocation2 + $0xc20] sm:$0xff] %v1091_v4  ;;  %v1219_v4 = vld [vmem:[%s15730_s5 + $0xe20] sm:$0xff] }
 0x199   : > { %1094 = vst [vmem:[#allocation2 + $0xc28] sm:$0xff] %v1093_v5  ;;  %v1221_v5 = vld [vmem:[%s15730_s5 + $0xe28] sm:$0xff] }
 0x19a   : > { %1096 = vst [vmem:[#allocation2 + $0xc30] sm:$0xff] %v1095_v6  ;;  %v1223_v6 = vld [vmem:[%s15730_s5 + $0xe30] sm:$0xff] }
 0x19b   : > { %1098 = vst [vmem:[#allocation2 + $0xc38] sm:$0xff] %v1097_v7  ;;  %v1225_v7 = vld [vmem:[%s15730_s5 + $0xe38] sm:$0xff] }
 0x19c   : > { %1100 = vst [vmem:[#allocation2 + $0xc40] sm:$0xff] %v1099_v8  ;;  %v1227_v8 = vld [vmem:[%s15730_s5 + $0xe40] sm:$0xff] }
 0x19d   : > { %1102 = vst [vmem:[#allocation2 + $0xc48] sm:$0xff] %v1101_v9  ;;  %v1229_v9 = vld [vmem:[%s15730_s5 + $0xe48] sm:$0xff] }
 0x19e   : > { %1104 = vst [vmem:[#allocation2 + $0xc50] sm:$0xff] %v1103_v10  ;;  %v1231_v10 = vld [vmem:[%s15730_s5 + $0xe50] sm:$0xff] }
 0x19f   : > { %1106 = vst [vmem:[#allocation2 + $0xc58] sm:$0xff] %v1105_v11  ;;  %v1233_v11 = vld [vmem:[%s15730_s5 + $0xe58] sm:$0xff] }
 0x1a0   : > { %1108 = vst [vmem:[#allocation2 + $0xc60] sm:$0xff] %v1107_v12  ;;  %v1235_v12 = vld [vmem:[%s15730_s5 + $0xe60] sm:$0xff] }
 0x1a1   : > { %1110 = vst [vmem:[#allocation2 + $0xc68] sm:$0xff] %v1109_v13  ;;  %v1237_v13 = vld [vmem:[%s15730_s5 + $0xe68] sm:$0xff] }
 0x1a2   : > { %1112 = vst [vmem:[#allocation2 + $0xc70] sm:$0xff] %v1111_v14  ;;  %v1239_v14 = vld [vmem:[%s15730_s5 + $0xe70] sm:$0xff] }
 0x1a3   : > { %1114 = vst [vmem:[#allocation2 + $0xc78] sm:$0xff] %v1113_v15  ;;  %v1241_v15 = vld [vmem:[%s15730_s5 + $0xe78] sm:$0xff] }
 0x1a4   : > { %1116 = vst [vmem:[#allocation2 + $0xc80] sm:$0xff] %v1115_v16  ;;  %v1243_v16 = vld [vmem:[%s15730_s5 + $0xe80] sm:$0xff] }
 0x1a5   : > { %1118 = vst [vmem:[#allocation2 + $0xc88] sm:$0xff] %v1117_v17  ;;  %v1245_v17 = vld [vmem:[%s15730_s5 + $0xe88] sm:$0xff] }
 0x1a6   : > { %1120 = vst [vmem:[#allocation2 + $0xc90] sm:$0xff] %v1119_v18  ;;  %v1247_v18 = vld [vmem:[%s15730_s5 + $0xe90] sm:$0xff] }
 0x1a7   : > { %1122 = vst [vmem:[#allocation2 + $0xc98] sm:$0xff] %v1121_v19  ;;  %v1249_v19 = vld [vmem:[%s15730_s5 + $0xe98] sm:$0xff] }
 0x1a8   : > { %1124 = vst [vmem:[#allocation2 + $0xca0] sm:$0xff] %v1123_v20  ;;  %v1251_v20 = vld [vmem:[%s15730_s5 + $0xea0] sm:$0xff] }
 0x1a9   : > { %1126 = vst [vmem:[#allocation2 + $0xca8] sm:$0xff] %v1125_v21  ;;  %v1253_v21 = vld [vmem:[%s15730_s5 + $0xea8] sm:$0xff] }
 0x1aa   : > { %1128 = vst [vmem:[#allocation2 + $0xcb0] sm:$0xff] %v1127_v22  ;;  %v1255_v22 = vld [vmem:[%s15730_s5 + $0xeb0] sm:$0xff] }
 0x1ab   : > { %1130 = vst [vmem:[#allocation2 + $0xcb8] sm:$0xff] %v1129_v23  ;;  %v1257_v23 = vld [vmem:[%s15730_s5 + $0xeb8] sm:$0xff] }
 0x1ac   : > { %1132 = vst [vmem:[#allocation2 + $0xcc0] sm:$0xff] %v1131_v24  ;;  %v1259_v24 = vld [vmem:[%s15730_s5 + $0xec0] sm:$0xff] }
 0x1ad   : > { %1134 = vst [vmem:[#allocation2 + $0xcc8] sm:$0xff] %v1133_v25  ;;  %v1261_v25 = vld [vmem:[%s15730_s5 + $0xec8] sm:$0xff] }
 0x1ae   : > { %1136 = vst [vmem:[#allocation2 + $0xcd0] sm:$0xff] %v1135_v26  ;;  %v1263_v26 = vld [vmem:[%s15730_s5 + $0xed0] sm:$0xff] }
 0x1af   : > { %1138 = vst [vmem:[#allocation2 + $0xcd8] sm:$0xff] %v1137_v27  ;;  %v1265_v27 = vld [vmem:[%s15730_s5 + $0xed8] sm:$0xff] }
 0x1b0   : > { %1140 = vst [vmem:[#allocation2 + $0xce0] sm:$0xff] %v1139_v28  ;;  %v1267_v28 = vld [vmem:[%s15730_s5 + $0xee0] sm:$0xff] }
 0x1b1   : > { %1142 = vst [vmem:[#allocation2 + $0xce8] sm:$0xff] %v1141_v29  ;;  %v1269_v29 = vld [vmem:[%s15730_s5 + $0xee8] sm:$0xff] }
 0x1b2   : > { %1144 = vst [vmem:[#allocation2 + $0xcf0] sm:$0xff] %v1143_v30  ;;  %v1271_v30 = vld [vmem:[%s15730_s5 + $0xef0] sm:$0xff] }
 0x1b3   : > { %1146 = vst [vmem:[#allocation2 + $0xcf8] sm:$0xff] %v1145_v31  ;;  %v1273_v31 = vld [vmem:[%s15730_s5 + $0xef8] sm:$0xff] }
 0x1b4   : > { %1148 = vst [vmem:[#allocation2 + $0xd00] sm:$0xff] %v1147_v32  ;;  %v1275_v32 = vld [vmem:[%s15730_s5 + $0xf00] sm:$0xff] }
 0x1b5   : > { %1150 = vst [vmem:[#allocation2 + $0xd08] sm:$0xff] %v1149_v33  ;;  %v1277_v33 = vld [vmem:[%s15730_s5 + $0xf08] sm:$0xff] }
 0x1b6   : > { %1152 = vst [vmem:[#allocation2 + $0xd10] sm:$0xff] %v1151_v34  ;;  %v1279_v34 = vld [vmem:[%s15730_s5 + $0xf10] sm:$0xff] }
 0x1b7   : > { %1154 = vst [vmem:[#allocation2 + $0xd18] sm:$0xff] %v1153_v35  ;;  %v1281_v35 = vld [vmem:[%s15730_s5 + $0xf18] sm:$0xff] }
 0x1b8   : > { %1156 = vst [vmem:[#allocation2 + $0xd20] sm:$0xff] %v1155_v36  ;;  %v1283_v36 = vld [vmem:[%s15730_s5 + $0xf20] sm:$0xff] }
 0x1b9   : > { %1158 = vst [vmem:[#allocation2 + $0xd28] sm:$0xff] %v1157_v37  ;;  %v1285_v37 = vld [vmem:[%s15730_s5 + $0xf28] sm:$0xff] }
 0x1ba   : > { %1160 = vst [vmem:[#allocation2 + $0xd30] sm:$0xff] %v1159_v38  ;;  %v1287_v38 = vld [vmem:[%s15730_s5 + $0xf30] sm:$0xff] }
 0x1bb   : > { %1162 = vst [vmem:[#allocation2 + $0xd38] sm:$0xff] %v1161_v39  ;;  %v1289_v39 = vld [vmem:[%s15730_s5 + $0xf38] sm:$0xff] }
 0x1bc   : > { %1164 = vst [vmem:[#allocation2 + $0xd40] sm:$0xff] %v1163_v40  ;;  %v1291_v40 = vld [vmem:[%s15730_s5 + $0xf40] sm:$0xff] }
 0x1bd   : > { %1166 = vst [vmem:[#allocation2 + $0xd48] sm:$0xff] %v1165_v41  ;;  %v1293_v41 = vld [vmem:[%s15730_s5 + $0xf48] sm:$0xff] }
 0x1be   : > { %1168 = vst [vmem:[#allocation2 + $0xd50] sm:$0xff] %v1167_v42  ;;  %v1295_v42 = vld [vmem:[%s15730_s5 + $0xf50] sm:$0xff] }
 0x1bf   : > { %1170 = vst [vmem:[#allocation2 + $0xd58] sm:$0xff] %v1169_v43  ;;  %v1297_v43 = vld [vmem:[%s15730_s5 + $0xf58] sm:$0xff] }
 0x1c0   : > { %1172 = vst [vmem:[#allocation2 + $0xd60] sm:$0xff] %v1171_v44  ;;  %v1299_v44 = vld [vmem:[%s15730_s5 + $0xf60] sm:$0xff] }
 0x1c1   : > { %1174 = vst [vmem:[#allocation2 + $0xd68] sm:$0xff] %v1173_v45  ;;  %v1301_v45 = vld [vmem:[%s15730_s5 + $0xf68] sm:$0xff] }
 0x1c2   : > { %1176 = vst [vmem:[#allocation2 + $0xd70] sm:$0xff] %v1175_v46  ;;  %v1303_v46 = vld [vmem:[%s15730_s5 + $0xf70] sm:$0xff] }
 0x1c3   : > { %1178 = vst [vmem:[#allocation2 + $0xd78] sm:$0xff] %v1177_v47  ;;  %v1305_v47 = vld [vmem:[%s15730_s5 + $0xf78] sm:$0xff] }
 0x1c4   : > { %1180 = vst [vmem:[#allocation2 + $0xd80] sm:$0xff] %v1179_v48  ;;  %v1307_v48 = vld [vmem:[%s15730_s5 + $0xf80] sm:$0xff] }
 0x1c5   : > { %1182 = vst [vmem:[#allocation2 + $0xd88] sm:$0xff] %v1181_v49  ;;  %v1309_v49 = vld [vmem:[%s15730_s5 + $0xf88] sm:$0xff] }
 0x1c6   : > { %1184 = vst [vmem:[#allocation2 + $0xd90] sm:$0xff] %v1183_v50  ;;  %v1311_v50 = vld [vmem:[%s15730_s5 + $0xf90] sm:$0xff] }
 0x1c7   : > { %1186 = vst [vmem:[#allocation2 + $0xd98] sm:$0xff] %v1185_v51  ;;  %v1313_v51 = vld [vmem:[%s15730_s5 + $0xf98] sm:$0xff] }
 0x1c8   : > { %1188 = vst [vmem:[#allocation2 + $0xda0] sm:$0xff] %v1187_v52  ;;  %v1315_v52 = vld [vmem:[%s15730_s5 + $0xfa0] sm:$0xff] }
 0x1c9   : > { %1190 = vst [vmem:[#allocation2 + $0xda8] sm:$0xff] %v1189_v53  ;;  %v1317_v53 = vld [vmem:[%s15730_s5 + $0xfa8] sm:$0xff] }
 0x1ca   : > { %1192 = vst [vmem:[#allocation2 + $0xdb0] sm:$0xff] %v1191_v54  ;;  %v1319_v54 = vld [vmem:[%s15730_s5 + $0xfb0] sm:$0xff] }
 0x1cb   : > { %1194 = vst [vmem:[#allocation2 + $0xdb8] sm:$0xff] %v1193_v55  ;;  %v1321_v55 = vld [vmem:[%s15730_s5 + $0xfb8] sm:$0xff] }
 0x1cc   : > { %1196 = vst [vmem:[#allocation2 + $0xdc0] sm:$0xff] %v1195_v56  ;;  %v1323_v56 = vld [vmem:[%s15730_s5 + $0xfc0] sm:$0xff] }
 0x1cd   : > { %1198 = vst [vmem:[#allocation2 + $0xdc8] sm:$0xff] %v1197_v57  ;;  %v1325_v57 = vld [vmem:[%s15730_s5 + $0xfc8] sm:$0xff] }
 0x1ce   : > { %1200 = vst [vmem:[#allocation2 + $0xdd0] sm:$0xff] %v1199_v58  ;;  %v1327_v58 = vld [vmem:[%s15730_s5 + $0xfd0] sm:$0xff] }
 0x1cf   : > { %1202 = vst [vmem:[#allocation2 + $0xdd8] sm:$0xff] %v1201_v59  ;;  %v1329_v59 = vld [vmem:[%s15730_s5 + $0xfd8] sm:$0xff] }
 0x1d0   : > { %1204 = vst [vmem:[#allocation2 + $0xde0] sm:$0xff] %v1203_v60  ;;  %v1331_v60 = vld [vmem:[%s15730_s5 + $0xfe0] sm:$0xff] }
 0x1d1   : > { %1206 = vst [vmem:[#allocation2 + $0xde8] sm:$0xff] %v1205_v61  ;;  %v1333_v61 = vld [vmem:[%s15730_s5 + $0xfe8] sm:$0xff] }
 0x1d2   : > { %1208 = vst [vmem:[#allocation2 + $0xdf0] sm:$0xff] %v1207_v62  ;;  %v1335_v62 = vld [vmem:[%s15730_s5 + $0xff0] sm:$0xff] }
 0x1d3   : > { %1210 = vst [vmem:[#allocation2 + $0xdf8] sm:$0xff] %v1209_v63  ;;  %v1337_v63 = vld [vmem:[%s15730_s5 + $0xff8] sm:$0xff] }
 0x1d4   : > { %1212 = vst [vmem:[#allocation2 + $0xe00] sm:$0xff] %v1211_v0  ;;  %v1339_v0 = vld [vmem:[%s15730_s5 + $0x1000] sm:$0xff] }
 0x1d5   : > { %1214 = vst [vmem:[#allocation2 + $0xe08] sm:$0xff] %v1213_v1  ;;  %v1341_v1 = vld [vmem:[%s15730_s5 + $0x1008] sm:$0xff] }
 0x1d6   : > { %1216 = vst [vmem:[#allocation2 + $0xe10] sm:$0xff] %v1215_v2  ;;  %v1343_v2 = vld [vmem:[%s15730_s5 + $0x1010] sm:$0xff] }
 0x1d7   : > { %1218 = vst [vmem:[#allocation2 + $0xe18] sm:$0xff] %v1217_v3  ;;  %v1345_v3 = vld [vmem:[%s15730_s5 + $0x1018] sm:$0xff] }
 0x1d8   : > { %1220 = vst [vmem:[#allocation2 + $0xe20] sm:$0xff] %v1219_v4  ;;  %v1347_v4 = vld [vmem:[%s15730_s5 + $0x1020] sm:$0xff] }
 0x1d9   : > { %1222 = vst [vmem:[#allocation2 + $0xe28] sm:$0xff] %v1221_v5  ;;  %v1349_v5 = vld [vmem:[%s15730_s5 + $0x1028] sm:$0xff] }
 0x1da   : > { %1224 = vst [vmem:[#allocation2 + $0xe30] sm:$0xff] %v1223_v6  ;;  %v1351_v6 = vld [vmem:[%s15730_s5 + $0x1030] sm:$0xff] }
 0x1db   : > { %1226 = vst [vmem:[#allocation2 + $0xe38] sm:$0xff] %v1225_v7  ;;  %v1353_v7 = vld [vmem:[%s15730_s5 + $0x1038] sm:$0xff] }
 0x1dc   : > { %1228 = vst [vmem:[#allocation2 + $0xe40] sm:$0xff] %v1227_v8  ;;  %v1355_v8 = vld [vmem:[%s15730_s5 + $0x1040] sm:$0xff] }
 0x1dd   : > { %1230 = vst [vmem:[#allocation2 + $0xe48] sm:$0xff] %v1229_v9  ;;  %v1357_v9 = vld [vmem:[%s15730_s5 + $0x1048] sm:$0xff] }
 0x1de   : > { %1232 = vst [vmem:[#allocation2 + $0xe50] sm:$0xff] %v1231_v10  ;;  %v1359_v10 = vld [vmem:[%s15730_s5 + $0x1050] sm:$0xff] }
 0x1df   : > { %1234 = vst [vmem:[#allocation2 + $0xe58] sm:$0xff] %v1233_v11  ;;  %v1361_v11 = vld [vmem:[%s15730_s5 + $0x1058] sm:$0xff] }
 0x1e0   : > { %1236 = vst [vmem:[#allocation2 + $0xe60] sm:$0xff] %v1235_v12  ;;  %v1363_v12 = vld [vmem:[%s15730_s5 + $0x1060] sm:$0xff] }
 0x1e1   : > { %1238 = vst [vmem:[#allocation2 + $0xe68] sm:$0xff] %v1237_v13  ;;  %v1365_v13 = vld [vmem:[%s15730_s5 + $0x1068] sm:$0xff] }
 0x1e2   : > { %1240 = vst [vmem:[#allocation2 + $0xe70] sm:$0xff] %v1239_v14  ;;  %v1367_v14 = vld [vmem:[%s15730_s5 + $0x1070] sm:$0xff] }
 0x1e3   : > { %1242 = vst [vmem:[#allocation2 + $0xe78] sm:$0xff] %v1241_v15  ;;  %v1369_v15 = vld [vmem:[%s15730_s5 + $0x1078] sm:$0xff] }
 0x1e4   : > { %1244 = vst [vmem:[#allocation2 + $0xe80] sm:$0xff] %v1243_v16  ;;  %v1371_v16 = vld [vmem:[%s15730_s5 + $0x1080] sm:$0xff] }
 0x1e5   : > { %1246 = vst [vmem:[#allocation2 + $0xe88] sm:$0xff] %v1245_v17  ;;  %v1373_v17 = vld [vmem:[%s15730_s5 + $0x1088] sm:$0xff] }
 0x1e6   : > { %1248 = vst [vmem:[#allocation2 + $0xe90] sm:$0xff] %v1247_v18  ;;  %v1375_v18 = vld [vmem:[%s15730_s5 + $0x1090] sm:$0xff] }
 0x1e7   : > { %1250 = vst [vmem:[#allocation2 + $0xe98] sm:$0xff] %v1249_v19  ;;  %v1377_v19 = vld [vmem:[%s15730_s5 + $0x1098] sm:$0xff] }
 0x1e8   : > { %1252 = vst [vmem:[#allocation2 + $0xea0] sm:$0xff] %v1251_v20  ;;  %v1379_v20 = vld [vmem:[%s15730_s5 + $0x10a0] sm:$0xff] }
 0x1e9   : > { %1254 = vst [vmem:[#allocation2 + $0xea8] sm:$0xff] %v1253_v21  ;;  %v1381_v21 = vld [vmem:[%s15730_s5 + $0x10a8] sm:$0xff] }
 0x1ea   : > { %1256 = vst [vmem:[#allocation2 + $0xeb0] sm:$0xff] %v1255_v22  ;;  %v1383_v22 = vld [vmem:[%s15730_s5 + $0x10b0] sm:$0xff] }
 0x1eb   : > { %1258 = vst [vmem:[#allocation2 + $0xeb8] sm:$0xff] %v1257_v23  ;;  %v1385_v23 = vld [vmem:[%s15730_s5 + $0x10b8] sm:$0xff] }
 0x1ec   : > { %1260 = vst [vmem:[#allocation2 + $0xec0] sm:$0xff] %v1259_v24  ;;  %v1387_v24 = vld [vmem:[%s15730_s5 + $0x10c0] sm:$0xff] }
 0x1ed   : > { %1262 = vst [vmem:[#allocation2 + $0xec8] sm:$0xff] %v1261_v25  ;;  %v1389_v25 = vld [vmem:[%s15730_s5 + $0x10c8] sm:$0xff] }
 0x1ee   : > { %1264 = vst [vmem:[#allocation2 + $0xed0] sm:$0xff] %v1263_v26  ;;  %v1391_v26 = vld [vmem:[%s15730_s5 + $0x10d0] sm:$0xff] }
 0x1ef   : > { %1266 = vst [vmem:[#allocation2 + $0xed8] sm:$0xff] %v1265_v27  ;;  %v1393_v27 = vld [vmem:[%s15730_s5 + $0x10d8] sm:$0xff] }
 0x1f0   : > { %1268 = vst [vmem:[#allocation2 + $0xee0] sm:$0xff] %v1267_v28  ;;  %v1395_v28 = vld [vmem:[%s15730_s5 + $0x10e0] sm:$0xff] }
 0x1f1   : > { %1270 = vst [vmem:[#allocation2 + $0xee8] sm:$0xff] %v1269_v29  ;;  %v1397_v29 = vld [vmem:[%s15730_s5 + $0x10e8] sm:$0xff] }
 0x1f2   : > { %1272 = vst [vmem:[#allocation2 + $0xef0] sm:$0xff] %v1271_v30  ;;  %v1399_v30 = vld [vmem:[%s15730_s5 + $0x10f0] sm:$0xff] }
 0x1f3   : > { %1274 = vst [vmem:[#allocation2 + $0xef8] sm:$0xff] %v1273_v31  ;;  %v1401_v31 = vld [vmem:[%s15730_s5 + $0x10f8] sm:$0xff] }
 0x1f4   : > { %1276 = vst [vmem:[#allocation2 + $0xf00] sm:$0xff] %v1275_v32  ;;  %v1403_v32 = vld [vmem:[%s15730_s5 + $0x1100] sm:$0xff] }
 0x1f5   : > { %1278 = vst [vmem:[#allocation2 + $0xf08] sm:$0xff] %v1277_v33  ;;  %v1405_v33 = vld [vmem:[%s15730_s5 + $0x1108] sm:$0xff] }
 0x1f6   : > { %1280 = vst [vmem:[#allocation2 + $0xf10] sm:$0xff] %v1279_v34  ;;  %v1407_v34 = vld [vmem:[%s15730_s5 + $0x1110] sm:$0xff] }
 0x1f7   : > { %1282 = vst [vmem:[#allocation2 + $0xf18] sm:$0xff] %v1281_v35  ;;  %v1409_v35 = vld [vmem:[%s15730_s5 + $0x1118] sm:$0xff] }
 0x1f8   : > { %1284 = vst [vmem:[#allocation2 + $0xf20] sm:$0xff] %v1283_v36  ;;  %v1411_v36 = vld [vmem:[%s15730_s5 + $0x1120] sm:$0xff] }
 0x1f9   : > { %1286 = vst [vmem:[#allocation2 + $0xf28] sm:$0xff] %v1285_v37  ;;  %v1413_v37 = vld [vmem:[%s15730_s5 + $0x1128] sm:$0xff] }
 0x1fa   : > { %1288 = vst [vmem:[#allocation2 + $0xf30] sm:$0xff] %v1287_v38  ;;  %v1415_v38 = vld [vmem:[%s15730_s5 + $0x1130] sm:$0xff] }
 0x1fb   : > { %1290 = vst [vmem:[#allocation2 + $0xf38] sm:$0xff] %v1289_v39  ;;  %v1417_v39 = vld [vmem:[%s15730_s5 + $0x1138] sm:$0xff] }
 0x1fc   : > { %1292 = vst [vmem:[#allocation2 + $0xf40] sm:$0xff] %v1291_v40  ;;  %v1419_v40 = vld [vmem:[%s15730_s5 + $0x1140] sm:$0xff] }
 0x1fd   : > { %1294 = vst [vmem:[#allocation2 + $0xf48] sm:$0xff] %v1293_v41  ;;  %v1421_v41 = vld [vmem:[%s15730_s5 + $0x1148] sm:$0xff] }
 0x1fe   : > { %1296 = vst [vmem:[#allocation2 + $0xf50] sm:$0xff] %v1295_v42  ;;  %v1423_v42 = vld [vmem:[%s15730_s5 + $0x1150] sm:$0xff] }
 0x1ff   : > { %1298 = vst [vmem:[#allocation2 + $0xf58] sm:$0xff] %v1297_v43  ;;  %v1425_v43 = vld [vmem:[%s15730_s5 + $0x1158] sm:$0xff] }
 0x200   : > { %1300 = vst [vmem:[#allocation2 + $0xf60] sm:$0xff] %v1299_v44  ;;  %v1427_v44 = vld [vmem:[%s15730_s5 + $0x1160] sm:$0xff] }
 0x201   : > { %1302 = vst [vmem:[#allocation2 + $0xf68] sm:$0xff] %v1301_v45  ;;  %v1429_v45 = vld [vmem:[%s15730_s5 + $0x1168] sm:$0xff] }
 0x202   : > { %1304 = vst [vmem:[#allocation2 + $0xf70] sm:$0xff] %v1303_v46  ;;  %v1431_v46 = vld [vmem:[%s15730_s5 + $0x1170] sm:$0xff] }
 0x203   : > { %1306 = vst [vmem:[#allocation2 + $0xf78] sm:$0xff] %v1305_v47  ;;  %v1433_v47 = vld [vmem:[%s15730_s5 + $0x1178] sm:$0xff] }
 0x204   : > { %1308 = vst [vmem:[#allocation2 + $0xf80] sm:$0xff] %v1307_v48  ;;  %v1435_v48 = vld [vmem:[%s15730_s5 + $0x1180] sm:$0xff] }
 0x205   : > { %1310 = vst [vmem:[#allocation2 + $0xf88] sm:$0xff] %v1309_v49  ;;  %v1437_v49 = vld [vmem:[%s15730_s5 + $0x1188] sm:$0xff] }
 0x206   : > { %1312 = vst [vmem:[#allocation2 + $0xf90] sm:$0xff] %v1311_v50  ;;  %v1439_v50 = vld [vmem:[%s15730_s5 + $0x1190] sm:$0xff] }
 0x207   : > { %1314 = vst [vmem:[#allocation2 + $0xf98] sm:$0xff] %v1313_v51  ;;  %v1441_v51 = vld [vmem:[%s15730_s5 + $0x1198] sm:$0xff] }
 0x208   : > { %1316 = vst [vmem:[#allocation2 + $0xfa0] sm:$0xff] %v1315_v52  ;;  %v1443_v52 = vld [vmem:[%s15730_s5 + $0x11a0] sm:$0xff] }
 0x209   : > { %1318 = vst [vmem:[#allocation2 + $0xfa8] sm:$0xff] %v1317_v53  ;;  %v1445_v53 = vld [vmem:[%s15730_s5 + $0x11a8] sm:$0xff] }
 0x20a   : > { %1320 = vst [vmem:[#allocation2 + $0xfb0] sm:$0xff] %v1319_v54  ;;  %v1447_v54 = vld [vmem:[%s15730_s5 + $0x11b0] sm:$0xff] }
 0x20b   : > { %1322 = vst [vmem:[#allocation2 + $0xfb8] sm:$0xff] %v1321_v55  ;;  %v1449_v55 = vld [vmem:[%s15730_s5 + $0x11b8] sm:$0xff] }
 0x20c   : > { %1324 = vst [vmem:[#allocation2 + $0xfc0] sm:$0xff] %v1323_v56  ;;  %v1451_v56 = vld [vmem:[%s15730_s5 + $0x11c0] sm:$0xff] }
 0x20d   : > { %1326 = vst [vmem:[#allocation2 + $0xfc8] sm:$0xff] %v1325_v57  ;;  %v1453_v57 = vld [vmem:[%s15730_s5 + $0x11c8] sm:$0xff] }
 0x20e   : > { %1328 = vst [vmem:[#allocation2 + $0xfd0] sm:$0xff] %v1327_v58  ;;  %v1455_v58 = vld [vmem:[%s15730_s5 + $0x11d0] sm:$0xff] }
 0x20f   : > { %1330 = vst [vmem:[#allocation2 + $0xfd8] sm:$0xff] %v1329_v59  ;;  %v1457_v59 = vld [vmem:[%s15730_s5 + $0x11d8] sm:$0xff] }
 0x210   : > { %1332 = vst [vmem:[#allocation2 + $0xfe0] sm:$0xff] %v1331_v60  ;;  %v1459_v60 = vld [vmem:[%s15730_s5 + $0x11e0] sm:$0xff] }
 0x211   : > { %1334 = vst [vmem:[#allocation2 + $0xfe8] sm:$0xff] %v1333_v61  ;;  %v1461_v61 = vld [vmem:[%s15730_s5 + $0x11e8] sm:$0xff] }
 0x212   : > { %1336 = vst [vmem:[#allocation2 + $0xff0] sm:$0xff] %v1335_v62  ;;  %v1463_v62 = vld [vmem:[%s15730_s5 + $0x11f0] sm:$0xff] }
 0x213   : > { %1338 = vst [vmem:[#allocation2 + $0xff8] sm:$0xff] %v1337_v63  ;;  %v1465_v63 = vld [vmem:[%s15730_s5 + $0x11f8] sm:$0xff] }
 0x214   : > { %1340 = vst [vmem:[#allocation2 + $0x1000] sm:$0xff] %v1339_v0  ;;  %v1467_v0 = vld [vmem:[%s15730_s5 + $0x1200] sm:$0xff] }
 0x215   : > { %1342 = vst [vmem:[#allocation2 + $0x1008] sm:$0xff] %v1341_v1  ;;  %v1469_v1 = vld [vmem:[%s15730_s5 + $0x1208] sm:$0xff] }
 0x216   : > { %1344 = vst [vmem:[#allocation2 + $0x1010] sm:$0xff] %v1343_v2  ;;  %v1471_v2 = vld [vmem:[%s15730_s5 + $0x1210] sm:$0xff] }
 0x217   : > { %1346 = vst [vmem:[#allocation2 + $0x1018] sm:$0xff] %v1345_v3  ;;  %v1473_v3 = vld [vmem:[%s15730_s5 + $0x1218] sm:$0xff] }
 0x218   : > { %1348 = vst [vmem:[#allocation2 + $0x1020] sm:$0xff] %v1347_v4  ;;  %v1475_v4 = vld [vmem:[%s15730_s5 + $0x1220] sm:$0xff] }
 0x219   : > { %1350 = vst [vmem:[#allocation2 + $0x1028] sm:$0xff] %v1349_v5  ;;  %v1477_v5 = vld [vmem:[%s15730_s5 + $0x1228] sm:$0xff] }
 0x21a   : > { %1352 = vst [vmem:[#allocation2 + $0x1030] sm:$0xff] %v1351_v6  ;;  %v1479_v6 = vld [vmem:[%s15730_s5 + $0x1230] sm:$0xff] }
 0x21b   : > { %1354 = vst [vmem:[#allocation2 + $0x1038] sm:$0xff] %v1353_v7  ;;  %v1481_v7 = vld [vmem:[%s15730_s5 + $0x1238] sm:$0xff] }
 0x21c   : > { %1356 = vst [vmem:[#allocation2 + $0x1040] sm:$0xff] %v1355_v8  ;;  %v1493_v8 = vld [vmem:[%s12463_s16 + $0x20] sm:$0xff] }
 0x21d   : > { %1358 = vst [vmem:[#allocation2 + $0x1048] sm:$0xff] %v1357_v9  ;;  %v1491_v9 = vld [vmem:[%s12463_s16 + $0x10] sm:$0xff] }
 0x21e   : > { %1360 = vst [vmem:[#allocation2 + $0x1050] sm:$0xff] %v1359_v10  ;;  %v1489_v10 = vld [vmem:[%s12463_s16] sm:$0xff] }
 0x21f   : > { %1362 = vst [vmem:[#allocation2 + $0x1058] sm:$0xff] %v1361_v11  ;;  %v12333_v11 = vmov 0  }
 0x220   : > { %1364 = vst [vmem:[#allocation2 + $0x1060] sm:$0xff] %v1363_v12  ;;  %12132 = vset.pattern.permute.xlu2 %v12333_v11  ;;  %12131 = vset.pattern.permute.xlu1 %v12333_v11  ;;  %v1494_v12 = vld [vmem:[%s12463_s16 + $0x28] sm:$0xff] }
 0x221   : > { %1366 = vst [vmem:[#allocation2 + $0x1068] sm:$0xff] %v1365_v13  ;;  %12130 = vset.pattern.permute.xlu0 %v12333_v11  ;;  %1549 = vperm.xlu2 %12132, %v1493_v8  }
 0x222   : > { %1368 = vst [vmem:[#allocation2 + $0x1070] sm:$0xff] %v1367_v14  ;;  %1539 = vperm.xlu1 %12131, %v1491_v9   ;;  %1529 = vperm.xlu0 %12130, %v1489_v10  }
 0x223   : > { %1370 = vst [vmem:[#allocation2 + $0x1078] sm:$0xff] %v1369_v15 }
 0x224   : > { %1372 = vst [vmem:[#allocation2 + $0x1080] sm:$0xff] %v1371_v16 }
 0x225   : > { %1374 = vst [vmem:[#allocation2 + $0x1088] sm:$0xff] %v1373_v17 }
 0x226   : > { %1376 = vst [vmem:[#allocation2 + $0x1090] sm:$0xff] %v1375_v18 }
 0x227   : > { %1378 = vst [vmem:[#allocation2 + $0x1098] sm:$0xff] %v1377_v19 }
 0x228   : > { %1380 = vst [vmem:[#allocation2 + $0x10a0] sm:$0xff] %v1379_v20 }
 0x229   : > { %1382 = vst [vmem:[#allocation2 + $0x10a8] sm:$0xff] %v1381_v21 }
 0x22a   : > { %1384 = vst [vmem:[#allocation2 + $0x10b0] sm:$0xff] %v1383_v22 }
 0x22b   : > { %1386 = vst [vmem:[#allocation2 + $0x10b8] sm:$0xff] %v1385_v23 }
 0x22c   : > { %1388 = vst [vmem:[#allocation2 + $0x10c0] sm:$0xff] %v1387_v24 }
 0x22d   : > { %1390 = vst [vmem:[#allocation2 + $0x10c8] sm:$0xff] %v1389_v25 }
 0x22e   : > { %1392 = vst [vmem:[#allocation2 + $0x10d0] sm:$0xff] %v1391_v26 }
 0x22f   : > { %1394 = vst [vmem:[#allocation2 + $0x10d8] sm:$0xff] %v1393_v27 }
 0x230   : > { %1396 = vst [vmem:[#allocation2 + $0x10e0] sm:$0xff] %v1395_v28 }
 0x231   : > { %1398 = vst [vmem:[#allocation2 + $0x10e8] sm:$0xff] %v1397_v29 }
 0x232   : > { %1400 = vst [vmem:[#allocation2 + $0x10f0] sm:$0xff] %v1399_v30 }
 0x233   : > { %1402 = vst [vmem:[#allocation2 + $0x10f8] sm:$0xff] %v1401_v31 }
 0x234   : > { %1404 = vst [vmem:[#allocation2 + $0x1100] sm:$0xff] %v1403_v32 }
 0x235   : > { %1406 = vst [vmem:[#allocation2 + $0x1108] sm:$0xff] %v1405_v33 }
 0x236   : > { %1408 = vst [vmem:[#allocation2 + $0x1110] sm:$0xff] %v1407_v34 }
 0x237   : > { %1410 = vst [vmem:[#allocation2 + $0x1118] sm:$0xff] %v1409_v35 }
 0x238   : > { %1412 = vst [vmem:[#allocation2 + $0x1120] sm:$0xff] %v1411_v36 }
 0x239   : > { %1414 = vst [vmem:[#allocation2 + $0x1128] sm:$0xff] %v1413_v37 }
 0x23a   : > { %1416 = vst [vmem:[#allocation2 + $0x1130] sm:$0xff] %v1415_v38 }
 0x23b   : > { %1418 = vst [vmem:[#allocation2 + $0x1138] sm:$0xff] %v1417_v39 }
 0x23c   : > { %1420 = vst [vmem:[#allocation2 + $0x1140] sm:$0xff] %v1419_v40 }
 0x23d   : > { %1422 = vst [vmem:[#allocation2 + $0x1148] sm:$0xff] %v1421_v41 }
 0x23e   : > { %1424 = vst [vmem:[#allocation2 + $0x1150] sm:$0xff] %v1423_v42 }
 0x23f   : > { %1426 = vst [vmem:[#allocation2 + $0x1158] sm:$0xff] %v1425_v43 }
 0x240   : > { %1428 = vst [vmem:[#allocation2 + $0x1160] sm:$0xff] %v1427_v44 }
 0x241   : > { %1430 = vst [vmem:[#allocation2 + $0x1168] sm:$0xff] %v1429_v45 }
 0x242   : > { %1432 = vst [vmem:[#allocation2 + $0x1170] sm:$0xff] %v1431_v46 }
 0x243   : > { %1434 = vst [vmem:[#allocation2 + $0x1178] sm:$0xff] %v1433_v47 }
 0x244   : > { %1436 = vst [vmem:[#allocation2 + $0x1180] sm:$0xff] %v1435_v48 }
 0x245   : > { %1438 = vst [vmem:[#allocation2 + $0x1188] sm:$0xff] %v1437_v49 }
 0x246   : > { %1440 = vst [vmem:[#allocation2 + $0x1190] sm:$0xff] %v1439_v50 }
 0x247   : > { %1442 = vst [vmem:[#allocation2 + $0x1198] sm:$0xff] %v1441_v51 }
 0x248   : > { %1444 = vst [vmem:[#allocation2 + $0x11a0] sm:$0xff] %v1443_v52 }
 0x249   : > { %1446 = vst [vmem:[#allocation2 + $0x11a8] sm:$0xff] %v1445_v53 }
 0x24a   : > { %1448 = vst [vmem:[#allocation2 + $0x11b0] sm:$0xff] %v1447_v54 }
 0x24b   : > { %1450 = vst [vmem:[#allocation2 + $0x11b8] sm:$0xff] %v1449_v55 }
 0x24c   : > { %1452 = vst [vmem:[#allocation2 + $0x11c0] sm:$0xff] %v1451_v56 }
 0x24d   : > { %1454 = vst [vmem:[#allocation2 + $0x11c8] sm:$0xff] %v1453_v57 }
 0x24e   : > { %1456 = vst [vmem:[#allocation2 + $0x11d0] sm:$0xff] %v1455_v58 }
 0x24f   : > { %1458 = vst [vmem:[#allocation2 + $0x11d8] sm:$0xff] %v1457_v59 }
 0x250   : > { %1460 = vst [vmem:[#allocation2 + $0x11e0] sm:$0xff] %v1459_v60 }
 0x251   : > { %1462 = vst [vmem:[#allocation2 + $0x11e8] sm:$0xff] %v1461_v61 }
 0x252   : > { %1464 = vst [vmem:[#allocation2 + $0x11f0] sm:$0xff] %v1463_v62 }
 0x253   : > { %1466 = vst [vmem:[#allocation2 + $0x11f8] sm:$0xff] %v1465_v63 }
 0x254   : > { %1468 = vst [vmem:[#allocation2 + $0x1200] sm:$0xff] %v1467_v0 }
 0x255   : > { %1470 = vst [vmem:[#allocation2 + $0x1208] sm:$0xff] %v1469_v1 }
 0x256   : > { %1472 = vst [vmem:[#allocation2 + $0x1210] sm:$0xff] %v1471_v2 }
 0x257   : > { %1474 = vst [vmem:[#allocation2 + $0x1218] sm:$0xff] %v1473_v3 }
 0x258   : > { %1476 = vst [vmem:[#allocation2 + $0x1220] sm:$0xff] %v1475_v4 }
 0x259   : > { %1478 = vst [vmem:[#allocation2 + $0x1228] sm:$0xff] %v1477_v5 }
 0x25a   : > { %1480 = vst [vmem:[#allocation2 + $0x1230] sm:$0xff] %v1479_v6 }
 0x25b   : > { %1482 = vst [vmem:[#allocation2 + $0x1238] sm:$0xff] %v1481_v7 }
 0x25c   : > { %1488 = vsyncadd [#allocation7], 74752  ;;  %v1492_v13 = vld [vmem:[%s12463_s16 + $0x18] sm:$0xff]  ;;  %v1490_v14 = vld [vmem:[%s12463_s16 + $0x8] sm:$0xff]  ;;  %1554 = vperm.xlu2 %12132, %v1494_v12   ;;  %vm3847_vm0 = vcmask 523264   ;;  %s12334_s22 = smov 64  }
 0x25d   : > { %1544 = vperm.xlu1 %12131, %v1492_v13   ;;  %1534 = vperm.xlu0 %12130, %v1490_v14   ;;  %v1497_v15 = vld [vmem:[%s12463_s16 + $0x40] sm:$0xff]  ;;  %v1496_v16 = vld [vmem:[%s12463_s16 + $0x38] sm:$0xff]  ;;  %v1495_v17 = vld [vmem:[%s12463_s16 + $0x30] sm:$0xff]  ;;  %vm3866_vm2 = vcmask 517120  }
 0x25e   : > { %v1500_v18 = vld [vmem:[%s12463_s16 + $0x58] sm:$0xff]  ;;  %v1499_v19 = vld [vmem:[%s12463_s16 + $0x50] sm:$0xff]  ;;  %v1498_v20 = vld [vmem:[%s12463_s16 + $0x48] sm:$0xff] }
 0x25f   : > { %v1503_v21 = vld [vmem:[%s12463_s16 + $0x70] sm:$0xff]  ;;  %v1502_v22 = vld [vmem:[%s12463_s16 + $0x68] sm:$0xff]  ;;  %v1501_v23 = vld [vmem:[%s12463_s16 + $0x60] sm:$0xff] }
 0x260   : > { %v1506_v24 = vld [vmem:[%s12463_s16 + $0x88] sm:$0xff]  ;;  %v1505_v25 = vld [vmem:[%s12463_s16 + $0x80] sm:$0xff]  ;;  %v1504_v26 = vld [vmem:[%s12463_s16 + $0x78] sm:$0xff] }
 0x261   : > { %v1509_v27 = vld [vmem:[%s12463_s16 + $0xa0] sm:$0xff]  ;;  %v1508_v28 = vld [vmem:[%s12463_s16 + $0x98] sm:$0xff]  ;;  %v1507_v29 = vld [vmem:[%s12463_s16 + $0x90] sm:$0xff] }
 0x262   : > { %v1512_v30 = vld [vmem:[%s12463_s16 + $0xb8] sm:$0xff]  ;;  %v1511_v31 = vld [vmem:[%s12463_s16 + $0xb0] sm:$0xff]  ;;  %v1510_v32 = vld [vmem:[%s12463_s16 + $0xa8] sm:$0xff] }
 0x263   : > { %v1515_v33 = vld [vmem:[%s12463_s16 + $0xd0] sm:$0xff]  ;;  %v1514_v34 = vld [vmem:[%s12463_s16 + $0xc8] sm:$0xff]  ;;  %v1513_v35 = vld [vmem:[%s12463_s16 + $0xc0] sm:$0xff] }
 0x264   : > { %1569 = vperm.xlu2 %12132, %v1497_v15   ;;  %v1518_v36 = vld [vmem:[%s12463_s16 + $0xe8] sm:$0xff]  ;;  %v1517_v37 = vld [vmem:[%s12463_s16 + $0xe0] sm:$0xff]  ;;  %v1516_v38 = vld [vmem:[%s12463_s16 + $0xd8] sm:$0xff] }
 0x265   : > { %1564 = vperm.xlu1 %12131, %v1496_v16   ;;  %1559 = vperm.xlu0 %12130, %v1495_v17   ;;  %v1521_v39 = vld [vmem:[%s12463_s16 + $0x100] sm:$0xff]  ;;  %v1520_v40 = vld [vmem:[%s12463_s16 + $0xf8] sm:$0xff]  ;;  %v1519_v41 = vld [vmem:[%s12463_s16 + $0xf0] sm:$0xff] }
 0x266   : > { %v1524_v42 = vld [vmem:[%s12463_s16 + $0x118] sm:$0xff]  ;;  %v1523_v43 = vld [vmem:[%s12463_s16 + $0x110] sm:$0xff]  ;;  %v1522_v44 = vld [vmem:[%s12463_s16 + $0x108] sm:$0xff] }
 0x267   : > { %v1751_v46 = vld [vmem:[%s12463_s16 + $0x9] sm:$0xff]  ;;  %v1750_v47 = vld [vmem:[%s12463_s16 + $0x1] sm:$0xff]  ;;  %v1753_v51 = vld [vmem:[%s12463_s16 + $0x19] sm:$0xff] }
 0x268   : > { %v1525_v48 = vld [vmem:[%s12463_s16 + $0x120] sm:$0xff]  ;;  %v1752_v52 = vld [vmem:[%s12463_s16 + $0x11] sm:$0xff]  ;;  %v1755_v56 = vld [vmem:[%s12463_s16 + $0x29] sm:$0xff] }
 0x269   : > { %v1754_v50 = vld [vmem:[%s12463_s16 + $0x21] sm:$0xff]  ;;  %v1757_v54 = vld [vmem:[%s12463_s16 + $0x39] sm:$0xff]  ;;  %v1756_v55 = vld [vmem:[%s12463_s16 + $0x31] sm:$0xff] }
 0x26a   : > { %v1760_v60 = vld [vmem:[%s12463_s16 + $0x51] sm:$0xff]  ;;  %v1759_v61 = vld [vmem:[%s12463_s16 + $0x49] sm:$0xff]  ;;  %v1758_v62 = vld [vmem:[%s12463_s16 + $0x41] sm:$0xff] }
 0x26b   : > { %v1763_v2 = vld [vmem:[%s12463_s16 + $0x69] sm:$0xff]  ;;  %v1762_v3 = vld [vmem:[%s12463_s16 + $0x61] sm:$0xff]  ;;  %v1761_v4 = vld [vmem:[%s12463_s16 + $0x59] sm:$0xff] }
 0x26c   : > { %1584 = vperm.xlu2 %12132, %v1500_v18   ;;  %v1766_v8 = vld [vmem:[%s12463_s16 + $0x81] sm:$0xff]  ;;  %v1765_v9 = vld [vmem:[%s12463_s16 + $0x79] sm:$0xff]  ;;  %v1764_v10 = vld [vmem:[%s12463_s16 + $0x71] sm:$0xff] }
 0x26d   : > { %1579 = vperm.xlu1 %12131, %v1499_v19   ;;  %1574 = vperm.xlu0 %12130, %v1498_v20   ;;  %v1769_v14 = vld [vmem:[%s12463_s16 + $0x99] sm:$0xff]  ;;  %v1768_v15 = vld [vmem:[%s12463_s16 + $0x91] sm:$0xff]  ;;  %v1767_v16 = vld [vmem:[%s12463_s16 + $0x89] sm:$0xff] }
 0x26e   : > { %v1772_v20 = vld [vmem:[%s12463_s16 + $0xb1] sm:$0xff] }
 0x274   : > { %1599 = vperm.xlu2 %12132, %v1503_v21   ;;  %v1771_v21 = vld [vmem:[%s12463_s16 + $0xa9] sm:$0xff] }
 0x275   : > { %1594 = vperm.xlu1 %12131, %v1502_v22   ;;  %1589 = vperm.xlu0 %12130, %v1501_v23   ;;  %v1770_v22 = vld [vmem:[%s12463_s16 + $0xa1] sm:$0xff] }
 0x27b   : > { %v14233_v45 = vpop.permute.xlu2 %1549 }
 0x27c   : > { %1614 = vperm.xlu2 %12132, %v1506_v24  }
 0x27d   : > { %1609 = vperm.xlu1 %12131, %v1505_v25   ;;  %1604 = vperm.xlu0 %12130, %v1504_v26   ;;  %v1775_v26 = vld [vmem:[%s12463_s16 + $0xc9] sm:$0xff] }
 0x284   : > { %1629 = vperm.xlu2 %12132, %v1509_v27   ;;  %v1774_v27 = vld [vmem:[%s12463_s16 + $0xc1] sm:$0xff] }
 0x285   : > { %1624 = vperm.xlu1 %12131, %v1508_v28   ;;  %1619 = vperm.xlu0 %12130, %v1507_v29   ;;  %v1773_v28 = vld [vmem:[%s12463_s16 + $0xb9] sm:$0xff] }
 0x28c   : > { %1644 = vperm.xlu2 %12132, %v1512_v30  }
 0x28d   : > { %1639 = vperm.xlu1 %12131, %v1511_v31   ;;  %1634 = vperm.xlu0 %12130, %v1510_v32   ;;  %v1778_v32 = vld [vmem:[%s12463_s16 + $0xe1] sm:$0xff] }
 0x294   : > { %1659 = vperm.xlu2 %12132, %v1515_v33   ;;  %v14250_v58 = vpop.permute.xlu1 %1539  ;;  %v14252_v59 = vpop.permute.xlu0 %1529  ;;  %v1777_v33 = vld [vmem:[%s12463_s16 + $0xd9] sm:$0xff] }
 0x295   : > { %1654 = vperm.xlu1 %12131, %v1514_v34   ;;  %1649 = vperm.xlu0 %12130, %v1513_v35   ;;  %v1776_v34 = vld [vmem:[%s12463_s16 + $0xd1] sm:$0xff] }
 0x29c   : > { %1674 = vperm.xlu2 %12132, %v1518_v36  }
 0x29d   : > { %1669 = vperm.xlu1 %12131, %v1517_v37   ;;  %1664 = vperm.xlu0 %12130, %v1516_v38   ;;  %v1781_v38 = vld [vmem:[%s12463_s16 + $0xf9] sm:$0xff] }
 0x2a4   : > { %1689 = vperm.xlu2 %12132, %v1521_v39   ;;  %v1780_v39 = vld [vmem:[%s12463_s16 + $0xf1] sm:$0xff] }
 0x2a5   : > { %1684 = vperm.xlu1 %12131, %v1520_v40   ;;  %1679 = vperm.xlu0 %12130, %v1519_v41   ;;  %v1779_v40 = vld [vmem:[%s12463_s16 + $0xe9] sm:$0xff] }
 0x2ac   : > { %1704 = vperm.xlu2 %12132, %v1524_v42  }
 0x2ad   : > { %1699 = vperm.xlu1 %12131, %v1523_v43   ;;  %1694 = vperm.xlu0 %12130, %v1522_v44   ;;  %v1784_v44 = vld [vmem:[%s12463_s16 + $0x111] sm:$0xff] }
 0x2b4   : > { %1795 = vperm.xlu2 %12132, %v1751_v46   ;;  %v1783_v46 = vld [vmem:[%s12463_s16 + $0x109] sm:$0xff] }
 0x2b5   : > { %1790 = vperm.xlu1 %12131, %v1750_v47   ;;  %1709 = vperm.xlu0 %12130, %v1525_v48   ;;  %v1782_v47 = vld [vmem:[%s12463_s16 + $0x101] sm:$0xff] }
 0x2b6   : > { %v14238_v49 = vpop.permute.xlu2 %1554 }
 0x2bc   : > { %1810 = vperm.xlu2 %12132, %v1754_v50  }
 0x2bd   : > { %1805 = vperm.xlu1 %12131, %v1753_v51   ;;  %1800 = vperm.xlu0 %12130, %v1752_v52   ;;  %v2048_v52 = vld [vmem:[%s12463_s16 + $0x2] sm:$0xff] }
 0x2be   : > { %v14243_v53 = vpop.permute.xlu2 %1569 }
 0x2c4   : > { %1825 = vperm.xlu2 %12132, %v1757_v54   ;;  %v1786_v54 = vld [vmem:[%s12463_s16 + $0x121] sm:$0xff] }
 0x2c5   : > { %1820 = vperm.xlu1 %12131, %v1756_v55   ;;  %1815 = vperm.xlu0 %12130, %v1755_v56   ;;  %v1785_v55 = vld [vmem:[%s12463_s16 + $0x119] sm:$0xff] }
 0x2c6   : > { %v14248_v57 = vpop.permute.xlu2 %1584 }
 0x2cc   : > { %1840 = vperm.xlu2 %12132, %v1760_v60  }
 0x2cd   : > { %1835 = vperm.xlu1 %12131, %v1759_v61   ;;  %1830 = vperm.xlu0 %12130, %v1758_v62   ;;  %v2051_v62 = vld [vmem:[%s12463_s16 + $0x1a] sm:$0xff] }
 0x2ce   : > { %v14257_v63 = vpop.permute.xlu2 %1599 }
 0x2cf   : > { %v14259_v0 = vpop.permute.xlu1 %1544  ;;  %v14261_v1 = vpop.permute.xlu0 %1534 }
 0x2d4   : > { %1855 = vperm.xlu2 %12132, %v1763_v2   ;;  %v2050_v2 = vld [vmem:[%s12463_s16 + $0x12] sm:$0xff] }
 0x2d5   : > { %1850 = vperm.xlu1 %12131, %v1762_v3   ;;  %1845 = vperm.xlu0 %12130, %v1761_v4   ;;  %v2049_v3 = vld [vmem:[%s12463_s16 + $0xa] sm:$0xff] }
 0x2d6   : > { %v14266_v5 = vpop.permute.xlu2 %1614 }
 0x2d7   : > { %v14268_v6 = vpop.permute.xlu1 %1564  ;;  %v14270_v7 = vpop.permute.xlu0 %1559 }
 0x2dc   : > { %1870 = vperm.xlu2 %12132, %v1766_v8  }
 0x2dd   : > { %1865 = vperm.xlu1 %12131, %v1765_v9   ;;  %1860 = vperm.xlu0 %12130, %v1764_v10   ;;  %v2054_v10 = vld [vmem:[%s12463_s16 + $0x32] sm:$0xff] }
 0x2de   : > { %v14275_v11 = vpop.permute.xlu2 %1629 }
 0x2df   : > { %v14277_v12 = vpop.permute.xlu1 %1579  ;;  %v14279_v13 = vpop.permute.xlu0 %1574 }
 0x2e4   : > { %1885 = vperm.xlu2 %12132, %v1769_v14   ;;  %v2053_v14 = vld [vmem:[%s12463_s16 + $0x2a] sm:$0xff] }
 0x2e5   : > { %1880 = vperm.xlu1 %12131, %v1768_v15   ;;  %1875 = vperm.xlu0 %12130, %v1767_v16   ;;  %v2052_v15 = vld [vmem:[%s12463_s16 + $0x22] sm:$0xff] }
 0x2e6   : > { %v14284_v17 = vpop.permute.xlu2 %1644 }
 0x2e7   : > { %15739 = vst [vmem:[#allocation13_spill] sm:$0xff] %v14284_v17  ;;  %v14286_v18 = vpop.permute.xlu1 %1594  ;;  %v14288_v19 = vpop.permute.xlu0 %1589 }
 0x2ec   : > { %1900 = vperm.xlu2 %12132, %v1772_v20  }
 0x2ed   : > { %1895 = vperm.xlu1 %12131, %v1771_v21   ;;  %1890 = vperm.xlu0 %12130, %v1770_v22   ;;  %v2057_v22 = vld [vmem:[%s12463_s16 + $0x4a] sm:$0xff] }
 0x2ee   : > { %v14293_v23 = vpop.permute.xlu2 %1659 }
 0x2ef   : > { %15740 = vst [vmem:[#allocation14_spill] sm:$0xff] %v14293_v23  ;;  %v14295_v24 = vpop.permute.xlu1 %1609  ;;  %v14297_v25 = vpop.permute.xlu0 %1604  ;;  %v2651_v23 = vld [vmem:[%s12463_s16 + $0x3c] sm:$0xff] }
 0x2f4   : > { %1915 = vperm.xlu2 %12132, %v1775_v26   ;;  %v2056_v26 = vld [vmem:[%s12463_s16 + $0x42] sm:$0xff] }
 0x2f5   : > { %1910 = vperm.xlu1 %12131, %v1774_v27   ;;  %1905 = vperm.xlu0 %12130, %v1773_v28   ;;  %v2055_v27 = vld [vmem:[%s12463_s16 + $0x3a] sm:$0xff] }
 0x2f6   : > { %v14302_v29 = vpop.permute.xlu2 %1674 }
 0x2f7   : > { %15741 = vst [vmem:[#allocation15_spill] sm:$0xff] %v14302_v29  ;;  %v14304_v30 = vpop.permute.xlu1 %1624  ;;  %v14306_v31 = vpop.permute.xlu0 %1619  ;;  %v2353_v29 = vld [vmem:[%s12463_s16 + $0x3b] sm:$0xff] }
 0x2fc   : > { %1930 = vperm.xlu2 %12132, %v1778_v32  }
 0x2fd   : > { %1925 = vperm.xlu1 %12131, %v1777_v33   ;;  %1920 = vperm.xlu0 %12130, %v1776_v34   ;;  %v2060_v34 = vld [vmem:[%s12463_s16 + $0x62] sm:$0xff] }
 0x2fe   : > { %v14311_v35 = vpop.permute.xlu2 %1689 }
 0x2ff   : > { %15742 = vst [vmem:[#allocation16_spill] sm:$0xff] %v14311_v35  ;;  %v14313_v36 = vpop.permute.xlu1 %1639  ;;  %v14315_v37 = vpop.permute.xlu0 %1634  ;;  %v2645_v35 = vld [vmem:[%s12463_s16 + $0xc] sm:$0xff] }
 0x300   : > { %15743 = vst [vmem:[#allocation17_spill] sm:$0xff] %v14313_v36  ;;  %v2360_v36 = vld [vmem:[%s12463_s16 + $0x73] sm:$0xff] }
 0x304   : > { %1945 = vperm.xlu2 %12132, %v1781_v38   ;;  %v2059_v38 = vld [vmem:[%s12463_s16 + $0x5a] sm:$0xff] }
 0x305   : > { %1940 = vperm.xlu1 %12131, %v1780_v39   ;;  %1935 = vperm.xlu0 %12130, %v1779_v40   ;;  %v2058_v39 = vld [vmem:[%s12463_s16 + $0x52] sm:$0xff] }
 0x306   : > { %v14320_v41 = vpop.permute.xlu2 %1704 }
 0x307   : > { %15744 = vst [vmem:[#allocation18_spill] sm:$0xff] %v14320_v41  ;;  %v14322_v42 = vpop.permute.xlu1 %1654  ;;  %v14324_v43 = vpop.permute.xlu0 %1649  ;;  %v2349_v41 = vld [vmem:[%s12463_s16 + $0x1b] sm:$0xff] }
 0x308   : > { %15745 = vst [vmem:[#allocation19_spill] sm:$0xff] %v14322_v42 }
 0x309   : > { %15746 = vst [vmem:[#allocation20_spill] sm:$0xff] %v14324_v43 }
 0x30c   : > { %1960 = vperm.xlu2 %12132, %v1784_v44  }
 0x30d   : > { %1955 = vperm.xlu1 %12131, %v1783_v46   ;;  %1950 = vperm.xlu0 %12130, %v1782_v47   ;;  %v2063_v47 = vld [vmem:[%s12463_s16 + $0x7a] sm:$0xff] }
 0x30e   : > { %v14329_v48 = vpop.permute.xlu2 %1795 }
 0x30f   : > { %v14331_v50 = vpop.permute.xlu1 %1669  ;;  %v14333_v51 = vpop.permute.xlu0 %1664 }
 0x310   : > { %15747 = vst [vmem:[#allocation21_spill] sm:$0xff] %v14331_v50  ;;  %v2352_v50 = vld [vmem:[%s12463_s16 + $0x33] sm:$0xff] }
 0x311   : > { %15748 = vst [vmem:[#allocation22_spill] sm:$0xff] %v14333_v51  ;;  %v2355_v51 = vld [vmem:[%s12463_s16 + $0x4b] sm:$0xff] }
 0x314   : > { %2088 = vperm.xlu2 %12132, %v2048_v52   ;;  %v2062_v52 = vld [vmem:[%s12463_s16 + $0x72] sm:$0xff] }
 0x315   : > { %1970 = vperm.xlu1 %12131, %v1786_v54   ;;  %1965 = vperm.xlu0 %12130, %v1785_v55   ;;  %v2061_v54 = vld [vmem:[%s12463_s16 + $0x6a] sm:$0xff] }
 0x316   : > { %v14338_v56 = vpop.permute.xlu2 %1810 }
 0x317   : > { %v14340_v60 = vpop.permute.xlu1 %1684  ;;  %v14342_v61 = vpop.permute.xlu0 %1679 }
 0x318   : > { %15749 = vst [vmem:[#allocation23_spill] sm:$0xff] %v14340_v60  ;;  %v2648_v60 = vld [vmem:[%s12463_s16 + $0x24] sm:$0xff] }
 0x319   : > { %15750 = vst [vmem:[#allocation24_spill] sm:$0xff] %v14342_v61  ;;  %v2644_v61 = vld [vmem:[%s12463_s16 + $0x4] sm:$0xff] }
 0x31c   : > { %2103 = vperm.xlu2 %12132, %v2051_v62  }
 0x31d   : > { %2098 = vperm.xlu1 %12131, %v2050_v2   ;;  %2093 = vperm.xlu0 %12130, %v2049_v3   ;;  %v2066_v3 = vld [vmem:[%s12463_s16 + $0x92] sm:$0xff] }
 0x31e   : > { %v14347_v4 = vpop.permute.xlu2 %1825 }
 0x31f   : > { %v14349_v8 = vpop.permute.xlu1 %1699  ;;  %v14351_v9 = vpop.permute.xlu0 %1694 }
 0x320   : > { %15751 = vst [vmem:[#allocation25_spill] sm:$0xff] %v14349_v8  ;;  %v2649_v8 = vld [vmem:[%s12463_s16 + $0x2c] sm:$0xff] }
 0x321   : > { %15752 = vst [vmem:[#allocation26_spill] sm:$0xff] %v14351_v9  ;;  %v2646_v9 = vld [vmem:[%s12463_s16 + $0x14] sm:$0xff] }
 0x324   : > { %2118 = vperm.xlu2 %12132, %v2054_v10   ;;  %v2065_v10 = vld [vmem:[%s12463_s16 + $0x8a] sm:$0xff] }
 0x325   : > { %2113 = vperm.xlu1 %12131, %v2053_v14   ;;  %2108 = vperm.xlu0 %12130, %v2052_v15   ;;  %v2064_v14 = vld [vmem:[%s12463_s16 + $0x82] sm:$0xff] }
 0x326   : > { %v14356_v16 = vpop.permute.xlu2 %1840 }
 0x327   : > { %v14358_v20 = vpop.permute.xlu1 %1790  ;;  %v14360_v21 = vpop.permute.xlu0 %1709 }
 0x328   : > { %15753 = vst [vmem:[#allocation27_spill] sm:$0xff] %v14360_v21  ;;  %v2350_v21 = vld [vmem:[%s12463_s16 + $0x23] sm:$0xff] }
 0x32c   : > { %2133 = vperm.xlu2 %12132, %v2057_v22  }
 0x32d   : > { %2128 = vperm.xlu1 %12131, %v2056_v26   ;;  %2123 = vperm.xlu0 %12130, %v2055_v27   ;;  %v2069_v27 = vld [vmem:[%s12463_s16 + $0xaa] sm:$0xff] }
 0x32e   : > { %v14365_v28 = vpop.permute.xlu2 %1855 }
 0x32f   : > { %v14367_v32 = vpop.permute.xlu1 %1805  ;;  %v14369_v33 = vpop.permute.xlu0 %1800 }
 0x334   : > { %2148 = vperm.xlu2 %12132, %v2060_v34   ;;  %v2068_v34 = vld [vmem:[%s12463_s16 + $0xa2] sm:$0xff] }
 0x335   : > { %2143 = vperm.xlu1 %12131, %v2059_v38   ;;  %2138 = vperm.xlu0 %12130, %v2058_v39   ;;  %v2067_v38 = vld [vmem:[%s12463_s16 + $0x9a] sm:$0xff] }
 0x336   : > { %v14374_v40 = vpop.permute.xlu2 %1870 }
 0x337   : > { %v14376_v44 = vpop.permute.xlu1 %1820  ;;  %v14378_v46 = vpop.permute.xlu0 %1815 }
 0x33c   : > { %2163 = vperm.xlu2 %12132, %v2063_v47  }
 0x33d   : > { %2158 = vperm.xlu1 %12131, %v2062_v52   ;;  %2153 = vperm.xlu0 %12130, %v2061_v54   ;;  %v2348_v54 = vld [vmem:[%s12463_s16 + $0x13] sm:$0xff] }
 0x33e   : > { %v14383_v55 = vpop.permute.xlu2 %1885 }
 0x33f   : > { %v14385_v62 = vpop.permute.xlu1 %1835  ;;  %v14387_v2 = vpop.permute.xlu0 %1830 }
 0x344   : > { %2178 = vperm.xlu2 %12132, %v2066_v3   ;;  %v2347_v3 = vld [vmem:[%s12463_s16 + $0xb] sm:$0xff] }
 0x345   : > { %2173 = vperm.xlu1 %12131, %v2065_v10   ;;  %2168 = vperm.xlu0 %12130, %v2064_v14   ;;  %v2346_v10 = vld [vmem:[%s12463_s16 + $0x3] sm:$0xff] }
 0x346   : > { %v14392_v15 = vpop.permute.xlu2 %1900 }
 0x347   : > { %15754 = vst [vmem:[#allocation28_spill] sm:$0xff] %v14392_v15  ;;  %v14394_v22 = vpop.permute.xlu1 %1850  ;;  %v14396_v26 = vpop.permute.xlu0 %1845  ;;  %v2657_v15 = vld [vmem:[%s12463_s16 + $0x6c] sm:$0xff] }
 0x34c   : > { %2193 = vperm.xlu2 %12132, %v2069_v27  }
 0x34d   : > { %2188 = vperm.xlu1 %12131, %v2068_v34   ;;  %2183 = vperm.xlu0 %12130, %v2067_v38   ;;  %v2351_v38 = vld [vmem:[%s12463_s16 + $0x2b] sm:$0xff] }
 0x34e   : > { %v14401_v39 = vpop.permute.xlu2 %1915 }
 0x34f   : > { %15755 = vst [vmem:[#allocation29_spill] sm:$0xff] %v14401_v39  ;;  %v14403_v47 = vpop.permute.xlu1 %1865  ;;  %v14405_v52 = vpop.permute.xlu0 %1860 }
 0x354   : > { %2396 = vperm.xlu2 %12132, %v2348_v54  }
 0x355   : > { %2391 = vperm.xlu1 %12131, %v2347_v3   ;;  %2386 = vperm.xlu0 %12130, %v2346_v10  }
 0x356   : > { %v14410_v14 = vpop.permute.xlu2 %1930 }
 0x357   : > { %15756 = vst [vmem:[#allocation30_spill] sm:$0xff] %v14410_v14  ;;  %v14412_v27 = vpop.permute.xlu1 %1880  ;;  %v14414_v34 = vpop.permute.xlu0 %1875 }
 0x35c   : > { %2411 = vperm.xlu2 %12132, %v2351_v38  }
 0x35d   : > { %2406 = vperm.xlu1 %12131, %v2350_v21   ;;  %2401 = vperm.xlu0 %12130, %v2349_v41  }
 0x35e   : > { %v14419_v54 = vpop.permute.xlu2 %1945 }
 0x35f   : > { %15757 = vst [vmem:[#allocation31_spill] sm:$0xff] %v14419_v54  ;;  %v14421_v3 = vpop.permute.xlu1 %1895  ;;  %v14423_v10 = vpop.permute.xlu0 %1890  ;;  %v2647_v54 = vld [vmem:[%s12463_s16 + $0x1c] sm:$0xff] }
 0x364   : > { %2694 = vperm.xlu2 %12132, %v2646_v9  }
 0x365   : > { %2689 = vperm.xlu1 %12131, %v2645_v35   ;;  %2684 = vperm.xlu0 %12130, %v2644_v61  }
 0x366   : > { %v14428_v38 = vpop.permute.xlu2 %1960 }
 0x367   : > { %15758 = vst [vmem:[#allocation32_spill] sm:$0xff] %v14428_v38  ;;  %v14430_v21 = vpop.permute.xlu1 %1910  ;;  %v14432_v41 = vpop.permute.xlu0 %1905  ;;  %v2354_v38 = vld [vmem:[%s12463_s16 + $0x43] sm:$0xff] }
 0x368   : > { %15759 = vst [vmem:[#allocation33_spill] sm:$0xff] %v14430_v21  ;;  %v2652_v21 = vld [vmem:[%s12463_s16 + $0x44] sm:$0xff] }
 0x369   : > { %15760 = vst [vmem:[#allocation34_spill] sm:$0xff] %v14432_v41  ;;  %v2362_v41 = vld [vmem:[%s12463_s16 + $0x83] sm:$0xff] }
 0x36c   : > { %2709 = vperm.xlu2 %12132, %v2649_v8  }
 0x36d   : > { %2704 = vperm.xlu1 %12131, %v2648_v60   ;;  %2699 = vperm.xlu0 %12130, %v2647_v54   ;;  %v14455_v54 = vld [vmem:[%s15726_s1 + $0x1] ss:$0 sm:$0xff] }
 0x36e   : > { %v14437_v9 = vpop.permute.xlu2 %2088 }
 0x36f   : > { %v14439_v35 = vpop.permute.xlu1 %1925  ;;  %v14441_v61 = vpop.permute.xlu0 %1920 }
 0x370   : > { %15761 = vst [vmem:[#allocation35_spill] sm:$0xff] %v14439_v35 }
 0x371   : > { %15762 = vst [vmem:[#allocation36_spill] sm:$0xff] %v14441_v61  ;;  %v2650_v61 = vld [vmem:[%s12463_s16 + $0x34] sm:$0xff] }
 0x374   : > { %2426 = vperm.xlu2 %12132, %v2354_v38  }
 0x375   : > { %2421 = vperm.xlu1 %12131, %v2353_v29   ;;  %2416 = vperm.xlu0 %12130, %v2352_v50   ;;  %v14463_v29 = vld [vmem:[%s15726_s1] ss:$0 sm:$0xff]  ;;  %v1980_v50 = vmul.f32 %v14455_v54, %v14376_v44  ;;  %v2653_v44 = vld [vmem:[%s12463_s16 + $0x4c] sm:$0xff] }
 0x376   : > { %v14446_v14 = vpop.permute.xlu2 %2103  ;;  %v1719_v38 = vmul.f32 %v14463_v29, %v14270_v7  ;;  %v2356_v7 = vld [vmem:[%s12463_s16 + $0x53] sm:$0xff] }
 0x377   : > { %v14448_v8 = vpop.permute.xlu1 %1940  ;;  %v14450_v60 = vpop.permute.xlu0 %1935 }
 0x378   : > { %15763 = vst [vmem:[#allocation37_spill] sm:$0xff] %v14448_v8  ;;  %v14472_v8 = vld [vmem:[%s15726_s1 + $0x2] ss:$0 sm:$0xff]  ;;  %v2017_v35 = vadd.f32 %v1980_v50, %v1719_v38 }
 0x379   : > { %15764 = vst [vmem:[#allocation38_spill] sm:$0xff] %v14450_v60 }
 0x37c   : > { %2719 = vperm.xlu2 %12132, %v2651_v23  }
 0x37d   : > { %2714 = vperm.xlu1 %12131, %v2650_v61   ;;  %2431 = vperm.xlu0 %12130, %v2355_v51   ;;  %v1983_v61 = vmul.f32 %v14455_v54, %v14385_v62  ;;  %v1722_v51 = vmul.f32 %v14463_v29, %v14279_v13  ;;  %v2358_v62 = vld [vmem:[%s12463_s16 + $0x63] sm:$0xff]  ;;  %v1986_v13 = vmul.f32 %v14455_v54, %v14394_v22  ;;  %v2654_v22 = vld [vmem:[%s12463_s16 + $0x54] sm:$0xff] }
 0x37e   : > { %v2119_v60 = vpop.permute.xlu2 %2118 }
 0x37f   : > { %v2278_v42 = vmul.f32 %v14472_v8, %v2119_v60  ;;  %v14475_v39 = vpop.permute.xlu1 %1955  ;;  %v14477_v43 = vpop.permute.xlu0 %1950  ;;  %v2020_v50 = vadd.f32 %v1983_v61, %v1722_v51 }
 0x380   : > { %15765 = vst [vmem:[#allocation39_spill] sm:$0xff] %v14475_v39 }
 0x381   : > { %15766 = vst [vmem:[#allocation40_spill] sm:$0xff] %v14477_v43  ;;  %v14479_v23 = vadd.f32 %v2278_v42, %v2017_v35  ;;  %v2359_v43 = vld [vmem:[%s12463_s16 + $0x6b] sm:$0xff] }
 0x384   : > { %2436 = vperm.xlu2 %12132, %v2356_v7   ;;  %v2357_v7 = vld [vmem:[%s12463_s16 + $0x5b] sm:$0xff] }
 0x385   : > { %2729 = vperm.xlu1 %12131, %v2653_v44   ;;  %2724 = vperm.xlu0 %12130, %v2652_v21   ;;  %v1725_v21 = vmul.f32 %v14463_v29, %v14288_v19  ;;  %v1989_v19 = vmul.f32 %v14455_v54, %v14403_v47  ;;  %v1992_v47 = vmul.f32 %v14455_v54, %v14412_v27 }
 0x386   : > { %v2134_v60 = vpop.permute.xlu2 %2133  ;;  %v1720_v27 = vmul.f32 %v14463_v29, %v14268_v6  ;;  %v2363_v6 = vld [vmem:[%s12463_s16 + $0x8b] sm:$0xff] }
 0x387   : > { %v2281_v38 = vmul.f32 %v14472_v8, %v2134_v60  ;;  %v14489_v42 = vpop.permute.xlu1 %1970  ;;  %v14491_v35 = vpop.permute.xlu0 %1965  ;;  %v2023_v61 = vadd.f32 %v1986_v13, %v1725_v21 }
 0x388   : > { %15767 = vst [vmem:[#allocation41_spill] sm:$0xff] %v14489_v42  ;;  %v2361_v42 = vld [vmem:[%s12463_s16 + $0x7b] sm:$0xff] }
 0x389   : > { %15768 = vst [vmem:[#allocation42_spill] sm:$0xff] %v14491_v35  ;;  %v14493_v39 = vadd.f32 %v2281_v38, %v2020_v50  ;;  %v2656_v35 = vld [vmem:[%s12463_s16 + $0x64] sm:$0xff] }
 0x38c   : > { %2451 = vperm.xlu2 %12132, %v2359_v43   ;;  %v2655_v43 = vld [vmem:[%s12463_s16 + $0x5c] sm:$0xff] }
 0x38d   : > { %2446 = vperm.xlu1 %12131, %v2358_v62   ;;  %2441 = vperm.xlu0 %12130, %v2357_v7   ;;  %v1728_v62 = vmul.f32 %v14463_v29, %v14297_v25  ;;  %v1981_v25 = vmul.f32 %v14455_v54, %v14347_v4 }
 0x38e   : > { %v2149_v44 = vpop.permute.xlu2 %2148 }
 0x38f   : > { %v2284_v51 = vmul.f32 %v14472_v8, %v2149_v44  ;;  %v14503_v60 = vpop.permute.xlu1 %2098  ;;  %v14505_v50 = vpop.permute.xlu0 %2093  ;;  %v2026_v13 = vadd.f32 %v1989_v19, %v1728_v62 }
 0x391   : > { %v14507_v38 = vadd.f32 %v2284_v51, %v2023_v61 }
 0x394   : > { %2744 = vperm.xlu2 %12132, %v2656_v35   ;;  %v1982_v35 = vmul.f32 %v14455_v54, %v14387_v2 }
 0x395   : > { %2739 = vperm.xlu1 %12131, %v2655_v43   ;;  %2734 = vperm.xlu0 %12130, %v2654_v22   ;;  %v1731_v43 = vmul.f32 %v14463_v29, %v14306_v31  ;;  %v1721_v22 = vmul.f32 %v14463_v29, %v14243_v53 }
 0x396   : > { %v2164_v7 = vpop.permute.xlu2 %2163 }
 0x397   : > { %v2287_v21 = vmul.f32 %v14472_v8, %v2164_v7  ;;  %v14517_v44 = vpop.permute.xlu1 %2113  ;;  %v14519_v61 = vpop.permute.xlu0 %2108  ;;  %v2029_v4 = vadd.f32 %v1992_v47, %v1731_v43  ;;  %v2018_v7 = vadd.f32 %v1981_v25, %v1720_v27  ;;  %v1995_v47 = vmul.f32 %v14455_v54, %v14421_v3 }
 0x398   : > { %v1984_v25 = vmul.f32 %v14455_v54, %v14356_v16  ;;  %v1734_v43 = vmul.f32 %v14463_v29, %v14315_v37  ;;  %v1723_v3 = vmul.f32 %v14463_v29, %v14277_v12  ;;  %v2660_v12 = vld [vmem:[%s12463_s16 + $0x84] sm:$0xff] }
 0x399   : > { %v14521_v51 = vadd.f32 %v2287_v21, %v2026_v13  ;;  %v2019_v13 = vadd.f32 %v1982_v35, %v1721_v22  ;;  %v2658_v21 = vld [vmem:[%s12463_s16 + $0x74] sm:$0xff]  ;;  %v1985_v35 = vmul.f32 %v14455_v54, %v14396_v26  ;;  %v1724_v22 = vmul.f32 %v14463_v29, %v14248_v57 }
 0x39a   : > { %v2032_v16 = vadd.f32 %v1995_v47, %v1734_v43  ;;  %v1726_v47 = vmul.f32 %v14463_v29, %v14286_v18  ;;  %v1991_v18 = vmul.f32 %v14455_v54, %v14414_v34 }
 0x39c   : > { %2461 = vperm.xlu2 %12132, %v2361_v42  }
 0x39d   : > { %2456 = vperm.xlu1 %12131, %v2360_v36   ;;  %2749 = vperm.xlu0 %12130, %v2657_v15  }
 0x39e   : > { %v2179_v19 = vpop.permute.xlu2 %2178 }
 0x39f   : > { %v2290_v62 = vmul.f32 %v14472_v8, %v2179_v19  ;;  %v2129_v2 = vpop.permute.xlu1 %2128  ;;  %v2124_v42 = vpop.permute.xlu0 %2123 }
 0x3a0   : > { %v2280_v31 = vmul.f32 %v14472_v8, %v2129_v2  ;;  %v2279_v36 = vmul.f32 %v14472_v8, %v2124_v42  ;;  %v2022_v2 = vadd.f32 %v1985_v35, %v1724_v22 }
 0x3a1   : > { %v14541_v15 = vadd.f32 %v2290_v62, %v2029_v4  ;;  %v2021_v62 = vadd.f32 %v1984_v25, %v1723_v3 }
 0x3a2   : > { %v14544_v53 = vadd.f32 %v2280_v31, %v2019_v13  ;;  %v14546_v17 = vadd.f32 %v2279_v36, %v2018_v7  ;;  %v2661_v7 = vld [vmem:[%s12463_s16 + $0x8c] sm:$0xff]  ;;  %v2659_v31 = vld [vmem:[%s12463_s16 + $0x7c] sm:$0xff]  ;;  %v1987_v36 = vmul.f32 %v14455_v54, %v14365_v28 }
 0x3a4   : > { %2754 = vperm.xlu2 %12132, %v2658_v21   ;;  %v1988_v21 = vmul.f32 %v14455_v54, %v14405_v52  ;;  %v2024_v22 = vadd.f32 %v1987_v36, %v1726_v47 }
 0x3a5   : > { %2471 = vperm.xlu1 %12131, %v2363_v6   ;;  %2466 = vperm.xlu0 %12130, %v2362_v41   ;;  %v1727_v6 = vmul.f32 %v14463_v29, %v14257_v63  ;;  %v1990_v63 = vmul.f32 %v14455_v54, %v14374_v40  ;;  %v14604_v40 = vld [vmem:[%s15726_s1 + $0x3] ss:$0 sm:$0xff] }
 0x3a6   : > { %v2194_v27 = vpop.permute.xlu2 %2193 }
 0x3a7   : > { %v2293_v19 = vmul.f32 %v14472_v8, %v2194_v27  ;;  %v2144_v26 = vpop.permute.xlu1 %2143  ;;  %v2139_v4 = vpop.permute.xlu0 %2138  ;;  %v2025_v3 = vadd.f32 %v1988_v21, %v1727_v6  ;;  %v2366_v27 = vld [vmem:[%s12463_s16 + $0xa3] sm:$0xff]  ;;  %v2274_v21 = vmul.f32 %v14472_v8, %v14503_v60  ;;  %v1994_v60 = vmul.f32 %v14455_v54, %v14423_v10 }
 0x3a8   : > { %v2283_v37 = vmul.f32 %v14472_v8, %v2144_v26  ;;  %v2282_v41 = vmul.f32 %v14472_v8, %v2139_v4  ;;  %v2365_v26 = vld [vmem:[%s12463_s16 + $0x9b] sm:$0xff]  ;;  %v2364_v4 = vld [vmem:[%s12463_s16 + $0x93] sm:$0xff] }
 0x3a9   : > { %v14565_v42 = vadd.f32 %v2293_v19, %v2032_v16 }
 0x3aa   : > { %v14568_v57 = vadd.f32 %v2283_v37, %v2022_v2  ;;  %v14570_v13 = vadd.f32 %v2282_v41, %v2021_v62  ;;  %v1730_v62 = vmul.f32 %v14463_v29, %v14266_v5  ;;  %v1729_v2 = vmul.f32 %v14463_v29, %v14295_v24 }
 0x3ab   : > { %v1976_v41 = vmul.f32 %v14455_v54, %v14369_v33  ;;  %v1715_v24 = vmul.f32 %v14463_v29, %v14250_v58  ;;  %v2663_v33 = vld [vmem:[%s12463_s16 + $0x9c] sm:$0xff]  ;;  %v1993_v58 = vmul.f32 %v14455_v54, %v14383_v55  ;;  %v1979_v55 = vmul.f32 %v14455_v54, %v14378_v46 }
 0x3ac   : > { %2769 = vperm.xlu2 %12132, %v2661_v7   ;;  %v1718_v46 = vmul.f32 %v14463_v29, %v14238_v49 }
 0x3ad   : > { %2764 = vperm.xlu1 %12131, %v2660_v12   ;;  %2759 = vperm.xlu0 %12130, %v2659_v31   ;;  %v2027_v12 = vadd.f32 %v1990_v63, %v1729_v2  ;;  %v2028_v31 = vadd.f32 %v1991_v18, %v1730_v62  ;;  %v14641_v63 = vld [vmem:[%s15727_s2] ss:$0 sm:$0xff] }
 0x3ae   : > { %v2397_v25 = vpop.permute.xlu2 %2396 }
 0x3af   : > { %v2159_v35 = vpop.permute.xlu1 %2158  ;;  %v2154_v43 = vpop.permute.xlu0 %2153 }
 0x3b0   : > { %v2286_v28 = vmul.f32 %v14472_v8, %v2159_v35  ;;  %v2285_v52 = vmul.f32 %v14472_v8, %v2154_v43  ;;  %v2662_v35 = vld [vmem:[%s12463_s16 + $0x94] sm:$0xff]  ;;  %v2367_v43 = vld [vmem:[%s12463_s16 + $0xab] sm:$0xff] }
 0x3b2   : > { %v14585_v16 = vadd.f32 %v2286_v28, %v2025_v3  ;;  %v14587_v19 = vadd.f32 %v2285_v52, %v2024_v22  ;;  %v2013_v22 = vadd.f32 %v1976_v41, %v1715_v24  ;;  %v2572_v3 = vmul.f32 %v14604_v40, %v2397_v25  ;;  %v14623_v28 = vld [vmem:[%s15726_s1 + $0x4] ss:$0 sm:$0xff] }
 0x3b3   : > { %v1732_v25 = vmul.f32 %v14463_v29, %v14304_v30 }
 0x3b4   : > { %2486 = vperm.xlu2 %12132, %v2366_v27   ;;  %v2311_v52 = vadd.f32 %v2274_v21, %v2013_v22  ;;  %v1733_v27 = vmul.f32 %v14463_v29, %v14275_v11  ;;  %v2665_v21 = vld [vmem:[%s12463_s16 + $0xac] sm:$0xff] }
 0x3b5   : > { %2481 = vperm.xlu1 %12131, %v2365_v26   ;;  %2476 = vperm.xlu0 %12130, %v2364_v4   ;;  %v11471_v4 = vld [vmem:[%s15728_s3 + $0x38] sm:$0xff]  ;;  %v2030_v62 = vadd.f32 %v1993_v58, %v1732_v25  ;;  %v11469_v58 = vld [vmem:[%s15728_s3 + $0x28] sm:$0xff] }
 0x3b6   : > { %v2412_v37 = vpop.permute.xlu2 %2411  ;;  %v2609_v10 = vadd.f32 %v2572_v3, %v2311_v52  ;;  %v2031_v2 = vadd.f32 %v1994_v60, %v1733_v27  ;;  %3654 = vmatpush.bf16.msra.mxu0 %v11471_v4  ;;  %v11479_v3 = vld [vmem:[%s15728_s3 + $0x78] sm:$0xff]  ;;  %v2073_v4 = vld [vmem:[%s12463_s16 + $0xca] sm:$0xff] }
 0x3b7   : > { %v2174_v34 = vpop.permute.xlu1 %2173  ;;  %v2169_v7 = vpop.permute.xlu0 %2168  ;;  %3712 = vmatpush.bf16.msra.mxu1 %v11479_v3  ;;  %v11466_v3 = vld [vmem:[%s15728_s3 + $0x10] sm:$0xff] }
 0x3b8   : > { %v2289_v5 = vmul.f32 %v14472_v8, %v2174_v34  ;;  %v2288_v36 = vmul.f32 %v14472_v8, %v2169_v7  ;;  %v2277_v7 = vmul.f32 %v14472_v8, %v14517_v44 }
 0x3ba   : > { %v14613_v6 = vadd.f32 %v2289_v5, %v2028_v31  ;;  %v14615_v47 = vadd.f32 %v2288_v36, %v2027_v12  ;;  %v2070_v31 = vld [vmem:[%s12463_s16 + $0xb2] sm:$0xff] }
 0x3bb   : > { %v11470_v5 = vld [vmem:[%s15728_s3 + $0x30] sm:$0xff] }
 0x3bc   : > { %2779 = vperm.xlu2 %12132, %v2663_v33   ;;  %v2664_v33 = vld [vmem:[%s12463_s16 + $0xa4] sm:$0xff]  ;;  %3655 = vmatpush.bf16.msra.mxu0 %v11470_v5 }
 0x3bd   : > { %2774 = vperm.xlu1 %12131, %v2662_v35   ;;  %2491 = vperm.xlu0 %12130, %v2367_v43   ;;  %v2016_v35 = vadd.f32 %v1979_v55, %v1718_v46  ;;  %v2575_v43 = vmul.f32 %v14604_v40, %v2412_v37  ;;  %v11487_v37 = vld [vmem:[%s15728_s3 + $0xb8] sm:$0xff]  ;;  %v2072_v55 = vld [vmem:[%s12463_s16 + $0xc2] sm:$0xff] }
 0x3be   : > { %v2695_v26 = vpop.permute.xlu2 %2694  ;;  %3770 = vmatpush.bf16.msra.mxu2 %v11487_v37  ;;  %v11485_v46 = vld [vmem:[%s15728_s3 + $0xa8] sm:$0xff] }
 0x3bf   : > { %v2870_v11 = vmul.f32 %v14623_v28, %v2695_v26  ;;  %v2189_v30 = vpop.permute.xlu1 %2188  ;;  %v2184_v18 = vpop.permute.xlu0 %2183  ;;  %v2314_v44 = vadd.f32 %v2277_v7, %v2016_v35  ;;  %v11467_v7 = vld [vmem:[%s15728_s3 + $0x18] sm:$0xff]  ;;  %v2370_v35 = vld [vmem:[%s12463_s16 + $0xc3] sm:$0xff] }
 0x3c0   : > { %v2292_v41 = vmul.f32 %v14472_v8, %v2189_v30  ;;  %v2291_v34 = vmul.f32 %v14472_v8, %v2184_v18  ;;  %3656 = vmatpush.bf16.msra.mxu0 %v11469_v58  ;;  %v11486_v30 = vld [vmem:[%s15728_s3 + $0xb0] sm:$0xff]  ;;  %v11468_v18 = vld [vmem:[%s15728_s3 + $0x20] sm:$0xff] }
 0x3c1   : > { %v2907_v12 = vadd.f32 %v2870_v11, %v2609_v10  ;;  %v2612_v60 = vadd.f32 %v2575_v43, %v2314_v44  ;;  %v11478_v10 = vld [vmem:[%s15728_s3 + $0x70] sm:$0xff]  ;;  %v2071_v11 = vld [vmem:[%s12463_s16 + $0xba] sm:$0xff]  ;;  %v1713_v44 = vmul.f32 %v14463_v29, %v14252_v59 }
 0x3c2   : > { %v14654_v36 = vadd.f32 %v2292_v41, %v2031_v2  ;;  %v14656_v24 = vadd.f32 %v2291_v34, %v2030_v62  ;;  %3713 = vmatpush.bf16.msra.mxu1 %v11478_v10  ;;  %3771 = vmatpush.bf16.msra.mxu2 %v11486_v30  ;;  %v11477_v34 = vld [vmem:[%s15728_s3 + $0x68] sm:$0xff]  ;;  %v2369_v43 = vld [vmem:[%s12463_s16 + $0xbb] sm:$0xff]  ;;  %v1977_v10 = vmul.f32 %v14455_v54, %v14367_v32 }
 0x3c3   : > { %v2948_v49 = vadd.f32 %v14641_v63, %v2907_v12  ;;  %v1975_v12 = vmul.f32 %v14455_v54, %v14329_v48  ;;  %v2272_v48 = vmul.f32 %v14472_v8, %v14437_v9  ;;  %v2667_v32 = vld [vmem:[%s12463_s16 + $0xbc] sm:$0xff] }
 0x3c4   : > { %2198 = vperm.xlu2 %12132, %v2070_v31   ;;  %3657 = vmatpush.bf16.msra.mxu0 %v11468_v18 }
 0x3c5   : > { %12140 = vtanh.f32 %v2948_v49  ;;  %2789 = vperm.xlu1 %12131, %v2665_v21   ;;  %2784 = vperm.xlu0 %12130, %v2664_v33   ;;  %v1974_v21 = vmul.f32 %v14455_v54, %v14358_v20  ;;  %v1714_v33 = vmul.f32 %v14463_v29, %v14261_v1  ;;  %v11476_v49 = vld [vmem:[%s15728_s3 + $0x60] sm:$0xff]  ;;  %v2368_v20 = vld [vmem:[%s12463_s16 + $0xb3] sm:$0xff] }
 0x3c6   : > { %v2710_v22 = vpop.permute.xlu2 %2709  ;;  %3714 = vmatpush.bf16.msra.mxu1 %v11477_v34  ;;  %3772 = vmatpush.bf16.msra.mxu2 %v11485_v46  ;;  %v11484_v1 = vld [vmem:[%s15728_s3 + $0xa0] sm:$0xff]  ;;  %v1717_v46 = vmul.f32 %v14463_v29, %v14233_v45  ;;  %v11482_v45 = vld [vmem:[%s15728_s3 + $0x90] sm:$0xff] }
 0x3c7   : > { %v2873_v52 = vmul.f32 %v14623_v28, %v2710_v22  ;;  %v2392_v27 = vpop.permute.xlu1 %2391  ;;  %v2387_v25 = vpop.permute.xlu0 %2386  ;;  %v2273_v22 = vmul.f32 %v14472_v8, %v14505_v50  ;;  %v2012_v58 = vadd.f32 %v1975_v12, %v1714_v33  ;;  %v2011_v59 = vadd.f32 %v1974_v21, %v1713_v44  ;;  %v11474_v12 = vld [vmem:[%s15728_s3 + $0x50] sm:$0xff] }
 0x3c8   : > { %3658 = vmatpush.bf16.msra.mxu0 %v11467_v7  ;;  %v2571_v9 = vmul.f32 %v14604_v40, %v2392_v27  ;;  %v11483_v27 = vld [vmem:[%s15728_s3 + $0x98] sm:$0xff]  ;;  %v1716_v7 = vmul.f32 %v14463_v29, %v14259_v0  ;;  %v2276_v21 = vmul.f32 %v14472_v8, %v14519_v61  ;;  %v11464_v0 = vld [vmem:[%s15728_s3] sm:$0xff] }
 0x3c9   : > { %v2910_v26 = vadd.f32 %v2873_v52, %v2612_v60  ;;  %v2570_v60 = vmul.f32 %v14604_v40, %v2387_v25  ;;  %v2309_v50 = vadd.f32 %v2272_v48, %v2011_v59  ;;  %v2310_v52 = vadd.f32 %v2273_v22, %v2012_v58  ;;  %v11465_v25 = vld [vmem:[%s15728_s3 + $0x8] sm:$0xff] }
 0x3ca   : > { %3715 = vmatpush.bf16.msra.mxu1 %v11476_v49  ;;  %3773 = vmatpush.bf16.msra.mxu2 %v11484_v1  ;;  %v2014_v29 = vadd.f32 %v1977_v10, %v1716_v7  ;;  %v2077_v7 = vld [vmem:[%s12463_s16 + $0xea] sm:$0xff] }
 0x3cb   : > { %v12141_v62 = vpop.eup %12140  ;;  %v2951_v2 = vadd.f32 %v14641_v63, %v2910_v26  ;;  %v2608_v18 = vadd.f32 %v2571_v9, %v2310_v52 }
 0x3cc   : > { %3022 = vst [vmem:[#allocation3 + $0x10] sm:$0xff] %v12141_v62  ;;  %2213 = vperm.xlu2 %12132, %v2073_v4   ;;  %v11475_v4 = vld [vmem:[%s15728_s3 + $0x58] sm:$0xff]  ;;  %3659 = vmatpush.bf16.msra.mxu0 %v11466_v3  ;;  %v2607_v62 = vadd.f32 %v2570_v60, %v2309_v50  ;;  %v11472_v50 = vld [vmem:[%s15728_s3 + $0x40] sm:$0xff] }
 0x3cd   : > { %12142 = vtanh.f32 %v2951_v2  ;;  %2208 = vperm.xlu1 %12131, %v2072_v55   ;;  %2203 = vperm.xlu0 %12130, %v2071_v11   ;;  %v1978_v55 = vmul.f32 %v14455_v54, %v14338_v56  ;;  %v2275_v56 = vmul.f32 %v14472_v8, %v14446_v14  ;;  %v2666_v54 = vld [vmem:[%s12463_s16 + $0xb4] sm:$0xff] }
 0x3ce   : > { %v14685_v41 = vpop.permute.xlu2 %2426  ;;  %3716 = vmatpush.bf16.msra.mxu1 %v11475_v4  ;;  %3774 = vmatpush.bf16.msra.mxu2 %v11483_v27  ;;  %v2074_v60 = vld [vmem:[%s12463_s16 + $0xd2] sm:$0xff] }
 0x3cf   : > { %v2407_v31 = vpop.permute.xlu1 %2406  ;;  %v2402_v5 = vpop.permute.xlu0 %2401  ;;  %v2015_v14 = vadd.f32 %v1978_v55, %v1717_v46  ;;  %v2312_v48 = vadd.f32 %v2275_v56, %v2014_v29  ;;  %v2669_v27 = vld [vmem:[%s12463_s16 + $0xcc] sm:$0xff]  ;;  %v11480_v55 = vld [vmem:[%s15728_s3 + $0x80] sm:$0xff] }
 0x3d0   : > { %3660 = vmatpush.bf16.msra.mxu0 %v11465_v25  ;;  %v2574_v49 = vmul.f32 %v14604_v40, %v2407_v31  ;;  %v2573_v44 = vmul.f32 %v14604_v40, %v2402_v5  ;;  %v11473_v31 = vld [vmem:[%s15728_s3 + $0x48] sm:$0xff] }
 0x3d1   : > { %v2313_v22 = vadd.f32 %v2276_v21, %v2015_v14  ;;  %v11481_v5 = vld [vmem:[%s15728_s3 + $0x88] sm:$0xff] }
 0x3d2   : > { %3717 = vmatpush.bf16.msra.mxu1 %v11474_v12  ;;  %3775 = vmatpush.bf16.msra.mxu2 %v11482_v45  ;;  %v2610_v58 = vadd.f32 %v2573_v44, %v2312_v48  ;;  %v2668_v25 = vld [vmem:[%s12463_s16 + $0xc4] sm:$0xff]  ;;  %v2075_v12 = vld [vmem:[%s12463_s16 + $0xda] sm:$0xff] }
 0x3d3   : > { %v12143_v37 = vpop.eup %12142 }
 0x3d4   : > { %3025 = vst [vmem:[#allocation3 + $0x28] sm:$0xff] %v12143_v37  ;;  %2506 = vperm.xlu2 %12132, %v2370_v35   ;;  %3661 = vmatpush.bf16.msra.mxu0 %v11464_v0  ;;  %v2611_v37 = vadd.f32 %v2574_v49, %v2313_v22  ;;  %v2373_v22 = vld [vmem:[%s12463_s16 + $0xdb] sm:$0xff] }
 0x3d5   : > { %2501 = vperm.xlu1 %12131, %v2369_v43   ;;  %2496 = vperm.xlu0 %12130, %v2368_v20   ;;  %v2371_v43 = vld [vmem:[%s12463_s16 + $0xcb] sm:$0xff] }
 0x3d6   : > { %v14722_v26 = vpop.permute.xlu2 %2719  ;;  %3718 = vmatpush.bf16.msra.mxu1 %v11473_v31  ;;  %3776 = vmatpush.bf16.msra.mxu2 %v11481_v5  ;;  %v2372_v31 = vld [vmem:[%s12463_s16 + $0xd3] sm:$0xff]  ;;  %v2578_v5 = vmul.f32 %v14604_v40, %v14685_v41 }
 0x3d7   : > { %v2690_v11 = vpop.permute.xlu1 %2689  ;;  %v2685_v30 = vpop.permute.xlu0 %2684  ;;  %v2875_v56 = vmul.f32 %v14623_v28, %v14722_v26 }
 0x3d8   : > { %v2869_v2 = vmul.f32 %v14623_v28, %v2690_v11  ;;  %v2868_v34 = vmul.f32 %v14623_v28, %v2685_v30 }
 0x3da   : > { %v2906_v33 = vadd.f32 %v2869_v2, %v2608_v18  ;;  %v2905_v35 = vadd.f32 %v2868_v34, %v2607_v62  ;;  %3719 = vmatpush.bf16.msra.mxu1 %v11472_v50  ;;  %3777 = vmatpush.bf16.msra.mxu2 %v11480_v55 }
 0x3dc   : > { %v2947_v8 = vadd.f32 %v14641_v63, %v2906_v33  ;;  %v2946_v61 = vadd.f32 %v14641_v63, %v2905_v35  ;;  %2799 = vperm.xlu2 %12132, %v2667_v32  }
 0x3dd   : > { %2794 = vperm.xlu1 %12131, %v2666_v54   ;;  %2511 = vperm.xlu0 %12130, %v2371_v43   ;;  %v2076_v54 = vld [vmem:[%s12463_s16 + $0xe2] sm:$0xff] }
 0x3de   : > { %12144 = vtanh.f32 %v2947_v8  ;;  %v14763_v20 = vpop.permute.xlu2 %2436 }
 0x3df   : > { %12146 = vtanh.f32 %v2946_v61  ;;  %v2705_v1 = vpop.permute.xlu1 %2704  ;;  %v2700_v3 = vpop.permute.xlu0 %2699  ;;  %v2374_v61 = vld [vmem:[%s12463_s16 + $0xe3] sm:$0xff] }
 0x3e0   : > { %v2872_v59 = vmul.f32 %v14623_v28, %v2705_v1  ;;  %v2871_v9 = vmul.f32 %v14623_v28, %v2700_v3 }
 0x3e2   : > { %v2909_v52 = vadd.f32 %v2872_v59, %v2611_v37  ;;  %v2908_v4 = vadd.f32 %v2871_v9, %v2610_v58 }
 0x3e4   : > { %v12145_v10 = vpop.eup %12144  ;;  %v2950_v11 = vadd.f32 %v14641_v63, %v2909_v52  ;;  %v2949_v30 = vadd.f32 %v14641_v63, %v2908_v4  ;;  %2218 = vperm.xlu2 %12132, %v2074_v60   ;;  %v2615_v4 = vadd.f32 %v2578_v5, %v14544_v53  ;;  %v2672_v5 = vld [vmem:[%s12463_s16 + $0xe4] sm:$0xff] }
 0x3e5   : > { %v12147_v18 = vpop.eup %12146  ;;  %3021 = vst [vmem:[#allocation3 + $0x8] sm:$0xff] %v12145_v10  ;;  %2809 = vperm.xlu1 %12131, %v2669_v27   ;;  %2804 = vperm.xlu0 %12130, %v2668_v25  }
 0x3e6   : > { %3020 = vst [vmem:[#allocation3] sm:$0xff] %v12147_v18  ;;  %12148 = vtanh.f32 %v2950_v11  ;;  %v14784_v62 = vpop.permute.xlu2 %2451  ;;  %v2671_v18 = vld [vmem:[%s12463_s16 + $0xdc] sm:$0xff] }
 0x3e7   : > { %12150 = vtanh.f32 %v2949_v30  ;;  %v2422_v2 = vpop.permute.xlu1 %2421  ;;  %v2417_v34 = vpop.permute.xlu0 %2416 }
 0x3e8   : > { %v2577_v46 = vmul.f32 %v14604_v40, %v2422_v2  ;;  %v2576_v35 = vmul.f32 %v14604_v40, %v2417_v34 }
 0x3ea   : > { %v2614_v32 = vadd.f32 %v2577_v46, %v14546_v17  ;;  %v2613_v44 = vadd.f32 %v2576_v35, %v14479_v23  ;;  %v2670_v46 = vld [vmem:[%s12463_s16 + $0xd4] sm:$0xff] }
 0x3ec   : > { %v12149_v21 = vpop.eup %12148  ;;  %v2912_v33 = vadd.f32 %v2875_v56, %v2614_v32  ;;  %2233 = vperm.xlu2 %12132, %v2077_v7   ;;  %v2375_v7 = vld [vmem:[%s12463_s16 + $0xeb] sm:$0xff] }
 0x3ed   : > { %v12151_v43 = vpop.eup %12150  ;;  %3024 = vst [vmem:[#allocation3 + $0x20] sm:$0xff] %v12149_v21  ;;  %2228 = vperm.xlu1 %12131, %v2076_v54   ;;  %2223 = vperm.xlu0 %12130, %v2075_v12   ;;  %v3057_v45 = vld [vmem:[#allocation3] ss:$2 sm:$0xff]  ;;  %v3095_v0 = vld [vmem:[#allocation3 + $0x1] ss:$2 sm:$0xff] }
 0x3ee   : > { %3023 = vst [vmem:[#allocation3 + $0x18] sm:$0xff] %v12151_v43  ;;  %v2953_v26 = vadd.f32 %v14641_v63, %v2912_v33  ;;  %v14795_v17 = vpop.permute.xlu2 %2744  ;;  %v3132_v14 = vmax.f32 %v3057_v45, %v3095_v0 }
 0x3ef   : > { %v2715_v29 = vpop.permute.xlu1 %2714  ;;  %v2432_v49 = vpop.permute.xlu0 %2431 }
 0x3f0   : > { %12152 = vtanh.f32 %v2953_v26  ;;  %v2874_v8 = vmul.f32 %v14623_v28, %v2715_v29  ;;  %3151 = vst [vmem:[#allocation4] sm:$0xff] %v3132_v14  ;;  %v2579_v3 = vmul.f32 %v14604_v40, %v2432_v49  ;;  %v3189_v52 = vpack.c.bf16 %v3132_v14, %v3132_v14 }
 0x3f2   : > { %v2911_v48 = vadd.f32 %v2874_v8, %v2613_v44  ;;  %v2616_v55 = vadd.f32 %v2579_v3, %v14493_v39  ;;  %v3303_v56 = vunpack.c.l.b16 %v3189_v52  ;;  %v2078_v44 = vld [vmem:[%s12463_s16 + $0xf2] sm:$0xff] }
 0x3f4   : > { %v2952_v1 = vadd.f32 %v14641_v63, %v2911_v48  ;;  %2526 = vperm.xlu2 %12132, %v2374_v61   ;;  %v3061_v37 = vld [vmem:[#allocation3 + $0x20] ss:$2 sm:$0xff]  ;;  %v3099_v58 = vld [vmem:[#allocation3 + $0x21] ss:$2 sm:$0xff]  ;;  %v2880_v48 = vmul.f32 %v14623_v28, %v14795_v17 }
 0x3f5   : > { %2521 = vperm.xlu1 %12131, %v2373_v22   ;;  %2516 = vperm.xlu0 %12130, %v2372_v31   ;;  %v3059_v23 = vld [vmem:[#allocation3 + $0x10] ss:$2 sm:$0xff]  ;;  %v3097_v59 = vld [vmem:[#allocation3 + $0x11] ss:$2 sm:$0xff]  ;;  %v14806_v9 = vmax.f32 %v3061_v37, %v3099_v58  ;;  %v2673_v31 = vld [vmem:[%s12463_s16 + $0xec] sm:$0xff]  ;;  %v2580_v37 = vmul.f32 %v14604_v40, %v14763_v20 }
 0x3f6   : > { %v12153_v60 = vpop.eup %12152  ;;  %12154 = vtanh.f32 %v2952_v1  ;;  %v14808_v50 = vpop.permute.xlu2 %2461  ;;  %v3133_v41 = vmax.f32 %v3059_v23, %v3097_v59 }
 0x3f7   : > { %3027 = vst [vmem:[#allocation3 + $0x38] sm:$0xff] %v12153_v60  ;;  %v2730_v27 = vpop.permute.xlu1 %2729  ;;  %v2725_v25 = vpop.permute.xlu0 %2724  ;;  %v3191_v17 = vpack.c.bf16 %v14806_v9, %v14806_v9 }
 0x3f8   : > { %v2877_v10 = vmul.f32 %v14623_v28, %v2730_v27  ;;  %v2876_v11 = vmul.f32 %v14623_v28, %v2725_v25  ;;  %3152 = vst [vmem:[#allocation4 + $0x8] sm:$0xff] %v3133_v41  ;;  %v3190_v30 = vpack.c.bf16 %v3133_v41, %v3133_v41 }
 0x3f9   : > { %3153 = vst [vmem:[#allocation4 + $0x10] sm:$0xff] %v14806_v9 }
 0x3fa   : > { %v2914_v2 = vadd.f32 %v2877_v10, %v2616_v55  ;;  %v2913_v34 = vadd.f32 %v2876_v11, %v2615_v4  ;;  %v3304_v53 = vunpack.c.l.b16 %v3190_v30  ;;  %v2617_v11 = vadd.f32 %v2580_v37, %v14570_v13 }
 0x3fc   : > { %v12155_v32 = vpop.eup %12154  ;;  %v2955_v54 = vadd.f32 %v14641_v63, %v2914_v2  ;;  %v2954_v39 = vadd.f32 %v14641_v63, %v2913_v34  ;;  %2819 = vperm.xlu2 %12132, %v2671_v18   ;;  %v3322_v12 = vpack.c.b16 %v3304_v53, %v3303_v56  ;;  %v3305_v56 = vunpack.c.l.b16 %v3191_v17 }
 0x3fd   : > { %3026 = vst [vmem:[#allocation3 + $0x30] sm:$0xff] %v12155_v32  ;;  %2814 = vperm.xlu1 %12131, %v2670_v46   ;;  %2531 = vperm.xlu0 %12130, %v2375_v7   ;;  %v2081_v7 = vld [vmem:[%s12463_s16 + $0x10a] sm:$0xff] }
 0x3fe   : > { %12156 = vtanh.f32 %v2955_v54  ;;  %v14820_v21 = vpop.permute.xlu2 %2754  ;;  %3662 = vmatmul.bf16.vlgmr.msra.gmra.mxu0 %v3322_v12  ;;  %v2080_v54 = vld [vmem:[%s12463_s16 + $0x102] sm:$0xff] }
 0x3ff   : > { %12158 = vtanh.f32 %v2954_v39  ;;  %v2447_v33 = vpop.permute.xlu1 %2446  ;;  %v2442_v35 = vpop.permute.xlu0 %2441  ;;  %v3208_v43 = vld [vmem:[#allocation4 + $0x1] sm:$0xff]  ;;  %v2079_v39 = vld [vmem:[%s12463_s16 + $0xfa] sm:$0xff] }
 0x400   : > { %v3246_v45 = vld [vmem:[#allocation4 + $0x2] sm:$0xff]  ;;  %v2582_v0 = vmul.f32 %v14604_v40, %v2447_v33  ;;  %v3227_v14 = vpack.c.bf16 %v3208_v43, %v3208_v43  ;;  %v3247_v29 = vld [vmem:[#allocation4 + $0xa] sm:$0xff]  ;;  %v2581_v41 = vmul.f32 %v14604_v40, %v2442_v35  ;;  %v2583_v33 = vmul.f32 %v14604_v40, %v14784_v62 }
 0x401   : > { %v3209_v26 = vld [vmem:[#allocation4 + $0x9] sm:$0xff]  ;;  %v3265_v49 = vpack.c.bf16 %v3246_v45, %v3246_v45  ;;  %v3266_v61 = vpack.c.bf16 %v3247_v29, %v3247_v29 }
 0x402   : > { %v3228_v8 = vpack.c.bf16 %v3209_v26, %v3209_v26  ;;  %v2619_v22 = vadd.f32 %v2582_v0, %v14507_v38  ;;  %v3361_v1 = vunpack.c.l.b16 %v3227_v14  ;;  %v2618_v2 = vadd.f32 %v2581_v41, %v14568_v57 }
 0x403   : > { %v3419_v3 = vunpack.c.l.b16 %v3265_v49  ;;  %v3420_v23 = vunpack.c.l.b16 %v3266_v61  ;;  %v2620_v49 = vadd.f32 %v2583_v33, %v14587_v19  ;;  %v2378_v61 = vld [vmem:[%s12463_s16 + $0x103] sm:$0xff] }
 0x404   : > { %v3362_v58 = vunpack.c.l.b16 %v3228_v8  ;;  %v12157_v59 = vpop.eup %12156  ;;  %v2917_v60 = vadd.f32 %v2880_v48, %v2619_v22  ;;  %2238 = vperm.xlu2 %12132, %v2078_v44   ;;  %v3063_v52 = vld [vmem:[#allocation3 + $0x30] ss:$2 sm:$0xff]  ;;  %v3101_v4 = vld [vmem:[#allocation3 + $0x31] ss:$2 sm:$0xff]  ;;  %v2882_v48 = vmul.f32 %v14623_v28, %v14820_v21 }
 0x405   : > { %v12159_v38 = vpop.eup %12158  ;;  %3029 = vst [vmem:[#allocation3 + $0x48] sm:$0xff] %v12157_v59  ;;  %2829 = vperm.xlu1 %12131, %v2673_v31   ;;  %2824 = vperm.xlu0 %12130, %v2672_v5   ;;  %v3438_v25 = vpack.c.b16 %v3420_v23, %v3419_v3  ;;  %v3135_v20 = vmax.f32 %v3063_v52, %v3101_v4  ;;  %v2377_v5 = vld [vmem:[%s12463_s16 + $0xfb] sm:$0xff] }
 0x406   : > { %v3380_v27 = vpack.c.b16 %v3362_v58, %v3361_v1  ;;  %3028 = vst [vmem:[#allocation3 + $0x40] sm:$0xff] %v12159_v38  ;;  %v2958_v55 = vadd.f32 %v14641_v63, %v2917_v60  ;;  %v14835_v10 = vpop.permute.xlu2 %2769  ;;  %v2376_v1 = vld [vmem:[%s12463_s16 + $0xf3] sm:$0xff] }
 0x407   : > { %3778 = vmatmul.bf16.vlgmr.msra.gmra.mxu2 %v3438_v25  ;;  %v2740_v9 = vpop.permute.xlu1 %2739  ;;  %v2735_v30 = vpop.permute.xlu0 %2734  ;;  %3154 = vst [vmem:[#allocation4 + $0x18] sm:$0xff] %v3135_v20  ;;  %v3192_v18 = vpack.c.bf16 %v3135_v20, %v3135_v20  ;;  %v2675_v20 = vld [vmem:[%s12463_s16 + $0xfc] sm:$0xff] }
 0x408   : > { %3720 = vmatmul.bf16.vlgmr.msra.gmra.mxu1 %v3380_v27  ;;  %12160 = vtanh.f32 %v2958_v55  ;;  %v2879_v34 = vmul.f32 %v14623_v28, %v2740_v9  ;;  %v2878_v46 = vmul.f32 %v14623_v28, %v2735_v30  ;;  %v2674_v30 = vld [vmem:[%s12463_s16 + $0xf4] sm:$0xff] }
 0x409   : > { %v3306_v53 = vunpack.c.l.b16 %v3192_v18  ;;  %v2379_v18 = vld [vmem:[%s12463_s16 + $0x10b] sm:$0xff] }
 0x40a   : > { %v2916_v32 = vadd.f32 %v2879_v34, %v2618_v2  ;;  %v2915_v13 = vadd.f32 %v2878_v46, %v2617_v11  ;;  %v2885_v11 = vmul.f32 %v14623_v28, %v14835_v10  ;;  %v2585_v46 = vmul.f32 %v14604_v40, %v14808_v50 }
 0x40b   : > { %v3323_v12 = vpack.c.b16 %v3306_v53, %v3305_v56 }
 0x40c   : > { %v2957_v35 = vadd.f32 %v14641_v63, %v2916_v32  ;;  %v2956_v43 = vadd.f32 %v14641_v63, %v2915_v13  ;;  %2253 = vperm.xlu2 %12132, %v2081_v7  }
 0x40d   : > { %2248 = vperm.xlu1 %12131, %v2080_v54   ;;  %2243 = vperm.xlu0 %12130, %v2079_v39   ;;  %v3065_v57 = vld [vmem:[#allocation3 + $0x40] ss:$2 sm:$0xff]  ;;  %v3103_v45 = vld [vmem:[#allocation3 + $0x41] ss:$2 sm:$0xff] }
 0x40e   : > { %v12161_v0 = vpop.eup %12160  ;;  %12162 = vtanh.f32 %v2957_v35  ;;  %v14848_v26 = vpop.permute.xlu2 %2486  ;;  %3667 = vmatmul.bf16.gmra.mxu0 %v3323_v12  ;;  %v14850_v14 = vmax.f32 %v3065_v57, %v3103_v45  ;;  %v3210_v3 = vld [vmem:[#allocation4 + $0x11] sm:$0xff]  ;;  %v2622_v57 = vadd.f32 %v2585_v46, %v14521_v51 }
 0x40f   : > { %3032 = vst [vmem:[#allocation3 + $0x60] sm:$0xff] %v12161_v0  ;;  %12164 = vtanh.f32 %v2956_v43  ;;  %v2457_v62 = vpop.permute.xlu1 %2456  ;;  %v2750_v29 = vpop.permute.xlu0 %2749  ;;  %v3248_v23 = vld [vmem:[#allocation4 + $0x12] sm:$0xff]  ;;  %v3229_v60 = vpack.c.bf16 %v3210_v3, %v3210_v3 }
 0x410   : > { %v2584_v44 = vmul.f32 %v14604_v40, %v2457_v62  ;;  %v2881_v8 = vmul.f32 %v14623_v28, %v2750_v29  ;;  %3155 = vst [vmem:[#allocation4 + $0x20] sm:$0xff] %v14850_v14  ;;  %v3267_v38 = vpack.c.bf16 %v3248_v23, %v3248_v23  ;;  %v3193_v43 = vpack.c.bf16 %v14850_v14, %v14850_v14  ;;  %v2677_v14 = vld [vmem:[%s12463_s16 + $0x10c] sm:$0xff] }
 0x411   : > { %v3363_v2 = vunpack.c.l.b16 %v3229_v60 }
 0x412   : > { %v2621_v22 = vadd.f32 %v2584_v44, %v14585_v16  ;;  %v2918_v31 = vadd.f32 %v2881_v8, %v2620_v49  ;;  %v3421_v56 = vunpack.c.l.b16 %v3267_v38  ;;  %v2082_v8 = vld [vmem:[%s12463_s16 + $0x112] sm:$0xff]  ;;  %v2083_v38 = vld [vmem:[%s12463_s16 + $0x11a] sm:$0xff] }
 0x414   : > { %v12163_v37 = vpop.eup %12162  ;;  %v2919_v58 = vadd.f32 %v2882_v48, %v2621_v22  ;;  %v2959_v19 = vadd.f32 %v14641_v63, %v2918_v31  ;;  %2546 = vperm.xlu2 %12132, %v2378_v61   ;;  %v2676_v22 = vld [vmem:[%s12463_s16 + $0x104] sm:$0xff]  ;;  %v3307_v31 = vunpack.c.l.b16 %v3193_v43 }
 0x415   : > { %v12165_v59 = vpop.eup %12164  ;;  %3031 = vst [vmem:[#allocation3 + $0x58] sm:$0xff] %v12163_v37  ;;  %2541 = vperm.xlu1 %12131, %v2377_v5   ;;  %2536 = vperm.xlu0 %12130, %v2376_v1  }
 0x416   : > { %3030 = vst [vmem:[#allocation3 + $0x50] sm:$0xff] %v12165_v59  ;;  %v2960_v21 = vadd.f32 %v14641_v63, %v2919_v58  ;;  %12166 = vtanh.f32 %v2959_v19  ;;  %v14864_v16 = vpop.permute.xlu2 %2779 }
 0x417   : > { %v2472_v41 = vpop.permute.xlu1 %2471  ;;  %v2467_v52 = vpop.permute.xlu0 %2466  ;;  %v3211_v4 = vld [vmem:[#allocation4 + $0x19] sm:$0xff] }
 0x418   : > { %v3249_v17 = vld [vmem:[#allocation4 + $0x1a] sm:$0xff]  ;;  %12168 = vtanh.f32 %v2960_v21  ;;  %v2587_v27 = vmul.f32 %v14604_v40, %v2472_v41  ;;  %v3230_v25 = vpack.c.bf16 %v3211_v4, %v3211_v4  ;;  %v2586_v7 = vmul.f32 %v14604_v40, %v2467_v52  ;;  %v2380_v41 = vld [vmem:[%s12463_s16 + $0x113] sm:$0xff] }
 0x419   : > { %v3268_v55 = vpack.c.bf16 %v3249_v17, %v3249_v17  ;;  %v2887_v52 = vmul.f32 %v14623_v28, %v14864_v16  ;;  %v2084_v17 = vld [vmem:[%s12463_s16 + $0x122] sm:$0xff] }
 0x41a   : > { %v2624_v9 = vadd.f32 %v2587_v27, %v14613_v6  ;;  %v3364_v34 = vunpack.c.l.b16 %v3230_v25  ;;  %v2623_v45 = vadd.f32 %v2586_v7, %v14615_v47 }
 0x41b   : > { %v3422_v53 = vunpack.c.l.b16 %v3268_v55 }
 0x41c   : > { %v12167_v32 = vpop.eup %12166  ;;  %v2922_v13 = vadd.f32 %v2885_v11, %v2624_v9  ;;  %2839 = vperm.xlu2 %12132, %v2675_v20   ;;  %v3381_v54 = vpack.c.b16 %v3364_v34, %v3363_v2 }
 0x41d   : > { %3033 = vst [vmem:[#allocation3 + $0x68] sm:$0xff] %v12167_v32  ;;  %2834 = vperm.xlu1 %12131, %v2674_v30   ;;  %2551 = vperm.xlu0 %12130, %v2379_v18   ;;  %v3439_v10 = vpack.c.b16 %v3422_v53, %v3421_v56  ;;  %v3067_v6 = vld [vmem:[#allocation3 + $0x50] ss:$2 sm:$0xff]  ;;  %v3105_v39 = vld [vmem:[#allocation3 + $0x51] ss:$2 sm:$0xff] }
 0x41e   : > { %v12169_v12 = vpop.eup %12168  ;;  %v2963_v33 = vadd.f32 %v14641_v63, %v2922_v13  ;;  %3725 = vmatmul.bf16.gmra.mxu1 %v3381_v54  ;;  %v14877_v50 = vpop.permute.xlu2 %2198  ;;  %v3137_v35 = vmax.f32 %v3067_v6, %v3105_v39  ;;  %v2678_v13 = vld [vmem:[%s12463_s16 + $0x114] sm:$0xff]  ;;  %v2382_v6 = vld [vmem:[%s12463_s16 + $0x123] sm:$0xff] }
 0x41f   : > { %3034 = vst [vmem:[#allocation3 + $0x70] sm:$0xff] %v12169_v12  ;;  %3783 = vmatmul.bf16.gmra.mxu2 %v3439_v10  ;;  %v2765_v0 = vpop.permute.xlu1 %2764  ;;  %v2760_v62 = vpop.permute.xlu0 %2759  ;;  %v2381_v39 = vld [vmem:[%s12463_s16 + $0x11b] sm:$0xff] }
 0x420   : > { %12170 = vtanh.f32 %v2963_v33  ;;  %v2884_v29 = vmul.f32 %v14623_v28, %v2765_v0  ;;  %v2883_v49 = vmul.f32 %v14623_v28, %v2760_v62  ;;  %3156 = vst [vmem:[#allocation4 + $0x28] sm:$0xff] %v3137_v35  ;;  %v3194_v44 = vpack.c.bf16 %v3137_v35, %v3137_v35 }
 0x421   : > { %v2590_v35 = vmul.f32 %v14604_v40, %v14848_v26 }
 0x422   : > { %v2921_v61 = vadd.f32 %v2884_v29, %v2623_v45  ;;  %v2920_v48 = vadd.f32 %v2883_v49, %v2622_v57  ;;  %v3308_v51 = vunpack.c.l.b16 %v3194_v44 }
 0x424   : > { %v2962_v5 = vadd.f32 %v14641_v63, %v2921_v61  ;;  %v2961_v47 = vadd.f32 %v14641_v63, %v2920_v48  ;;  %2258 = vperm.xlu2 %12132, %v2082_v8   ;;  %v3324_v1 = vpack.c.b16 %v3308_v51, %v3307_v31  ;;  %v3069_v3 = vld [vmem:[#allocation3 + $0x60] ss:$2 sm:$0xff]  ;;  %v3107_v37 = vld [vmem:[#allocation3 + $0x61] ss:$2 sm:$0xff] }
 0x425   : > { %2849 = vperm.xlu1 %12131, %v2677_v14   ;;  %2844 = vperm.xlu0 %12130, %v2676_v22   ;;  %v14890_v58 = vmax.f32 %v3069_v3, %v3107_v37  ;;  %v2627_v22 = vadd.f32 %v2590_v35, %v14654_v36 }
 0x426   : > { %v12171_v19 = vpop.eup %12170  ;;  %12172 = vtanh.f32 %v2962_v5  ;;  %v14892_v23 = vpop.permute.xlu2 %2213  ;;  %3672 = vmatmul.bf16.gmra.mxu0 %v3324_v1 }
 0x427   : > { %3037 = vst [vmem:[#allocation3 + $0x88] sm:$0xff] %v12171_v19  ;;  %12174 = vtanh.f32 %v2961_v47  ;;  %v2482_v59 = vpop.permute.xlu1 %2481  ;;  %v2477_v21 = vpop.permute.xlu0 %2476  ;;  %v3212_v27 = vld [vmem:[#allocation4 + $0x21] sm:$0xff] }
 0x428   : > { %v2589_v60 = vmul.f32 %v14604_v40, %v2482_v59  ;;  %3157 = vst [vmem:[#allocation4 + $0x30] sm:$0xff] %v14890_v58  ;;  %v2588_v55 = vmul.f32 %v14604_v40, %v2477_v21  ;;  %v3250_v11 = vld [vmem:[#allocation4 + $0x22] sm:$0xff]  ;;  %v3231_v30 = vpack.c.bf16 %v3212_v27, %v3212_v27  ;;  %v2680_v59 = vld [vmem:[%s12463_s16 + $0x124] sm:$0xff] }
 0x429   : > { %v3269_v7 = vpack.c.bf16 %v3250_v11, %v3250_v11 }
 0x42a   : > { %v2626_v4 = vadd.f32 %v2589_v60, %v14656_v24  ;;  %v2625_v56 = vadd.f32 %v2588_v55, %v14541_v15  ;;  %v3365_v12 = vunpack.c.l.b16 %v3231_v30  ;;  %v15769_v30 = vld [vmem:[#allocation34_spill] sm:$0xff] }
 0x42b   : > { %v3423_v43 = vunpack.c.l.b16 %v3269_v7 }
 0x42c   : > { %v12173_v25 = vpop.eup %12172  ;;  %v2924_v20 = vadd.f32 %v2887_v52, %v2626_v4  ;;  %2556 = vperm.xlu2 %12132, %v2380_v41  }
 0x42d   : > { %v12175_v9 = vpop.eup %12174  ;;  %3036 = vst [vmem:[#allocation3 + $0x80] sm:$0xff] %v12173_v25  ;;  %2268 = vperm.xlu1 %12131, %v2084_v17   ;;  %2263 = vperm.xlu0 %12130, %v2083_v38  }
 0x42e   : > { %3035 = vst [vmem:[#allocation3 + $0x78] sm:$0xff] %v12175_v9  ;;  %v2965_v16 = vadd.f32 %v14641_v63, %v2924_v20  ;;  %v14904_v24 = vpop.permute.xlu2 %2506 }
 0x42f   : > { %v2775_v18 = vpop.permute.xlu1 %2774  ;;  %v2492_v2 = vpop.permute.xlu0 %2491  ;;  %v3213_v34 = vld [vmem:[#allocation4 + $0x29] sm:$0xff] }
 0x430   : > { %v3251_v46 = vld [vmem:[#allocation4 + $0x2a] sm:$0xff]  ;;  %12176 = vtanh.f32 %v2965_v16  ;;  %v2886_v53 = vmul.f32 %v14623_v28, %v2775_v18  ;;  %v3232_v32 = vpack.c.bf16 %v3213_v34, %v3213_v34  ;;  %v2591_v0 = vmul.f32 %v14604_v40, %v2492_v2 }
 0x431   : > { %v3270_v54 = vpack.c.bf16 %v3251_v46, %v3251_v46  ;;  %v3195_v40 = vpack.c.bf16 %v14890_v58, %v14890_v58  ;;  %v2679_v58 = vld [vmem:[%s12463_s16 + $0x11c] sm:$0xff] }
 0x432   : > { %v2923_v10 = vadd.f32 %v2886_v53, %v2625_v56  ;;  %v3366_v33 = vunpack.c.l.b16 %v3232_v32  ;;  %v2628_v5 = vadd.f32 %v2591_v0, %v14565_v42  ;;  %v14937_v16 = vld [vmem:[%s15726_s1 + $0x1] ss:$0 sm:$0xff]  ;;  %v14944_v53 = vld [vmem:[%s15726_s1] ss:$0 sm:$0xff]  ;;  %v15770_v32 = vld [vmem:[#allocation13_spill] sm:$0xff] }
 0x433   : > { %v3424_v57 = vunpack.c.l.b16 %v3270_v54  ;;  %v3309_v21 = vunpack.c.l.b16 %v3195_v40  ;;  %v1997_v18 = vmul.f32 %v14937_v16, %v15769_v30  ;;  %v14951_v54 = vld [vmem:[%s15726_s1 + $0x2] ss:$0 sm:$0xff]  ;;  %v15776_v30 = vld [vmem:[#allocation19_spill] sm:$0xff] }
 0x434   : > { %v2964_v45 = vadd.f32 %v14641_v63, %v2923_v10  ;;  %2854 = vperm.xlu2 %12132, %v2678_v13   ;;  %v3382_v15 = vpack.c.b16 %v3366_v33, %v3365_v12  ;;  %v3073_v62 = vld [vmem:[#allocation3 + $0x80] ss:$2 sm:$0xff]  ;;  %v3111_v29 = vld [vmem:[#allocation3 + $0x81] ss:$2 sm:$0xff]  ;;  %v1736_v13 = vmul.f32 %v14944_v53, %v15770_v32 }
 0x435   : > { %2566 = vperm.xlu1 %12131, %v2382_v6   ;;  %2561 = vperm.xlu0 %12130, %v2381_v39   ;;  %v3440_v49 = vpack.c.b16 %v3424_v57, %v3423_v43  ;;  %v3071_v44 = vld [vmem:[#allocation3 + $0x70] ss:$2 sm:$0xff]  ;;  %v3109_v8 = vld [vmem:[#allocation3 + $0x71] ss:$2 sm:$0xff]  ;;  %v14915_v61 = vmax.f32 %v3073_v62, %v3111_v29 }
 0x436   : > { %v12177_v48 = vpop.eup %12176  ;;  %12178 = vtanh.f32 %v2964_v45  ;;  %3730 = vmatmul.bf16.gmra.mxu1 %v3382_v15  ;;  %v14917_v26 = vpop.permute.xlu2 %2799  ;;  %v3139_v14 = vmax.f32 %v3071_v44, %v3109_v8  ;;  %v2034_v45 = vadd.f32 %v1997_v18, %v1736_v13  ;;  %v1738_v18 = vmul.f32 %v14944_v53, %v15776_v30 }
 0x437   : > { %3039 = vst [vmem:[#allocation3 + $0x98] sm:$0xff] %v12177_v48  ;;  %3788 = vmatmul.bf16.gmra.mxu2 %v3440_v49  ;;  %v2790_v31 = vpop.permute.xlu1 %2789  ;;  %v2785_v51 = vpop.permute.xlu0 %2784  ;;  %v3197_v57 = vpack.c.bf16 %v14915_v61, %v14915_v61  ;;  %v15771_v49 = vld [vmem:[#allocation28_spill] sm:$0xff] }
 0x438   : > { %v2889_v47 = vmul.f32 %v14623_v28, %v2790_v31  ;;  %v2888_v1 = vmul.f32 %v14623_v28, %v2785_v51  ;;  %3158 = vst [vmem:[#allocation4 + $0x38] sm:$0xff] %v3139_v14  ;;  %v3196_v3 = vpack.c.bf16 %v3139_v14, %v3139_v14  ;;  %v1996_v44 = vmul.f32 %v14937_v16, %v15771_v49  ;;  %v14963_v48 = vld [vmem:[%s15726_s1 + $0x3] ss:$0 sm:$0xff] }
 0x439   : > { %3159 = vst [vmem:[#allocation4 + $0x40] sm:$0xff] %v14915_v61  ;;  %v3311_v14 = vunpack.c.l.b16 %v3197_v57  ;;  %v2294_v51 = vmul.f32 %v14951_v54, %v14877_v50 }
 0x43a   : > { %v2926_v37 = vadd.f32 %v2889_v47, %v2628_v5  ;;  %v2925_v19 = vadd.f32 %v2888_v1, %v2627_v22  ;;  %v3310_v36 = vunpack.c.l.b16 %v3196_v3  ;;  %v15772_v22 = vld [vmem:[#allocation17_spill] sm:$0xff]  ;;  %v14973_v5 = vld [vmem:[%s15726_s1 + $0x4] ss:$0 sm:$0xff] }
 0x43b   : > { %v1735_v31 = vmul.f32 %v14944_v53, %v15772_v22  ;;  %v2891_v47 = vmul.f32 %v14973_v5, %v14917_v26 }
 0x43c   : > { %v12179_v60 = vpop.eup %12178  ;;  %v2967_v41 = vadd.f32 %v14641_v63, %v2926_v37  ;;  %v2966_v52 = vadd.f32 %v14641_v63, %v2925_v19  ;;  %v3325_v42 = vpack.c.b16 %v3310_v36, %v3309_v21 }
 0x43d   : > { %3038 = vst [vmem:[#allocation3 + $0x90] sm:$0xff] %v12179_v60  ;;  %2864 = vperm.xlu1 %12131, %v2680_v59   ;;  %2859 = vperm.xlu0 %12130, %v2679_v58   ;;  %v2033_v37 = vadd.f32 %v1996_v44, %v1735_v31  ;;  %v15773_v58 = vld [vmem:[#allocation33_spill] sm:$0xff] }
 0x43e   : > { %12180 = vtanh.f32 %v2967_v41  ;;  %v14930_v28 = vpop.permute.xlu2 %2218  ;;  %3677 = vmatmul.bf16.gmra.mxu0 %v3325_v42  ;;  %v1998_v21 = vmul.f32 %v14937_v16, %v15773_v58  ;;  %v14983_v41 = vld [vmem:[%s15727_s2] ss:$0 sm:$0xff] }
 0x43f   : > { %12182 = vtanh.f32 %v2966_v52  ;;  %v14932_v4 = vpop.permute.xlu1 %2208  ;;  %v2204_v17 = vpop.permute.xlu0 %2203  ;;  %v3214_v38 = vld [vmem:[#allocation4 + $0x31] sm:$0xff]  ;;  %v2331_v50 = vadd.f32 %v2294_v51, %v2033_v37 }
 0x440   : > { %v3252_v27 = vld [vmem:[#allocation4 + $0x32] sm:$0xff]  ;;  %v3233_v20 = vpack.c.bf16 %v3214_v38, %v3214_v38  ;;  %v3253_v55 = vld [vmem:[#allocation4 + $0x3a] sm:$0xff]  ;;  %v2295_v10 = vmul.f32 %v14951_v54, %v2204_v17 }
 0x441   : > { %v3215_v25 = vld [vmem:[#allocation4 + $0x39] sm:$0xff]  ;;  %v3271_v11 = vpack.c.bf16 %v3252_v27, %v3252_v27  ;;  %v3272_v63 = vpack.c.bf16 %v3253_v55, %v3253_v55  ;;  %v15774_v17 = vld [vmem:[#allocation20_spill] sm:$0xff] }
 0x442   : > { %v3234_v9 = vpack.c.bf16 %v3215_v25, %v3215_v25  ;;  %v3367_v2 = vunpack.c.l.b16 %v3233_v20  ;;  %v2332_v8 = vadd.f32 %v2295_v10, %v2034_v45  ;;  %v1737_v38 = vmul.f32 %v14944_v53, %v15774_v17  ;;  %v15775_v27 = vld [vmem:[#allocation29_spill] sm:$0xff] }
 0x443   : > { %v3425_v34 = vunpack.c.l.b16 %v3271_v11  ;;  %v3426_v7 = vunpack.c.l.b16 %v3272_v63  ;;  %v1999_v25 = vmul.f32 %v14937_v16, %v15775_v27  ;;  %v2296_v20 = vmul.f32 %v14951_v54, %v14932_v4 }
 0x444   : > { %v3368_v46 = vunpack.c.l.b16 %v3234_v9  ;;  %v12181_v56 = vpop.eup %12180  ;;  %v3075_v6 = vld [vmem:[#allocation3 + $0x90] ss:$2 sm:$0xff]  ;;  %v3113_v39 = vld [vmem:[#allocation3 + $0x91] ss:$2 sm:$0xff] }
 0x445   : > { %v12183_v12 = vpop.eup %12182  ;;  %3041 = vst [vmem:[#allocation3 + $0xa8] sm:$0xff] %v12181_v56  ;;  %v3441_v35 = vpack.c.b16 %v3426_v7, %v3425_v34  ;;  %v3141_v43 = vmax.f32 %v3075_v6, %v3113_v39  ;;  %v2297_v34 = vmul.f32 %v14951_v54, %v14892_v23  ;;  %v2036_v32 = vadd.f32 %v1999_v25, %v1738_v18 }
 0x446   : > { %v3383_v33 = vpack.c.b16 %v3368_v46, %v3367_v2  ;;  %3040 = vst [vmem:[#allocation3 + $0xa0] sm:$0xff] %v12183_v12  ;;  %v14956_v0 = vpop.permute.xlu2 %2233  ;;  %v2035_v2 = vadd.f32 %v1998_v21, %v1737_v38  ;;  %v2594_v39 = vmul.f32 %v14963_v48, %v14904_v24 }
 0x447   : > { %3793 = vmatmul.bf16.gmra.mxu2 %v3441_v35  ;;  %v2502_v15 = vpop.permute.xlu1 %2501  ;;  %v2497_v62 = vpop.permute.xlu0 %2496  ;;  %3160 = vst [vmem:[#allocation4 + $0x48] sm:$0xff] %v3141_v43  ;;  %v3198_v29 = vpack.c.bf16 %v3141_v43, %v3141_v43  ;;  %v2334_v6 = vadd.f32 %v2297_v34, %v2036_v32  ;;  %v15779_v34 = vld [vmem:[#allocation36_spill] sm:$0xff] }
 0x448   : > { %3735 = vmatmul.bf16.gmra.mxu1 %v3383_v33  ;;  %v2593_v61 = vmul.f32 %v14963_v48, %v2502_v15  ;;  %v2592_v59 = vmul.f32 %v14963_v48, %v2497_v62  ;;  %v2333_v4 = vadd.f32 %v2296_v20, %v2035_v2 }
 0x449   : > { %v3312_v40 = vunpack.c.l.b16 %v3198_v29 }
 0x44a   : > { %v2630_v1 = vadd.f32 %v2593_v61, %v2332_v8  ;;  %v2629_v9 = vadd.f32 %v2592_v59, %v2331_v50  ;;  %v2631_v45 = vadd.f32 %v2594_v39, %v2333_v4 }
 0x44b   : > { %v3326_v3 = vpack.c.b16 %v3312_v40, %v3311_v14 }
 0x44c   : > { %v2928_v19 = vadd.f32 %v2891_v47, %v2630_v1 }
 0x44d   : > { %v3077_v36 = vld [vmem:[#allocation3 + $0xa0] ss:$2 sm:$0xff]  ;;  %v3115_v60 = vld [vmem:[#allocation3 + $0xa1] ss:$2 sm:$0xff] }
 0x44e   : > { %v2969_v52 = vadd.f32 %v14983_v41, %v2928_v19  ;;  %v14986_v26 = vpop.permute.xlu2 %2526  ;;  %3682 = vmatmul.bf16.gmra.mxu0 %v3326_v3  ;;  %v14988_v42 = vmax.f32 %v3077_v36, %v3115_v60  ;;  %v3216_v7 = vld [vmem:[#allocation4 + $0x41] sm:$0xff] }
 0x44f   : > { %v2795_v55 = vpop.permute.xlu1 %2794  ;;  %v2512_v11 = vpop.permute.xlu0 %2511  ;;  %v3254_v56 = vld [vmem:[#allocation4 + $0x42] sm:$0xff]  ;;  %v3235_v12 = vpack.c.bf16 %v3216_v7, %v3216_v7 }
 0x450   : > { %12184 = vtanh.f32 %v2969_v52  ;;  %v2890_v63 = vmul.f32 %v14973_v5, %v2795_v55  ;;  %3161 = vst [vmem:[#allocation4 + $0x50] sm:$0xff] %v14988_v42  ;;  %v2595_v13 = vmul.f32 %v14963_v48, %v2512_v11  ;;  %v3273_v33 = vpack.c.bf16 %v3254_v56, %v3254_v56  ;;  %v15777_v36 = vld [vmem:[#allocation35_spill] sm:$0xff]  ;;  %v15778_v52 = vld [vmem:[#allocation22_spill] sm:$0xff] }
 0x451   : > { %v3369_v14 = vunpack.c.l.b16 %v3235_v12  ;;  %v2001_v60 = vmul.f32 %v14937_v16, %v15777_v36  ;;  %v1740_v17 = vmul.f32 %v14944_v53, %v15778_v52  ;;  %v3199_v11 = vpack.c.bf16 %v14988_v42, %v14988_v42 }
 0x452   : > { %v2927_v46 = vadd.f32 %v2890_v63, %v2629_v9  ;;  %v2632_v23 = vadd.f32 %v2595_v13, %v2334_v6  ;;  %v3427_v24 = vunpack.c.l.b16 %v3273_v33  ;;  %v15780_v13 = vld [vmem:[#allocation14_spill] sm:$0xff]  ;;  %v2298_v42 = vmul.f32 %v14951_v54, %v14930_v28 }
 0x453   : > { %v2038_v9 = vadd.f32 %v2001_v60, %v1740_v17  ;;  %v3313_v32 = vunpack.c.l.b16 %v3199_v11 }
 0x454   : > { %v2968_v10 = vadd.f32 %v14983_v41, %v2927_v46  ;;  %v2000_v46 = vmul.f32 %v14937_v16, %v15779_v34 }
 0x456   : > { %v12185_v35 = vpop.eup %12184  ;;  %12186 = vtanh.f32 %v2968_v10  ;;  %v2820_v43 = vpop.permute.xlu2 %2819  ;;  %v1739_v10 = vmul.f32 %v14944_v53, %v15780_v13 }
 0x457   : > { %3043 = vst [vmem:[#allocation3 + $0xb8] sm:$0xff] %v12185_v35  ;;  %v2810_v57 = vpop.permute.xlu1 %2809  ;;  %v2805_v15 = vpop.permute.xlu0 %2804  ;;  %v3217_v62 = vld [vmem:[#allocation4 + $0x49] sm:$0xff]  ;;  %v2895_v6 = vmul.f32 %v14973_v5, %v2820_v43  ;;  %v15782_v43 = vld [vmem:[#allocation21_spill] sm:$0xff] }
 0x458   : > { %v3255_v29 = vld [vmem:[#allocation4 + $0x4a] sm:$0xff]  ;;  %v2893_v49 = vmul.f32 %v14973_v5, %v2810_v57  ;;  %v2892_v44 = vmul.f32 %v14973_v5, %v2805_v15  ;;  %v3236_v8 = vpack.c.bf16 %v3217_v62, %v3217_v62  ;;  %v2037_v33 = vadd.f32 %v2000_v46, %v1739_v10  ;;  %v15781_v57 = vld [vmem:[#allocation30_spill] sm:$0xff] }
 0x459   : > { %v3274_v61 = vpack.c.bf16 %v3255_v29, %v3255_v29 }
 0x45a   : > { %v2930_v40 = vadd.f32 %v2893_v49, %v2632_v23  ;;  %v2929_v22 = vadd.f32 %v2892_v44, %v2631_v45  ;;  %v3370_v31 = vunpack.c.l.b16 %v3236_v8  ;;  %v2002_v45 = vmul.f32 %v14937_v16, %v15781_v57 }
 0x45b   : > { %v3428_v51 = vunpack.c.l.b16 %v3274_v61  ;;  %v2335_v29 = vadd.f32 %v2298_v42, %v2037_v33  ;;  %v1741_v8 = vmul.f32 %v14944_v53, %v15782_v43  ;;  %v15783_v61 = vld [vmem:[#allocation38_spill] sm:$0xff] }
 0x45c   : > { %v12187_v47 = vpop.eup %12186  ;;  %v2971_v1 = vadd.f32 %v14983_v41, %v2930_v40  ;;  %v2970_v3 = vadd.f32 %v14983_v41, %v2929_v22  ;;  %v3384_v37 = vpack.c.b16 %v3370_v31, %v3369_v14  ;;  %v2003_v14 = vmul.f32 %v14937_v16, %v15783_v61 }
 0x45d   : > { %v3442_v19 = vpack.c.b16 %v3428_v51, %v3427_v24  ;;  %3042 = vst [vmem:[#allocation3 + $0xb0] sm:$0xff] %v12187_v47  ;;  %v15784_v47 = vld [vmem:[#allocation15_spill] sm:$0xff] }
 0x45e   : > { %12188 = vtanh.f32 %v2971_v1  ;;  %3740 = vmatmul.bf16.gmra.mxu1 %v3384_v37  ;;  %v15010_v59 = vpop.permute.xlu2 %2238  ;;  %v1742_v1 = vmul.f32 %v14944_v53, %v15784_v47  ;;  %v2301_v37 = vmul.f32 %v14951_v54, %v14956_v0 }
 0x45f   : > { %3798 = vmatmul.bf16.gmra.mxu2 %v3442_v19  ;;  %12190 = vtanh.f32 %v2970_v3  ;;  %v2229_v58 = vpop.permute.xlu1 %2228  ;;  %v2224_v21 = vpop.permute.xlu0 %2223  ;;  %v2039_v3 = vadd.f32 %v2002_v45, %v1741_v8  ;;  %v15786_v8 = vld [vmem:[#allocation23_spill] sm:$0xff] }
 0x460   : > { %v2299_v38 = vmul.f32 %v14951_v54, %v2224_v21  ;;  %v2300_v24 = vmul.f32 %v14951_v54, %v2229_v58  ;;  %v2040_v60 = vadd.f32 %v2003_v14, %v1742_v1  ;;  %v1744_v61 = vmul.f32 %v14944_v53, %v15786_v8 }
 0x462   : > { %v2336_v7 = vadd.f32 %v2299_v38, %v2038_v9  ;;  %v2337_v58 = vadd.f32 %v2300_v24, %v2039_v3  ;;  %v2338_v17 = vadd.f32 %v2301_v37, %v2040_v60  ;;  %v2598_v38 = vmul.f32 %v14963_v48, %v14986_v26  ;;  %v15787_v37 = vld [vmem:[#allocation32_spill] sm:$0xff] }
 0x464   : > { %v12189_v50 = vpop.eup %12188  ;;  %v3079_v27 = vld [vmem:[#allocation3 + $0xb0] ss:$2 sm:$0xff]  ;;  %v3117_v25 = vld [vmem:[#allocation3 + $0xb1] ss:$2 sm:$0xff]  ;;  %v2635_v9 = vadd.f32 %v2598_v38, %v2337_v58 }
 0x465   : > { %v12191_v20 = vpop.eup %12190  ;;  %3045 = vst [vmem:[#allocation3 + $0xc8] sm:$0xff] %v12189_v50  ;;  %v3143_v55 = vmax.f32 %v3079_v27, %v3117_v25 }
 0x466   : > { %3044 = vst [vmem:[#allocation3 + $0xc0] sm:$0xff] %v12191_v20  ;;  %v15019_v63 = vpop.permute.xlu2 %2253 }
 0x467   : > { %v2522_v30 = vpop.permute.xlu1 %2521  ;;  %v2517_v18 = vpop.permute.xlu0 %2516  ;;  %3162 = vst [vmem:[#allocation4 + $0x58] sm:$0xff] %v3143_v55  ;;  %v3200_v2 = vpack.c.bf16 %v3143_v55, %v3143_v55 }
 0x468   : > { %v2597_v56 = vmul.f32 %v14963_v48, %v2522_v30  ;;  %v2596_v23 = vmul.f32 %v14963_v48, %v2517_v18 }
 0x469   : > { %v3314_v4 = vunpack.c.l.b16 %v3200_v2 }
 0x46a   : > { %v2634_v39 = vadd.f32 %v2597_v56, %v2336_v7  ;;  %v2633_v31 = vadd.f32 %v2596_v23, %v2335_v29 }
 0x46b   : > { %v3327_v12 = vpack.c.b16 %v3314_v4, %v3313_v32 }
 0x46c   : > { %v2932_v35 = vadd.f32 %v2895_v6, %v2634_v39 }
 0x46d   : > { %3687 = vmatmul.bf16.gmra.mxu0 %v3327_v12  ;;  %v3081_v15 = vld [vmem:[#allocation3 + $0xc0] ss:$2 sm:$0xff]  ;;  %v3119_v62 = vld [vmem:[#allocation3 + $0xc1] ss:$2 sm:$0xff] }
 0x46e   : > { %v2973_v49 = vadd.f32 %v14983_v41, %v2932_v35  ;;  %v15033_v44 = vpop.permute.xlu2 %2546  ;;  %v15035_v28 = vmax.f32 %v3081_v15, %v3119_v62  ;;  %v3218_v21 = vld [vmem:[#allocation4 + $0x51] sm:$0xff]  ;;  %v15785_v15 = vld [vmem:[#allocation31_spill] sm:$0xff] }
 0x46f   : > { %v2815_v40 = vpop.permute.xlu1 %2814  ;;  %v2532_v22 = vpop.permute.xlu0 %2531  ;;  %v3256_v36 = vld [vmem:[#allocation4 + $0x52] sm:$0xff]  ;;  %v3237_v27 = vpack.c.bf16 %v3218_v21, %v3218_v21  ;;  %v2005_v62 = vmul.f32 %v14937_v16, %v15785_v15  ;;  %v15794_v15 = vld [vmem:[#allocation39_spill] sm:$0xff] }
 0x470   : > { %12192 = vtanh.f32 %v2973_v49  ;;  %v2894_v51 = vmul.f32 %v14973_v5, %v2815_v40  ;;  %3163 = vst [vmem:[#allocation4 + $0x60] sm:$0xff] %v15035_v28  ;;  %v2599_v50 = vmul.f32 %v14963_v48, %v2532_v22  ;;  %v3275_v25 = vpack.c.bf16 %v3256_v36, %v3256_v36  ;;  %v15063_v49 = vld [vmem:[%s15729_s4] ss:$0 sm:$0xff] }
 0x471   : > { %v3371_v26 = vunpack.c.l.b16 %v3237_v27  ;;  %v3201_v47 = vpack.c.bf16 %v15035_v28, %v15035_v28  ;;  %v2042_v1 = vadd.f32 %v2005_v62, %v1744_v61  ;;  %v2007_v62 = vmul.f32 %v14937_v16, %v15794_v15 }
 0x472   : > { %v2931_v19 = vadd.f32 %v2894_v51, %v2633_v31  ;;  %v2636_v0 = vadd.f32 %v2599_v50, %v2338_v17  ;;  %v3429_v32 = vunpack.c.l.b16 %v3275_v25  ;;  %v15788_v50 = vld [vmem:[#allocation25_spill] sm:$0xff] }
 0x473   : > { %v15789_v17 = vld [vmem:[#allocation37_spill] sm:$0xff] }
 0x474   : > { %v2972_v52 = vadd.f32 %v14983_v41, %v2931_v19  ;;  %v2008_v19 = vmul.f32 %v14937_v16, %v15787_v37  ;;  %v2004_v38 = vmul.f32 %v14937_v16, %v15789_v17 }
 0x476   : > { %v12193_v20 = vpop.eup %12192  ;;  %12194 = vtanh.f32 %v2972_v52  ;;  %v15052_v55 = vpop.permute.xlu2 %2839  ;;  %v1747_v52 = vmul.f32 %v14944_v53, %v15788_v50 }
 0x477   : > { %3047 = vst [vmem:[#allocation3 + $0xd8] sm:$0xff] %v12193_v20  ;;  %v2830_v11 = vpop.permute.xlu1 %2829  ;;  %v2825_v30 = vpop.permute.xlu0 %2824  ;;  %v3219_v18 = vld [vmem:[#allocation4 + $0x59] sm:$0xff] }
 0x478   : > { %v3257_v2 = vld [vmem:[#allocation4 + $0x5a] sm:$0xff]  ;;  %v2897_v34 = vmul.f32 %v14973_v5, %v2830_v11  ;;  %v2896_v46 = vmul.f32 %v14973_v5, %v2825_v30  ;;  %v3238_v7 = vpack.c.bf16 %v3219_v18, %v3219_v18  ;;  %v2302_v18 = vmul.f32 %v14951_v54, %v15010_v59 }
 0x479   : > { %v3276_v56 = vpack.c.bf16 %v3257_v2, %v3257_v2  ;;  %v2899_v2 = vmul.f32 %v14973_v5, %v15052_v55 }
 0x47a   : > { %v2934_v4 = vadd.f32 %v2897_v34, %v2636_v0  ;;  %v2933_v13 = vadd.f32 %v2896_v46, %v2635_v9  ;;  %v3372_v10 = vunpack.c.l.b16 %v3238_v7  ;;  %v3315_v0 = vunpack.c.l.b16 %v3201_v47  ;;  %v15790_v9 = vld [vmem:[#allocation24_spill] sm:$0xff] }
 0x47b   : > { %v3430_v42 = vunpack.c.l.b16 %v3276_v56  ;;  %v3663_v29 = vpop.f32.mrf.mxu0  ;;  %v1743_v30 = vmul.f32 %v14944_v53, %v15790_v9  ;;  %v2045_v7 = vadd.f32 %v2008_v19, %v1747_v52  ;;  %v2305_v19 = vmul.f32 %v14951_v54, %v15019_v63 }
 0x47c   : > { %v12195_v6 = vpop.eup %12194  ;;  %v2975_v39 = vadd.f32 %v14983_v41, %v2934_v4  ;;  %v2974_v12 = vadd.f32 %v14983_v41, %v2933_v13  ;;  %v3385_v33 = vpack.c.b16 %v3372_v10, %v3371_v26  ;;  %v3664_v21 = vadd.f32 %v15063_v49, %v3663_v29  ;;  %v15791_v13 = vld [vmem:[#allocation40_spill] sm:$0xff] }
 0x47d   : > { %v3443_v35 = vpack.c.b16 %v3430_v42, %v3429_v32  ;;  %3046 = vst [vmem:[#allocation3 + $0xd0] sm:$0xff] %v12195_v6  ;;  %v2041_v4 = vadd.f32 %v2004_v38, %v1743_v30  ;;  %v2006_v10 = vmul.f32 %v14937_v16, %v15791_v13 }
 0x47e   : > { %12196 = vtanh.f32 %v2975_v39  ;;  %3745 = vmatmul.bf16.gmra.mxu1 %v3385_v33  ;;  %v2259_v23 = vpop.permute.xlu2 %2258  ;;  %v15793_v33 = vld [vmem:[#allocation26_spill] sm:$0xff] }
 0x47f   : > { %3803 = vmatmul.bf16.gmra.mxu2 %v3443_v35  ;;  %12198 = vtanh.f32 %v2974_v12  ;;  %v2249_v57 = vpop.permute.xlu1 %2248  ;;  %v2244_v45 = vpop.permute.xlu0 %2243  ;;  %v2306_v25 = vmul.f32 %v14951_v54, %v2259_v23  ;;  %v15792_v12 = vld [vmem:[#allocation16_spill] sm:$0xff]  ;;  %v1746_v55 = vmul.f32 %v14944_v53, %v15793_v33  ;;  %v2339_v29 = vadd.f32 %v2302_v18, %v2041_v4 }
 0x480   : > { %v2303_v14 = vmul.f32 %v14951_v54, %v2244_v45  ;;  %v1745_v59 = vmul.f32 %v14944_v53, %v15792_v12 }
 0x481   : > { %v2343_v35 = vadd.f32 %v2306_v25, %v2045_v7 }
 0x482   : > { %v2340_v27 = vadd.f32 %v2303_v14, %v2042_v1  ;;  %v2043_v1 = vadd.f32 %v2006_v10, %v1745_v59 }
 0x483   : > { %v3665_v39 = vpop.f32.mrf.mxu0 }
 0x484   : > { %v12197_v43 = vpop.eup %12196  ;;  %v3083_v40 = vld [vmem:[#allocation3 + $0xd0] ss:$2 sm:$0xff]  ;;  %v3121_v22 = vld [vmem:[#allocation3 + $0xd1] ss:$2 sm:$0xff] }
 0x485   : > { %v3721_v24 = vpop.f32.mrf.mxu1  ;;  %v12199_v31 = vpop.eup %12198  ;;  %3049 = vst [vmem:[#allocation3 + $0xe8] sm:$0xff] %v12197_v43  ;;  %v3145_v51 = vmax.f32 %v3083_v40, %v3121_v22  ;;  %v3666_v22 = vadd.f32 %v15063_v49, %v3665_v39 }
 0x486   : > { %3048 = vst [vmem:[#allocation3 + $0xe0] sm:$0xff] %v12199_v31  ;;  %v2557_v3 = vpop.permute.xlu2 %2556  ;;  %v3722_v20 = vadd.f32 %v3721_v24, %v3664_v21  ;;  %v2304_v24 = vmul.f32 %v14951_v54, %v2249_v57 }
 0x487   : > { %v2542_v36 = vpop.permute.xlu1 %2541  ;;  %v2537_v60 = vpop.permute.xlu0 %2536  ;;  %3164 = vst [vmem:[#allocation4 + $0x68] sm:$0xff] %v3145_v51  ;;  %v3202_v58 = vpack.c.bf16 %v3145_v51, %v3145_v51  ;;  %v2604_v56 = vmul.f32 %v14963_v48, %v2557_v3 }
 0x488   : > { %v2601_v28 = vmul.f32 %v14963_v48, %v2542_v36  ;;  %v2600_v6 = vmul.f32 %v14963_v48, %v2537_v60  ;;  %v2044_v36 = vadd.f32 %v2007_v62, %v1746_v55  ;;  %v2341_v17 = vadd.f32 %v2304_v24, %v2043_v1 }
 0x489   : > { %v3316_v11 = vunpack.c.l.b16 %v3202_v58  ;;  %v2641_v40 = vadd.f32 %v2604_v56, %v2343_v35 }
 0x48a   : > { %v2638_v34 = vadd.f32 %v2601_v28, %v2340_v27  ;;  %v3779_v46 = vpop.f32.mrf.mxu2  ;;  %v2637_v3 = vadd.f32 %v2600_v6, %v2339_v29  ;;  %v2342_v63 = vadd.f32 %v2305_v19, %v2044_v36 }
 0x48b   : > { %v3780_v26 = vadd.f32 %v3779_v46, %v3722_v20  ;;  %v3328_v32 = vpack.c.b16 %v3316_v11, %v3315_v0  ;;  %v2602_v0 = vmul.f32 %v14963_v48, %v15033_v44  ;;  %v3668_v10 = vpop.f32.mrf.mxu0 }
 0x48c   : > { %v2936_v42 = vadd.f32 %v2899_v2, %v2638_v34 }
 0x48d   : > { %12200 = vtanh.f32 %v3780_v26  ;;  %3692 = vmatmul.bf16.gmra.mxu0 %v3328_v32  ;;  %v3085_v23 = vld [vmem:[#allocation3 + $0xe0] ss:$2 sm:$0xff]  ;;  %v3123_v45 = vld [vmem:[#allocation3 + $0xe1] ss:$2 sm:$0xff]  ;;  %v3723_v8 = vpop.f32.mrf.mxu1  ;;  %v2639_v2 = vadd.f32 %v2602_v0, %v2341_v17 }
 0x48e   : > { %v2977_v43 = vadd.f32 %v14983_v41, %v2936_v42  ;;  %v2855_v61 = vpop.permute.xlu2 %2854  ;;  %v15096_v14 = vmax.f32 %v3085_v23, %v3123_v45  ;;  %v3724_v21 = vadd.f32 %v3723_v8, %v3666_v22  ;;  %v3220_v50 = vld [vmem:[#allocation4 + $0x61] sm:$0xff] }
 0x48f   : > { %v2902_v31 = vmul.f32 %v14973_v5, %v2855_v61  ;;  %v2835_v51 = vpop.permute.xlu1 %2834  ;;  %v2552_v47 = vpop.permute.xlu0 %2551  ;;  %v3258_v20 = vld [vmem:[#allocation4 + $0x62] sm:$0xff]  ;;  %v3239_v11 = vpack.c.bf16 %v3220_v50, %v3220_v50  ;;  %v15795_v50 = vld [vmem:[#allocation41_spill] sm:$0xff] }
 0x490   : > { %12202 = vtanh.f32 %v2977_v43  ;;  %v2898_v37 = vmul.f32 %v14973_v5, %v2835_v51  ;;  %3165 = vst [vmem:[#allocation4 + $0x70] sm:$0xff] %v15096_v14  ;;  %v2603_v27 = vmul.f32 %v14963_v48, %v2552_v47  ;;  %v3277_v56 = vpack.c.bf16 %v3258_v20, %v3258_v20  ;;  %v15796_v17 = vld [vmem:[#allocation42_spill] sm:$0xff] }
 0x491   : > { %v2939_v57 = vadd.f32 %v2902_v31, %v2641_v40  ;;  %v3373_v44 = vunpack.c.l.b16 %v3239_v11  ;;  %v3669_v43 = vadd.f32 %v15063_v49, %v3668_v10  ;;  %v3203_v19 = vpack.c.bf16 %v15096_v14, %v15096_v14  ;;  %v15797_v20 = vld [vmem:[#allocation18_spill] sm:$0xff] }
 0x492   : > { %v2935_v60 = vadd.f32 %v2898_v37, %v2637_v3  ;;  %v3781_v58 = vpop.f32.mrf.mxu2  ;;  %v2640_v30 = vadd.f32 %v2603_v27, %v2342_v63  ;;  %v3431_v33 = vunpack.c.l.b16 %v3277_v56  ;;  %v1748_v14 = vmul.f32 %v14944_v53, %v15797_v20  ;;  %v15798_v63 = vld [vmem:[#allocation27_spill] sm:$0xff] }
 0x493   : > { %v12201_v52 = vpop.eup %12200  ;;  %v2980_v38 = vadd.f32 %v14983_v41, %v2939_v57  ;;  %v3782_v28 = vadd.f32 %v3781_v58, %v3724_v21  ;;  %v3670_v51 = vpop.f32.mrf.mxu0  ;;  %v1749_v0 = vmul.f32 %v14944_v53, %v15798_v63 }
 0x494   : > { %3848 = vst.msk [vmem:[#allocation5] sm:$0xff] %vm3847_vm0, %v12201_v52  ;;  %v2976_v25 = vadd.f32 %v14983_v41, %v2935_v60  ;;  %v3671_v57 = vadd.f32 %v15063_v49, %v3670_v51  ;;  %v2010_v52 = vmul.f32 %v14937_v16, %v15795_v50 }
 0x495   : > { %12204 = vtanh.f32 %v2980_v38  ;;  %v2009_v38 = vmul.f32 %v14937_v16, %v15796_v17 }
 0x496   : > { %v12203_v9 = vpop.eup %12202  ;;  %12206 = vtanh.f32 %v2976_v25 }
 0x497   : > { %3051 = vst [vmem:[#allocation3 + $0xf8] sm:$0xff] %v12203_v9  ;;  %12208 = vtanh.f32 %v3782_v28  ;;  %v2850_v18 = vpop.permute.xlu1 %2849  ;;  %v2845_v34 = vpop.permute.xlu0 %2844  ;;  %v3221_v46 = vld [vmem:[#allocation4 + $0x69] sm:$0xff]  ;;  %v3317_v28 = vunpack.c.l.b16 %v3203_v19 }
 0x498   : > { %v3259_v7 = vld [vmem:[#allocation4 + $0x6a] sm:$0xff]  ;;  %v2901_v26 = vmul.f32 %v14973_v5, %v2850_v18  ;;  %v2900_v32 = vmul.f32 %v14973_v5, %v2845_v34  ;;  %v3240_v4 = vpack.c.bf16 %v3221_v46, %v3221_v46  ;;  %v2047_v46 = vadd.f32 %v2010_v52, %v1749_v0 }
 0x499   : > { %v3278_v13 = vpack.c.bf16 %v3259_v7, %v3259_v7  ;;  %v2046_v7 = vadd.f32 %v2009_v38, %v1748_v14 }
 0x49a   : > { %v2938_v42 = vadd.f32 %v2901_v26, %v2640_v30  ;;  %v2937_v6 = vadd.f32 %v2900_v32, %v2639_v2  ;;  %v3374_v39 = vunpack.c.l.b16 %v3240_v4 }
 0x49b   : > { %v3432_v12 = vunpack.c.l.b16 %v3278_v13  ;;  %v12205_v59 = vpop.eup %12204  ;;  %v3726_v45 = vpop.f32.mrf.mxu1 }
 0x49c   : > { %v12207_v55 = vpop.eup %12206  ;;  %3054 = vst [vmem:[#allocation3 + $0x110] sm:$0xff] %v12205_v59  ;;  %v2979_v35 = vadd.f32 %v14983_v41, %v2938_v42  ;;  %v2978_v23 = vadd.f32 %v14983_v41, %v2937_v6  ;;  %v3386_v15 = vpack.c.b16 %v3374_v39, %v3373_v44  ;;  %v3727_v24 = vadd.f32 %v3726_v45, %v3669_v43 }
 0x49d   : > { %v12209_v62 = vpop.eup %12208  ;;  %3050 = vst [vmem:[#allocation3 + $0xf0] sm:$0xff] %v12207_v55  ;;  %v3444_v29 = vpack.c.b16 %v3432_v12, %v3431_v33 }
 0x49e   : > { %3849 = vst.msk [vmem:[#allocation5 + $0x8] sm:$0xff] %vm3847_vm0, %v12209_v62  ;;  %12210 = vtanh.f32 %v2979_v35  ;;  %3750 = vmatmul.bf16.gmra.mxu1 %v3386_v15 }
 0x49f   : > { %12212 = vtanh.f32 %v2978_v23  ;;  %3808 = vmatmul.bf16.gmra.mxu2 %v3444_v29  ;;  %v2269_v8 = vpop.permute.xlu1 %2268  ;;  %v2264_v61 = vpop.permute.xlu0 %2263 }
 0x4a0   : > { %v2308_v11 = vmul.f32 %v14951_v54, %v2269_v8  ;;  %v2307_v9 = vmul.f32 %v14951_v54, %v2264_v61 }
 0x4a2   : > { %v3784_v40 = vpop.f32.mrf.mxu2  ;;  %v2345_v32 = vadd.f32 %v2308_v11, %v2047_v46  ;;  %v2344_v4 = vadd.f32 %v2307_v9, %v2046_v7 }
 0x4a3   : > { %v3785_v22 = vadd.f32 %v3784_v40, %v3727_v24  ;;  %v3728_v21 = vpop.f32.mrf.mxu1  ;;  %v3673_v6 = vpop.f32.mrf.mxu0 }
 0x4a4   : > { %v12211_v31 = vpop.eup %12210  ;;  %v3087_v47 = vld [vmem:[#allocation3 + $0xf0] ss:$2 sm:$0xff]  ;;  %v3125_v1 = vld [vmem:[#allocation3 + $0xf1] ss:$2 sm:$0xff]  ;;  %v3729_v27 = vadd.f32 %v3728_v21, %v3671_v57  ;;  %v3674_v43 = vadd.f32 %v15063_v49, %v3673_v6 }
 0x4a5   : > { %v12213_v3 = vpop.eup %12212  ;;  %3053 = vst [vmem:[#allocation3 + $0x108] sm:$0xff] %v12211_v31  ;;  %12214 = vtanh.f32 %v3785_v22  ;;  %v3147_v37 = vmax.f32 %v3087_v47, %v3125_v1 }
 0x4a6   : > { %3052 = vst [vmem:[#allocation3 + $0x100] sm:$0xff] %v12213_v3 }
 0x4a7   : > { %v2567_v36 = vpop.permute.xlu1 %2566  ;;  %v2562_v60 = vpop.permute.xlu0 %2561  ;;  %3166 = vst [vmem:[#allocation4 + $0x78] sm:$0xff] %v3147_v37  ;;  %v3204_v58 = vpack.c.bf16 %v3147_v37, %v3147_v37 }
 0x4a8   : > { %v2606_v16 = vmul.f32 %v14963_v48, %v2567_v36  ;;  %v2605_v56 = vmul.f32 %v14963_v48, %v2562_v60 }
 0x4a9   : > { %v3318_v25 = vunpack.c.l.b16 %v3204_v58 }
 0x4aa   : > { %v3786_v30 = vpop.f32.mrf.mxu2  ;;  %v2643_v10 = vadd.f32 %v2606_v16, %v2345_v32  ;;  %v2642_v42 = vadd.f32 %v2605_v56, %v2344_v4 }
 0x4ab   : > { %v12215_v18 = vpop.eup %12214  ;;  %v3787_v2 = vadd.f32 %v3786_v30, %v3729_v27  ;;  %v3329_v34 = vpack.c.b16 %v3318_v25, %v3317_v28  ;;  %v3675_v22 = vpop.f32.mrf.mxu0 }
 0x4ac   : > { %3850 = vst.msk [vmem:[#allocation5 + $0x10] sm:$0xff] %vm3847_vm0, %v12215_v18  ;;  %v3676_v52 = vadd.f32 %v15063_v49, %v3675_v22 }
 0x4ad   : > { %12216 = vtanh.f32 %v3787_v2  ;;  %3697 = vmatmul.bf16.gmra.mxu0 %v3329_v34  ;;  %v3089_v26 = vld [vmem:[#allocation3 + $0x100] ss:$2 sm:$0xff]  ;;  %v3127_v53 = vld [vmem:[#allocation3 + $0x101] ss:$2 sm:$0xff] }
 0x4ae   : > { %v15133_v13 = vmax.f32 %v3089_v26, %v3127_v53  ;;  %v3222_v35 = vld [vmem:[#allocation4 + $0x71] sm:$0xff] }
 0x4af   : > { %v2865_v54 = vpop.permute.xlu1 %2864  ;;  %v2860_v44 = vpop.permute.xlu0 %2859  ;;  %v3260_v23 = vld [vmem:[#allocation4 + $0x72] sm:$0xff]  ;;  %v3241_v62 = vpack.c.bf16 %v3222_v35, %v3222_v35 }
 0x4b0   : > { %v2904_v39 = vmul.f32 %v14973_v5, %v2865_v54  ;;  %v2903_v12 = vmul.f32 %v14973_v5, %v2860_v44  ;;  %3167 = vst [vmem:[#allocation4 + $0x80] sm:$0xff] %v15133_v13  ;;  %v3279_v29 = vpack.c.bf16 %v3260_v23, %v3260_v23  ;;  %v3205_v9 = vpack.c.bf16 %v15133_v13, %v15133_v13 }
 0x4b1   : > { %v3375_v51 = vunpack.c.l.b16 %v3241_v62 }
 0x4b2   : > { %v2941_v48 = vadd.f32 %v2904_v39, %v2643_v10  ;;  %v2940_v59 = vadd.f32 %v2903_v12, %v2642_v42  ;;  %v3433_v1 = vunpack.c.l.b16 %v3279_v29  ;;  %v3319_v16 = vunpack.c.l.b16 %v3205_v9 }
 0x4b3   : > { %v12217_v33 = vpop.eup %12216  ;;  %v3731_v55 = vpop.f32.mrf.mxu1 }
 0x4b4   : > { %3851 = vst.msk [vmem:[#allocation5 + $0x18] sm:$0xff] %vm3847_vm0, %v12217_v33  ;;  %v2982_v45 = vadd.f32 %v14983_v41, %v2941_v48  ;;  %v2981_v15 = vadd.f32 %v14983_v41, %v2940_v59  ;;  %v3732_v40 = vadd.f32 %v3731_v55, %v3674_v43 }
 0x4b6   : > { %12218 = vtanh.f32 %v2982_v45 }
 0x4b7   : > { %12220 = vtanh.f32 %v2981_v15  ;;  %v3223_v5 = vld [vmem:[#allocation4 + $0x79] sm:$0xff] }
 0x4b8   : > { %v3261_v8 = vld [vmem:[#allocation4 + $0x7a] sm:$0xff]  ;;  %v3242_v61 = vpack.c.bf16 %v3223_v5, %v3223_v5 }
 0x4b9   : > { %v3280_v24 = vpack.c.bf16 %v3261_v8, %v3261_v8 }
 0x4ba   : > { %v3789_v31 = vpop.f32.mrf.mxu2  ;;  %v3376_v47 = vunpack.c.l.b16 %v3242_v61 }
 0x4bb   : > { %v3434_v3 = vunpack.c.l.b16 %v3280_v24  ;;  %v3790_v37 = vadd.f32 %v3789_v31, %v3732_v40  ;;  %v3733_v19 = vpop.f32.mrf.mxu1  ;;  %v3893_v41 = vld [vmem:[#allocation5 + $0x2] ss:$4 sm:$0xff]  ;;  %v3903_v21 = vld [vmem:[#allocation5 + $0x3] ss:$4 sm:$0xff]  ;;  %v3678_v27 = vpop.f32.mrf.mxu0 }
 0x4bc   : > { %v12219_v57 = vpop.eup %12218  ;;  %v3912_v36 = vmax.f32 %v3893_v41, %v3903_v21  ;;  %v3387_v60 = vpack.c.b16 %v3376_v47, %v3375_v51  ;;  %v3734_v17 = vadd.f32 %v3733_v19, %v3676_v52  ;;  %v3679_v18 = vadd.f32 %v15063_v49, %v3678_v27 }
 0x4bd   : > { %v3445_v58 = vpack.c.b16 %v3434_v3, %v3433_v1  ;;  %v12221_v50 = vpop.eup %12220  ;;  %3056 = vst [vmem:[#allocation3 + $0x120] sm:$0xff] %v12219_v57  ;;  %12222 = vtanh.f32 %v3790_v37 }
 0x4be   : > { %3055 = vst [vmem:[#allocation3 + $0x118] sm:$0xff] %v12221_v50  ;;  %3922 = vrot.lane.b32.xlu2 %v3912_v36, %s12334_s22  ;;  %3755 = vmatmul.bf16.gmra.mxu1 %v3387_v60 }
 0x4bf   : > { %3813 = vmatmul.bf16.gmra.mxu2 %v3445_v58 }
 0x4c2   : > { %v3791_v38 = vpop.f32.mrf.mxu2 }
 0x4c3   : > { %v12223_v28 = vpop.eup %12222  ;;  %v3792_v25 = vadd.f32 %v3791_v38, %v3734_v17  ;;  %v3680_v32 = vpop.f32.mrf.mxu0 }
 0x4c4   : > { %3852 = vst.msk [vmem:[#allocation5 + $0x20] sm:$0xff] %vm3847_vm0, %v12223_v28  ;;  %v3093_v14 = vld [vmem:[#allocation3 + $0x120] ss:$2 sm:$0xf]  ;;  %v3681_v13 = vadd.f32 %v15063_v49, %v3680_v32 }
 0x4c5   : > { %v3736_v20 = vpop.f32.mrf.mxu1  ;;  %12224 = vtanh.f32 %v3792_v25  ;;  %v3091_v63 = vld [vmem:[#allocation3 + $0x110] ss:$2 sm:$0xff]  ;;  %v3129_v0 = vld [vmem:[#allocation3 + $0x111] ss:$2 sm:$0xff] }
 0x4c6   : > { %v3149_v11 = vmax.f32 %v3091_v63, %v3129_v0  ;;  %v3131_v30 = vld [vmem:[#allocation3 + $0x121] ss:$2 sm:$0xf]  ;;  %v3737_v46 = vadd.f32 %v3736_v20, %v3679_v18 }
 0x4c7   : > { %v3150_v2 = vmax.f32 %v3093_v14, %v3131_v30 }
 0x4c8   : > { %3168 = vst [vmem:[#allocation4 + $0x88] sm:$0xff] %v3149_v11  ;;  %v3206_v34 = vpack.c.bf16 %v3149_v11, %v3149_v11 }
 0x4c9   : > { %3169 = vst [vmem:[#allocation4 + $0x90] sm:$0xf] %v3150_v2 }
 0x4ca   : > { %v3794_v7 = vpop.f32.mrf.mxu2  ;;  %v3320_v56 = vunpack.c.l.b16 %v3206_v34 }
 0x4cb   : > { %v12225_v26 = vpop.eup %12224  ;;  %v3795_v53 = vadd.f32 %v3794_v7, %v3737_v46  ;;  %v3683_v40 = vpop.f32.mrf.mxu0 }
 0x4cc   : > { %3853 = vst.msk [vmem:[#allocation5 + $0x28] sm:$0xff] %vm3847_vm0, %v12225_v26  ;;  %v3330_v4 = vpack.c.b16 %v3320_v56, %v3319_v16  ;;  %v3684_v19 = vadd.f32 %v15063_v49, %v3683_v40 }
 0x4cd   : > { %12226 = vtanh.f32 %v3795_v53  ;;  %v3738_v54 = vpop.f32.mrf.mxu1 }
 0x4ce   : > { %3702 = vmatmul.bf16.gmra.mxu0 %v3330_v4  ;;  %v3739_v48 = vadd.f32 %v3738_v54, %v3681_v13  ;;  %v3942_v13 = vlaneseq }
 0x4cf   : > { %v3224_v44 = vld [vmem:[#allocation4 + $0x81] sm:$0xff] }
 0x4d0   : > { %v3262_v10 = vld [vmem:[#allocation4 + $0x82] sm:$0xff]  ;;  %v3243_v6 = vpack.c.bf16 %v3224_v44, %v3224_v44  ;;  %v3263_v39 = vld [vmem:[#allocation4 + $0x8a] sm:$0xff]  ;;  %v3264_v31 = vld [vmem:[#allocation4 + $0x92] sm:$0x3]  ;;  %vm15162_vm1 = vcmp.lt.s32.totalorder %v3942_v13, 128  ;;  %vm4116_vm3 = vcmp.lt.s32.totalorder %v3942_v13, 64 }
 0x4d1   : > { %v3225_v42 = vld [vmem:[#allocation4 + $0x89] sm:$0xff]  ;;  %v3281_v12 = vpack.c.bf16 %v3262_v10, %v3262_v10  ;;  %v3282_v33 = vpack.c.bf16 %v3263_v39, %v3263_v39  ;;  %v3226_v22 = vld [vmem:[#allocation4 + $0x91] sm:$0x3]  ;;  %v3283_v37 = vpack.c.bf16 %v3264_v31, %v3264_v31 }
 0x4d2   : > { %v3244_v59 = vpack.c.bf16 %v3225_v42, %v3225_v42  ;;  %v3188_v55 = vld [vmem:[#allocation4 + $0x90] sm:$0x3]  ;;  %v3796_v35 = vpop.f32.mrf.mxu2  ;;  %v3377_v23 = vunpack.c.l.b16 %v3243_v6  ;;  %v3245_v3 = vpack.c.bf16 %v3226_v22, %v3226_v22 }
 0x4d3   : > { %v3435_v45 = vunpack.c.l.b16 %v3281_v12  ;;  %v12227_v15 = vpop.eup %12226  ;;  %v3797_v62 = vadd.f32 %v3796_v35, %v3739_v48  ;;  %v3436_v43 = vunpack.c.l.b16 %v3282_v33  ;;  %v3207_v5 = vpack.c.bf16 %v3188_v55, %v3188_v55  ;;  %v3685_v58 = vpop.f32.mrf.mxu0  ;;  %v3868_v44 = vld [vmem:[#allocation5] ss:$4 sm:$0xff]  ;;  %v3878_v10 = vld [vmem:[#allocation5 + $0x1] ss:$4 sm:$0xff] }
 0x4d4   : > { %v3378_v29 = vunpack.c.l.b16 %v3244_v59  ;;  %3854 = vst.msk [vmem:[#allocation5 + $0x30] sm:$0xff] %vm3847_vm0, %v12227_v15  ;;  %v3379_v57 = vunpack.c.l.b16 %v3245_v3  ;;  %v3437_v36 = vunpack.c.l.b16 %v3283_v37  ;;  %v3686_v25 = vadd.f32 %v15063_v49, %v3685_v58 }
 0x4d5   : > { %12228 = vtanh.f32 %v3797_v62  ;;  %v3446_v61 = vpack.c.b16 %v3436_v43, %v3435_v45  ;;  %v3321_v24 = vunpack.c.l.b16 %v3207_v5  ;;  %v3887_v6 = vmax.f32 %v3868_v44, %v3878_v10 }
 0x4d6   : > { %v3388_v8 = vpack.c.b16 %v3378_v29, %v3377_v23  ;;  %v3389_v27 = vpack.c.b16 %v3379_v57, %v3379_v57  ;;  %v3447_v28 = vpack.c.b16 %v3437_v36, %v3437_v36 }
 0x4d7   : > { %3818 = vmatmul.bf16.gmra.mxu2 %v3446_v61  ;;  %v3331_v1 = vpack.c.b16 %v3321_v24, %v3321_v24 }
 0x4d8   : > { %3760 = vmatmul.bf16.gmra.mxu1 %v3388_v8 }
 0x4db   : > { %v12229_v51 = vpop.eup %12228  ;;  %v3741_v47 = vpop.f32.mrf.mxu1 }
 0x4dc   : > { %3855 = vst.msk [vmem:[#allocation5 + $0x38] sm:$0xff] %vm3847_vm0, %v12229_v51  ;;  %v3742_v41 = vadd.f32 %v3741_v47, %v3684_v19 }
 0x4de   : > { %3707 = vmatmul.bf16.gmra.mxu0 %v3331_v1 }
 0x4e2   : > { %v3799_v21 = vpop.f32.mrf.mxu2 }
 0x4e3   : > { %v3800_v60 = vadd.f32 %v3799_v21, %v3742_v41  ;;  %v3895_v50 = vld [vmem:[#allocation5 + $0x22] ss:$4 sm:$0xff]  ;;  %v3905_v52 = vld [vmem:[#allocation5 + $0x23] ss:$4 sm:$0xff]  ;;  %v3743_v38 = vpop.f32.mrf.mxu1 }
 0x4e4   : > { %v3913_v17 = vmax.f32 %v3895_v50, %v3905_v52  ;;  %v3744_v20 = vadd.f32 %v3743_v38, %v3686_v25 }
 0x4e5   : > { %12230 = vtanh.f32 %v3800_v60 }
 0x4e6   : > { %3924 = vrot.lane.b32.xlu0 %v3913_v17, %s12334_s22 }
 0x4e7   : > { %3823 = vmatmul.bf16.gmra.mxu2 %v3447_v28 }
 0x4e8   : > { %3765 = vmatmul.bf16.gmra.mxu1 %v3389_v27 }
 0x4ea   : > { %v3801_v14 = vpop.f32.mrf.mxu2  ;;  %v3688_v9 = vpop.f32.mrf.mxu0 }
 0x4eb   : > { %v12231_v63 = vpop.eup %12230  ;;  %v3802_v0 = vadd.f32 %v3801_v14, %v3744_v20  ;;  %v3689_v18 = vadd.f32 %v15063_v49, %v3688_v9 }
 0x4ec   : > { %3856 = vst.msk [vmem:[#allocation5 + $0x40] sm:$0xff] %vm3847_vm0, %v12231_v63 }
 0x4ed   : > { %12232 = vtanh.f32 %v3802_v0  ;;  %v3870_v0 = vld [vmem:[#allocation5 + $0x20] ss:$4 sm:$0xff] }
 0x4f2   : > { %v3690_v7 = vpop.f32.mrf.mxu0 }
 0x4f3   : > { %v12233_v11 = vpop.eup %12232  ;;  %v3691_v56 = vadd.f32 %v15063_v49, %v3690_v7 }
 0x4f4   : > { %3857 = vst.msk [vmem:[#allocation5 + $0x48] sm:$0xff] %vm3847_vm0, %v12233_v11  ;;  %v3880_v11 = vld [vmem:[#allocation5 + $0x21] ss:$4 sm:$0xff] }
 0x4fb   : > { %v3746_v30 = vpop.f32.mrf.mxu1 }
 0x4fc   : > { %v3747_v2 = vadd.f32 %v3746_v30, %v3689_v18  ;;  %v3888_v30 = vmax.f32 %v3870_v0, %v3880_v11 }
 0x502   : > { %v3804_v34 = vpop.f32.mrf.mxu2 }
 0x503   : > { %v3805_v46 = vadd.f32 %v3804_v34, %v3747_v2  ;;  %v3748_v16 = vpop.f32.mrf.mxu1 }
 0x504   : > { %v3749_v26 = vadd.f32 %v3748_v16, %v3691_v56 }
 0x505   : > { %12234 = vtanh.f32 %v3805_v46 }
 0x50a   : > { %v3806_v53 = vpop.f32.mrf.mxu2  ;;  %v3693_v48 = vpop.f32.mrf.mxu0 }
 0x50b   : > { %v12235_v32 = vpop.eup %12234  ;;  %v3807_v4 = vadd.f32 %v3806_v53, %v3749_v26  ;;  %v3694_v23 = vadd.f32 %v15063_v49, %v3693_v48 }
 0x50c   : > { %3858 = vst.msk [vmem:[#allocation5 + $0x50] sm:$0xff] %vm3847_vm0, %v12235_v32 }
 0x50d   : > { %12236 = vtanh.f32 %v3807_v4 }
 0x512   : > { %v3695_v43 = vpop.f32.mrf.mxu0 }
 0x513   : > { %v12237_v54 = vpop.eup %12236  ;;  %v3696_v8 = vadd.f32 %v15063_v49, %v3695_v43 }
 0x514   : > { %3859 = vst.msk [vmem:[#allocation5 + $0x58] sm:$0xff] %vm3847_vm0, %v12237_v54 }
 0x518   : > { %v3923_v39 = vpop.permute.xlu2 %3922 }
 0x519   : > { %v3937_v12 = vsel %vm3847_vm0, %v3887_v6, %v3923_v39 }
 0x51a   : > { %3946 = vst.msk [vmem:[#allocation6] sm:$0x1] %vm15162_vm1, %v3937_v12 }
 0x51b   : > { %v3897_v59 = vld [vmem:[#allocation5 + $0x42] ss:$4 sm:$0xff]  ;;  %v3907_v33 = vld [vmem:[#allocation5 + $0x43] ss:$4 sm:$0xff]  ;;  %3948 = vst [vmem:[#allocation1] sm:$0xff] %v3937_v12  ;;  %v3751_v35 = vpop.f32.mrf.mxu1 }
 0x51c   : > { %v3914_v55 = vmax.f32 %v3897_v59, %v3907_v33  ;;  %v3752_v45 = vadd.f32 %v3751_v35, %v3694_v23 }
 0x51e   : > { %3926 = vrot.lane.b32.xlu1 %v3914_v55, %s12334_s22 }
 0x522   : > { %v3950_v15 = vld [vmem:[#allocation1 + $0x1] ss:$9 sm:$0xff]  ;;  %v3809_v62 = vpop.f32.mrf.mxu2 }
 0x523   : > { %3952 = vst.msk [vmem:[#allocation6 + $0x1] sm:$0x1] %vm15162_vm1, %v3950_v15  ;;  %v3810_v29 = vadd.f32 %v3809_v62, %v3752_v45  ;;  %v3753_v5 = vpop.f32.mrf.mxu1 }
 0x524   : > { %3953 = vst [vmem:[#allocation1] sm:$0xff] %v3937_v12  ;;  %v3754_v61 = vadd.f32 %v3753_v5, %v3696_v8 }
 0x525   : > { %12238 = vtanh.f32 %v3810_v29 }
 0x52a   : > { %v3811_v24 = vpop.f32.mrf.mxu2  ;;  %v3698_v1 = vpop.f32.mrf.mxu0 }
 0x52b   : > { %v12239_v40 = vpop.eup %12238  ;;  %v3955_v22 = vld [vmem:[#allocation1 + $0x2] ss:$9 sm:$0xff]  ;;  %v3812_v31 = vadd.f32 %v3811_v24, %v3754_v61  ;;  %v3699_v19 = vadd.f32 %v15063_v49, %v3698_v1 }
 0x52c   : > { %3957 = vst.msk [vmem:[#allocation6 + $0x2] sm:$0x1] %vm15162_vm1, %v3955_v22  ;;  %v3872_v22 = vld [vmem:[#allocation5 + $0x40] ss:$4 sm:$0xff] }
 0x52d   : > { %3958 = vst [vmem:[#allocation1] sm:$0xff] %v3937_v12  ;;  %12240 = vtanh.f32 %v3812_v31  ;;  %v3882_v31 = vld [vmem:[#allocation5 + $0x41] ss:$4 sm:$0xff] }
 0x52e   : > { %3860 = vst.msk [vmem:[#allocation5 + $0x60] sm:$0xff] %vm3847_vm0, %v12239_v40 }
 0x532   : > { %v3700_v57 = vpop.f32.mrf.mxu0 }
 0x533   : > { %v12241_v51 = vpop.eup %12240  ;;  %v3701_v50 = vadd.f32 %v15063_v49, %v3700_v57 }
 0x534   : > { %v3960_v47 = vld [vmem:[#allocation1 + $0x3] ss:$9 sm:$0xff]  ;;  %3861 = vst.msk [vmem:[#allocation5 + $0x68] sm:$0xff] %vm3847_vm0, %v12241_v51  ;;  %v3889_v51 = vmax.f32 %v3872_v22, %v3882_v31 }
 0x535   : > { %3962 = vst.msk [vmem:[#allocation6 + $0x3] sm:$0x1] %vm15162_vm1, %v3960_v47 }
 0x536   : > { %3963 = vst [vmem:[#allocation1] sm:$0xff] %v3937_v12 }
 0x53b   : > { %v3756_v3 = vpop.f32.mrf.mxu1 }
 0x53c   : > { %v3757_v41 = vadd.f32 %v3756_v3, %v3699_v19 }
 0x53d   : > { %v3965_v37 = vld [vmem:[#allocation1 + $0x4] ss:$9 sm:$0xff] }
 0x53e   : > { %3967 = vst.msk [vmem:[#allocation6 + $0x4] sm:$0x1] %vm15162_vm1, %v3965_v37 }
 0x53f   : > { %3968 = vst [vmem:[#allocation1] sm:$0xff] %v3937_v12 }
 0x542   : > { %v3814_v21 = vpop.f32.mrf.mxu2 }
 0x543   : > { %v3815_v36 = vadd.f32 %v3814_v21, %v3757_v41  ;;  %v3758_v58 = vpop.f32.mrf.mxu1 }
 0x544   : > { %v3759_v52 = vadd.f32 %v3758_v58, %v3701_v50 }
 0x545   : > { %12242 = vtanh.f32 %v3815_v36 }
 0x546   : > { %v3970_v60 = vld [vmem:[#allocation1 + $0x5] ss:$9 sm:$0xff] }
 0x547   : > { %3972 = vst.msk [vmem:[#allocation6 + $0x5] sm:$0x1] %vm15162_vm1, %v3970_v60 }
 0x548   : > { %3973 = vst [vmem:[#allocation1] sm:$0xff] %v3937_v12 }
 0x54a   : > { %v3816_v17 = vpop.f32.mrf.mxu2 }
 0x54b   : > { %v12243_v38 = vpop.eup %12242  ;;  %v3817_v27 = vadd.f32 %v3816_v17, %v3759_v52  ;;  %v3703_v28 = vpop.f32.mrf.mxu0 }
 0x54c   : > { %3862 = vst.msk [vmem:[#allocation5 + $0x70] sm:$0xff] %vm3847_vm0, %v12243_v38  ;;  %v3704_v9 = vadd.f32 %v15063_v49, %v3703_v28 }
 0x54d   : > { %12244 = vtanh.f32 %v3817_v27 }
 0x54f   : > { %v3975_v25 = vld [vmem:[#allocation1 + $0x6] ss:$9 sm:$0xff] }
 0x550   : > { %3977 = vst.msk [vmem:[#allocation6 + $0x6] sm:$0x1] %vm15162_vm1, %v3975_v25 }
 0x551   : > { %3978 = vst [vmem:[#allocation1] sm:$0xff] %v3937_v12 }
 0x553   : > { %v12245_v20 = vpop.eup %12244  ;;  %v3705_v14 = vpop.f32.mrf.mxu0 }
 0x554   : > { %3863 = vst.msk [vmem:[#allocation5 + $0x78] sm:$0xff] %vm3847_vm0, %v12245_v20  ;;  %v3706_v54 = vadd.f32 %v15063_v49, %v3705_v14 }
 0x555   : > { %v3761_v63 = vpop.f32.mrf.mxu1 }
 0x556   : > { %v3762_v34 = vadd.f32 %v3761_v63, %v3704_v9 }
 0x558   : > { %v3980_v18 = vld [vmem:[#allocation1 + $0x7] ss:$9 sm:$0xff]  ;;  %v3925_v2 = vpop.permute.xlu0 %3924 }
 0x559   : > { %3982 = vst.msk [vmem:[#allocation6 + $0x7] sm:$0x1] %vm15162_vm1, %v3980_v18  ;;  %v3938_v46 = vsel %vm3847_vm0, %v3888_v30, %v3925_v2 }
 0x55a   : > { %3983 = vst.msk [vmem:[#allocation6 + $0x8] sm:$0x1] %vm15162_vm1, %v3938_v46  ;;  %v3819_v7 = vpop.f32.mrf.mxu2 }
 0x55b   : > { %3985 = vst [vmem:[#allocation1] sm:$0xff] %v3938_v46  ;;  %v3820_v16 = vadd.f32 %v3819_v7, %v3762_v34  ;;  %v3899_v56 = vld [vmem:[#allocation5 + $0x62] ss:$4 sm:$0xff]  ;;  %v3909_v26 = vld [vmem:[#allocation5 + $0x63] ss:$4 sm:$0xff]  ;;  %v3708_v53 = vpop.f32.mrf.mxu0 }
 0x55c   : > { %v3915_v4 = vmax.f32 %v3899_v56, %v3909_v26  ;;  %v3709_v33 = vadd.f32 %v15063_v49, %v3708_v53  ;;  %v3874_v57 = vld [vmem:[#allocation5 + $0x60] ss:$4 sm:$0xff]  ;;  %v3884_v36 = vld [vmem:[#allocation5 + $0x61] ss:$4 sm:$0xff] }
 0x55d   : > { %v3763_v32 = vpop.f32.mrf.mxu1  ;;  %12246 = vtanh.f32 %v3820_v16  ;;  %v3890_v60 = vmax.f32 %v3874_v57, %v3884_v36 }
 0x55e   : > { %3928 = vrot.lane.b32.xlu2 %v3915_v4, %s12334_s22  ;;  %v3764_v44 = vadd.f32 %v3763_v32, %v3706_v54 }
 0x562   : > { %v3987_v10 = vld [vmem:[#allocation1 + $0x1] ss:$9 sm:$0xff]  ;;  %v3821_v6 = vpop.f32.mrf.mxu2 }
 0x563   : > { %v12247_v39 = vpop.eup %12246  ;;  %3989 = vst.msk [vmem:[#allocation6 + $0x9] sm:$0x1] %vm15162_vm1, %v3987_v10  ;;  %v3822_v12 = vadd.f32 %v3821_v6, %v3764_v44  ;;  %v3710_v48 = vpop.f32.mrf.mxu0 }
 0x564   : > { %3990 = vst [vmem:[#allocation1] sm:$0xff] %v3938_v46 }
 0x565   : > { %v3766_v59 = vpop.f32.mrf.mxu1  ;;  %3864 = vst.msk [vmem:[#allocation5 + $0x80] sm:$0xff] %vm3847_vm0, %v12247_v39  ;;  %12248 = vtanh.f32 %v3822_v12 }
 0x566   : > { %v3767_v55 = vadd.f32 %v3766_v59, %v3709_v33 }
 0x56a   : > { %v3824_v35 = vpop.f32.mrf.mxu2 }
 0x56b   : > { %v12249_v23 = vpop.eup %12248  ;;  %v3992_v45 = vld [vmem:[#allocation1 + $0x2] ss:$9 sm:$0xff]  ;;  %v3825_v15 = vadd.f32 %v3824_v35, %v3767_v55 }
 0x56c   : > { %3994 = vst.msk [vmem:[#allocation6 + $0xa] sm:$0x1] %vm15162_vm1, %v3992_v45 }
 0x56d   : > { %v3768_v62 = vpop.f32.mrf.mxu1  ;;  %3995 = vst [vmem:[#allocation1] sm:$0xff] %v3938_v46  ;;  %12250 = vtanh.f32 %v3825_v15 }
 0x56e   : > { %3865 = vst.msk [vmem:[#allocation5 + $0x88] sm:$0xff] %vm3847_vm0, %v12249_v23 }
 0x572   : > { %v3826_v29 = vpop.f32.mrf.mxu2 }
 0x573   : > { %v12251_v43 = vpop.eup %12250 }
 0x574   : > { %v3997_v5 = vld [vmem:[#allocation1 + $0x3] ss:$9 sm:$0xff]  ;;  %3867 = vst.msk [vmem:[#allocation5 + $0x90] sm:$0x3] %vm3866_vm2, %v12251_v43 }
 0x575   : > { %3999 = vst.msk [vmem:[#allocation6 + $0xb] sm:$0x1] %vm15162_vm1, %v3997_v5  ;;  %v3901_v49 = vld [vmem:[#allocation5 + $0x82] ss:$4 sm:$0xf] }
 0x576   : > { %4000 = vst [vmem:[#allocation1] sm:$0xff] %v3938_v46  ;;  %v3911_v8 = vld [vmem:[#allocation5 + $0x83] ss:$4 sm:$0xf] }
 0x577   : > { %v3916_v61 = vmax.f32 %v3901_v49, %v3911_v8 }
 0x579   : > { %3930 = vrot.lane.b32.xlu0 %v3916_v61, %s12334_s22 }
 0x57b   : > { %v3876_v25 = vld [vmem:[#allocation5 + $0x80] ss:$4 sm:$0x1f]  ;;  %v3886_v20 = vld [vmem:[#allocation5 + $0x81] ss:$4 sm:$0x1f] }
 0x57c   : > { %v3891_v63 = vmax.f32 %v3876_v25, %v3886_v20 }
 0x57d   : > { %v4002_v24 = vld [vmem:[#allocation1 + $0x4] ss:$9 sm:$0xff] }
 0x57e   : > { %4004 = vst.msk [vmem:[#allocation6 + $0xc] sm:$0x1] %vm15162_vm1, %v4002_v24 }
 0x57f   : > { %4005 = vst [vmem:[#allocation1] sm:$0xff] %v3938_v46 }
 0x586   : > { %v4007_v40 = vld [vmem:[#allocation1 + $0x5] ss:$9 sm:$0xff] }
 0x587   : > { %4009 = vst.msk [vmem:[#allocation6 + $0xd] sm:$0x1] %vm15162_vm1, %v4007_v40 }
 0x588   : > { %4010 = vst [vmem:[#allocation1] sm:$0xff] %v3938_v46 }
 0x58f   : > { %v4012_v47 = vld [vmem:[#allocation1 + $0x6] ss:$9 sm:$0xff] }
 0x590   : > { %v3927_v1 = vpop.permute.xlu1 %3926  ;;  %4014 = vst.msk [vmem:[#allocation6 + $0xe] sm:$0x1] %vm15162_vm1, %v4012_v47 }
 0x591   : > { %v3939_v3 = vsel %vm3847_vm0, %v3889_v51, %v3927_v1  ;;  %4015 = vst [vmem:[#allocation1] sm:$0xff] %v3938_v46 }
 0x592   : > { %4020 = vst.msk [vmem:[#allocation6 + $0x10] sm:$0x1] %vm15162_vm1, %v3939_v3 }
 0x598   : > { %v4017_v37 = vld [vmem:[#allocation1 + $0x7] ss:$9 sm:$0xff] }
 0x599   : > { %4019 = vst.msk [vmem:[#allocation6 + $0xf] sm:$0x1] %vm15162_vm1, %v4017_v37 }
 0x59a   : > { %4022 = vst [vmem:[#allocation1] sm:$0xff] %v3939_v3 }
 0x5a1   : > { %v4024_v19 = vld [vmem:[#allocation1 + $0x1] ss:$9 sm:$0xff] }
 0x5a2   : > { %4026 = vst.msk [vmem:[#allocation6 + $0x11] sm:$0x1] %vm15162_vm1, %v4024_v19 }
 0x5a3   : > { %4027 = vst [vmem:[#allocation1] sm:$0xff] %v3939_v3 }
 0x5aa   : > { %v4029_v41 = vld [vmem:[#allocation1 + $0x2] ss:$9 sm:$0xff] }
 0x5ab   : > { %4031 = vst.msk [vmem:[#allocation6 + $0x12] sm:$0x1] %vm15162_vm1, %v4029_v41 }
 0x5ac   : > { %4032 = vst [vmem:[#allocation1] sm:$0xff] %v3939_v3 }
 0x5b3   : > { %v4034_v21 = vld [vmem:[#allocation1 + $0x3] ss:$9 sm:$0xff] }
 0x5b4   : > { %4036 = vst.msk [vmem:[#allocation6 + $0x13] sm:$0x1] %vm15162_vm1, %v4034_v21 }
 0x5b5   : > { %4037 = vst [vmem:[#allocation1] sm:$0xff] %v3939_v3 }
 0x5b8   : > { %v3929_v58 = vpop.permute.xlu2 %3928 }
 0x5b9   : > { %v3940_v50 = vsel %vm3847_vm0, %v3890_v60, %v3929_v58 }
 0x5ba   : > { %4057 = vst.msk [vmem:[#allocation6 + $0x18] sm:$0x1] %vm15162_vm1, %v3940_v50 }
 0x5bc   : > { %v4039_v52 = vld [vmem:[#allocation1 + $0x4] ss:$9 sm:$0xff] }
 0x5bd   : > { %4041 = vst.msk [vmem:[#allocation6 + $0x14] sm:$0x1] %vm15162_vm1, %v4039_v52 }
 0x5be   : > { %4042 = vst [vmem:[#allocation1] sm:$0xff] %v3939_v3 }
 0x5c5   : > { %v4044_v17 = vld [vmem:[#allocation1 + $0x5] ss:$9 sm:$0xff] }
 0x5c6   : > { %4046 = vst.msk [vmem:[#allocation6 + $0x15] sm:$0x1] %vm15162_vm1, %v4044_v17 }
 0x5c7   : > { %4047 = vst [vmem:[#allocation1] sm:$0xff] %v3939_v3 }
 0x5ce   : > { %v4049_v38 = vld [vmem:[#allocation1 + $0x6] ss:$9 sm:$0xff] }
 0x5cf   : > { %4051 = vst.msk [vmem:[#allocation6 + $0x16] sm:$0x1] %vm15162_vm1, %v4049_v38 }
 0x5d0   : > { %4052 = vst [vmem:[#allocation1] sm:$0xff] %v3939_v3 }
 0x5d7   : > { %v4054_v27 = vld [vmem:[#allocation1 + $0x7] ss:$9 sm:$0xff] }
 0x5d8   : > { %4056 = vst.msk [vmem:[#allocation6 + $0x17] sm:$0x1] %vm15162_vm1, %v4054_v27 }
 0x5d9   : > { %4059 = vst [vmem:[#allocation1] sm:$0xff] %v3940_v50 }
 0x5e0   : > { %v4061_v28 = vld [vmem:[#allocation1 + $0x1] ss:$9 sm:$0xff] }
 0x5e1   : > { %4063 = vst.msk [vmem:[#allocation6 + $0x19] sm:$0x1] %vm15162_vm1, %v4061_v28 }
 0x5e2   : > { %4064 = vst [vmem:[#allocation1] sm:$0xff] %v3940_v50 }
 0x5e9   : > { %v4066_v14 = vld [vmem:[#allocation1 + $0x2] ss:$9 sm:$0xff] }
 0x5ea   : > { %4068 = vst.msk [vmem:[#allocation6 + $0x1a] sm:$0x1] %vm15162_vm1, %v4066_v14 }
 0x5eb   : > { %4069 = vst [vmem:[#allocation1] sm:$0xff] %v3940_v50  ;;  %v3931_v0 = vpop.permute.xlu0 %3930 }
 0x5ec   : > { %v3941_v11 = vsel %vm3847_vm0, %v3891_v63, %v3931_v0 }
 0x5ed   : > { %4094 = vst.msk [vmem:[#allocation6 + $0x20] sm:$0x1] %vm15162_vm1, %v3941_v11 }
 0x5f2   : > { %v4071_v9 = vld [vmem:[#allocation1 + $0x3] ss:$9 sm:$0xff] }
 0x5f3   : > { %4073 = vst.msk [vmem:[#allocation6 + $0x1b] sm:$0x1] %vm15162_vm1, %v4071_v9 }
 0x5f4   : > { %4074 = vst [vmem:[#allocation1] sm:$0xff] %v3940_v50 }
 0x5fb   : > { %v4076_v30 = vld [vmem:[#allocation1 + $0x4] ss:$9 sm:$0xff] }
 0x5fc   : > { %4078 = vst.msk [vmem:[#allocation6 + $0x1c] sm:$0x1] %vm15162_vm1, %v4076_v30 }
 0x5fd   : > { %4079 = vst [vmem:[#allocation1] sm:$0xff] %v3940_v50 }
 0x604   : > { %v4081_v18 = vld [vmem:[#allocation1 + $0x5] ss:$9 sm:$0xff] }
 0x605   : > { %4083 = vst.msk [vmem:[#allocation6 + $0x1d] sm:$0x1] %vm15162_vm1, %v4081_v18 }
 0x606   : > { %4084 = vst [vmem:[#allocation1] sm:$0xff] %v3940_v50 }
 0x60d   : > { %v4086_v2 = vld [vmem:[#allocation1 + $0x6] ss:$9 sm:$0xff] }
 0x60e   : > { %4088 = vst.msk [vmem:[#allocation6 + $0x1e] sm:$0x1] %vm15162_vm1, %v4086_v2 }
 0x60f   : > { %4089 = vst [vmem:[#allocation1] sm:$0xff] %v3940_v50 }
 0x616   : > { %v4091_v34 = vld [vmem:[#allocation1 + $0x7] ss:$9 sm:$0xff] }
 0x617   : > { %4093 = vst.msk [vmem:[#allocation6 + $0x1f] sm:$0x1] %vm15162_vm1, %v4091_v34 }
 0x618   : > { %4096 = vst [vmem:[#allocation1] sm:$0xff] %v3941_v11 }
 0x61f   : > { %v4098_v46 = vld [vmem:[#allocation1 + $0x1] ss:$9 sm:$0xff] }
 0x620   : > { %4100 = vst.msk [vmem:[#allocation6 + $0x21] sm:$0x1] %vm15162_vm1, %v4098_v46 }
 0x621   : > { %4101 = vst [vmem:[#allocation1] sm:$0xff] %v3941_v11 }
 0x628   : > { %v4103_v7 = vld [vmem:[#allocation1 + $0x2] ss:$9 sm:$0xff] }
 0x629   : > { %4105 = vst.msk [vmem:[#allocation6 + $0x22] sm:$0x1] %vm15162_vm1, %v4103_v7 }
 0x62a   : > { %4106 = vst [vmem:[#allocation1] sm:$0xff] %v3941_v11 }
 0x631   : > { %v4108_v16 = vld [vmem:[#allocation1 + $0x3] ss:$9 sm:$0xff] }
 0x632   : > { %4110 = vst.msk [vmem:[#allocation6 + $0x23] sm:$0x1] %vm15162_vm1, %v4108_v16 }
 0x633   : > { %4112 = vst [vmem:[#allocation1] sm:$0xff] %v3891_v63 }
 0x63a   : > { %v4114_v56 = vld [vmem:[#allocation1 + $0x4] ss:$9 sm:$0xff] }
 0x63b   : > { %4118 = vst.msk [vmem:[#allocation6 + $0x24] sm:$0x1] %vm4116_vm3, %v4114_v56 }
 0x63c   : > { %12311 = dma.done.wait [#allocation7], 74752 }
 0x63d   : > { %12312 = vsyncadd [#allocation7], 4294892544  ;;  %v9117_v26 = vld [vmem:[#allocation2 + $0x70] sm:$0xf]  ;;  %v11503_v53 = vld [vmem:[#allocation2 + $0x74] sm:$0xf0]  ;;  %s8889_s21 = scalar_lea.hbm %s15734_s9, %s12406_s13 }
 0x63e   : > { %v9437_v32 = vld [vmem:[#allocation2 + $0x2f0] sm:$0xf]  ;;  %v9118_v4 = vor.u32 %v11503_v53, %v9117_v26  ;;  %v11583_v54 = vld [vmem:[#allocation2 + $0x2f4] sm:$0xf0]  ;;  %v9109_v44 = vld [vmem:[#allocation2 + $0x60] sm:$0xf] }
 0x63f   : > { %v11501_v10 = vld [vmem:[#allocation2 + $0x64] sm:$0xf0]  ;;  %v9438_v6 = vor.u32 %v11583_v54, %v9437_v32  ;;  %v9429_v39 = vld [vmem:[#allocation2 + $0x2e0] sm:$0xf]  ;;  %v9101_v59 = vld [vmem:[#allocation2 + $0x50] sm:$0xf] }
 0x640   : > { %v11581_v12 = vld [vmem:[#allocation2 + $0x2e4] sm:$0xf0]  ;;  %7757 = vmatpush.bf16.msra.mxu3 %v9118_v4  ;;  %v9110_v42 = vor.u32 %v11501_v10, %v9109_v44  ;;  %v11499_v13 = vld [vmem:[#allocation2 + $0x54] sm:$0xf0]  ;;  %v9421_v33 = vld [vmem:[#allocation2 + $0x2d0] sm:$0xf] }
 0x641   : > { %7822 = vmatpush.bf16.msrb.mxu0 %v9438_v6  ;;  %v9430_v48 = vor.u32 %v11581_v12, %v9429_v39  ;;  %v11579_v55 = vld [vmem:[#allocation2 + $0x2d4] sm:$0xf0]  ;;  %v9102_v35 = vor.u32 %v11499_v13, %v9101_v59  ;;  %v9093_v45 = vld [vmem:[#allocation2 + $0x40] sm:$0xf]  ;;  %v11497_v15 = vld [vmem:[#allocation2 + $0x44] sm:$0xf0] }
 0x642   : > { %v9422_v23 = vor.u32 %v11579_v55, %v9421_v33  ;;  %v9413_v62 = vld [vmem:[#allocation2 + $0x2c0] sm:$0xf]  ;;  %v11577_v29 = vld [vmem:[#allocation2 + $0x2c4] sm:$0xf0]  ;;  %v9094_v43 = vor.u32 %v11497_v15, %v9093_v45  ;;  %v9085_v49 = vld [vmem:[#allocation2 + $0x30] sm:$0xf] }
 0x643   : > { %v9414_v5 = vor.u32 %v11577_v29, %v9413_v62  ;;  %v11495_v8 = vld [vmem:[#allocation2 + $0x34] sm:$0xf0]  ;;  %v9405_v61 = vld [vmem:[#allocation2 + $0x2b0] sm:$0xf]  ;;  %v9077_v31 = vld [vmem:[#allocation2 + $0x20] sm:$0xf] }
 0x644   : > { %7758 = vmatpush.bf16.msra.mxu3 %v9110_v42  ;;  %v11575_v24 = vld [vmem:[#allocation2 + $0x2b4] sm:$0xf0]  ;;  %v9086_v40 = vor.u32 %v11495_v8, %v9085_v49  ;;  %v11493_v51 = vld [vmem:[#allocation2 + $0x24] sm:$0xf0]  ;;  %v9397_v47 = vld [vmem:[#allocation2 + $0x2a0] sm:$0xf] }
 0x645   : > { %7823 = vmatpush.bf16.msrb.mxu0 %v9430_v48  ;;  %v9406_v22 = vor.u32 %v11575_v24, %v9405_v61  ;;  %v11573_v1 = vld [vmem:[#allocation2 + $0x2a4] sm:$0xf0]  ;;  %v9078_v3 = vor.u32 %v11493_v51, %v9077_v31  ;;  %v9069_v19 = vld [vmem:[#allocation2 + $0x10] sm:$0xf]  ;;  %v11491_v41 = vld [vmem:[#allocation2 + $0x14] sm:$0xf0] }
 0x646   : > { %v9398_v37 = vor.u32 %v11573_v1, %v9397_v47  ;;  %v9389_v21 = vld [vmem:[#allocation2 + $0x290] sm:$0xf]  ;;  %v11571_v57 = vld [vmem:[#allocation2 + $0x294] sm:$0xf0]  ;;  %v9070_v36 = vor.u32 %v11491_v41, %v9069_v19  ;;  %v9061_v50 = vld [vmem:[#allocation2] sm:$0xf] }
 0x647   : > { %v15260_v60 = vld [vmem:[#allocation6] sm:$0xff]  ;;  %v9390_v58 = vor.u32 %v11571_v57, %v9389_v21  ;;  %v11489_v52 = vld [vmem:[#allocation2 + $0x4] sm:$0xf0]  ;;  %v9381_v17 = vld [vmem:[#allocation2 + $0x280] sm:$0xf]  ;;  %s8891_s29 = sshll.u32 %s14195_s28, 4  ;;  %s8892_s29 = int_to_ptr.vmem [resolvable:$true] %s8891_s29 }
 0x648   : > { %7759 = vmatpush.bf16.msra.mxu3 %v9102_v35  ;;  %v11569_v38 = vld [vmem:[#allocation2 + $0x284] sm:$0xf0]  ;;  %v9181_v27 = vld [vmem:[#allocation2 + $0xf0] sm:$0xf]  ;;  %v11519_v28 = vld [vmem:[#allocation2 + $0xf4] sm:$0xf0]  ;;  %v9062_v63 = vor.u32 %v11489_v52, %v9061_v50 }
 0x649   : > { %7824 = vmatpush.bf16.msrb.mxu0 %v9422_v23  ;;  %v9693_v25 = vld [vmem:[#allocation2 + $0x4f0] sm:$0xf]  ;;  %v11647_v20 = vld [vmem:[#allocation2 + $0x4f4] sm:$0xf0]  ;;  %v4133_v14 = vperm.slane %v15260_v60, 0  ;;  %v4138_v0 = vperm.slane %v15260_v60, 5  ;;  %v9382_v11 = vor.u32 %v11569_v38, %v9381_v17  ;;  %v9182_v9 = vor.u32 %v11519_v28, %v9181_v27 }
 0x64a   : > { %v9694_v30 = vor.u32 %v11647_v20, %v9693_v25  ;;  %v9173_v18 = vld [vmem:[#allocation2 + $0xe0] sm:$0xf]  ;;  %v11517_v2 = vld [vmem:[#allocation2 + $0xe4] sm:$0xf0]  ;;  %v9165_v53 = vld [vmem:[#allocation2 + $0xd0] sm:$0xf] }
 0x64b   : > { %v9685_v34 = vld [vmem:[#allocation2 + $0x4e0] sm:$0xf]  ;;  %v11645_v46 = vld [vmem:[#allocation2 + $0x4e4] sm:$0xf0]  ;;  %v15264_v7 = vpack.c.bf16 %v4133_v14, %v4133_v14  ;;  %v15266_v16 = vpack.c.bf16 %v4138_v0, %v4138_v0  ;;  %v9174_v56 = vor.u32 %v11517_v2, %v9173_v18  ;;  %v11515_v32 = vld [vmem:[#allocation2 + $0xd4] sm:$0xf0] }
 0x64c   : > { %7760 = vmatpush.bf16.msra.mxu3 %v9094_v43  ;;  %v9686_v26 = vor.u32 %v11645_v46, %v9685_v34  ;;  %v9677_v4 = vld [vmem:[#allocation2 + $0x4d0] sm:$0xf]  ;;  %v11643_v54 = vld [vmem:[#allocation2 + $0x4d4] sm:$0xf0]  ;;  %v9166_v44 = vor.u32 %v11515_v32, %v9165_v53  ;;  %v9157_v6 = vld [vmem:[#allocation2 + $0xc0] sm:$0xf] }
 0x64d   : > { %7825 = vmatpush.bf16.msrb.mxu0 %v9414_v5  ;;  %v9678_v10 = vor.u32 %v11643_v54, %v9677_v4  ;;  %v11513_v39 = vld [vmem:[#allocation2 + $0xc4] sm:$0xf0]  ;;  %v9669_v12 = vld [vmem:[#allocation2 + $0x4c0] sm:$0xf]  ;;  %v9149_v13 = vld [vmem:[#allocation2 + $0xb0] sm:$0xf] }
 0x64e   : > { %v11641_v42 = vld [vmem:[#allocation2 + $0x4c4] sm:$0xf0]  ;;  %v9158_v48 = vor.u32 %v11513_v39, %v9157_v6  ;;  %v11511_v33 = vld [vmem:[#allocation2 + $0xb4] sm:$0xf0]  ;;  %v9661_v55 = vld [vmem:[#allocation2 + $0x4b0] sm:$0xf] }
 0x64f   : > { %v9670_v59 = vor.u32 %v11641_v42, %v9669_v12  ;;  %v11639_v35 = vld [vmem:[#allocation2 + $0x4b4] sm:$0xf0]  ;;  %v9150_v23 = vor.u32 %v11511_v33, %v9149_v13  ;;  %v9141_v15 = vld [vmem:[#allocation2 + $0xa0] sm:$0xf]  ;;  %v11509_v62 = vld [vmem:[#allocation2 + $0xa4] sm:$0xf0] }
 0x650   : > { %7761 = vmatpush.bf16.msra.mxu3 %v9086_v40  ;;  %v9662_v45 = vor.u32 %v11639_v35, %v9661_v55  ;;  %v9653_v29 = vld [vmem:[#allocation2 + $0x4a0] sm:$0xf]  ;;  %v11637_v43 = vld [vmem:[#allocation2 + $0x4a4] sm:$0xf0]  ;;  %v9142_v5 = vor.u32 %v11509_v62, %v9141_v15  ;;  %v9133_v8 = vld [vmem:[#allocation2 + $0x90] sm:$0xf] }
 0x651   : > { %7826 = vmatpush.bf16.msrb.mxu0 %v9406_v22  ;;  %v9654_v49 = vor.u32 %v11637_v43, %v9653_v29  ;;  %v11507_v61 = vld [vmem:[#allocation2 + $0x94] sm:$0xf0]  ;;  %v9645_v24 = vld [vmem:[#allocation2 + $0x490] sm:$0xf]  ;;  %v9125_v31 = vld [vmem:[#allocation2 + $0x80] sm:$0xf] }
 0x652   : > { %v11635_v40 = vld [vmem:[#allocation2 + $0x494] sm:$0xf0]  ;;  %v9134_v22 = vor.u32 %v11507_v61, %v9133_v8  ;;  %v11505_v47 = vld [vmem:[#allocation2 + $0x84] sm:$0xf0]  ;;  %v9637_v1 = vld [vmem:[#allocation2 + $0x480] sm:$0xf] }
 0x653   : > { %v9646_v51 = vor.u32 %v11635_v40, %v9645_v24  ;;  %v11535_v19 = vld [vmem:[#allocation2 + $0x174] sm:$0xf0]  ;;  %v15270_v41 = vld [vmem:[#allocation6 + $0x8] sm:$0xff]  ;;  %v9949_v21 = vld [vmem:[#allocation2 + $0x6f0] sm:$0xf]  ;;  %s8893_s17 = sshll.u32 %s8889_s21, 4  ;;  %s8894_s17 = int_to_ptr.hbm [resolvable:$true] %s8893_s17 }
 0x654   : > { %7762 = vmatpush.bf16.msra.mxu3 %v9078_v3  ;;  %v11633_v3 = vld [vmem:[#allocation2 + $0x484] sm:$0xf0]  ;;  %v11711_v57 = vld [vmem:[#allocation2 + $0x6f4] sm:$0xf0]  ;;  %v4142_v50 = vperm.slane %v15270_v41, 1  ;;  %vm8878_vm4 = vcmask 24576  }
 0x655   : > { %7827 = vmatpush.bf16.msrb.mxu0 %v9398_v37  ;;  %v9245_v37 = vld [vmem:[#allocation2 + $0x170] sm:$0xf]  ;;  %v9638_v52 = vor.u32 %v11633_v3, %v9637_v1  ;;  %v9950_v38 = vor.u32 %v11711_v57, %v9949_v21  ;;  %v9237_v27 = vld [vmem:[#allocation2 + $0x160] sm:$0xf]  ;;  %v11533_v28 = vld [vmem:[#allocation2 + $0x164] sm:$0xf0] }
 0x656   : > { %v9246_v17 = vor.u32 %v11535_v19, %v9245_v37  ;;  %v9941_v20 = vld [vmem:[#allocation2 + $0x6e0] sm:$0xf]  ;;  %v11709_v14 = vld [vmem:[#allocation2 + $0x6e4] sm:$0xf0]  ;;  %v9238_v0 = vor.u32 %v11533_v28, %v9237_v27  ;;  %v9933_v18 = vld [vmem:[#allocation2 + $0x6d0] sm:$0xf] }
 0x657   : > { %v11707_v2 = vld [vmem:[#allocation2 + $0x6d4] sm:$0xf0]  ;;  %v9925_v53 = vld [vmem:[#allocation2 + $0x6c0] sm:$0xf]  ;;  %v11705_v32 = vld [vmem:[#allocation2 + $0x6c4] sm:$0xf0] }
 0x658   : > { %7763 = vmatpush.bf16.msra.mxu3 %v9070_v36  ;;  %v4134_v36 = vperm.slane %v15260_v60, 1  ;;  %v9934_v46 = vor.u32 %v11707_v2, %v9933_v18  ;;  %v9926_v54 = vor.u32 %v11705_v32, %v9925_v53  ;;  %v9917_v6 = vld [vmem:[#allocation2 + $0x6b0] sm:$0xf]  ;;  %v11703_v39 = vld [vmem:[#allocation2 + $0x6b4] sm:$0xf0]  ;;  %v4146_v1 = vperm.slane %v15270_v41, 5 }
 0x659   : > { %7828 = vmatpush.bf16.msrb.mxu0 %v9390_v58  ;;  %v9126_v58 = vor.u32 %v11505_v47, %v9125_v31  ;;  %v9918_v42 = vor.u32 %v11703_v39, %v9917_v6  ;;  %v9909_v13 = vld [vmem:[#allocation2 + $0x6a0] sm:$0xf]  ;;  %v11701_v33 = vld [vmem:[#allocation2 + $0x6a4] sm:$0xf0]  ;;  %v9901_v15 = vld [vmem:[#allocation2 + $0x690] sm:$0xf] }
 0x65a   : > { %v15274_v25 = vpack.c.bf16 %v4134_v36, %v4134_v36  ;;  %v9910_v35 = vor.u32 %v11701_v33, %v9909_v13  ;;  %v11699_v62 = vld [vmem:[#allocation2 + $0x694] sm:$0xf0]  ;;  %v9893_v8 = vld [vmem:[#allocation2 + $0x680] sm:$0xf]  ;;  %v11697_v61 = vld [vmem:[#allocation2 + $0x684] sm:$0xf0] }
 0x65b   : > { %v9902_v43 = vor.u32 %v11699_v62, %v9901_v15  ;;  %v9309_v24 = vld [vmem:[#allocation2 + $0x1f0] sm:$0xf]  ;;  %v11551_v40 = vld [vmem:[#allocation2 + $0x1f4] sm:$0xf0]  ;;  %v9894_v3 = vor.u32 %v11697_v61, %v9893_v8  ;;  %v9301_v21 = vld [vmem:[#allocation2 + $0x1e0] sm:$0xf] }
 0x65c   : > { %7764 = vmatpush.bf16.msra.mxu3 %v9062_v63  ;;  %v15276_v63 = vpack.c.bf16 %v4142_v50, %v4142_v50  ;;  %v11775_v31 = vld [vmem:[#allocation2 + $0x8f4] sm:$0xf0]  ;;  %v9310_v37 = vor.u32 %v11551_v40, %v9309_v24  ;;  %v11549_v57 = vld [vmem:[#allocation2 + $0x1e4] sm:$0xf0]  ;;  %v9285_v18 = vld [vmem:[#allocation2 + $0x1c0] sm:$0xf] }
 0x65d   : > { %7829 = vmatpush.bf16.msrb.mxu0 %v9382_v11  ;;  %v9942_v11 = vor.u32 %v11709_v14, %v9941_v20  ;;  %v11773_v50 = vld [vmem:[#allocation2 + $0x8e4] sm:$0xf0]  ;;  %v11547_v28 = vld [vmem:[#allocation2 + $0x1d4] sm:$0xf0]  ;;  %v9565_v20 = vld [vmem:[#allocation2 + $0x3f0] sm:$0xf] }
 0x65e   : > { %v11615_v14 = vld [vmem:[#allocation2 + $0x3f4] sm:$0xf0]  ;;  %v11545_v2 = vld [vmem:[#allocation2 + $0x1c4] sm:$0xf0]  ;;  %v10181_v53 = vld [vmem:[#allocation2 + $0x8c0] sm:$0xf] }
 0x65f   : > { %7765 = vmatmul.bf16.vlgmr.msra.gmra.mxu3 %v15264_v7  ;;  %v11769_v32 = vld [vmem:[#allocation2 + $0x8c4] sm:$0xf0]  ;;  %v9277_v6 = vld [vmem:[#allocation2 + $0x1b0] sm:$0xf]  ;;  %v11543_v39 = vld [vmem:[#allocation2 + $0x1b4] sm:$0xf0] }
 0x660   : > { %7770 = vmatpush.bf16.msrb.mxu3 %v9182_v9  ;;  %7830 = vmatmul.bf16.vlgmr.msrb.gmra.mxu0 %v15266_v16  ;;  %v9229_v9 = vld [vmem:[#allocation2 + $0x150] sm:$0xf]  ;;  %v11767_v33 = vld [vmem:[#allocation2 + $0x8b4] sm:$0xf0]  ;;  %v9269_v15 = vld [vmem:[#allocation2 + $0x1a0] sm:$0xf] }
 0x661   : > { %7874 = vmatpush.bf16.msra.mxu0 %v9694_v30  ;;  %v11531_v30 = vld [vmem:[#allocation2 + $0x154] sm:$0xf0]  ;;  %v10173_v13 = vld [vmem:[#allocation2 + $0x8b0] sm:$0xf]  ;;  %v11541_v62 = vld [vmem:[#allocation2 + $0x1a4] sm:$0xf0] }
 0x662   : > { %v9230_v34 = vor.u32 %v11531_v30, %v9229_v9  ;;  %v9566_v9 = vor.u32 %v11615_v14, %v9565_v20  ;;  %v10165_v8 = vld [vmem:[#allocation2 + $0x8a0] sm:$0xf]  ;;  %v11765_v61 = vld [vmem:[#allocation2 + $0x8a4] sm:$0xf0]  ;;  %s15803_s22 = sand.u32 1, %s12323_s10   ;;  %s12281_s23 = sshra.s32 %s8894_s17, 4  ;;  %s12282_s23 = int_to_ptr.hbm [resolvable:$true] %s12281_s23 }
 0x663   : > { %v11609_v40 = vld [vmem:[#allocation2 + $0x3c4] sm:$0xf0]  ;;  %v10149_v20 = vld [vmem:[#allocation2 + $0x880] sm:$0xf]  ;;  %s8881_s14 = scalar_lea.sflag [#allocation9], %s15803_s22  ;;  %s12283_s13 = scalar_lea.hbm %s12282_s23, 1 }
 0x664   : > { %7771 = vmatpush.bf16.msrb.mxu3 %v9174_v56  ;;  %v9221_v56 = vld [vmem:[#allocation2 + $0x140] sm:$0xf]  ;;  %7848 = vmatpush.bf16.msrb.mxu2 %v9566_v9  ;;  %v11761_v14 = vld [vmem:[#allocation2 + $0x884] sm:$0xf0]  ;;  %v11591_v9 = vld [vmem:[#allocation2 + $0x334] sm:$0xf0]  ;;  %p12284_p11 = scmp.ne.s32.totalorder %s12282_s23, %s12283_s13  ;;  %p12288_p0 = scmp.lt.s32.totalorder %s12282_s23, %s15734_s9 }
 0x665   : > { %7875 = vmatpush.bf16.msra.mxu0 %v9686_v26  ;;  %v11529_v26 = vld [vmem:[#allocation2 + $0x144] sm:$0xf0]  ;;  %s12287_s27 = scalar_lea.hbm %s15734_s9, 2 }
 0x666   : > { %v9222_v4 = vor.u32 %v11529_v26, %v9221_v56  ;;  %v11599_v56 = vld [vmem:[#allocation2 + $0x374] sm:$0xf0]  ;;  %v9557_v26 = vld [vmem:[#allocation2 + $0x3e0] sm:$0xf]  ;;  %p12285_p12 = pnand %p12284_p11, %p12423_p5  ;;  %p12289_p1 = scmp.lt.s32.totalorder %s12287_s27, %s12283_s13 }
 0x668   : > { %7772 = vmatpush.bf16.msrb.mxu3 %v9166_v44  ;;  %v9213_v44 = vld [vmem:[#allocation2 + $0x130] sm:$0xf]  ;;  %p12286_p13 = pneg %p12285_p12  ;;  %p12290_p2 = por %p12289_p1, %p12288_p0 }
 0x669   : > { %7876 = vmatpush.bf16.msra.mxu0 %v9678_v10  ;;  %v11527_v10 = vld [vmem:[#allocation2 + $0x134] sm:$0xf0] }
 0x66a   : > { %v9214_v12 = vor.u32 %v11527_v10, %v9213_v44  ;;  %v9286_v10 = vor.u32 %v11545_v2, %v9285_v18  ;;  %v9373_v18 = vld [vmem:[#allocation2 + $0x270] sm:$0xf]  ;;  %v11567_v2 = vld [vmem:[#allocation2 + $0x274] sm:$0xf0]  ;;  %p12291_p3 = pnand %p12290_p2, %p12286_p13 }
 0x66c   : > { %7773 = vmatpush.bf16.msrb.mxu3 %v9158_v48  ;;  %v9205_v48 = vld [vmem:[#allocation2 + $0x120] sm:$0xf] }
 0x66d   : > { %7877 = vmatpush.bf16.msra.mxu0 %v9670_v59  ;;  %v11525_v59 = vld [vmem:[#allocation2 + $0x124] sm:$0xf0] }
 0x66e   : > { %v9206_v55 = vor.u32 %v11525_v59, %v9205_v48  ;;  %v11597_v48 = vld [vmem:[#allocation2 + $0x364] sm:$0xf0]  ;;  %v9549_v59 = vld [vmem:[#allocation2 + $0x3d0] sm:$0xf] }
 0x670   : > { %7774 = vmatpush.bf16.msrb.mxu3 %v9150_v23  ;;  %v9197_v23 = vld [vmem:[#allocation2 + $0x110] sm:$0xf] }
 0x671   : > { %7878 = vmatpush.bf16.msra.mxu0 %v9662_v45  ;;  %v11523_v45 = vld [vmem:[#allocation2 + $0x114] sm:$0xf0] }
 0x672   : > { %v9198_v29 = vor.u32 %v11523_v45, %v9197_v23  ;;  %v9278_v45 = vor.u32 %v11543_v39, %v9277_v6  ;;  %v9374_v6 = vor.u32 %v11567_v2, %v9373_v18  ;;  %v9365_v39 = vld [vmem:[#allocation2 + $0x260] sm:$0xf]  ;;  %v4139_v18 = vperm.slane %v15260_v60, 6 }
 0x674   : > { %7775 = vmatpush.bf16.msrb.mxu3 %v9142_v5  ;;  %v9189_v5 = vld [vmem:[#allocation2 + $0x100] sm:$0xf] }
 0x675   : > { %7879 = vmatpush.bf16.msra.mxu0 %v9654_v49  ;;  %v11521_v49 = vld [vmem:[#allocation2 + $0x104] sm:$0xf0] }
 0x676   : > { %v9190_v47 = vor.u32 %v11521_v49, %v9189_v5  ;;  %v11595_v5 = vld [vmem:[#allocation2 + $0x354] sm:$0xf0]  ;;  %v9541_v49 = vld [vmem:[#allocation2 + $0x3c0] sm:$0xf] }
 0x678   : > { %7776 = vmatpush.bf16.msrb.mxu3 %v9134_v22  ;;  %v10205_v22 = vld [vmem:[#allocation2 + $0x8f0] sm:$0xf] }
 0x679   : > { %7880 = vmatpush.bf16.msra.mxu0 %v9646_v51  ;;  %v4135_v51 = vperm.slane %v15260_v60, 2  ;;  %v10206_v19 = vor.u32 %v11775_v31, %v10205_v22  ;;  %v9542_v22 = vor.u32 %v11609_v40, %v9541_v49  ;;  %v9270_v31 = vor.u32 %v11541_v62, %v9269_v15  ;;  %v9357_v62 = vld [vmem:[#allocation2 + $0x250] sm:$0xf] }
 0x67a   : > { %v10445_v49 = vld [vmem:[#allocation2 + $0xad0] sm:$0xf] }
 0x67b   : > { %v15282_v36 = vpack.c.bf16 %v4135_v51, %v4135_v51  ;;  %v9261_v51 = vld [vmem:[#allocation2 + $0x190] sm:$0xf] }
 0x67c   : > { %7777 = vmatpush.bf16.msrb.mxu3 %v9126_v58  ;;  %v10197_v58 = vld [vmem:[#allocation2 + $0x8e0] sm:$0xf] }
 0x67d   : > { %7881 = vmatpush.bf16.msra.mxu0 %v9638_v52  ;;  %v15284_v52 = vpack.c.bf16 %v4146_v1, %v4146_v1  ;;  %v10198_v27 = vor.u32 %v11773_v50, %v10197_v58  ;;  %v10166_v1 = vor.u32 %v11765_v61, %v10165_v8  ;;  %v11607_v50 = vld [vmem:[#allocation2 + $0x3b4] sm:$0xf0]  ;;  %v9453_v8 = vld [vmem:[#allocation2 + $0x310] sm:$0xf] }
 0x67e   : > { %v11587_v61 = vld [vmem:[#allocation2 + $0x314] sm:$0xf0] }
 0x67f   : > { %7778 = vmatmul.bf16.vlgmr.msrb.gmra.mxu3 %v15274_v25  ;;  %v9454_v40 = vor.u32 %v11587_v61, %v9453_v8 }
 0x680   : > { %7783 = vmatpush.bf16.msra.mxu3 %v9246_v17  ;;  %7882 = vmatmul.bf16.vlgmr.msra.gmra.mxu0 %v15276_v63  ;;  %v9302_v17 = vor.u32 %v11549_v57, %v9301_v21  ;;  %v10157_v21 = vld [vmem:[#allocation2 + $0x890] sm:$0xf]  ;;  %v11763_v57 = vld [vmem:[#allocation2 + $0x894] sm:$0xf0] }
 0x681   : > { %7926 = vmatpush.bf16.msrb.mxu0 %v9950_v38  ;;  %v9293_v38 = vld [vmem:[#allocation2 + $0x1d0] sm:$0xf] }
 0x682   : > { %v9294_v30 = vor.u32 %v11547_v28, %v9293_v38  ;;  %v11537_v28 = vld [vmem:[#allocation2 + $0x184] sm:$0xf0] }
 0x684   : > { %7784 = vmatpush.bf16.msra.mxu3 %v9238_v0  ;;  %v10189_v0 = vld [vmem:[#allocation2 + $0x8d0] sm:$0xf] }
 0x685   : > { %7927 = vmatpush.bf16.msrb.mxu0 %v9942_v11  ;;  %v11771_v11 = vld [vmem:[#allocation2 + $0x8d4] sm:$0xf0] }
 0x688   : > { %7785 = vmatpush.bf16.msra.mxu3 %v9230_v34  ;;  %v10190_v34 = vor.u32 %v11771_v11, %v10189_v0  ;;  %v10158_v0 = vor.u32 %v11763_v57, %v10157_v21  ;;  %v9469_v11 = vld [vmem:[#allocation2 + $0x330] sm:$0xf]  ;;  %v11561_v21 = vld [vmem:[#allocation2 + $0x244] sm:$0xf0] }
 0x689   : > { %7928 = vmatpush.bf16.msrb.mxu0 %v9934_v46  ;;  %v9501_v46 = vld [vmem:[#allocation2 + $0x370] sm:$0xf] }
 0x68c   : > { %7786 = vmatpush.bf16.msra.mxu3 %v9222_v4  ;;  %v9502_v4 = vor.u32 %v11599_v56, %v9501_v46  ;;  %v11605_v46 = vld [vmem:[#allocation2 + $0x3a4] sm:$0xf0]  ;;  %v10461_v56 = vld [vmem:[#allocation2 + $0xaf0] sm:$0xf] }
 0x68d   : > { %7929 = vmatpush.bf16.msrb.mxu0 %v9926_v54  ;;  %v11613_v54 = vld [vmem:[#allocation2 + $0x3e4] sm:$0xf0] }
 0x68e   : > { %v9558_v44 = vor.u32 %v11613_v54, %v9557_v26  ;;  %7835 = vmatpush.bf16.msrb.mxu1 %v9502_v4  ;;  %v11839_v26 = vld [vmem:[#allocation2 + $0xaf4] sm:$0xf0]  ;;  %v15289_v4 = vld [vmem:[#allocation6 + $0x10] sm:$0xff] }
 0x690   : > { %7787 = vmatpush.bf16.msra.mxu3 %v9214_v12  ;;  %v10182_v12 = vor.u32 %v11769_v32, %v10181_v53  ;;  %7849 = vmatpush.bf16.msrb.mxu2 %v9558_v44  ;;  %v4136_v53 = vperm.slane %v15260_v60, 3  ;;  %v4150_v44 = vperm.slane %v15289_v4, 1 }
 0x691   : > { %7930 = vmatpush.bf16.msrb.mxu0 %v9918_v42  ;;  %v9493_v42 = vld [vmem:[#allocation2 + $0x360] sm:$0xf] }
 0x694   : > { %7788 = vmatpush.bf16.msra.mxu3 %v9206_v55  ;;  %v9494_v55 = vor.u32 %v11597_v48, %v9493_v42  ;;  %v9461_v42 = vld [vmem:[#allocation2 + $0x320] sm:$0xf]  ;;  %v10462_v48 = vor.u32 %v11839_v26, %v10461_v56  ;;  %v9341_v56 = vld [vmem:[#allocation2 + $0x230] sm:$0xf]  ;;  %v11559_v26 = vld [vmem:[#allocation2 + $0x234] sm:$0xf0] }
 0x695   : > { %7931 = vmatpush.bf16.msrb.mxu0 %v9910_v35  ;;  %v11611_v35 = vld [vmem:[#allocation2 + $0x3d4] sm:$0xf0] }
 0x696   : > { %v9550_v23 = vor.u32 %v11611_v35, %v9549_v59  ;;  %7836 = vmatpush.bf16.msrb.mxu1 %v9494_v55  ;;  %v11589_v59 = vld [vmem:[#allocation2 + $0x324] sm:$0xf0]  ;;  %v15292_v55 = vpack.c.bf16 %v4136_v53, %v4136_v53  ;;  %v10453_v35 = vld [vmem:[#allocation2 + $0xae0] sm:$0xf] }
 0x698   : > { %7789 = vmatpush.bf16.msra.mxu3 %v9198_v29  ;;  %v10174_v29 = vor.u32 %v11767_v33, %v10173_v13  ;;  %7850 = vmatpush.bf16.msrb.mxu2 %v9550_v23  ;;  %v9517_v13 = vld [vmem:[#allocation2 + $0x390] sm:$0xf]  ;;  %v11603_v33 = vld [vmem:[#allocation2 + $0x394] sm:$0xf0]  ;;  %v11837_v23 = vld [vmem:[#allocation2 + $0xae4] sm:$0xf0] }
 0x699   : > { %7932 = vmatpush.bf16.msrb.mxu0 %v9902_v43  ;;  %v9485_v43 = vld [vmem:[#allocation2 + $0x350] sm:$0xf]  ;;  %v9518_v15 = vor.u32 %v11603_v33, %v9517_v13  ;;  %v9333_v13 = vld [vmem:[#allocation2 + $0x220] sm:$0xf]  ;;  %v11557_v33 = vld [vmem:[#allocation2 + $0x224] sm:$0xf0] }
 0x69a   : > { %v9486_v24 = vor.u32 %v11595_v5, %v9485_v43  ;;  %v15294_v43 = vpack.c.bf16 %v4150_v44, %v4150_v44  ;;  %v11661_v44 = vld [vmem:[#allocation2 + $0x564] sm:$0xf0]  ;;  %v9334_v61 = vor.u32 %v11557_v33, %v9333_v13 }
 0x69b   : > { %v11901_v33 = vld [vmem:[#allocation2 + $0xce4] sm:$0xf0] }
 0x69c   : > { %7790 = vmatpush.bf16.msra.mxu3 %v9190_v47  ;;  %v11539_v47 = vld [vmem:[#allocation2 + $0x194] sm:$0xf0]  ;;  %7837 = vmatpush.bf16.msrb.mxu1 %v9486_v24  ;;  %v10454_v24 = vor.u32 %v11837_v23, %v10453_v35  ;;  %v9741_v23 = vld [vmem:[#allocation2 + $0x550] sm:$0xf] }
 0x69d   : > { %7933 = vmatpush.bf16.msrb.mxu0 %v9894_v3  ;;  %7851 = vmatpush.bf16.msrb.mxu2 %v9542_v22  ;;  %v9477_v3 = vld [vmem:[#allocation2 + $0x340] sm:$0xf] }
 0x69e   : > { %v9509_v22 = vld [vmem:[#allocation2 + $0x380] sm:$0xf] }
 0x69f   : > { %7791 = vmatmul.bf16.vlgmr.msra.gmra.mxu3 %v15282_v36 }
 0x6a0   : > { %7796 = vmatpush.bf16.msrb.mxu3 %v9310_v37  ;;  %7934 = vmatmul.bf16.vlgmr.msrb.gmra.mxu0 %v15284_v52  ;;  %v11593_v37 = vld [vmem:[#allocation2 + $0x344] sm:$0xf0] }
 0x6a1   : > { %7978 = vmatpush.bf16.msra.mxu0 %v10206_v19  ;;  %v9533_v19 = vld [vmem:[#allocation2 + $0x3b0] sm:$0xf]  ;;  %v9478_v58 = vor.u32 %v11593_v37, %v9477_v3  ;;  %v11679_v3 = vld [vmem:[#allocation2 + $0x5f4] sm:$0xf0]  ;;  %v4140_v37 = vperm.slane %v15260_v60, 7 }
 0x6a2   : > { %v9534_v38 = vor.u32 %v11607_v50, %v9533_v19  ;;  %v9349_v19 = vld [vmem:[#allocation2 + $0x240] sm:$0xf] }
 0x6a3   : > { %7838 = vmatpush.bf16.msrb.mxu1 %v9478_v58  ;;  %v10437_v50 = vld [vmem:[#allocation2 + $0xac0] sm:$0xf] }
 0x6a4   : > { %7797 = vmatpush.bf16.msrb.mxu3 %v9302_v17  ;;  %v9253_v17 = vld [vmem:[#allocation2 + $0x180] sm:$0xf]  ;;  %7852 = vmatpush.bf16.msrb.mxu2 %v9534_v38  ;;  %v11585_v38 = vld [vmem:[#allocation2 + $0x304] sm:$0xf0] }
 0x6a5   : > { %7979 = vmatpush.bf16.msra.mxu0 %v10198_v27  ;;  %v9262_v27 = vor.u32 %v11539_v47, %v9261_v51  ;;  %v9254_v54 = vor.u32 %v11537_v28, %v9253_v17  ;;  %v9821_v51 = vld [vmem:[#allocation2 + $0x5f0] sm:$0xf]  ;;  %v11835_v47 = vld [vmem:[#allocation2 + $0xad4] sm:$0xf0]  ;;  %v9445_v17 = vld [vmem:[#allocation2 + $0x300] sm:$0xf]  ;;  %v15299_v28 = vpack.c.bf16 %v4140_v37, %v4140_v37 }
 0x6a6   : > { %v9822_v57 = vor.u32 %v11679_v3, %v9821_v51  ;;  %v11657_v51 = vld [vmem:[#allocation2 + $0x544] sm:$0xf0]  ;;  %v11827_v3 = vld [vmem:[#allocation2 + $0xa94] sm:$0xf0] }
 0x6a7   : > { %v11671_v37 = vld [vmem:[#allocation2 + $0x5b4] sm:$0xf0] }
 0x6a8   : > { %7798 = vmatpush.bf16.msrb.mxu3 %v9294_v30  ;;  %v9525_v30 = vld [vmem:[#allocation2 + $0x3a0] sm:$0xf] }
 0x6a9   : > { %7980 = vmatpush.bf16.msra.mxu0 %v10190_v34  ;;  %v9470_v34 = vor.u32 %v11591_v9, %v9469_v11  ;;  %v9526_v32 = vor.u32 %v11605_v46, %v9525_v30  ;;  %v11833_v11 = vld [vmem:[#allocation2 + $0xac4] sm:$0xf0]  ;;  %v9446_v9 = vor.u32 %v11585_v38, %v9445_v17  ;;  %v9350_v46 = vor.u32 %v11561_v21, %v9349_v19  ;;  %v9317_v19 = vld [vmem:[#allocation2 + $0x200] sm:$0xf] }
 0x6aa   : > { %v11677_v30 = vld [vmem:[#allocation2 + $0x5e4] sm:$0xf0]  ;;  %v10438_v53 = vor.u32 %v11833_v11, %v10437_v50  ;;  %v10405_v17 = vld [vmem:[#allocation2 + $0xa80] sm:$0xf]  ;;  %v9629_v11 = vld [vmem:[#allocation2 + $0x470] sm:$0xf] }
 0x6ab   : > { %7839 = vmatpush.bf16.msrb.mxu1 %v9470_v34  ;;  %7853 = vmatpush.bf16.msrb.mxu2 %v9526_v32  ;;  %v15303_v32 = vpack.c.bf16 %v4139_v18, %v4139_v18  ;;  %v11553_v50 = vld [vmem:[#allocation2 + $0x204] sm:$0xf0]  ;;  %v10717_v18 = vld [vmem:[#allocation2 + $0xcf0] sm:$0xf] }
 0x6ac   : > { %7799 = vmatpush.bf16.msrb.mxu3 %v9286_v10  ;;  %v10150_v10 = vor.u32 %v11761_v14, %v10149_v20  ;;  %v9757_v20 = vld [vmem:[#allocation2 + $0x570] sm:$0xf]  ;;  %v11663_v14 = vld [vmem:[#allocation2 + $0x574] sm:$0xf0]  ;;  %v11825_v38 = vld [vmem:[#allocation2 + $0xa84] sm:$0xf0] }
 0x6ad   : > { %7981 = vmatpush.bf16.msra.mxu0 %v10182_v12  ;;  %v11565_v12 = vld [vmem:[#allocation2 + $0x264] sm:$0xf0]  ;;  %v9758_v2 = vor.u32 %v11663_v14, %v9757_v20  ;;  %v9725_v20 = vld [vmem:[#allocation2 + $0x530] sm:$0xf]  ;;  %v11655_v14 = vld [vmem:[#allocation2 + $0x534] sm:$0xf0] }
 0x6ae   : > { %v9366_v5 = vor.u32 %v11565_v12, %v9365_v39  ;;  %v11831_v39 = vld [vmem:[#allocation2 + $0xab4] sm:$0xf0] }
 0x6af   : > { %7854 = vmatpush.bf16.msrb.mxu2 %v9518_v15  ;;  %v11675_v12 = vld [vmem:[#allocation2 + $0x5d4] sm:$0xf0]  ;;  %v9797_v15 = vld [vmem:[#allocation2 + $0x5c0] sm:$0xf] }
 0x6b0   : > { %7800 = vmatpush.bf16.msrb.mxu3 %v9278_v45  ;;  %v9462_v45 = vor.u32 %v11589_v59, %v9461_v42  ;;  %v9342_v59 = vor.u32 %v11559_v26, %v9341_v56  ;;  %v9318_v26 = vor.u32 %v11553_v50, %v9317_v19  ;;  %v9701_v50 = vld [vmem:[#allocation2 + $0x500] sm:$0xf] }
 0x6b1   : > { %7982 = vmatpush.bf16.msra.mxu0 %v10174_v29  ;;  %v11563_v29 = vld [vmem:[#allocation2 + $0x254] sm:$0xf0] }
 0x6b2   : > { %7840 = vmatpush.bf16.msrb.mxu1 %v9462_v45  ;;  %v9358_v58 = vor.u32 %v11563_v29, %v9357_v62  ;;  %v11659_v45 = vld [vmem:[#allocation2 + $0x554] sm:$0xf0]  ;;  %v10421_v62 = vld [vmem:[#allocation2 + $0xaa0] sm:$0xf]  ;;  %v11829_v29 = vld [vmem:[#allocation2 + $0xaa4] sm:$0xf0] }
 0x6b4   : > { %7801 = vmatpush.bf16.msrb.mxu3 %v9270_v31  ;;  %v11601_v31 = vld [vmem:[#allocation2 + $0x384] sm:$0xf0] }
 0x6b5   : > { %7983 = vmatpush.bf16.msra.mxu0 %v10166_v1  ;;  %v9510_v1 = vor.u32 %v11601_v31, %v9509_v22  ;;  %v10422_v22 = vor.u32 %v11829_v29, %v10421_v62  ;;  %v9733_v31 = vld [vmem:[#allocation2 + $0x540] sm:$0xf] }
 0x6b6   : > { %7841 = vmatpush.bf16.msrb.mxu1 %v9454_v40  ;;  %v11555_v40 = vld [vmem:[#allocation2 + $0x214] sm:$0xf0]  ;;  %v9734_v21 = vor.u32 %v11657_v51, %v9733_v31  ;;  %v10077_v51 = vld [vmem:[#allocation2 + $0x7f0] sm:$0xf] }
 0x6b7   : > { %7855 = vmatpush.bf16.msrb.mxu2 %v9510_v1  ;;  %v10413_v1 = vld [vmem:[#allocation2 + $0xa90] sm:$0xf] }
 0x6b8   : > { %7802 = vmatpush.bf16.msrb.mxu3 %v9262_v27  ;;  %v10446_v27 = vor.u32 %v11835_v47, %v10445_v49  ;;  %v9742_v49 = vor.u32 %v11659_v45, %v9741_v23  ;;  %v9789_v47 = vld [vmem:[#allocation2 + $0x5b0] sm:$0xf]  ;;  %v11627_v45 = vld [vmem:[#allocation2 + $0x454] sm:$0xf0] }
 0x6b9   : > { %7984 = vmatpush.bf16.msra.mxu0 %v10158_v0  ;;  %v9813_v0 = vld [vmem:[#allocation2 + $0x5e0] sm:$0xf]  ;;  %v9613_v23 = vld [vmem:[#allocation2 + $0x450] sm:$0xf] }
 0x6ba   : > { %v9814_v34 = vor.u32 %v11677_v30, %v9813_v0  ;;  %7856 = vmatmul.bf16.vlgmr.msrb.gmra.mxu2 %v15299_v28  ;;  %7842 = vmatpush.bf16.msrb.mxu1 %v9446_v9  ;;  %v9781_v0 = vld [vmem:[#allocation2 + $0x5a0] sm:$0xf]  ;;  %v11631_v9 = vld [vmem:[#allocation2 + $0x474] sm:$0xf0]  ;;  %v11669_v30 = vld [vmem:[#allocation2 + $0x5a4] sm:$0xf0] }
 0x6bb   : > { %7900 = vmatpush.bf16.msra.mxu2 %v9822_v57  ;;  %v9790_v57 = vor.u32 %v11671_v37, %v9789_v47  ;;  %v9782_v56 = vor.u32 %v11669_v30, %v9781_v0  ;;  %v11743_v47 = vld [vmem:[#allocation2 + $0x7f4] sm:$0xf0]  ;;  %v11625_v37 = vld [vmem:[#allocation2 + $0x444] sm:$0xf0] }
 0x6bc   : > { %7803 = vmatpush.bf16.msrb.mxu3 %v9254_v54  ;;  %v9749_v54 = vld [vmem:[#allocation2 + $0x560] sm:$0xf]  ;;  %v11897_v0 = vld [vmem:[#allocation2 + $0xcc4] sm:$0xf0] }
 0x6bd   : > { %7985 = vmatpush.bf16.msra.mxu0 %v10150_v10  ;;  %v9805_v10 = vld [vmem:[#allocation2 + $0x5d0] sm:$0xf]  ;;  %v9750_v42 = vor.u32 %v11661_v44, %v9749_v54  ;;  %7843 = vmatmul.bf16.vlgmr.msrb.gmra.mxu1 %v15303_v32  ;;  %v10406_v54 = vor.u32 %v11825_v38, %v10405_v17  ;;  %v9630_v44 = vor.u32 %v11631_v9, %v9629_v11  ;;  %v11649_v17 = vld [vmem:[#allocation2 + $0x504] sm:$0xf0] }
 0x6be   : > { %7887 = vmatpush.bf16.msra.mxu1 %v9758_v2  ;;  %v11903_v2 = vld [vmem:[#allocation2 + $0xcf4] sm:$0xf0]  ;;  %v9702_v9 = vor.u32 %v11649_v17, %v9701_v50  ;;  %v11741_v30 = vld [vmem:[#allocation2 + $0x7e4] sm:$0xf0] }
 0x6bf   : > { %7804 = vmatmul.bf16.vlgmr.msrb.gmra.mxu3 %v15292_v55  ;;  %7901 = vmatpush.bf16.msra.mxu2 %v9814_v34  ;;  %v4137_v34 = vperm.slane %v15260_v60, 4  ;;  %v10709_v60 = vld [vmem:[#allocation2 + $0xce0] sm:$0xf] }
 0x6c0   : > { %7809 = vmatpush.bf16.msra.mxu3 %v9374_v6  ;;  %7986 = vmatmul.bf16.vlgmr.msra.gmra.mxu0 %v15294_v43  ;;  %v10429_v6 = vld [vmem:[#allocation2 + $0xab0] sm:$0xf] }
 0x6c1   : > { %8030 = vmatpush.bf16.msrb.mxu0 %v10462_v48  ;;  %v9806_v48 = vor.u32 %v11675_v12, %v9805_v10  ;;  %v10430_v35 = vor.u32 %v11831_v39, %v10429_v6  ;;  %v9621_v10 = vld [vmem:[#allocation2 + $0x460] sm:$0xf]  ;;  %v11653_v39 = vld [vmem:[#allocation2 + $0x524] sm:$0xf0]  ;;  %v10718_v12 = vor.u32 %v11903_v2, %v10717_v18  ;;  %v15308_v13 = vpack.c.bf16 %v4137_v34, %v4137_v34 }
 0x6c2   : > { %7888 = vmatpush.bf16.msra.mxu1 %v9750_v42  ;;  %v9717_v6 = vld [vmem:[#allocation2 + $0x520] sm:$0xf]  ;;  %v11629_v42 = vld [vmem:[#allocation2 + $0x464] sm:$0xf0]  ;;  %v4143_v18 = vperm.slane %v15270_v41, 2 }
 0x6c3   : > { %7902 = vmatpush.bf16.msra.mxu2 %v9806_v48  ;;  %v9773_v48 = vld [vmem:[#allocation2 + $0x590] sm:$0xf]  ;;  %v9622_v29 = vor.u32 %v11629_v42, %v9621_v10  ;;  %v11725_v10 = vld [vmem:[#allocation2 + $0x764] sm:$0xf0]  ;;  %v11739_v42 = vld [vmem:[#allocation2 + $0x7d4] sm:$0xf0] }
 0x6c4   : > { %7810 = vmatpush.bf16.msra.mxu3 %v9366_v5  ;;  %v11673_v5 = vld [vmem:[#allocation2 + $0x5c4] sm:$0xf0] }
 0x6c5   : > { %8031 = vmatpush.bf16.msrb.mxu0 %v10454_v24  ;;  %v9798_v8 = vor.u32 %v11673_v5, %v9797_v15  ;;  %v9325_v24 = vld [vmem:[#allocation2 + $0x210] sm:$0xf] }
 0x6c6   : > { %7889 = vmatpush.bf16.msra.mxu1 %v9742_v49  ;;  %v10701_v5 = vld [vmem:[#allocation2 + $0xcd0] sm:$0xf]  ;;  %v11899_v49 = vld [vmem:[#allocation2 + $0xcd4] sm:$0xf0] }
 0x6c7   : > { %7903 = vmatpush.bf16.msra.mxu2 %v9798_v8  ;;  %v9709_v8 = vld [vmem:[#allocation2 + $0x510] sm:$0xf]  ;;  %v10702_v38 = vor.u32 %v11899_v49, %v10701_v5  ;;  %v10677_v5 = vld [vmem:[#allocation2 + $0xca0] sm:$0xf]  ;;  %v11893_v49 = vld [vmem:[#allocation2 + $0xca4] sm:$0xf0] }
 0x6c8   : > { %7811 = vmatpush.bf16.msra.mxu3 %v9358_v58  ;;  %v9326_v58 = vor.u32 %v11555_v40, %v9325_v24  ;;  %v11651_v24 = vld [vmem:[#allocation2 + $0x514] sm:$0xf0]  ;;  %v9765_v40 = vld [vmem:[#allocation2 + $0x580] sm:$0xf] }
 0x6c9   : > { %8032 = vmatpush.bf16.msrb.mxu0 %v10446_v27  ;;  %v10414_v27 = vor.u32 %v11827_v3, %v10413_v1  ;;  %v9710_v31 = vor.u32 %v11651_v24, %v9709_v8  ;;  %v4144_v1 = vperm.slane %v15270_v41, 3  ;;  %v9605_v3 = vld [vmem:[#allocation2 + $0x440] sm:$0xf]  ;;  %v11737_v8 = vld [vmem:[#allocation2 + $0x7c4] sm:$0xf0] }
 0x6ca   : > { %7890 = vmatpush.bf16.msra.mxu1 %v9734_v21  ;;  %v9614_v21 = vor.u32 %v11627_v45, %v9613_v23  ;;  %v9606_v34 = vor.u32 %v11625_v37, %v9605_v3  ;;  %v9997_v45 = vld [vmem:[#allocation2 + $0x750] sm:$0xf]  ;;  %v11721_v3 = vld [vmem:[#allocation2 + $0x744] sm:$0xf0] }
 0x6cb   : > { %7904 = vmatpush.bf16.msra.mxu2 %v9790_v57  ;;  %v10693_v57 = vld [vmem:[#allocation2 + $0xcc0] sm:$0xf]  ;;  %v15315_v11 = vpack.c.bf16 %v4144_v1, %v4144_v1  ;;  %v10045_v37 = vld [vmem:[#allocation2 + $0x7b0] sm:$0xf] }
 0x6cc   : > { %7812 = vmatpush.bf16.msra.mxu3 %v9350_v46  ;;  %v9726_v46 = vor.u32 %v11655_v14, %v9725_v20  ;;  %v11727_v20 = vld [vmem:[#allocation2 + $0x774] sm:$0xf0]  ;;  %v10069_v14 = vld [vmem:[#allocation2 + $0x7e0] sm:$0xf] }
 0x6cd   : > { %8033 = vmatpush.bf16.msrb.mxu0 %v10438_v53  ;;  %v4154_v53 = vperm.slane %v15289_v4, 5  ;;  %v9989_v1 = vld [vmem:[#allocation2 + $0x740] sm:$0xf] }
 0x6ce   : > { %7891 = vmatpush.bf16.msra.mxu1 %v9726_v46  ;;  %v9597_v46 = vld [vmem:[#allocation2 + $0x430] sm:$0xf]  ;;  %v9990_v50 = vor.u32 %v11721_v3, %v9989_v1 }
 0x6cf   : > { %7905 = vmatpush.bf16.msra.mxu2 %v9782_v56  ;;  %v15310_v15 = vpack.c.bf16 %v4154_v53, %v4154_v53  ;;  %v11623_v56 = vld [vmem:[#allocation2 + $0x434] sm:$0xf0]  ;;  %v10694_v53 = vor.u32 %v11897_v0, %v10693_v57  ;;  %v10957_v1 = vld [vmem:[#allocation2 + $0xed0] sm:$0xf] }
 0x6d0   : > { %7813 = vmatpush.bf16.msra.mxu3 %v9342_v59  ;;  %v11667_v59 = vld [vmem:[#allocation2 + $0x594] sm:$0xf0]  ;;  %v9965_v3 = vld [vmem:[#allocation2 + $0x710] sm:$0xf] }
 0x6d1   : > { %8034 = vmatpush.bf16.msrb.mxu0 %v10430_v35  ;;  %v9718_v35 = vor.u32 %v11653_v39, %v9717_v6  ;;  %v9774_v62 = vor.u32 %v11667_v59, %v9773_v48  ;;  %v10061_v6 = vld [vmem:[#allocation2 + $0x7d0] sm:$0xf]  ;;  %v9598_v59 = vor.u32 %v11623_v56, %v9597_v46  ;;  %v11735_v57 = vld [vmem:[#allocation2 + $0x7b4] sm:$0xf0]  ;;  %v11733_v46 = vld [vmem:[#allocation2 + $0x7a4] sm:$0xf0] }
 0x6d2   : > { %v10685_v39 = vld [vmem:[#allocation2 + $0xcb0] sm:$0xf] }
 0x6d3   : > { %7892 = vmatpush.bf16.msra.mxu1 %v9718_v35  ;;  %7906 = vmatpush.bf16.msra.mxu2 %v9774_v62  ;;  %v10062_v35 = vor.u32 %v11739_v42, %v10061_v6  ;;  %v11723_v62 = vld [vmem:[#allocation2 + $0x754] sm:$0xf0]  ;;  %v10973_v56 = vld [vmem:[#allocation2 + $0xef0] sm:$0xf] }
 0x6d4   : > { %7814 = vmatpush.bf16.msra.mxu3 %v9334_v61  ;;  %v10710_v61 = vor.u32 %v11901_v33, %v10709_v60  ;;  %v9589_v60 = vld [vmem:[#allocation2 + $0x420] sm:$0xf]  ;;  %v11621_v33 = vld [vmem:[#allocation2 + $0x424] sm:$0xf0] }
 0x6d5   : > { %8035 = vmatpush.bf16.msrb.mxu0 %v10422_v22  ;;  %v11665_v22 = vld [vmem:[#allocation2 + $0x584] sm:$0xf0]  ;;  %v9590_v24 = vor.u32 %v11621_v33, %v9589_v60 }
 0x6d6   : > { %v9766_v19 = vor.u32 %v11665_v22, %v9765_v40  ;;  %v9581_v40 = vld [vmem:[#allocation2 + $0x410] sm:$0xf]  ;;  %v11619_v22 = vld [vmem:[#allocation2 + $0x414] sm:$0xf0]  ;;  %v11693_v60 = vld [vmem:[#allocation2 + $0x664] sm:$0xf0] }
 0x6d7   : > { %7893 = vmatpush.bf16.msra.mxu1 %v9710_v31  ;;  %v9582_v17 = vor.u32 %v11619_v22, %v9581_v40  ;;  %v11691_v40 = vld [vmem:[#allocation2 + $0x654] sm:$0xf0] }
 0x6d8   : > { %7815 = vmatpush.bf16.msra.mxu3 %v9326_v58  ;;  %v10078_v58 = vor.u32 %v11743_v47, %v10077_v51  ;;  %7907 = vmatpush.bf16.msra.mxu2 %v9766_v19  ;;  %v10678_v51 = vor.u32 %v11893_v49, %v10677_v5  ;;  %v10669_v19 = vld [vmem:[#allocation2 + $0xc90] sm:$0xf]  ;;  %v10965_v49 = vld [vmem:[#allocation2 + $0xee0] sm:$0xf] }
 0x6d9   : > { %8036 = vmatpush.bf16.msrb.mxu0 %v10414_v27  ;;  %v10013_v27 = vld [vmem:[#allocation2 + $0x770] sm:$0xf] }
 0x6da   : > { %v10014_v2 = vor.u32 %v11727_v20, %v10013_v27  ;;  %v10661_v27 = vld [vmem:[#allocation2 + $0xc80] sm:$0xf]  ;;  %v11889_v20 = vld [vmem:[#allocation2 + $0xc84] sm:$0xf0] }
 0x6db   : > { %7908 = vmatmul.bf16.vlgmr.msra.gmra.mxu2 %v15315_v11  ;;  %7894 = vmatpush.bf16.msra.mxu1 %v9702_v9  ;;  %v9981_v9 = vld [vmem:[#allocation2 + $0x730] sm:$0xf]  ;;  %v10662_v42 = vor.u32 %v11889_v20, %v10661_v27  ;;  %v4148_v27 = vperm.slane %v15270_v41, 7  ;;  %v4828_v20 = vld [vmem:[%s15731_s6] sm:$0x3] }
 0x6dc   : > { %7816 = vmatpush.bf16.msra.mxu3 %v9318_v26  ;;  %7952 = vmatpush.bf16.msrb.mxu2 %v10078_v58  ;;  %v10070_v26 = vor.u32 %v11741_v30, %v10069_v14  ;;  %v9573_v58 = vld [vmem:[#allocation2 + $0x400] sm:$0xf]  ;;  %v10046_v14 = vor.u32 %v11735_v57, %v10045_v37  ;;  %v11719_v30 = vld [vmem:[#allocation2 + $0x734] sm:$0xf0]  ;;  %v11729_v57 = vld [vmem:[#allocation2 + $0x784] sm:$0xf0] }
 0x6dd   : > { %8037 = vmatpush.bf16.msrb.mxu0 %v10406_v54  ;;  %v15318_v54 = vpack.c.bf16 %v4143_v18, %v4143_v18  ;;  %v10037_v18 = vld [vmem:[#allocation2 + $0x7a0] sm:$0xf]  ;;  %v11715_v37 = vld [vmem:[#allocation2 + $0x714] sm:$0xf0] }
 0x6df   : > { %7817 = vmatmul.bf16.vlgmr.msra.gmra.mxu3 %v15308_v13  ;;  %7939 = vmatpush.bf16.msrb.mxu1 %v10014_v2  ;;  %v9885_v2 = vld [vmem:[#allocation2 + $0x670] sm:$0xf] }
 0x6e0   : > { %7861 = vmatpush.bf16.msrb.mxu3 %v9630_v44  ;;  %8038 = vmatmul.bf16.vlgmr.msrb.gmra.mxu0 %v15310_v15  ;;  %v10005_v44 = vld [vmem:[#allocation2 + $0x760] sm:$0xf] }
 0x6e1   : > { %8082 = vmatpush.bf16.msra.mxu0 %v10718_v12  ;;  %v11895_v12 = vld [vmem:[#allocation2 + $0xcb4] sm:$0xf0]  ;;  %v10006_v48 = vor.u32 %v11725_v10, %v10005_v44  ;;  %7953 = vmatpush.bf16.msrb.mxu2 %v10070_v26  ;;  %v9982_v44 = vor.u32 %v11719_v30, %v9981_v9  ;;  %v15325_v10 = vld [vmem:[#allocation6 + $0x18] sm:$0xff] }
 0x6e2   : > { %v10686_v23 = vor.u32 %v11895_v12, %v10685_v39  ;;  %7895 = vmatmul.bf16.vlgmr.msra.gmra.mxu1 %v15318_v54  ;;  %v15322_v47 = vpop.f32.mrf.mxu3  ;;  %v11967_v26 = vld [vmem:[#allocation2 + $0xef4] sm:$0xf0]  ;;  %v10038_v39 = vor.u32 %v11733_v46, %v10037_v18  ;;  %v4158_v12 = vperm.slane %v15325_v10, 1  ;;  %v10949_v18 = vld [vmem:[#allocation2 + $0xec0] sm:$0xf] }
 0x6e3   : > { %7940 = vmatpush.bf16.msrb.mxu1 %v10006_v48  ;;  %v11713_v46 = vld [vmem:[#allocation2 + $0x704] sm:$0xf0] }
 0x6e4   : > { %7862 = vmatpush.bf16.msrb.mxu3 %v9622_v29  ;;  %v10053_v29 = vld [vmem:[#allocation2 + $0x7c0] sm:$0xf]  ;;  %v15330_v22 = vpack.c.bf16 %v4158_v12, %v4158_v12  ;;  %v11805_v12 = vld [vmem:[#allocation2 + $0x9e4] sm:$0xf0] }
 0x6e5   : > { %8083 = vmatpush.bf16.msra.mxu0 %v10710_v61  ;;  %v9998_v61 = vor.u32 %v11723_v62, %v9997_v45  ;;  %7954 = vmatpush.bf16.msrb.mxu2 %v10062_v35  ;;  %v10054_v31 = vor.u32 %v11737_v8, %v10053_v29  ;;  %v9973_v35 = vld [vmem:[#allocation2 + $0x720] sm:$0xf]  ;;  %v11717_v45 = vld [vmem:[#allocation2 + $0x724] sm:$0xf0]  ;;  %v10029_v62 = vld [vmem:[#allocation2 + $0x790] sm:$0xf] }
 0x6e6   : > { %v11731_v29 = vld [vmem:[#allocation2 + $0x794] sm:$0xf0]  ;;  %v11965_v8 = vld [vmem:[#allocation2 + $0xee4] sm:$0xf0] }
 0x6e7   : > { %7941 = vmatpush.bf16.msrb.mxu1 %v9998_v61  ;;  %v9974_v61 = vor.u32 %v11717_v45, %v9973_v35  ;;  %v9853_v35 = vld [vmem:[#allocation2 + $0x630] sm:$0xf] }
 0x6e8   : > { %7863 = vmatpush.bf16.msrb.mxu3 %v9614_v21  ;;  %v11891_v21 = vld [vmem:[#allocation2 + $0xc94] sm:$0xf0] }
 0x6e9   : > { %8084 = vmatpush.bf16.msra.mxu0 %v10702_v38  ;;  %v11617_v38 = vld [vmem:[#allocation2 + $0x404] sm:$0xf0]  ;;  %7955 = vmatpush.bf16.msrb.mxu2 %v10054_v31  ;;  %v10670_v0 = vor.u32 %v11891_v21, %v10669_v19  ;;  %v10030_v31 = vor.u32 %v11731_v29, %v10029_v62  ;;  %v10966_v19 = vor.u32 %v11965_v8, %v10965_v49  ;;  %v10021_v21 = vld [vmem:[#allocation2 + $0x780] sm:$0xf] }
 0x6ea   : > { %v9574_v6 = vor.u32 %v11617_v38, %v9573_v58  ;;  %v7768_v33 = vpop.f32.mrf.mxu3  ;;  %v10333_v58 = vld [vmem:[#allocation2 + $0x9f0] sm:$0xf]  ;;  %v11807_v38 = vld [vmem:[#allocation2 + $0x9f4] sm:$0xf0]  ;;  %v10022_v9 = vor.u32 %v11729_v57, %v10021_v21  ;;  %v10261_v49 = vld [vmem:[#allocation2 + $0x960] sm:$0xf] }
 0x6eb   : > { %7942 = vmatpush.bf16.msrb.mxu1 %v9990_v50  ;;  %v11963_v50 = vld [vmem:[#allocation2 + $0xed4] sm:$0xf0]  ;;  %v11789_v8 = vld [vmem:[#allocation2 + $0x964] sm:$0xf0]  ;;  %v10253_v57 = vld [vmem:[#allocation2 + $0x950] sm:$0xf] }
 0x6ec   : > { %7864 = vmatpush.bf16.msrb.mxu3 %v9606_v34  ;;  %v11695_v34 = vld [vmem:[#allocation2 + $0x674] sm:$0xf0] }
 0x6ed   : > { %8085 = vmatpush.bf16.msra.mxu0 %v10694_v53  ;;  %v4141_v53 = vperm.slane %v15270_v41, 0  ;;  %7956 = vmatpush.bf16.msrb.mxu2 %v10046_v14  ;;  %v9886_v48 = vor.u32 %v11695_v34, %v9885_v2  ;;  %v9861_v14 = vld [vmem:[#allocation2 + $0x640] sm:$0xf]  ;;  %v10334_v2 = vor.u32 %v11807_v38, %v10333_v58  ;;  %v11791_v41 = vld [vmem:[#allocation2 + $0x974] sm:$0xf0] }
 0x6ee   : > { %v9957_v34 = vld [vmem:[#allocation2 + $0x700] sm:$0xf]  ;;  %v11787_v58 = vld [vmem:[#allocation2 + $0x954] sm:$0xf0] }
 0x6ef   : > { %v15328_v5 = vpack.c.bf16 %v4141_v53, %v4141_v53  ;;  %7943 = vmatpush.bf16.msrb.mxu1 %v9982_v44  ;;  %v10325_v53 = vld [vmem:[#allocation2 + $0x9e0] sm:$0xf]  ;;  %v11961_v44 = vld [vmem:[#allocation2 + $0xec4] sm:$0xf0] }
 0x6f0   : > { %7865 = vmatpush.bf16.msrb.mxu3 %v9598_v59  ;;  %v9877_v59 = vld [vmem:[#allocation2 + $0x660] sm:$0xf]  ;;  %v10326_v45 = vor.u32 %v11805_v12, %v10325_v53  ;;  %v10950_v62 = vor.u32 %v11961_v44, %v10949_v18  ;;  %v11955_v53 = vld [vmem:[#allocation2 + $0xe94] sm:$0xf0] }
 0x6f1   : > { %8086 = vmatpush.bf16.msra.mxu0 %v10686_v23  ;;  %v10974_v23 = vor.u32 %v11967_v26, %v10973_v56  ;;  %7957 = vmatpush.bf16.msrb.mxu2 %v10038_v39  ;;  %v10958_v56 = vor.u32 %v11963_v50, %v10957_v1  ;;  %v10269_v26 = vld [vmem:[#allocation2 + $0x970] sm:$0xf]  ;;  %v9958_v39 = vor.u32 %v11713_v46, %v9957_v34  ;;  %v10309_v50 = vld [vmem:[#allocation2 + $0x9c0] sm:$0xf]  ;;  %v11799_v44 = vld [vmem:[#allocation2 + $0x9b4] sm:$0xf0] }
 0x6f2   : > { %v10933_v38 = vld [vmem:[#allocation2 + $0xea0] sm:$0xf] }
 0x6f3   : > { %7944 = vmatpush.bf16.msrb.mxu1 %v9974_v61  ;;  %v10317_v61 = vld [vmem:[#allocation2 + $0x9d0] sm:$0xf]  ;;  %v10245_v46 = vld [vmem:[#allocation2 + $0x940] sm:$0xf] }
 0x6f4   : > { %7866 = vmatpush.bf16.msrb.mxu3 %v9590_v24  ;;  %v9869_v24 = vld [vmem:[#allocation2 + $0x650] sm:$0xf] }
 0x6f5   : > { %8087 = vmatpush.bf16.msra.mxu0 %v10678_v51  ;;  %v9878_v51 = vor.u32 %v11693_v60, %v9877_v59  ;;  %7958 = vmatpush.bf16.msrb.mxu2 %v10030_v31  ;;  %v9870_v30 = vor.u32 %v11691_v40, %v9869_v24  ;;  %v10270_v59 = vor.u32 %v11791_v41, %v10269_v26  ;;  %v7750_v60 = vperm.slane %v4828_v20, 0  ;;  %v10941_v24 = vld [vmem:[#allocation2 + $0xeb0] sm:$0xf]  ;;  %v11959_v40 = vld [vmem:[#allocation2 + $0xeb4] sm:$0xf0] }
 0x6f6   : > { %v11803_v31 = vld [vmem:[#allocation2 + $0x9d4] sm:$0xf0]  ;;  %v10942_v21 = vor.u32 %v11959_v40, %v10941_v24  ;;  %v11801_v20 = vld [vmem:[#allocation2 + $0x9c4] sm:$0xf0]  ;;  %v10301_v26 = vld [vmem:[#allocation2 + $0x9b0] sm:$0xf] }
 0x6f7   : > { %v10310_v18 = vor.u32 %v11801_v20, %v10309_v50  ;;  %v11797_v24 = vld [vmem:[#allocation2 + $0x9a4] sm:$0xf0]  ;;  %v11229_v40 = vld [vmem:[#allocation2 + $0x10f0] sm:$0xf] }
 0x6f8   : > { %7867 = vmatpush.bf16.msrb.mxu3 %v9582_v17  ;;  %v9966_v17 = vor.u32 %v11715_v37, %v9965_v3  ;;  %v9845_v3 = vld [vmem:[#allocation2 + $0x620] sm:$0xf]  ;;  %v11685_v37 = vld [vmem:[#allocation2 + $0x624] sm:$0xf0] }
 0x6f9   : > { %8088 = vmatpush.bf16.msra.mxu0 %v10670_v0  ;;  %v11689_v0 = vld [vmem:[#allocation2 + $0x644] sm:$0xf0]  ;;  %7959 = vmatpush.bf16.msrb.mxu2 %v10022_v9  ;;  %v9837_v9 = vld [vmem:[#allocation2 + $0x610] sm:$0xf] }
 0x6fa   : > { %7945 = vmatpush.bf16.msrb.mxu1 %v9966_v17  ;;  %v9862_v33 = vor.u32 %v11689_v0, %v9861_v14  ;;  %v7767_v17 = vadd.f32 %v15322_v47, %v7750_v60  ;;  %v10254_v14 = vor.u32 %v11787_v58, %v10253_v57  ;;  %v9846_v0 = vor.u32 %v11685_v37, %v9845_v3  ;;  %v10925_v47 = vld [vmem:[#allocation2 + $0xe90] sm:$0xf]  ;;  %v10917_v60 = vld [vmem:[#allocation2 + $0xe80] sm:$0xf]  ;;  %v11757_v20 = vld [vmem:[#allocation2 + $0x864] sm:$0xf0] }
 0x6fb   : > { %v10133_v58 = vld [vmem:[#allocation2 + $0x860] sm:$0xf] }
 0x6fc   : > { %7868 = vmatpush.bf16.msrb.mxu3 %v9574_v6  ;;  %v15338_v6 = vpack.c.bf16 %v4148_v27, %v4148_v27  ;;  %v11957_v27 = vld [vmem:[#allocation2 + $0xea4] sm:$0xf0] }
 0x6fd   : > { %8089 = vmatpush.bf16.msra.mxu0 %v10662_v42  ;;  %v15340_v42 = vld [vmem:[#allocation6 + $0x8] sm:$0xff]  ;;  %8004 = vmatpush.bf16.msra.mxu2 %v10334_v2  ;;  %v10934_v34 = vor.u32 %v11957_v27, %v10933_v38  ;;  %v11781_v38 = vld [vmem:[#allocation2 + $0x924] sm:$0xf0] }
 0x6fe   : > { %7960 = vmatmul.bf16.vlgmr.msrb.gmra.mxu2 %v15338_v6  ;;  %7946 = vmatpush.bf16.msrb.mxu1 %v9958_v39  ;;  %v9829_v39 = vld [vmem:[#allocation2 + $0x600] sm:$0xf] }
 0x6ff   : > { %7869 = vmatmul.bf16.vlgmr.msrb.gmra.mxu3 %v15328_v5 }
 0x700   : > { %7913 = vmatpush.bf16.msra.mxu3 %v9886_v48  ;;  %8090 = vmatmul.bf16.vlgmr.msra.gmra.mxu0 %v15330_v22  ;;  %v4147_v48 = vperm.slane %v15340_v42, 6 }
 0x701   : > { %8134 = vmatpush.bf16.msrb.mxu0 %v10974_v23  ;;  %v11687_v23 = vld [vmem:[#allocation2 + $0x634] sm:$0xf0]  ;;  %8005 = vmatpush.bf16.msra.mxu2 %v10326_v45  ;;  %v10237_v45 = vld [vmem:[#allocation2 + $0x930] sm:$0xf] }
 0x702   : > { %v15343_v29 = vpack.c.bf16 %v4147_v48, %v4147_v48  ;;  %7991 = vmatpush.bf16.msra.mxu1 %v10270_v59  ;;  %v9854_v1 = vor.u32 %v11687_v23, %v9853_v35  ;;  %v7779_v2 = vpop.f32.mrf.mxu3  ;;  %v11681_v59 = vld [vmem:[#allocation2 + $0x604] sm:$0xf0]  ;;  %v10302_v35 = vor.u32 %v11799_v44, %v10301_v26  ;;  %v10926_v23 = vor.u32 %v11955_v53, %v10925_v47  ;;  %v11213_v47 = vld [vmem:[#allocation2 + $0x10d0] sm:$0xf]  ;;  %v11779_v44 = vld [vmem:[#allocation2 + $0x914] sm:$0xf0] }
 0x703   : > { %v15348_v41 = vadd.f32 %v7779_v2, %v7767_v17  ;;  %v9830_v3 = vor.u32 %v11681_v59, %v9829_v39  ;;  %v10229_v17 = vld [vmem:[#allocation2 + $0x920] sm:$0xf]  ;;  %v10125_v2 = vld [vmem:[#allocation2 + $0x850] sm:$0xf]  ;;  %v10134_v26 = vor.u32 %v11757_v20, %v10133_v58  ;;  %v11869_v58 = vld [vmem:[#allocation2 + $0xbe4] sm:$0xf0] }
 0x704   : > { %7914 = vmatpush.bf16.msra.mxu3 %v9878_v51  ;;  %v10262_v51 = vor.u32 %v11789_v8, %v10261_v49  ;;  %7947 = vmatmul.bf16.vlgmr.msrb.gmra.mxu1 %v15343_v29  ;;  %v10293_v49 = vld [vmem:[#allocation2 + $0x9a0] sm:$0xf]  ;;  %v10141_v8 = vld [vmem:[#allocation2 + $0x870] sm:$0xf]  ;;  %v11751_v20 = vld [vmem:[#allocation2 + $0x834] sm:$0xf0] }
 0x705   : > { %8135 = vmatpush.bf16.msrb.mxu0 %v10966_v19  ;;  %v10318_v19 = vor.u32 %v11803_v31, %v10317_v61  ;;  %v11759_v61 = vld [vmem:[#allocation2 + $0x874] sm:$0xf0]  ;;  %v10294_v37 = vor.u32 %v11797_v24, %v10293_v49  ;;  %v10221_v53 = vld [vmem:[#allocation2 + $0x910] sm:$0xf] }
 0x706   : > { %7992 = vmatpush.bf16.msra.mxu1 %v10262_v51  ;;  %v12031_v31 = vld [vmem:[#allocation2 + $0x10f4] sm:$0xf0]  ;;  %v4145_v51 = vperm.slane %v15340_v42, 4  ;;  %v10142_v57 = vor.u32 %v11759_v61, %v10141_v8  ;;  %v10589_v59 = vld [vmem:[#allocation2 + $0xbf0] sm:$0xf] }
 0x707   : > { %8006 = vmatpush.bf16.msra.mxu2 %v10318_v19  ;;  %v4162_v19 = vperm.slane %v15325_v10, 5  ;;  %v11230_v27 = vor.u32 %v12031_v31, %v11229_v40  ;;  %v11205_v61 = vld [vmem:[#allocation2 + $0x10c0] sm:$0xf]  ;;  %v11777_v31 = vld [vmem:[#allocation2 + $0x904] sm:$0xf0] }
 0x708   : > { %7915 = vmatpush.bf16.msra.mxu3 %v9870_v30  ;;  %v11683_v30 = vld [vmem:[#allocation2 + $0x614] sm:$0xf0]  ;;  %v15352_v42 = vpack.c.bf16 %v4145_v51, %v4145_v51  ;;  %v10213_v40 = vld [vmem:[#allocation2 + $0x900] sm:$0xf] }
 0x709   : > { %8136 = vmatpush.bf16.msrb.mxu0 %v10958_v56  ;;  %v11785_v56 = vld [vmem:[#allocation2 + $0x944] sm:$0xf0]  ;;  %v9838_v48 = vor.u32 %v11683_v30, %v9837_v9  ;;  %v11221_v9 = vld [vmem:[#allocation2 + $0x10e0] sm:$0xf] }
 0x70a   : > { %7993 = vmatpush.bf16.msra.mxu1 %v10254_v14  ;;  %v10246_v12 = vor.u32 %v11785_v56, %v10245_v46  ;;  %v7781_v50 = vpop.f32.mrf.mxu3  ;;  %v10285_v14 = vld [vmem:[#allocation2 + $0x990] sm:$0xf]  ;;  %v12029_v30 = vld [vmem:[#allocation2 + $0x10e4] sm:$0xf0]  ;;  %v15354_v46 = vpack.c.bf16 %v4162_v19, %v4162_v19 }
 0x70b   : > { %8007 = vmatpush.bf16.msra.mxu2 %v10310_v18  ;;  %v10230_v18 = vor.u32 %v11781_v38, %v10229_v17  ;;  %v11222_v39 = vor.u32 %v12029_v30, %v11221_v9  ;;  %v12025_v19 = vld [vmem:[#allocation2 + $0x10c4] sm:$0xf0]  ;;  %v4151_v50 = vperm.slane %v15289_v4, 2  ;;  %v10517_v30 = vld [vmem:[#allocation2 + $0xb60] sm:$0xf] }
 0x70c   : > { %7916 = vmatpush.bf16.msra.mxu3 %v9862_v33  ;;  %v11953_v33 = vld [vmem:[#allocation2 + $0xe84] sm:$0xf0] }
 0x70d   : > { %8137 = vmatpush.bf16.msrb.mxu0 %v10950_v62  ;;  %v11783_v62 = vld [vmem:[#allocation2 + $0x934] sm:$0xf0]  ;;  %v15362_v9 = vpack.c.bf16 %v4151_v50, %v4151_v50  ;;  %v11745_v50 = vld [vmem:[#allocation2 + $0x804] sm:$0xf0] }
 0x70e   : > { %7994 = vmatpush.bf16.msra.mxu1 %v10246_v12  ;;  %v10277_v12 = vld [vmem:[#allocation2 + $0x980] sm:$0xf] }
 0x70f   : > { %8008 = vmatpush.bf16.msra.mxu2 %v10302_v35  ;;  %v11871_v35 = vld [vmem:[#allocation2 + $0xbf4] sm:$0xf0] }
 0x710   : > { %7917 = vmatpush.bf16.msra.mxu3 %v9854_v1  ;;  %v10238_v1 = vor.u32 %v11783_v62, %v10237_v45  ;;  %v10117_v45 = vld [vmem:[#allocation2 + $0x840] sm:$0xf]  ;;  %v11753_v62 = vld [vmem:[#allocation2 + $0x844] sm:$0xf0]  ;;  %v10590_v24 = vor.u32 %v11871_v35, %v10589_v59  ;;  %v11851_v59 = vld [vmem:[#allocation2 + $0xb54] sm:$0xf0] }
 0x711   : > { %8138 = vmatpush.bf16.msrb.mxu0 %v10942_v21  ;;  %v10918_v21 = vor.u32 %v11953_v33, %v10917_v60  ;;  %v12027_v60 = vld [vmem:[#allocation2 + $0x10d4] sm:$0xf0]  ;;  %v10222_v33 = vor.u32 %v11779_v44, %v10221_v53  ;;  %v10118_v38 = vor.u32 %v11753_v62, %v10117_v45  ;;  %v10101_v53 = vld [vmem:[#allocation2 + $0x820] sm:$0xf]  ;;  %v11749_v44 = vld [vmem:[#allocation2 + $0x824] sm:$0xf0] }
 0x712   : > { %7995 = vmatpush.bf16.msra.mxu1 %v10238_v1  ;;  %v11214_v51 = vor.u32 %v12027_v60, %v11213_v47  ;;  %v10525_v1 = vld [vmem:[#allocation2 + $0xb70] sm:$0xf]  ;;  %v10565_v60 = vld [vmem:[#allocation2 + $0xbc0] sm:$0xf]  ;;  %v12021_v35 = vld [vmem:[#allocation2 + $0x10a4] sm:$0xf0]  ;;  %v10102_v62 = vor.u32 %v11749_v44, %v10101_v53 }
 0x713   : > { %8009 = vmatpush.bf16.msra.mxu2 %v10294_v37  ;;  %v10581_v37 = vld [vmem:[#allocation2 + $0xbe0] sm:$0xf] }
 0x714   : > { %7918 = vmatpush.bf16.msra.mxu3 %v9846_v0  ;;  %v11795_v0 = vld [vmem:[#allocation2 + $0x994] sm:$0xf0] }
 0x715   : > { %8139 = vmatpush.bf16.msrb.mxu0 %v10934_v34  ;;  %v11755_v34 = vld [vmem:[#allocation2 + $0x854] sm:$0xf0]  ;;  %v10286_v56 = vor.u32 %v11795_v0, %v10285_v14  ;;  %v10582_v14 = vor.u32 %v11869_v58, %v10581_v37  ;;  %v11206_v0 = vor.u32 %v12025_v19, %v11205_v61  ;;  %v11181_v37 = vld [vmem:[#allocation2 + $0x1090] sm:$0xf]  ;;  %v10085_v58 = vld [vmem:[#allocation2 + $0x800] sm:$0xf] }
 0x716   : > { %7996 = vmatpush.bf16.msra.mxu1 %v10230_v18  ;;  %v10126_v8 = vor.u32 %v11755_v34, %v10125_v2  ;;  %v11853_v18 = vld [vmem:[#allocation2 + $0xb64] sm:$0xf0]  ;;  %v10573_v2 = vld [vmem:[#allocation2 + $0xbd0] sm:$0xf]  ;;  %v12019_v19 = vld [vmem:[#allocation2 + $0x1094] sm:$0xf0] }
 0x717   : > { %8010 = vmatpush.bf16.msra.mxu2 %v10286_v56  ;;  %v11197_v34 = vld [vmem:[#allocation2 + $0x10b0] sm:$0xf]  ;;  %v12023_v56 = vld [vmem:[#allocation2 + $0x10b4] sm:$0xf0] }
 0x718   : > { %7919 = vmatpush.bf16.msra.mxu3 %v9838_v48  ;;  %v11793_v48 = vld [vmem:[#allocation2 + $0x984] sm:$0xf0] }
 0x719   : > { %8140 = vmatpush.bf16.msrb.mxu0 %v10926_v23  ;;  %v4152_v23 = vperm.slane %v15289_v4, 3  ;;  %v10278_v49 = vor.u32 %v11793_v48, %v10277_v12  ;;  %v11867_v4 = vld [vmem:[#allocation2 + $0xbd4] sm:$0xf0]  ;;  %v11198_v12 = vor.u32 %v12023_v56, %v11197_v34  ;;  %v10509_v48 = vld [vmem:[#allocation2 + $0xb50] sm:$0xf] }
 0x71a   : > { %7997 = vmatpush.bf16.msra.mxu1 %v10222_v33  ;;  %v11189_v33 = vld [vmem:[#allocation2 + $0x10a0] sm:$0xf]  ;;  %v10510_v45 = vor.u32 %v11851_v59, %v10509_v48  ;;  %v11823_v34 = vld [vmem:[#allocation2 + $0xa74] sm:$0xf0]  ;;  %v11518_v56 = vld [vmem:[#allocation2 + $0xf4] sm:$0xf] }
 0x71b   : > { %8011 = vmatpush.bf16.msra.mxu2 %v10278_v49  ;;  %v10093_v49 = vld [vmem:[#allocation2 + $0x810] sm:$0xf] }
 0x71c   : > { %7920 = vmatpush.bf16.msra.mxu3 %v9830_v3  ;;  %v11855_v3 = vld [vmem:[#allocation2 + $0xb74] sm:$0xf0] }
 0x71d   : > { %8141 = vmatpush.bf16.msrb.mxu0 %v10918_v21  ;;  %v15359_v21 = vpack.c.bf16 %v4152_v23, %v4152_v23  ;;  %v10526_v17 = vor.u32 %v11855_v3, %v10525_v1  ;;  %v11865_v23 = vld [vmem:[#allocation2 + $0xbc4] sm:$0xf0]  ;;  %v10557_v1 = vld [vmem:[#allocation2 + $0xbb0] sm:$0xf] }
 0x71e   : > { %v10566_v61 = vor.u32 %v11865_v23, %v10565_v60  ;;  %v11821_v23 = vld [vmem:[#allocation2 + $0xa64] sm:$0xf0] }
 0x71f   : > { %7921 = vmatmul.bf16.vlgmr.msra.gmra.mxu3 %v15352_v42  ;;  %8056 = vmatpush.bf16.msrb.mxu2 %v10590_v24 }
 0x720   : > { %7965 = vmatpush.bf16.msrb.mxu3 %v10142_v57  ;;  %8142 = vmatmul.bf16.vlgmr.msrb.gmra.mxu0 %v15354_v46  ;;  %v10214_v57 = vor.u32 %v11777_v31, %v10213_v40  ;;  %v11190_v40 = vor.u32 %v12021_v35, %v11189_v33  ;;  %v10501_v31 = vld [vmem:[#allocation2 + $0xb40] sm:$0xf] }
 0x721   : > { %8186 = vmatpush.bf16.msra.mxu0 %v11230_v27  ;;  %v10109_v27 = vld [vmem:[#allocation2 + $0x830] sm:$0xf]  ;;  %8012 = vmatmul.bf16.vlgmr.msra.gmra.mxu2 %v15359_v21  ;;  %v10389_v35 = vld [vmem:[#allocation2 + $0xa60] sm:$0xf] }
 0x722   : > { %7998 = vmatpush.bf16.msra.mxu1 %v10214_v57  ;;  %v10110_v47 = vor.u32 %v11751_v20, %v10109_v27  ;;  %v7792_v24 = vpop.f32.mrf.mxu3  ;;  %v11863_v57 = vld [vmem:[#allocation2 + $0xbb4] sm:$0xf0]  ;;  %v11173_v27 = vld [vmem:[#allocation2 + $0x1080] sm:$0xf]  ;;  %v12017_v20 = vld [vmem:[#allocation2 + $0x1084] sm:$0xf0] }
 0x723   : > { %8057 = vmatpush.bf16.msrb.mxu2 %v10582_v14  ;;  %v15367_v3 = vadd.f32 %v7792_v24, %v15348_v41  ;;  %v10397_v14 = vld [vmem:[#allocation2 + $0xa70] sm:$0xf]  ;;  %v10549_v41 = vld [vmem:[#allocation2 + $0xba0] sm:$0xf]  ;;  %v11174_v60 = vor.u32 %v12017_v20, %v11173_v27  ;;  %v11859_v24 = vld [vmem:[#allocation2 + $0xb94] sm:$0xf0] }
 0x724   : > { %7966 = vmatpush.bf16.msrb.mxu3 %v10134_v26  ;;  %v10518_v26 = vor.u32 %v11853_v18, %v10517_v30  ;;  %v11182_v30 = vor.u32 %v12019_v19, %v11181_v37  ;;  %v10493_v18 = vld [vmem:[#allocation2 + $0xb30] sm:$0xf]  ;;  %v10398_v33 = vor.u32 %v11823_v34, %v10397_v14  ;;  %v11819_v19 = vld [vmem:[#allocation2 + $0xa54] sm:$0xf0]  ;;  %v10533_v14 = vld [vmem:[#allocation2 + $0xb80] sm:$0xf] }
 0x725   : > { %8187 = vmatpush.bf16.msra.mxu0 %v11222_v39  ;;  %v10574_v39 = vor.u32 %v11867_v4, %v10573_v2  ;;  %7999 = vmatmul.bf16.vlgmr.msra.gmra.mxu1 %v15362_v9  ;;  %v11847_v2 = vld [vmem:[#allocation2 + $0xb34] sm:$0xf0]  ;;  %v11861_v4 = vld [vmem:[#allocation2 + $0xba4] sm:$0xf0]  ;;  %v10381_v37 = vld [vmem:[#allocation2 + $0xa50] sm:$0xf] }
 0x726   : > { %8043 = vmatpush.bf16.msrb.mxu1 %v10526_v17  ;;  %v10494_v44 = vor.u32 %v11847_v2, %v10493_v18  ;;  %v10550_v48 = vor.u32 %v11861_v4, %v10549_v41  ;;  %v11843_v27 = vld [vmem:[#allocation2 + $0xb14] sm:$0xf0]  ;;  %v9167_v18 = vld [vmem:[#allocation2 + $0xd8] sm:$0xf0]  ;;  %v11817_v4 = vld [vmem:[#allocation2 + $0xa44] sm:$0xf0] }
 0x727   : > { %8058 = vmatpush.bf16.msrb.mxu2 %v10574_v39  ;;  %v15372_v39 = vld [vmem:[#allocation6 + $0x20] sm:$0x1f] }
 0x728   : > { %7967 = vmatpush.bf16.msrb.mxu3 %v10126_v8  ;;  %v11747_v8 = vld [vmem:[#allocation2 + $0x814] sm:$0xf0]  ;;  %v4166_v59 = vperm.slane %v15372_v39, 1 }
 0x729   : > { %8188 = vmatpush.bf16.msra.mxu0 %v11214_v51  ;;  %v11849_v51 = vld [vmem:[#allocation2 + $0xb44] sm:$0xf0]  ;;  %v11935_v41 = vld [vmem:[#allocation2 + $0xdf4] sm:$0xf0] }
 0x72a   : > { %8044 = vmatpush.bf16.msrb.mxu1 %v10518_v26  ;;  %v10502_v17 = vor.u32 %v11849_v51, %v10501_v31  ;;  %v9183_v26 = vld [vmem:[#allocation2 + $0xf8] sm:$0xf0]  ;;  %v11516_v31 = vld [vmem:[#allocation2 + $0xe4] sm:$0xf]  ;;  %v9175_v51 = vld [vmem:[#allocation2 + $0xe8] sm:$0xf0] }
 0x72b   : > { %8059 = vmatpush.bf16.msrb.mxu2 %v10566_v61  ;;  %v10541_v61 = vld [vmem:[#allocation2 + $0xb90] sm:$0xf]  ;;  %v9178_v20 = vor.u32 %v11516_v31, %v9175_v51 }
 0x72c   : > { %7968 = vmatpush.bf16.msrb.mxu3 %v10118_v38  ;;  %v10094_v38 = vor.u32 %v11747_v8, %v10093_v49  ;;  %v9186_v49 = vor.u32 %v11518_v56, %v9183_v26  ;;  %v11845_v8 = vld [vmem:[#allocation2 + $0xb24] sm:$0xf0]  ;;  %v10373_v56 = vld [vmem:[#allocation2 + $0xa40] sm:$0xf]  ;;  %v10365_v51 = vld [vmem:[#allocation2 + $0xa30] sm:$0xf] }
 0x72d   : > { %8189 = vmatpush.bf16.msra.mxu0 %v11206_v0  ;;  %v10558_v0 = vor.u32 %v11863_v57, %v10557_v1  ;;  %v15377_v57 = vpack.c.bf16 %v4166_v59, %v4166_v59  ;;  %v11841_v59 = vld [vmem:[#allocation2 + $0xb04] sm:$0xf0]  ;;  %v10374_v31 = vor.u32 %v11817_v4, %v10373_v56  ;;  %v10765_v56 = vld [vmem:[#allocation2 + $0xd50] sm:$0xf]  ;;  %v11915_v4 = vld [vmem:[#allocation2 + $0xd54] sm:$0xf0] }
 0x72e   : > { %8045 = vmatpush.bf16.msrb.mxu1 %v10510_v45  ;;  %v7794_v45 = vpop.f32.mrf.mxu3 }
 0x72f   : > { %8060 = vmatpush.bf16.msrb.mxu2 %v10558_v0  ;;  %v11857_v0 = vld [vmem:[#allocation2 + $0xb84] sm:$0xf0]  ;;  %v9159_v45 = vld [vmem:[#allocation2 + $0xc8] sm:$0xf0] }
 0x730   : > { %7969 = vmatpush.bf16.msrb.mxu3 %v10110_v47  ;;  %v15369_v47 = vld [vmem:[#allocation6 + $0x10] sm:$0xff]  ;;  %v10534_v26 = vor.u32 %v11857_v0, %v10533_v14  ;;  %v11931_v14 = vld [vmem:[#allocation2 + $0xdd4] sm:$0xf0] }
 0x731   : > { %8190 = vmatpush.bf16.msra.mxu0 %v11198_v12  ;;  %v4149_v53 = vperm.slane %v15369_v47, 0  ;;  %v10086_v12 = vor.u32 %v11745_v50, %v10085_v58  ;;  %v10542_v58 = vor.u32 %v11859_v24, %v10541_v61  ;;  %v10390_v50 = vor.u32 %v11821_v23, %v10389_v35  ;;  %v11919_v35 = vld [vmem:[#allocation2 + $0xd74] sm:$0xf0]  ;;  %v10837_v23 = vld [vmem:[#allocation2 + $0xde0] sm:$0xf] }
 0x732   : > { %8046 = vmatpush.bf16.msrb.mxu1 %v10502_v17  ;;  %v11514_v17 = vld [vmem:[#allocation2 + $0xd4] sm:$0xf]  ;;  %v4156_v34 = vperm.slane %v15369_v47, 7  ;;  %v4155_v61 = vperm.slane %v15369_v47, 6 }
 0x733   : > { %8061 = vmatpush.bf16.msrb.mxu2 %v10550_v48  ;;  %v10469_v48 = vld [vmem:[#allocation2 + $0xb00] sm:$0xf] }
 0x734   : > { %7970 = vmatpush.bf16.msrb.mxu3 %v10102_v62  ;;  %v10485_v62 = vld [vmem:[#allocation2 + $0xb20] sm:$0xf] }
 0x735   : > { %8191 = vmatpush.bf16.msra.mxu0 %v11190_v40  ;;  %v15375_v40 = vpack.c.bf16 %v4149_v53, %v4149_v53  ;;  %v10486_v1 = vor.u32 %v11845_v8, %v10485_v62  ;;  %v10382_v53 = vor.u32 %v11819_v19, %v10381_v37  ;;  %v15382_v62 = vpack.c.bf16 %v4156_v34, %v4156_v34  ;;  %v11933_v8 = vld [vmem:[#allocation2 + $0xde4] sm:$0xf0] }
 0x736   : > { %8047 = vmatpush.bf16.msrb.mxu1 %v10494_v44  ;;  %v11512_v44 = vld [vmem:[#allocation2 + $0xc4] sm:$0xf]  ;;  %v10838_v37 = vor.u32 %v11933_v8, %v10837_v23  ;;  %v10757_v8 = vld [vmem:[#allocation2 + $0xd40] sm:$0xf] }
 0x737   : > { %8062 = vmatpush.bf16.msrb.mxu2 %v10542_v58  ;;  %v9162_v19 = vor.u32 %v11512_v44, %v9159_v45  ;;  %v15385_v58 = vpack.c.bf16 %v4155_v61, %v4155_v61  ;;  %v9143_v44 = vld [vmem:[#allocation2 + $0xa8] sm:$0xf0]  ;;  %v11913_v61 = vld [vmem:[#allocation2 + $0xd44] sm:$0xf0] }
 0x738   : > { %7971 = vmatpush.bf16.msrb.mxu3 %v10094_v38  ;;  %v10477_v38 = vld [vmem:[#allocation2 + $0xb10] sm:$0xf] }
 0x739   : > { %8192 = vmatpush.bf16.msra.mxu0 %v11182_v30  ;;  %v10845_v30 = vld [vmem:[#allocation2 + $0xdf0] sm:$0xf]  ;;  %v10478_v2 = vor.u32 %v11843_v27, %v10477_v38  ;;  %v11510_v27 = vld [vmem:[#allocation2 + $0xb4] sm:$0xf] }
 0x73a   : > { %8048 = vmatpush.bf16.msrb.mxu1 %v10486_v1  ;;  %v11815_v1 = vld [vmem:[#allocation2 + $0xa34] sm:$0xf0]  ;;  %v10829_v38 = vld [vmem:[#allocation2 + $0xdd0] sm:$0xf] }
 0x73b   : > { %8063 = vmatpush.bf16.msrb.mxu2 %v10534_v26  ;;  %v10821_v26 = vld [vmem:[#allocation2 + $0xdc0] sm:$0xf] }
 0x73c   : > { %7972 = vmatpush.bf16.msrb.mxu3 %v10086_v12  ;;  %v10846_v12 = vor.u32 %v11935_v41, %v10845_v30  ;;  %v10366_v30 = vor.u32 %v11815_v1, %v10365_v51  ;;  %v10830_v41 = vor.u32 %v11931_v14, %v10829_v38  ;;  %v11506_v51 = vld [vmem:[#allocation2 + $0x94] sm:$0xf]  ;;  %v9135_v1 = vld [vmem:[#allocation2 + $0x98] sm:$0xf0]  ;;  %v11809_v38 = vld [vmem:[#allocation2 + $0xa04] sm:$0xf0] }
 0x73d   : > { %8193 = vmatpush.bf16.msra.mxu0 %v11174_v60  ;;  %v9170_v60 = vor.u32 %v11514_v17, %v9167_v18  ;;  %v11917_v17 = vld [vmem:[#allocation2 + $0xd64] sm:$0xf0]  ;;  %v10357_v18 = vld [vmem:[#allocation2 + $0xa20] sm:$0xf] }
 0x73e   : > { %8049 = vmatpush.bf16.msrb.mxu1 %v10478_v2  ;;  %8064 = vmatmul.bf16.vlgmr.msrb.gmra.mxu2 %v15382_v62  ;;  %v11813_v2 = vld [vmem:[#allocation2 + $0xa24] sm:$0xf0] }
 0x73f   : > { %7973 = vmatmul.bf16.vlgmr.msrb.gmra.mxu3 %v15375_v40  ;;  %8108 = vmatpush.bf16.msra.mxu2 %v10846_v12  ;;  %v11929_v12 = vld [vmem:[#allocation2 + $0xdc4] sm:$0xf0] }
 0x740   : > { %8017 = vmatpush.bf16.msra.mxu3 %v10398_v33  ;;  %8194 = vmatmul.bf16.vlgmr.msra.gmra.mxu0 %v15377_v57  ;;  %v10781_v33 = vld [vmem:[#allocation2 + $0xd70] sm:$0xf]  ;;  %v10822_v23 = vor.u32 %v11929_v12, %v10821_v26  ;;  %v9439_v26 = vld [vmem:[#allocation2 + $0x2f8] sm:$0xf0] }
 0x741   : > { %8251 = vmatpush.bf16.msrb.mxu0 %v9186_v49  ;;  %v10470_v49 = vor.u32 %v11841_v59, %v10469_v48  ;;  %v10782_v24 = vor.u32 %v11919_v35, %v10781_v33  ;;  %v10766_v48 = vor.u32 %v11915_v4, %v10765_v56  ;;  %v15389_v59 = vpop.f32.mrf.mxu0  ;;  %v10349_v33 = vld [vmem:[#allocation2 + $0xa10] sm:$0xf]  ;;  %v11811_v35 = vld [vmem:[#allocation2 + $0xa14] sm:$0xf0]  ;;  %v11925_v56 = vld [vmem:[#allocation2 + $0xda4] sm:$0xf0] }
 0x742   : > { %v7805_v45 = vpop.f32.mrf.mxu3  ;;  %v11582_v4 = vld [vmem:[#allocation2 + $0x2f4] sm:$0xf] }
 0x743   : > { %8050 = vmatpush.bf16.msrb.mxu1 %v10470_v49  ;;  %8109 = vmatpush.bf16.msra.mxu2 %v10838_v37  ;;  %v11927_v37 = vld [vmem:[#allocation2 + $0xdb4] sm:$0xf0] }
 0x744   : > { %8018 = vmatpush.bf16.msra.mxu3 %v10390_v50  ;;  %v10773_v50 = vld [vmem:[#allocation2 + $0xd60] sm:$0xf] }
 0x745   : > { %8252 = vmatpush.bf16.msrb.mxu0 %v9178_v20  ;;  %v9151_v20 = vld [vmem:[#allocation2 + $0xb8] sm:$0xf0]  ;;  %v10774_v0 = vor.u32 %v11917_v17, %v10773_v50  ;;  %v10758_v50 = vor.u32 %v11913_v61, %v10757_v8  ;;  %v10350_v17 = vor.u32 %v11811_v35, %v10349_v33  ;;  %v10741_v8 = vld [vmem:[#allocation2 + $0xd20] sm:$0xf]  ;;  %v11909_v61 = vld [vmem:[#allocation2 + $0xd24] sm:$0xf0] }
 0x746   : > { %v9154_v34 = vor.u32 %v11510_v27, %v9151_v20  ;;  %8051 = vmatmul.bf16.vlgmr.msrb.gmra.mxu1 %v15385_v58  ;;  %v11504_v27 = vld [vmem:[#allocation2 + $0x84] sm:$0xf]  ;;  %v9127_v20 = vld [vmem:[#allocation2 + $0x88] sm:$0xf0] }
 0x747   : > { %8095 = vmatpush.bf16.msra.mxu1 %v10782_v24  ;;  %8110 = vmatpush.bf16.msra.mxu2 %v10830_v41  ;;  %v10813_v24 = vld [vmem:[#allocation2 + $0xdb0] sm:$0xf]  ;;  %v11887_v41 = vld [vmem:[#allocation2 + $0xc74] sm:$0xf0]  ;;  %v9130_v35 = vor.u32 %v11504_v27, %v9127_v20 }
 0x748   : > { %8019 = vmatpush.bf16.msra.mxu3 %v10382_v53  ;;  %v11508_v53 = vld [vmem:[#allocation2 + $0xa4] sm:$0xf]  ;;  %v10814_v14 = vor.u32 %v11927_v37, %v10813_v24  ;;  %v9442_v24 = vor.u32 %v11582_v4, %v9439_v26  ;;  %v9423_v26 = vld [vmem:[#allocation2 + $0x2d8] sm:$0xf0] }
 0x749   : > { %8253 = vmatpush.bf16.msrb.mxu0 %v9170_v60  ;;  %v10358_v60 = vor.u32 %v11813_v2, %v10357_v18  ;;  %v9146_v49 = vor.u32 %v11508_v53, %v9143_v44  ;;  %v11911_v18 = vld [vmem:[#allocation2 + $0xd34] sm:$0xf0]  ;;  %v10805_v2 = vld [vmem:[#allocation2 + $0xda0] sm:$0xf]  ;;  %v4153_v53 = vperm.slane %v15369_v47, 4  ;;  %v7833_v12 = vpop.f32.mrf.mxu0 }
 0x74a   : > { %v10806_v33 = vor.u32 %v11925_v56, %v10805_v2  ;;  %v11923_v47 = vld [vmem:[#allocation2 + $0xd94] sm:$0xf0]  ;;  %v11101_v56 = vld [vmem:[#allocation2 + $0xff0] sm:$0xf]  ;;  %v4160_v12 = vperm.slane %v15325_v10, 3 }
 0x74b   : > { %8096 = vmatpush.bf16.msra.mxu1 %v10774_v0  ;;  %8111 = vmatpush.bf16.msra.mxu2 %v10822_v23  ;;  %v9138_v0 = vor.u32 %v11506_v51, %v9135_v1  ;;  %v11885_v51 = vld [vmem:[#allocation2 + $0xc64] sm:$0xf0]  ;;  %v10797_v1 = vld [vmem:[#allocation2 + $0xd90] sm:$0xf]  ;;  %v15399_v37 = vpack.c.bf16 %v4153_v53, %v4153_v53 }
 0x74c   : > { %8020 = vmatpush.bf16.msra.mxu3 %v10374_v31  ;;  %v15392_v31 = vadd.f32 %v7805_v45, %v15367_v3  ;;  %v10653_v3 = vld [vmem:[#allocation2 + $0xc70] sm:$0xf]  ;;  %v10645_v45 = vld [vmem:[#allocation2 + $0xc60] sm:$0xf]  ;;  %v10798_v27 = vor.u32 %v11923_v47, %v10797_v1  ;;  %v11983_v47 = vld [vmem:[#allocation2 + $0xf74] sm:$0xf0] }
 0x74d   : > { %8254 = vmatpush.bf16.msrb.mxu0 %v9162_v19  ;;  %v10341_v19 = vld [vmem:[#allocation2 + $0xa00] sm:$0xf]  ;;  %v10654_v23 = vor.u32 %v11887_v41, %v10653_v3  ;;  %v10646_v20 = vor.u32 %v11885_v51, %v10645_v45  ;;  %v11921_v41 = vld [vmem:[#allocation2 + $0xd84] sm:$0xf0]  ;;  %v11037_v1 = vld [vmem:[#allocation2 + $0xf70] sm:$0xf] }
 0x74e   : > { %v10789_v3 = vld [vmem:[#allocation2 + $0xd80] sm:$0xf] }
 0x74f   : > { %8097 = vmatpush.bf16.msra.mxu1 %v10766_v48  ;;  %v10342_v48 = vor.u32 %v11809_v38, %v10341_v19  ;;  %8112 = vmatpush.bf16.msra.mxu2 %v10814_v14  ;;  %v10742_v19 = vor.u32 %v11909_v61, %v10741_v8  ;;  %v10637_v38 = vld [vmem:[#allocation2 + $0xc50] sm:$0xf]  ;;  %v11883_v14 = vld [vmem:[#allocation2 + $0xc54] sm:$0xf0]  ;;  %v10725_v61 = vld [vmem:[#allocation2 + $0xd00] sm:$0xf] }
 0x750   : > { %8021 = vmatpush.bf16.msra.mxu3 %v10366_v30  ;;  %v10749_v30 = vld [vmem:[#allocation2 + $0xd30] sm:$0xf]  ;;  %v10638_v45 = vor.u32 %v11883_v14, %v10637_v38 }
 0x751   : > { %8255 = vmatpush.bf16.msrb.mxu0 %v9154_v34  ;;  %v15394_v34 = vpop.f32.mrf.mxu1  ;;  %v10750_v44 = vor.u32 %v11911_v18, %v10749_v30  ;;  %v10733_v30 = vld [vmem:[#allocation2 + $0xd10] sm:$0xf]  ;;  %v11907_v18 = vld [vmem:[#allocation2 + $0xd14] sm:$0xf0] }
 0x752   : > { %v10734_v53 = vor.u32 %v11907_v18, %v10733_v30  ;;  %v10621_v14 = vld [vmem:[#allocation2 + $0xc30] sm:$0xf]  ;;  %v11879_v18 = vld [vmem:[#allocation2 + $0xc34] sm:$0xf0] }
 0x753   : > { %8098 = vmatpush.bf16.msra.mxu1 %v10758_v50  ;;  %v11580_v50 = vld [vmem:[#allocation2 + $0x2e4] sm:$0xf]  ;;  %8113 = vmatpush.bf16.msra.mxu2 %v10806_v33  ;;  %v11881_v33 = vld [vmem:[#allocation2 + $0xc44] sm:$0xf0] }
 0x754   : > { %8022 = vmatpush.bf16.msra.mxu3 %v10358_v60  ;;  %v15397_v60 = vpop.f32.mrf.mxu2 }
 0x755   : > { %8256 = vmatpush.bf16.msrb.mxu0 %v9146_v49  ;;  %v7807_v49 = vpop.f32.mrf.mxu3 }
 0x756   : > { %v11576_v49 = vld [vmem:[#allocation2 + $0x2c4] sm:$0xf] }
 0x757   : > { %8099 = vmatpush.bf16.msra.mxu1 %v10750_v44  ;;  %v11999_v44 = vld [vmem:[#allocation2 + $0xff4] sm:$0xf0]  ;;  %8114 = vmatpush.bf16.msra.mxu2 %v10798_v27  ;;  %v4159_v27 = vperm.slane %v15325_v10, 2 }
 0x758   : > { %8023 = vmatpush.bf16.msra.mxu3 %v10350_v17  ;;  %v9431_v17 = vld [vmem:[#allocation2 + $0x2e8] sm:$0xf0]  ;;  %v11102_v8 = vor.u32 %v11999_v44, %v11101_v56  ;;  %v11981_v56 = vld [vmem:[#allocation2 + $0xf64] sm:$0xf0]  ;;  %v11995_v10 = vld [vmem:[#allocation2 + $0xfd4] sm:$0xf0] }
 0x759   : > { %8257 = vmatpush.bf16.msrb.mxu0 %v9138_v0  ;;  %v11578_v0 = vld [vmem:[#allocation2 + $0x2d4] sm:$0xf]  ;;  %v9434_v2 = vor.u32 %v11580_v50, %v9431_v17  ;;  %v7846_v4 = vpop.f32.mrf.mxu1  ;;  %v11093_v50 = vld [vmem:[#allocation2 + $0xfe0] sm:$0xf]  ;;  %v9415_v17 = vld [vmem:[#allocation2 + $0x2c8] sm:$0xf0] }
 0x75a   : > { %v9426_v51 = vor.u32 %v11578_v0, %v9423_v26  ;;  %v9418_v0 = vor.u32 %v11576_v49, %v9415_v17  ;;  %v11085_v4 = vld [vmem:[#allocation2 + $0xfd0] sm:$0xf]  ;;  %v11574_v26 = vld [vmem:[#allocation2 + $0x2b4] sm:$0xf]  ;;  %v11979_v49 = vld [vmem:[#allocation2 + $0xf54] sm:$0xf0] }
 0x75b   : > { %8100 = vmatpush.bf16.msra.mxu1 %v10742_v19  ;;  %v15404_v19 = vpack.c.bf16 %v4160_v12, %v4160_v12  ;;  %v10622_v12 = vor.u32 %v11879_v18, %v10621_v14  ;;  %v10605_v17 = vld [vmem:[#allocation2 + $0xc10] sm:$0xf]  ;;  %v11977_v14 = vld [vmem:[#allocation2 + $0xf44] sm:$0xf0] }
 0x75c   : > { %8024 = vmatpush.bf16.msra.mxu3 %v10342_v48  ;;  %v10629_v48 = vld [vmem:[#allocation2 + $0xc40] sm:$0xf]  ;;  %v11069_v18 = vld [vmem:[#allocation2 + $0xfb0] sm:$0xf] }
 0x75d   : > { %8258 = vmatpush.bf16.msrb.mxu0 %v9130_v35  ;;  %v10790_v35 = vor.u32 %v11921_v41, %v10789_v3  ;;  %v10630_v38 = vor.u32 %v11881_v33, %v10629_v48  ;;  %v15407_v3 = vpack.c.bf16 %v4159_v27, %v4159_v27  ;;  %v11029_v41 = vld [vmem:[#allocation2 + $0xf60] sm:$0xf]  ;;  %v11877_v33 = vld [vmem:[#allocation2 + $0xc24] sm:$0xf0] }
 0x75e   : > { %v11030_v44 = vor.u32 %v11981_v56, %v11029_v41  ;;  %v10613_v48 = vld [vmem:[#allocation2 + $0xc20] sm:$0xf]  ;;  %v9391_v41 = vld [vmem:[#allocation2 + $0x298] sm:$0xf0]  ;;  %v11991_v56 = vld [vmem:[#allocation2 + $0xfb4] sm:$0xf0] }
 0x75f   : > { %8025 = vmatmul.bf16.vlgmr.msra.gmra.mxu3 %v15399_v37  ;;  %8101 = vmatpush.bf16.msra.mxu1 %v10734_v53  ;;  %v9407_v53 = vld [vmem:[#allocation2 + $0x2b8] sm:$0xf0] }
 0x760   : > { %8069 = vmatpush.bf16.msrb.mxu3 %v10654_v23  ;;  %8259 = vmatmul.bf16.vlgmr.msrb.gmra.mxu0 %v15274_v25  ;;  %v7859_v23 = vpop.f32.mrf.mxu2  ;;  %v11997_v25 = vld [vmem:[#allocation2 + $0xfe4] sm:$0xf0] }
 0x761   : > { %8303 = vmatpush.bf16.msra.mxu0 %v9442_v24  ;;  %v11905_v24 = vld [vmem:[#allocation2 + $0xd04] sm:$0xf0]  ;;  %8115 = vmatpush.bf16.msra.mxu2 %v10790_v35  ;;  %v11086_v35 = vor.u32 %v11995_v10, %v11085_v4  ;;  %v9410_v23 = vor.u32 %v11574_v26, %v9407_v53  ;;  %v10597_v4 = vld [vmem:[#allocation2 + $0xc00] sm:$0xf] }
 0x762   : > { %v10726_v30 = vor.u32 %v11905_v24, %v10725_v61  ;;  %v11572_v61 = vld [vmem:[#allocation2 + $0x2a4] sm:$0xf]  ;;  %v9399_v24 = vld [vmem:[#allocation2 + $0x2a8] sm:$0xf0]  ;;  %v7818_v27 = vpop.f32.mrf.mxu3 }
 0x764   : > { %8070 = vmatpush.bf16.msrb.mxu3 %v10646_v20  ;;  %v11038_v20 = vor.u32 %v11983_v47, %v11037_v1  ;;  %8116 = vmatmul.bf16.vlgmr.msra.gmra.mxu2 %v15404_v19  ;;  %v15411_v47 = vpop.f32.mrf.mxu0 }
 0x765   : > { %8304 = vmatpush.bf16.msra.mxu0 %v9434_v2  ;;  %8160 = vmatpush.bf16.msrb.mxu2 %v11102_v8  ;;  %v11094_v2 = vor.u32 %v11997_v25, %v11093_v50  ;;  %v11077_v8 = vld [vmem:[#allocation2 + $0xfc0] sm:$0xf]  ;;  %v10614_v50 = vor.u32 %v11877_v33, %v10613_v48  ;;  %v9383_v48 = vld [vmem:[#allocation2 + $0x288] sm:$0xf0]  ;;  %v11070_v33 = vor.u32 %v11991_v56, %v11069_v18  ;;  %v11973_v56 = vld [vmem:[#allocation2 + $0xf24] sm:$0xf0] }
 0x766   : > { %8102 = vmatpush.bf16.msra.mxu1 %v10726_v30  ;;  %v11875_v30 = vld [vmem:[#allocation2 + $0xc14] sm:$0xf0]  ;;  %v10901_v18 = vld [vmem:[#allocation2 + $0xe60] sm:$0xf] }
 0x767   : > { %v10606_v10 = vor.u32 %v11875_v30, %v10605_v17 }
 0x768   : > { %8071 = vmatpush.bf16.msrb.mxu3 %v10638_v45  ;;  %v11021_v45 = vld [vmem:[#allocation2 + $0xf50] sm:$0xf] }
 0x769   : > { %8305 = vmatpush.bf16.msra.mxu0 %v9426_v51  ;;  %8161 = vmatpush.bf16.msrb.mxu2 %v11094_v2  ;;  %v11993_v51 = vld [vmem:[#allocation2 + $0xfc4] sm:$0xf0]  ;;  %v11022_v1 = vor.u32 %v11979_v49, %v11021_v45  ;;  %v7819_v2 = vadd.f32 %v7818_v27, %v15392_v31  ;;  %v11975_v45 = vld [vmem:[#allocation2 + $0xf34] sm:$0xf0]  ;;  %v11061_v31 = vld [vmem:[#allocation2 + $0xfa0] sm:$0xf] }
 0x76a   : > { %8147 = vmatpush.bf16.msrb.mxu1 %v11038_v20  ;;  %v11078_v25 = vor.u32 %v11993_v51, %v11077_v8  ;;  %v9402_v20 = vor.u32 %v11572_v61, %v9399_v24  ;;  %v10909_v8 = vld [vmem:[#allocation2 + $0xe70] sm:$0xf]  ;;  %v11951_v61 = vld [vmem:[#allocation2 + $0xe74] sm:$0xf0]  ;;  %v15416_v24 = vpop.f32.mrf.mxu1  ;;  %v11989_v51 = vld [vmem:[#allocation2 + $0xfa4] sm:$0xf0] }
 0x76b   : > { %8103 = vmatmul.bf16.vlgmr.msra.gmra.mxu1 %v15407_v3  ;;  %v7832_v53 = vadd.f32 %v15389_v59, %v7819_v2  ;;  %v11646_v59 = vld [vmem:[#allocation2 + $0x4f4] sm:$0xf]  ;;  %v7820_v2 = vpop.f32.mrf.mxu3 }
 0x76c   : > { %8072 = vmatpush.bf16.msrb.mxu3 %v10630_v38  ;;  %v11013_v38 = vld [vmem:[#allocation2 + $0xf40] sm:$0xf] }
 0x76d   : > { %8306 = vmatpush.bf16.msra.mxu0 %v9418_v0  ;;  %8162 = vmatpush.bf16.msrb.mxu2 %v11086_v35  ;;  %v11570_v0 = vld [vmem:[#allocation2 + $0x294] sm:$0xf]  ;;  %v11014_v26 = vor.u32 %v11977_v14, %v11013_v38  ;;  %v7845_v49 = vadd.f32 %v15394_v34, %v7832_v53  ;;  %v11062_v34 = vor.u32 %v11989_v51, %v11061_v31  ;;  %v10989_v31 = vld [vmem:[#allocation2 + $0xf10] sm:$0xf]  ;;  %v11985_v51 = vld [vmem:[#allocation2 + $0xf84] sm:$0xf0] }
 0x76e   : > { %8148 = vmatpush.bf16.msrb.mxu1 %v11030_v44  ;;  %v11873_v44 = vld [vmem:[#allocation2 + $0xc04] sm:$0xf0]  ;;  %v9394_v35 = vor.u32 %v11570_v0, %v9391_v41  ;;  %v10910_v14 = vor.u32 %v11951_v61, %v10909_v8  ;;  %v15424_v0 = vpop.f32.mrf.mxu2  ;;  %v10997_v41 = vld [vmem:[#allocation2 + $0xf20] sm:$0xf] }
 0x76f   : > { %v15422_v27 = vadd.f32 %v15397_v60, %v7845_v49  ;;  %v11644_v60 = vld [vmem:[#allocation2 + $0x4e4] sm:$0xf]  ;;  %v11971_v49 = vld [vmem:[#allocation2 + $0xf14] sm:$0xf0]  ;;  %v11045_v61 = vld [vmem:[#allocation2 + $0xf80] sm:$0xf] }
 0x770   : > { %8073 = vmatpush.bf16.msrb.mxu3 %v10622_v12  ;;  %v11568_v12 = vld [vmem:[#allocation2 + $0x284] sm:$0xf] }
 0x771   : > { %8307 = vmatpush.bf16.msra.mxu0 %v9410_v23  ;;  %8163 = vmatpush.bf16.msrb.mxu2 %v11078_v25  ;;  %v11005_v23 = vld [vmem:[#allocation2 + $0xf30] sm:$0xf]  ;;  %v7885_v25 = vpop.f32.mrf.mxu0  ;;  %v9386_v38 = vor.u32 %v11568_v12, %v9383_v48  ;;  %v11947_v12 = vld [vmem:[#allocation2 + $0xe54] sm:$0xf0] }
 0x772   : > { %8149 = vmatpush.bf16.msrb.mxu1 %v11022_v1  ;;  %v9695_v1 = vld [vmem:[#allocation2 + $0x4f8] sm:$0xf0]  ;;  %v11006_v30 = vor.u32 %v11975_v45, %v11005_v23  ;;  %v11053_v23 = vld [vmem:[#allocation2 + $0xf90] sm:$0xf]  ;;  %v11987_v45 = vld [vmem:[#allocation2 + $0xf94] sm:$0xf0] }
 0x773   : > { %v9698_v53 = vor.u32 %v11646_v59, %v9695_v1  ;;  %v11054_v48 = vor.u32 %v11987_v45, %v11053_v23  ;;  %v11357_v59 = vld [vmem:[#allocation2 + $0x11f0] sm:$0xf]  ;;  %v7898_v1 = vpop.f32.mrf.mxu1 }
 0x774   : > { %8074 = vmatpush.bf16.msrb.mxu3 %v10614_v50  ;;  %v15418_v50 = vld [vmem:[#allocation6 + $0x18] sm:$0xff] }
 0x775   : > { %8308 = vmatpush.bf16.msra.mxu0 %v9402_v20  ;;  %v4157_v17 = vperm.slane %v15418_v50, 0  ;;  %v10598_v20 = vor.u32 %v11873_v44, %v10597_v4  ;;  %8164 = vmatpush.bf16.msrb.mxu2 %v11070_v33  ;;  %v10998_v4 = vor.u32 %v11973_v56, %v10997_v41  ;;  %v10893_v44 = vld [vmem:[#allocation2 + $0xe50] sm:$0xf]  ;;  %v11640_v41 = vld [vmem:[#allocation2 + $0x4c4] sm:$0xf] }
 0x776   : > { %8150 = vmatpush.bf16.msrb.mxu1 %v11014_v26  ;;  %v11949_v26 = vld [vmem:[#allocation2 + $0xe64] sm:$0xf0]  ;;  %v10894_v2 = vor.u32 %v11947_v12, %v10893_v44  ;;  %v7911_v23 = vpop.f32.mrf.mxu2 }
 0x777   : > { %v15426_v25 = vpack.c.bf16 %v4157_v17, %v4157_v17  ;;  %v10902_v33 = vor.u32 %v11949_v26, %v10901_v18  ;;  %v9679_v17 = vld [vmem:[#allocation2 + $0x4d8] sm:$0xf0]  ;;  %v11046_v18 = vor.u32 %v11985_v51, %v11045_v61  ;;  %v11969_v26 = vld [vmem:[#allocation2 + $0xf04] sm:$0xf0]  ;;  %v11943_v61 = vld [vmem:[#allocation2 + $0xe34] sm:$0xf0] }
 0x778   : > { %8075 = vmatpush.bf16.msrb.mxu3 %v10606_v10  ;;  %v9687_v10 = vld [vmem:[#allocation2 + $0x4e8] sm:$0xf0]  ;;  %v12043_v23 = vld [vmem:[#allocation2 + $0x1154] sm:$0xf0] }
 0x779   : > { %8309 = vmatpush.bf16.msra.mxu0 %v9394_v35  ;;  %8165 = vmatpush.bf16.msrb.mxu2 %v11062_v34  ;;  %v11642_v35 = vld [vmem:[#allocation2 + $0x4d4] sm:$0xf]  ;;  %v9690_v8 = vor.u32 %v11644_v60, %v9687_v10  ;;  %v4164_v34 = vperm.slane %v15418_v50, 7  ;;  %v11293_v60 = vld [vmem:[#allocation2 + $0x1170] sm:$0xf] }
 0x77a   : > { %8151 = vmatpush.bf16.msrb.mxu1 %v11006_v30  ;;  %v10990_v30 = vor.u32 %v11971_v49, %v10989_v31  ;;  %v9682_v45 = vor.u32 %v11642_v35, %v9679_v17  ;;  %v12047_v10 = vld [vmem:[#allocation2 + $0x1174] sm:$0xf0]  ;;  %v9671_v31 = vld [vmem:[#allocation2 + $0x4c8] sm:$0xf0]  ;;  %v12045_v17 = vld [vmem:[#allocation2 + $0x1164] sm:$0xf0] }
 0x77b   : > { %v15431_v49 = vpack.c.bf16 %v4164_v34, %v4164_v34  ;;  %v11294_v44 = vor.u32 %v12047_v10, %v11293_v60  ;;  %v9674_v35 = vor.u32 %v11640_v41, %v9671_v31  ;;  %v9663_v34 = vld [vmem:[#allocation2 + $0x4b8] sm:$0xf0]  ;;  %v11636_v60 = vld [vmem:[#allocation2 + $0x4a4] sm:$0xf]  ;;  %v9655_v10 = vld [vmem:[#allocation2 + $0x4a8] sm:$0xf0] }
 0x77c   : > { %8076 = vmatpush.bf16.msrb.mxu3 %v10598_v20  ;;  %v12063_v20 = vld [vmem:[#allocation2 + $0x11f4] sm:$0xf0] }
 0x77d   : > { %8310 = vmatpush.bf16.msra.mxu0 %v9386_v38  ;;  %v10885_v38 = vld [vmem:[#allocation2 + $0xe40] sm:$0xf]  ;;  %8166 = vmatpush.bf16.msrb.mxu2 %v11054_v48  ;;  %v11358_v56 = vor.u32 %v12063_v20, %v11357_v59  ;;  %v4163_v48 = vperm.slane %v15418_v50, 6  ;;  %v11638_v20 = vld [vmem:[#allocation2 + $0x4b4] sm:$0xf] }
 0x77e   : > { %8152 = vmatpush.bf16.msrb.mxu1 %v10998_v4  ;;  %v11349_v4 = vld [vmem:[#allocation2 + $0x11e0] sm:$0xf]  ;;  %v9666_v41 = vor.u32 %v11638_v20, %v9663_v34  ;;  %v9647_v20 = vld [vmem:[#allocation2 + $0x498] sm:$0xf0]  ;;  %v12055_v34 = vld [vmem:[#allocation2 + $0x11b4] sm:$0xf0] }
 0x77f   : > { %8077 = vmatmul.bf16.vlgmr.msrb.gmra.mxu3 %v15426_v25  ;;  %v15434_v51 = vpack.c.bf16 %v4163_v48, %v4163_v48  ;;  %v11285_v59 = vld [vmem:[#allocation2 + $0x1160] sm:$0xf]  ;;  %v10861_v48 = vld [vmem:[#allocation2 + $0xe10] sm:$0xf] }
 0x780   : > { %8121 = vmatpush.bf16.msra.mxu3 %v10910_v14  ;;  %v11945_v14 = vld [vmem:[#allocation2 + $0xe44] sm:$0xf0]  ;;  %8311 = vmatmul.bf16.vlgmr.msra.gmra.mxu0 %v15266_v16 }
 0x781   : > { %8355 = vmatpush.bf16.msrb.mxu0 %v9698_v53  ;;  %v10981_v53 = vld [vmem:[#allocation2 + $0xf00] sm:$0xf]  ;;  %v12061_v16 = vld [vmem:[#allocation2 + $0x11e4] sm:$0xf0]  ;;  %8167 = vmatpush.bf16.msrb.mxu2 %v11046_v18  ;;  %v10886_v12 = vor.u32 %v11945_v14, %v10885_v38  ;;  %15801 = vst [vmem:[#allocation34_spill] sm:$0xff] %v15434_v51 }
 0x782   : > { %8153 = vmatpush.bf16.msrb.mxu1 %v10990_v30  ;;  %v10982_v1 = vor.u32 %v11969_v26, %v10981_v53  ;;  %v11341_v30 = vld [vmem:[#allocation2 + $0x11d0] sm:$0xf]  ;;  %v12059_v18 = vld [vmem:[#allocation2 + $0x11d4] sm:$0xf0]  ;;  %v10869_v14 = vld [vmem:[#allocation2 + $0xe20] sm:$0xf] }
 0x783   : > { %v11342_v53 = vor.u32 %v12059_v18, %v11341_v30  ;;  %v11277_v26 = vld [vmem:[#allocation2 + $0x1150] sm:$0xf]  ;;  %v11634_v30 = vld [vmem:[#allocation2 + $0x494] sm:$0xf]  ;;  %v10853_v18 = vld [vmem:[#allocation2 + $0xe00] sm:$0xf] }
 0x784   : > { %8122 = vmatpush.bf16.msra.mxu3 %v10902_v33  ;;  %v10877_v33 = vld [vmem:[#allocation2 + $0xe30] sm:$0xf]  ;;  %8168 = vmatmul.bf16.vlgmr.msrb.gmra.mxu2 %v15431_v49  ;;  %v11278_v31 = vor.u32 %v12043_v23, %v11277_v26  ;;  %v9650_v23 = vor.u32 %v11634_v30, %v9647_v20  ;;  %v11157_v30 = vld [vmem:[#allocation2 + $0x1060] sm:$0xf] }
 0x785   : > { %8356 = vmatpush.bf16.msrb.mxu0 %v9690_v8  ;;  %8212 = vmatpush.bf16.msra.mxu2 %v11358_v56  ;;  %v11350_v8 = vor.u32 %v12061_v16, %v11349_v4  ;;  %v10878_v38 = vor.u32 %v11943_v61, %v10877_v33  ;;  %v11941_v56 = vld [vmem:[#allocation2 + $0xe24] sm:$0xf0]  ;;  %v7870_v33 = vpop.f32.mrf.mxu3  ;;  %v9658_v61 = vor.u32 %v11636_v60, %v9655_v10  ;;  %v12039_v60 = vld [vmem:[#allocation2 + $0x1134] sm:$0xf0] }
 0x786   : > { %8154 = vmatpush.bf16.msrb.mxu1 %v10982_v1  ;;  %v12057_v4 = vld [vmem:[#allocation2 + $0x11c4] sm:$0xf0]  ;;  %v15438_v1 = vpop.f32.mrf.mxu0  ;;  %v10870_v16 = vor.u32 %v11941_v56, %v10869_v14 }
 0x787   : > { %v11937_v56 = vld [vmem:[#allocation2 + $0xe04] sm:$0xf0] }
 0x788   : > { %8123 = vmatpush.bf16.msra.mxu3 %v10894_v2  ;;  %v11286_v2 = vor.u32 %v12045_v17, %v11285_v59  ;;  %v11325_v59 = vld [vmem:[#allocation2 + $0x11b0] sm:$0xf]  ;;  %v7871_v17 = vadd.f32 %v7870_v33, %v15422_v27  ;;  %v11317_v27 = vld [vmem:[#allocation2 + $0x11a0] sm:$0xf]  ;;  %v12015_v33 = vld [vmem:[#allocation2 + $0x1074] sm:$0xf0] }
 0x789   : > { %8357 = vmatpush.bf16.msrb.mxu0 %v9682_v45  ;;  %8213 = vmatpush.bf16.msra.mxu2 %v11350_v8  ;;  %v11333_v45 = vld [vmem:[#allocation2 + $0x11c0] sm:$0xf]  ;;  %v11326_v26 = vor.u32 %v12055_v34, %v11325_v59  ;;  %v15449_v34 = vpop.f32.mrf.mxu2 }
 0x78a   : > { %8199 = vmatpush.bf16.msra.mxu1 %v11294_v44  ;;  %v11939_v44 = vld [vmem:[#allocation2 + $0xe14] sm:$0xf0]  ;;  %v11269_v8 = vld [vmem:[#allocation2 + $0x1140] sm:$0xf] }
 0x78b   : > { %8155 = vmatmul.bf16.vlgmr.msrb.gmra.mxu1 %v15434_v51  ;;  %v10862_v14 = vor.u32 %v11939_v44, %v10861_v48  ;;  %v4161_v48 = vperm.slane %v15418_v50, 4  ;;  %v12037_v51 = vld [vmem:[#allocation2 + $0x1124] sm:$0xf0] }
 0x78c   : > { %8124 = vmatpush.bf16.msra.mxu3 %v10886_v12  ;;  %v11334_v12 = vor.u32 %v12057_v4, %v11333_v45  ;;  %v11261_v45 = vld [vmem:[#allocation2 + $0x1130] sm:$0xf] }
 0x78d   : > { %8358 = vmatpush.bf16.msrb.mxu0 %v9674_v35  ;;  %8214 = vmatpush.bf16.msra.mxu2 %v11342_v53  ;;  %v12041_v35 = vld [vmem:[#allocation2 + $0x1144] sm:$0xf0]  ;;  %v11632_v53 = vld [vmem:[#allocation2 + $0x484] sm:$0xf]  ;;  %v11165_v4 = vld [vmem:[#allocation2 + $0x1070] sm:$0xf]  ;;  %v11262_v44 = vor.u32 %v12039_v60, %v11261_v45  ;;  %v7872_v20 = vpop.f32.mrf.mxu3 }
 0x78e   : > { %8200 = vmatpush.bf16.msra.mxu1 %v11286_v2  ;;  %v11270_v2 = vor.u32 %v12041_v35, %v11269_v8  ;;  %v12053_v8 = vld [vmem:[#allocation2 + $0x11a4] sm:$0xf0]  ;;  %v10854_v35 = vor.u32 %v11937_v56, %v10853_v18  ;;  %v11309_v45 = vld [vmem:[#allocation2 + $0x1190] sm:$0xf]  ;;  %v12051_v60 = vld [vmem:[#allocation2 + $0x1194] sm:$0xf0] }
 0x78f   : > { %v11318_v59 = vor.u32 %v12053_v8, %v11317_v27  ;;  %v11310_v56 = vor.u32 %v12051_v60, %v11309_v45  ;;  %v11141_v20 = vld [vmem:[#allocation2 + $0x1040] sm:$0xf] }
 0x790   : > { %8125 = vmatpush.bf16.msra.mxu3 %v10878_v38  ;;  %v7884_v38 = vadd.f32 %v15411_v47, %v7871_v17  ;;  %v11710_v47 = vld [vmem:[#allocation2 + $0x6f4] sm:$0xf]  ;;  %v11166_v17 = vor.u32 %v12015_v33, %v11165_v4  ;;  %v11301_v4 = vld [vmem:[#allocation2 + $0x1180] sm:$0xf]  ;;  %v12049_v33 = vld [vmem:[#allocation2 + $0x1184] sm:$0xf0] }
 0x791   : > { %8359 = vmatpush.bf16.msrb.mxu0 %v9666_v41  ;;  %v9639_v41 = vld [vmem:[#allocation2 + $0x488] sm:$0xf0]  ;;  %8215 = vmatpush.bf16.msra.mxu2 %v11334_v12  ;;  %v7937_v12 = vpop.f32.mrf.mxu0 }
 0x792   : > { %8201 = vmatpush.bf16.msra.mxu1 %v11278_v31  ;;  %v7897_v10 = vadd.f32 %v15416_v24, %v7884_v38  ;;  %v15443_v31 = vpop.f32.mrf.mxu1  ;;  %v9642_v24 = vor.u32 %v11632_v53, %v9639_v41  ;;  %v11253_v38 = vld [vmem:[#allocation2 + $0x1120] sm:$0xf]  ;;  %v15451_v12 = vpack.c.bf16 %v4161_v48, %v4161_v48  ;;  %v11149_v41 = vld [vmem:[#allocation2 + $0x1050] sm:$0xf]  ;;  %v4168_v48 = vperm.slane %v15372_v39, 3 }
 0x793   : > { %v11254_v18 = vor.u32 %v12037_v51, %v11253_v38  ;;  %v12009_v38 = vld [vmem:[#allocation2 + $0x1044] sm:$0xf0] }
 0x794   : > { %8126 = vmatpush.bf16.msra.mxu3 %v10870_v16  ;;  %v9951_v16 = vld [vmem:[#allocation2 + $0x6f8] sm:$0xf0]  ;;  %v15456_v45 = vpack.c.bf16 %v4168_v48, %v4168_v48 }
 0x795   : > { %8360 = vmatpush.bf16.msrb.mxu0 %v9658_v61  ;;  %v15447_v61 = vadd.f32 %v15424_v0, %v7897_v10  ;;  %8216 = vmatpush.bf16.msra.mxu2 %v11326_v26  ;;  %v9954_v50 = vor.u32 %v11710_v47, %v9951_v16  ;;  %v11708_v0 = vld [vmem:[#allocation2 + $0x6e4] sm:$0xf]  ;;  %v11245_v26 = vld [vmem:[#allocation2 + $0x1110] sm:$0xf]  ;;  %v12011_v10 = vld [vmem:[#allocation2 + $0x1054] sm:$0xf0] }
 0x796   : > { %8202 = vmatpush.bf16.msra.mxu1 %v11270_v2  ;;  %v12013_v2 = vld [vmem:[#allocation2 + $0x1064] sm:$0xf0]  ;;  %v11706_v47 = vld [vmem:[#allocation2 + $0x6d4] sm:$0xf]  ;;  %v9935_v16 = vld [vmem:[#allocation2 + $0x6d8] sm:$0xf0] }
 0x797   : > { %v11158_v53 = vor.u32 %v12013_v2, %v11157_v30  ;;  %v9938_v30 = vor.u32 %v11706_v47, %v9935_v16  ;;  %v9927_v2 = vld [vmem:[#allocation2 + $0x6c8] sm:$0xf0]  ;;  %v9311_v47 = vld [vmem:[#allocation2 + $0x1f8] sm:$0xf0] }
 0x798   : > { %8127 = vmatpush.bf16.msra.mxu3 %v10862_v14  ;;  %v9943_v14 = vld [vmem:[#allocation2 + $0x6e8] sm:$0xf0] }
 0x799   : > { %8361 = vmatpush.bf16.msrb.mxu0 %v9650_v23  ;;  %8217 = vmatpush.bf16.msra.mxu2 %v11318_v59  ;;  %v12035_v23 = vld [vmem:[#allocation2 + $0x1114] sm:$0xf0]  ;;  %v9946_v27 = vor.u32 %v11708_v0, %v9943_v14  ;;  %v11237_v59 = vld [vmem:[#allocation2 + $0x1100] sm:$0xf]  ;;  %v4167_v0 = vperm.slane %v15372_v39, 2  ;;  %v15463_v16 = vpop.f32.mrf.mxu0 }
 0x79a   : > { %8203 = vmatpush.bf16.msra.mxu1 %v11262_v44  ;;  %v7950_v8 = vpop.f32.mrf.mxu1  ;;  %v11246_v51 = vor.u32 %v12035_v23, %v11245_v26  ;;  %v11302_v44 = vor.u32 %v12049_v33, %v11301_v4  ;;  %v9919_v26 = vld [vmem:[#allocation2 + $0x6b8] sm:$0xf0]  ;;  %v12005_v39 = vld [vmem:[#allocation2 + $0x1024] sm:$0xf0]  ;;  %v11700_v4 = vld [vmem:[#allocation2 + $0x6a4] sm:$0xf] }
 0x79b   : > { %v9911_v33 = vld [vmem:[#allocation2 + $0x6a8] sm:$0xf0]  ;;  %v11550_v8 = vld [vmem:[#allocation2 + $0x1f4] sm:$0xf] }
 0x79c   : > { %8128 = vmatpush.bf16.msra.mxu3 %v10854_v35  ;;  %v11150_v35 = vor.u32 %v12011_v10, %v11149_v41  ;;  %v11702_v41 = vld [vmem:[#allocation2 + $0x6b4] sm:$0xf]  ;;  %v11125_v10 = vld [vmem:[#allocation2 + $0x1020] sm:$0xf] }
 0x79d   : > { %8362 = vmatpush.bf16.msrb.mxu0 %v9642_v24  ;;  %8218 = vmatpush.bf16.msra.mxu2 %v11310_v56  ;;  %v12033_v24 = vld [vmem:[#allocation2 + $0x1104] sm:$0xf0]  ;;  %v12007_v56 = vld [vmem:[#allocation2 + $0x1034] sm:$0xf0]  ;;  %v11126_v48 = vor.u32 %v12005_v39, %v11125_v10  ;;  %v11389_v10 = vld [vmem:[#allocation2 + $0x1230] sm:$0xf] }
 0x79e   : > { %8204 = vmatpush.bf16.msra.mxu1 %v11254_v18  ;;  %v11238_v60 = vor.u32 %v12033_v24, %v11237_v59  ;;  %v11133_v18 = vld [vmem:[#allocation2 + $0x1030] sm:$0xf]  ;;  %v9914_v59 = vor.u32 %v11700_v4, %v9911_v33  ;;  %v12003_v24 = vld [vmem:[#allocation2 + $0x1014] sm:$0xf0]  ;;  %v11774_v4 = vld [vmem:[#allocation2 + $0x8f4] sm:$0xf] }
 0x79f   : > { %8129 = vmatmul.bf16.vlgmr.msra.gmra.mxu3 %v15451_v12  ;;  %v11134_v23 = vor.u32 %v12007_v56, %v11133_v18  ;;  %v12001_v56 = vld [vmem:[#allocation2 + $0x1004] sm:$0xf0]  ;;  %v12071_v39 = vld [vmem:[#allocation2 + $0x1234] sm:$0xf0] }
 0x7a0   : > { %8173 = vmatpush.bf16.msrb.mxu3 %v11166_v17  ;;  %8363 = vmatmul.bf16.vlgmr.msrb.gmra.mxu0 %v15276_v63  ;;  %v7963_v17 = vpop.f32.mrf.mxu2  ;;  %v11142_v63 = vor.u32 %v12009_v38, %v11141_v20  ;;  %v11534_v38 = vld [vmem:[#allocation2 + $0x174] sm:$0xf] }
 0x7a1   : > { %8407 = vmatpush.bf16.msra.mxu0 %v9954_v50  ;;  %v11704_v50 = vld [vmem:[#allocation2 + $0x6c4] sm:$0xf]  ;;  %8219 = vmatpush.bf16.msra.mxu2 %v11302_v44  ;;  %v11117_v44 = vld [vmem:[#allocation2 + $0x1010] sm:$0xf]  ;;  %v11698_v17 = vld [vmem:[#allocation2 + $0x694] sm:$0xf] }
 0x7a2   : > { %8205 = vmatpush.bf16.msra.mxu1 %v11246_v51  ;;  %v9930_v14 = vor.u32 %v11704_v50, %v9927_v2  ;;  %v9314_v51 = vor.u32 %v11550_v8, %v9311_v47  ;;  %v9247_v50 = vld [vmem:[#allocation2 + $0x178] sm:$0xf0]  ;;  %v11548_v2 = vld [vmem:[#allocation2 + $0x1e4] sm:$0xf]  ;;  %v11118_v18 = vor.u32 %v12003_v24, %v11117_v44  ;;  %v15468_v33 = vpop.f32.mrf.mxu1  ;;  %v9239_v47 = vld [vmem:[#allocation2 + $0x168] sm:$0xf0]  ;;  %v7989_v24 = vpop.f32.mrf.mxu0 }
 0x7a3   : > { %v11532_v8 = vld [vmem:[#allocation2 + $0x164] sm:$0xf] }
 0x7a4   : > { %8174 = vmatpush.bf16.msrb.mxu3 %v11158_v53  ;;  %v15459_v53 = vpack.c.bf16 %v4167_v0, %v4167_v0  ;;  %8220 = vmatmul.bf16.vlgmr.msra.gmra.mxu2 %v15456_v45  ;;  %v9250_v0 = vor.u32 %v11534_v38, %v9247_v50  ;;  %v11390_v38 = vor.u32 %v12071_v39, %v11389_v10  ;;  %v11381_v50 = vld [vmem:[#allocation2 + $0x1220] sm:$0xf]  ;;  %v12067_v10 = vld [vmem:[#allocation2 + $0x1214] sm:$0xf0] }
 0x7a5   : > { %8408 = vmatpush.bf16.msra.mxu0 %v9946_v27  ;;  %v9922_v27 = vor.u32 %v11702_v41, %v9919_v26  ;;  %8277 = vmatpush.bf16.msrb.mxu2 %v9314_v51  ;;  %v11696_v41 = vld [vmem:[#allocation2 + $0x684] sm:$0xf]  ;;  %v9895_v26 = vld [vmem:[#allocation2 + $0x688] sm:$0xf0]  ;;  %v10207_v51 = vld [vmem:[#allocation2 + $0x8f8] sm:$0xf0] }
 0x7a6   : > { %8206 = vmatpush.bf16.msra.mxu1 %v11238_v60  ;;  %v11109_v60 = vld [vmem:[#allocation2 + $0x1000] sm:$0xf] }
 0x7a8   : > { %8175 = vmatpush.bf16.msrb.mxu3 %v11150_v35  ;;  %v7922_v35 = vpop.f32.mrf.mxu3 }
 0x7a9   : > { %8409 = vmatpush.bf16.msra.mxu0 %v9938_v30  ;;  %8207 = vmatmul.bf16.vlgmr.msra.gmra.mxu1 %v15459_v53  ;;  %v9903_v30 = vld [vmem:[#allocation2 + $0x698] sm:$0xf0]  ;;  %v7923_v20 = vadd.f32 %v7922_v35, %v15447_v61  ;;  %v9242_v35 = vor.u32 %v11532_v8, %v9239_v47  ;;  %v11544_v47 = vld [vmem:[#allocation2 + $0x1c4] sm:$0xf] }
 0x7aa   : > { %8264 = vmatpush.bf16.msrb.mxu1 %v9250_v0  ;;  %v9231_v8 = vld [vmem:[#allocation2 + $0x158] sm:$0xf0] }
 0x7ac   : > { %8176 = vmatpush.bf16.msrb.mxu3 %v11142_v63  ;;  %v9303_v63 = vld [vmem:[#allocation2 + $0x1e8] sm:$0xf0] }
 0x7ad   : > { %8410 = vmatpush.bf16.msra.mxu0 %v9930_v14  ;;  %v7936_v14 = vadd.f32 %v15438_v1, %v7923_v20  ;;  %v11546_v1 = vld [vmem:[#allocation2 + $0x1d4] sm:$0xf]  ;;  %v9898_v20 = vor.u32 %v11696_v41, %v9895_v26 }
 0x7ae   : > { %8265 = vmatpush.bf16.msrb.mxu1 %v9242_v35  ;;  %v10191_v35 = vld [vmem:[#allocation2 + $0x8d8] sm:$0xf0] }
 0x7af   : > { %v7949_v61 = vadd.f32 %v15443_v31, %v7936_v14  ;;  %v10210_v14 = vor.u32 %v11774_v4, %v10207_v51  ;;  %v11528_v4 = vld [vmem:[#allocation2 + $0x144] sm:$0xf]  ;;  %v8002_v51 = vpop.f32.mrf.mxu1 }
 0x7b0   : > { %8177 = vmatpush.bf16.msrb.mxu3 %v11134_v23  ;;  %v9306_v23 = vor.u32 %v11548_v2, %v9303_v63  ;;  %v12069_v2 = vld [vmem:[#allocation2 + $0x1224] sm:$0xf0]  ;;  %v7924_v0 = vpop.f32.mrf.mxu3  ;;  %v15476_v63 = vpop.f32.mrf.mxu2  ;;  %v9207_v51 = vld [vmem:[#allocation2 + $0x128] sm:$0xf0] }
 0x7b1   : > { %8411 = vmatpush.bf16.msra.mxu0 %v9922_v27  ;;  %v9906_v27 = vor.u32 %v11698_v17, %v9903_v30  ;;  %v15474_v17 = vadd.f32 %v15449_v34, %v7949_v61  ;;  %v11110_v30 = vor.u32 %v12001_v56, %v11109_v60  ;;  %v11772_v34 = vld [vmem:[#allocation2 + $0x8e4] sm:$0xf]  ;;  %v9287_v56 = vld [vmem:[#allocation2 + $0x1c8] sm:$0xf0]  ;;  %v11382_v26 = vor.u32 %v12069_v2, %v11381_v50  ;;  %v12065_v50 = vld [vmem:[#allocation2 + $0x1204] sm:$0xf0] }
 0x7b2   : > { %8278 = vmatpush.bf16.msrb.mxu2 %v9306_v23  ;;  %v11530_v23 = vld [vmem:[#allocation2 + $0x154] sm:$0xf]  ;;  %v9290_v41 = vor.u32 %v11544_v47, %v9287_v56  ;;  %v9223_v61 = vld [vmem:[#allocation2 + $0x148] sm:$0xf0]  ;;  %v11768_v2 = vld [vmem:[#allocation2 + $0x8c4] sm:$0xf] }
 0x7b3   : > { %v9234_v60 = vor.u32 %v11530_v23, %v9231_v8  ;;  %v10183_v0 = vld [vmem:[#allocation2 + $0x8c8] sm:$0xf0]  ;;  %v11526_v8 = vld [vmem:[#allocation2 + $0x134] sm:$0xf]  ;;  %v9215_v47 = vld [vmem:[#allocation2 + $0x138] sm:$0xf0] }
 0x7b4   : > { %8178 = vmatpush.bf16.msrb.mxu3 %v11126_v48  ;;  %v15470_v48 = vld [vmem:[#allocation6 + $0x20] sm:$0x1f]  ;;  %v9218_v56 = vor.u32 %v11526_v8, %v9215_v47 }
 0x7b5   : > { %8412 = vmatpush.bf16.msra.mxu0 %v9914_v59  ;;  %v4165_v44 = vperm.slane %v15470_v48, 0  ;;  %v9295_v59 = vld [vmem:[#allocation2 + $0x1d8] sm:$0xf0]  ;;  %8266 = vmatpush.bf16.msrb.mxu1 %v9234_v60 }
 0x7b6   : > { %v9298_v31 = vor.u32 %v11546_v1, %v9295_v59  ;;  %v11542_v1 = vld [vmem:[#allocation2 + $0x1b4] sm:$0xf]  ;;  %v9226_v59 = vor.u32 %v11528_v4, %v9223_v61  ;;  %v9119_v60 = vld [vmem:[#allocation2 + $0x78] sm:$0xf0]  ;;  %v10186_v61 = vor.u32 %v11768_v2, %v10183_v0 }
 0x7b7   : > { %v15478_v24 = vpack.c.bf16 %v4165_v44, %v4165_v44  ;;  %v11770_v44 = vld [vmem:[#allocation2 + $0x8d4] sm:$0xf]  ;;  %v9103_v8 = vld [vmem:[#allocation2 + $0x58] sm:$0xf0] }
 0x7b8   : > { %8179 = vmatpush.bf16.msrb.mxu3 %v11118_v18  ;;  %8279 = vmatpush.bf16.msrb.mxu2 %v9298_v31  ;;  %v10199_v18 = vld [vmem:[#allocation2 + $0x8e8] sm:$0xf0]  ;;  %v11365_v31 = vld [vmem:[#allocation2 + $0x1200] sm:$0xf]  ;;  %v10194_v23 = vor.u32 %v11770_v44, %v10191_v35  ;;  %v11538_v44 = vld [vmem:[#allocation2 + $0x194] sm:$0xf] }
 0x7b9   : > { %8413 = vmatpush.bf16.msra.mxu0 %v9906_v27  ;;  %v11373_v27 = vld [vmem:[#allocation2 + $0x1210] sm:$0xf]  ;;  %v10202_v39 = vor.u32 %v11772_v34, %v10199_v18  ;;  %8267 = vmatpush.bf16.msrb.mxu1 %v9226_v59  ;;  %v11540_v34 = vld [vmem:[#allocation2 + $0x1a4] sm:$0xf]  ;;  %v11502_v18 = vld [vmem:[#allocation2 + $0x74] sm:$0xf] }
 0x7ba   : > { %v9111_v35 = vld [vmem:[#allocation2 + $0x68] sm:$0xf0]  ;;  %v4169_v59 = vperm.slane %v15470_v48, 4  ;;  %v9199_v47 = vld [vmem:[#allocation2 + $0x118] sm:$0xf0] }
 0x7bc   : > { %8180 = vmatpush.bf16.msrb.mxu3 %v11110_v30  ;;  %8280 = vmatpush.bf16.msrb.mxu2 %v9290_v41  ;;  %v9279_v30 = vld [vmem:[#allocation2 + $0x1b8] sm:$0xf0]  ;;  %v9271_v41 = vld [vmem:[#allocation2 + $0x1a8] sm:$0xf0] }
 0x7bd   : > { %8414 = vmatpush.bf16.msra.mxu0 %v9898_v20  ;;  %v9282_v20 = vor.u32 %v11542_v1, %v9279_v30  ;;  %v9274_v4 = vor.u32 %v11540_v34, %v9271_v41  ;;  %v9122_v1 = vor.u32 %v11502_v18, %v9119_v60  ;;  %8268 = vmatpush.bf16.msrb.mxu1 %v9218_v56  ;;  %v11536_v34 = vld [vmem:[#allocation2 + $0x184] sm:$0xf]  ;;  %v9255_v60 = vld [vmem:[#allocation2 + $0x188] sm:$0xf0]  ;;  %v11614_v56 = vld [vmem:[#allocation2 + $0x3f4] sm:$0xf] }
 0x7be   : > { %v15483_v18 = vpack.c.bf16 %v4169_v59, %v4169_v59  ;;  %v9567_v41 = vld [vmem:[#allocation2 + $0x3f8] sm:$0xf0]  ;;  %v9191_v59 = vld [vmem:[#allocation2 + $0x108] sm:$0xf0] }
 0x7bf   : > { %8181 = vmatmul.bf16.vlgmr.msrb.gmra.mxu3 %v15478_v24 }
 0x7c0   : > { %8229 = vmatpush.bf16.msra.mxu3 %v11390_v38  ;;  %8415 = vmatmul.bf16.vlgmr.msra.gmra.mxu0 %v15284_v52  ;;  %v11374_v38 = vor.u32 %v12067_v10, %v11373_v27  ;;  %v11366_v52 = vor.u32 %v12065_v50, %v11365_v31  ;;  %v10175_v27 = vld [vmem:[#allocation2 + $0x8b8] sm:$0xf0]  ;;  %v11500_v10 = vld [vmem:[#allocation2 + $0x64] sm:$0xf]  ;;  %v10167_v31 = vld [vmem:[#allocation2 + $0x8a8] sm:$0xf0] }
 0x7c1   : > { %8459 = vmatpush.bf16.msrb.mxu0 %v10210_v14  ;;  %v8015_v14 = vpop.f32.mrf.mxu2  ;;  %8281 = vmatpush.bf16.msrb.mxu2 %v9282_v20  ;;  %v9263_v20 = vld [vmem:[#allocation2 + $0x198] sm:$0xf0]  ;;  %v11498_v50 = vld [vmem:[#allocation2 + $0x54] sm:$0xf]  ;;  %v9114_v0 = vor.u32 %v11500_v10, %v9111_v35  ;;  %v11520_v35 = vld [vmem:[#allocation2 + $0x104] sm:$0xf] }
 0x7c2   : > { %v9266_v14 = vor.u32 %v11538_v44, %v9263_v20  ;;  %v9106_v10 = vor.u32 %v11498_v50, %v9103_v8  ;;  %v9095_v44 = vld [vmem:[#allocation2 + $0x48] sm:$0xf0]  ;;  %v9194_v20 = vor.u32 %v11520_v35, %v9191_v59  ;;  %v11610_v35 = vld [vmem:[#allocation2 + $0x3d4] sm:$0xf]  ;;  %v11492_v59 = vld [vmem:[#allocation2 + $0x24] sm:$0xf] }
 0x7c3   : > { %v10151_v8 = vld [vmem:[#allocation2 + $0x888] sm:$0xf0] }
 0x7c4   : > { %8230 = vmatpush.bf16.msra.mxu3 %v11382_v26  ;;  %v11766_v26 = vld [vmem:[#allocation2 + $0x8b4] sm:$0xf] }
 0x7c5   : > { %8460 = vmatpush.bf16.msrb.mxu0 %v10202_v39  ;;  %v11524_v39 = vld [vmem:[#allocation2 + $0x124] sm:$0xf]  ;;  %8282 = vmatpush.bf16.msrb.mxu2 %v9274_v4  ;;  %v10178_v2 = vor.u32 %v11766_v26, %v10175_v27  ;;  %v9258_v4 = vor.u32 %v11536_v34, %v9255_v60  ;;  %v7974_v26 = vpop.f32.mrf.mxu3  ;;  %v11494_v60 = vld [vmem:[#allocation2 + $0x34] sm:$0xf] }
 0x7c6   : > { %v9210_v30 = vor.u32 %v11524_v39, %v9207_v51  ;;  %v11762_v39 = vld [vmem:[#allocation2 + $0x894] sm:$0xf]  ;;  %v10159_v51 = vld [vmem:[#allocation2 + $0x898] sm:$0xf0] }
 0x7c7   : > { %v10162_v50 = vor.u32 %v11762_v39, %v10159_v51 }
 0x7c8   : > { %8231 = vmatpush.bf16.msra.mxu3 %v11374_v38  ;;  %v11764_v38 = vld [vmem:[#allocation2 + $0x8a4] sm:$0xf]  ;;  %8269 = vmatpush.bf16.msrb.mxu1 %v9210_v30  ;;  %v7975_v30 = vadd.f32 %v7974_v26, %v15474_v17  ;;  %v9495_v26 = vld [vmem:[#allocation2 + $0x368] sm:$0xf0] }
 0x7c9   : > { %8461 = vmatpush.bf16.msrb.mxu0 %v10194_v23  ;;  %v11522_v23 = vld [vmem:[#allocation2 + $0x114] sm:$0xf]  ;;  %8283 = vmatpush.bf16.msrb.mxu2 %v9266_v14  ;;  %v10170_v27 = vor.u32 %v11764_v38, %v10167_v31  ;;  %v11760_v38 = vld [vmem:[#allocation2 + $0x884] sm:$0xf] }
 0x7ca   : > { %v9202_v48 = vor.u32 %v11522_v23, %v9199_v47  ;;  %v11598_v14 = vld [vmem:[#allocation2 + $0x374] sm:$0xf]  ;;  %v9503_v23 = vld [vmem:[#allocation2 + $0x378] sm:$0xf0]  ;;  %v11612_v47 = vld [vmem:[#allocation2 + $0x3e4] sm:$0xf] }
 0x7cb   : > { %v9506_v34 = vor.u32 %v11598_v14, %v9503_v23  ;;  %v15498_v14 = vpop.f32.mrf.mxu2  ;;  %v11594_v23 = vld [vmem:[#allocation2 + $0x354] sm:$0xf] }
 0x7cc   : > { %8232 = vmatpush.bf16.msra.mxu3 %v11366_v52  ;;  %v15485_v52 = vpop.f32.mrf.mxu0  ;;  %8270 = vmatpush.bf16.msrb.mxu1 %v9202_v48 }
 0x7cd   : > { %8462 = vmatpush.bf16.msrb.mxu0 %v10186_v61  ;;  %v11496_v61 = vld [vmem:[#allocation2 + $0x44] sm:$0xf]  ;;  %8284 = vmatpush.bf16.msrb.mxu2 %v9258_v4 }
 0x7ce   : > { %v9098_v17 = vor.u32 %v11496_v61, %v9095_v44  ;;  %v11596_v4 = vld [vmem:[#allocation2 + $0x364] sm:$0xf] }
 0x7cf   : > { %11395 = vmatmul.msk.bf16.vlgmr.msra.gmra.mxu3 %vm3847_vm0, %v15483_v18 }
 0x7d0   : > { %8238 = vmatpush.bf16.msrb.mxu3 %v9122_v1  ;;  %v9570_v1 = vor.u32 %v11614_v56, %v9567_v41  ;;  %v9087_v56 = vld [vmem:[#allocation2 + $0x38] sm:$0xf0]  ;;  %v15492_v41 = vpop.f32.mrf.mxu1  ;;  %8271 = vmatpush.bf16.msrb.mxu1 %v9194_v20  ;;  %v7976_v20 = vpop.f32.mrf.mxu3 }
 0x7d1   : > { %8463 = vmatpush.bf16.msrb.mxu0 %v10178_v2  ;;  %v9559_v2 = vld [vmem:[#allocation2 + $0x3e8] sm:$0xf0]  ;;  %8285 = vmatmul.bf16.vlgmr.msrb.gmra.mxu2 %v15292_v55  ;;  %v9090_v44 = vor.u32 %v11494_v60, %v9087_v56  ;;  %v11592_v56 = vld [vmem:[#allocation2 + $0x344] sm:$0xf]  ;;  %v11590_v20 = vld [vmem:[#allocation2 + $0x334] sm:$0xf] }
 0x7d2   : > { %8329 = vmatpush.bf16.msra.mxu2 %v9570_v1  ;;  %v9562_v31 = vor.u32 %v11612_v47, %v9559_v2  ;;  %v10463_v1 = vld [vmem:[#allocation2 + $0xaf8] sm:$0xf0]  ;;  %v11836_v2 = vld [vmem:[#allocation2 + $0xae4] sm:$0xf] }
 0x7d3   : > { %v9487_v47 = vld [vmem:[#allocation2 + $0x358] sm:$0xf0]  ;;  %8272 = vmatmul.bf16.vlgmr.msrb.gmra.mxu1 %v15282_v36 }
 0x7d4   : > { %8239 = vmatpush.bf16.msrb.mxu3 %v9114_v0  ;;  %v7988_v0 = vadd.f32 %v15463_v16, %v7975_v30  ;;  %v11838_v16 = vld [vmem:[#allocation2 + $0xaf4] sm:$0xf]  ;;  %8316 = vmatpush.bf16.msra.mxu1 %v9506_v34  ;;  %v8041_v39 = vpop.f32.mrf.mxu0  ;;  %v9079_v30 = vld [vmem:[#allocation2 + $0x28] sm:$0xf0]  ;;  %v11608_v34 = vld [vmem:[#allocation2 + $0x3c4] sm:$0xf] }
 0x7d5   : > { %8464 = vmatpush.bf16.msrb.mxu0 %v10170_v27  ;;  %v9498_v27 = vor.u32 %v11596_v4, %v9495_v26  ;;  %v10466_v55 = vor.u32 %v11838_v16, %v10463_v1  ;;  %v11606_v4 = vld [vmem:[#allocation2 + $0x3b4] sm:$0xf]  ;;  %v10447_v36 = vld [vmem:[#allocation2 + $0xad8] sm:$0xf0] }
 0x7d6   : > { %v8001_v48 = vadd.f32 %v15468_v33, %v7988_v0  ;;  %8330 = vmatpush.bf16.msra.mxu2 %v9562_v31  ;;  %v10154_v33 = vor.u32 %v11760_v38, %v10151_v8  ;;  %v9490_v0 = vor.u32 %v11594_v23, %v9487_v47  ;;  %v9543_v31 = vld [vmem:[#allocation2 + $0x3c8] sm:$0xf0]  ;;  %v9082_v38 = vor.u32 %v11492_v59, %v9079_v30  ;;  %v9071_v8 = vld [vmem:[#allocation2 + $0x18] sm:$0xf0]  ;;  %v8067_v59 = vpop.f32.mrf.mxu2  ;;  %v11604_v23 = vld [vmem:[#allocation2 + $0x3a4] sm:$0xf] }
 0x7d7   : > { %v9535_v1 = vld [vmem:[#allocation2 + $0x3b8] sm:$0xf0]  ;;  %v11566_v47 = vld [vmem:[#allocation2 + $0x274] sm:$0xf]  ;;  %v11600_v59 = vld [vmem:[#allocation2 + $0x384] sm:$0xf] }
 0x7d8   : > { %8240 = vmatpush.bf16.msrb.mxu3 %v9106_v10  ;;  %v9551_v10 = vld [vmem:[#allocation2 + $0x3d8] sm:$0xf0]  ;;  %v15496_v51 = vadd.f32 %v15476_v63, %v8001_v48  ;;  %v10455_v63 = vld [vmem:[#allocation2 + $0xae8] sm:$0xf0]  ;;  %8317 = vmatpush.bf16.msra.mxu1 %v9498_v27  ;;  %v8054_v26 = vpop.f32.mrf.mxu1  ;;  %v11488_v27 = vld [vmem:[#allocation2 + $0x4] sm:$0xf] }
 0x7d9   : > { %v9554_v61 = vor.u32 %v11610_v35, %v9551_v10  ;;  %8465 = vmatpush.bf16.msrb.mxu0 %v10162_v50  ;;  %v9546_v50 = vor.u32 %v11608_v34, %v9543_v31  ;;  %v10458_v60 = vor.u32 %v11836_v2, %v10455_v63  ;;  %v9479_v48 = vld [vmem:[#allocation2 + $0x348] sm:$0xf0]  ;;  %v11834_v35 = vld [vmem:[#allocation2 + $0xad4] sm:$0xf]  ;;  %v9538_v10 = vor.u32 %v11606_v4, %v9535_v1  ;;  %v9375_v34 = vld [vmem:[#allocation2 + $0x278] sm:$0xf0] }
 0x7da   : > { %v9482_v16 = vor.u32 %v11592_v56, %v9479_v48  ;;  %v10450_v30 = vor.u32 %v11834_v35, %v10447_v36  ;;  %v9527_v63 = vld [vmem:[#allocation2 + $0x3a8] sm:$0xf0]  ;;  %v11830_v31 = vld [vmem:[#allocation2 + $0xab4] sm:$0xf]  ;;  %v11564_v48 = vld [vmem:[#allocation2 + $0x264] sm:$0xf] }
 0x7db   : > { %8331 = vmatpush.bf16.msra.mxu2 %v9554_v61  ;;  %v9063_v61 = vld [vmem:[#allocation2 + $0x8] sm:$0xf0]  ;;  %v11602_v56 = vld [vmem:[#allocation2 + $0x394] sm:$0xf]  ;;  %v9519_v35 = vld [vmem:[#allocation2 + $0x398] sm:$0xf0] }
 0x7dc   : > { %8241 = vmatpush.bf16.msrb.mxu3 %v9098_v17  ;;  %v11490_v17 = vld [vmem:[#allocation2 + $0x14] sm:$0xf]  ;;  %8318 = vmatpush.bf16.msra.mxu1 %v9490_v0  ;;  %v9066_v0 = vor.u32 %v11488_v27, %v9063_v61  ;;  %v9367_v4 = vld [vmem:[#allocation2 + $0x268] sm:$0xf0]  ;;  %v9522_v36 = vor.u32 %v11602_v56, %v9519_v35  ;;  %v9359_v27 = vld [vmem:[#allocation2 + $0x258] sm:$0xf0] }
 0x7dd   : > { %8466 = vmatpush.bf16.msrb.mxu0 %v10154_v33  ;;  %v9074_v39 = vor.u32 %v11490_v17, %v9071_v8  ;;  %v11832_v33 = vld [vmem:[#allocation2 + $0xac4] sm:$0xf]  ;;  %v9378_v17 = vor.u32 %v11566_v47, %v9375_v34  ;;  %v10423_v1 = vld [vmem:[#allocation2 + $0xaa8] sm:$0xf0]  ;;  %v9370_v61 = vor.u32 %v11564_v48, %v9367_v4  ;;  %v15503_v34 = vpop.f32.mrf.mxu0  ;;  %v11662_v48 = vld [vmem:[#allocation2 + $0x574] sm:$0xf] }
 0x7de   : > { %v11588_v8 = vld [vmem:[#allocation2 + $0x324] sm:$0xf]  ;;  %v9759_v4 = vld [vmem:[#allocation2 + $0x578] sm:$0xf0] }
 0x7df   : > { %8332 = vmatpush.bf16.msra.mxu2 %v9546_v50  ;;  %v10431_v50 = vld [vmem:[#allocation2 + $0xab8] sm:$0xf0]  ;;  %v9762_v35 = vor.u32 %v11662_v48, %v9759_v4  ;;  %v11900_v48 = vld [vmem:[#allocation2 + $0xce4] sm:$0xf] }
 0x7e0   : > { %8242 = vmatpush.bf16.msrb.mxu3 %v9090_v44  ;;  %8467 = vmatmul.bf16.vlgmr.msrb.gmra.mxu0 %v15294_v43  ;;  %v10439_v44 = vld [vmem:[#allocation2 + $0xac8] sm:$0xf0]  ;;  %v9530_v43 = vor.u32 %v11604_v23, %v9527_v63  ;;  %v9823_v23 = vld [vmem:[#allocation2 + $0x5f8] sm:$0xf0] }
 0x7e1   : > { %8511 = vmatpush.bf16.msra.mxu0 %v10466_v55  ;;  %v9471_v55 = vld [vmem:[#allocation2 + $0x338] sm:$0xf0]  ;;  %8319 = vmatpush.bf16.msra.mxu1 %v9482_v16  ;;  %v11828_v16 = vld [vmem:[#allocation2 + $0xaa4] sm:$0xf] }
 0x7e2   : > { %v9474_v2 = vor.u32 %v11590_v20, %v9471_v55  ;;  %v9511_v20 = vld [vmem:[#allocation2 + $0x388] sm:$0xf0]  ;;  %v11678_v55 = vld [vmem:[#allocation2 + $0x5f4] sm:$0xf]  ;;  %v10415_v63 = vld [vmem:[#allocation2 + $0xa98] sm:$0xf0] }
 0x7e3   : > { %8333 = vmatpush.bf16.msra.mxu2 %v9538_v10  ;;  %v11562_v10 = vld [vmem:[#allocation2 + $0x254] sm:$0xf]  ;;  %v9514_v47 = vor.u32 %v11600_v59, %v9511_v20  ;;  %v9751_v20 = vld [vmem:[#allocation2 + $0x568] sm:$0xf0] }
 0x7e4   : > { %8243 = vmatpush.bf16.msrb.mxu3 %v9082_v38  ;;  %v10442_v38 = vor.u32 %v11832_v33, %v10439_v44  ;;  %v11586_v33 = vld [vmem:[#allocation2 + $0x314] sm:$0xf]  ;;  %v9455_v44 = vld [vmem:[#allocation2 + $0x318] sm:$0xf0] }
 0x7e5   : > { %8512 = vmatpush.bf16.msra.mxu0 %v10458_v60  ;;  %v9463_v60 = vld [vmem:[#allocation2 + $0x328] sm:$0xf0]  ;;  %8320 = vmatpush.bf16.msra.mxu1 %v9474_v2  ;;  %v11826_v2 = vld [vmem:[#allocation2 + $0xa94] sm:$0xf] }
 0x7e6   : > { %v9466_v26 = vor.u32 %v11588_v8, %v9463_v60  ;;  %v11584_v8 = vld [vmem:[#allocation2 + $0x304] sm:$0xf]  ;;  %v9447_v60 = vld [vmem:[#allocation2 + $0x308] sm:$0xf0] }
 0x7e7   : > { %8334 = vmatpush.bf16.msra.mxu2 %v9530_v43  ;;  %v11560_v43 = vld [vmem:[#allocation2 + $0x244] sm:$0xf] }
 0x7e8   : > { %8244 = vmatpush.bf16.msrb.mxu3 %v9074_v39  ;;  %v10434_v39 = vor.u32 %v11830_v31, %v10431_v50  ;;  %v8026_v31 = vpop.f32.mrf.mxu3  ;;  %v10426_v50 = vor.u32 %v11828_v16, %v10423_v1  ;;  %v10418_v16 = vor.u32 %v11826_v2, %v10415_v63  ;;  %v15508_v59 = vpop.f32.mrf.mxu1 }
 0x7e9   : > { %8513 = vmatpush.bf16.msra.mxu0 %v10450_v30  ;;  %8321 = vmatpush.bf16.msra.mxu1 %v9466_v26  ;;  %v9458_v30 = vor.u32 %v11586_v33, %v9455_v44  ;;  %v8027_v56 = vadd.f32 %v8026_v31, %v15496_v51  ;;  %v11676_v26 = vld [vmem:[#allocation2 + $0x5e4] sm:$0xf]  ;;  %v9343_v51 = vld [vmem:[#allocation2 + $0x238] sm:$0xf0]  ;;  %v8093_v2 = vpop.f32.mrf.mxu0 }
 0x7eb   : > { %8335 = vmatpush.bf16.msra.mxu2 %v9522_v36  ;;  %v9815_v36 = vld [vmem:[#allocation2 + $0x5e8] sm:$0xf0]  ;;  %v8040_v33 = vadd.f32 %v15485_v52, %v8027_v56  ;;  %v11674_v52 = vld [vmem:[#allocation2 + $0x5d4] sm:$0xf]  ;;  %v9743_v56 = vld [vmem:[#allocation2 + $0x558] sm:$0xf0] }
 0x7ec   : > { %8245 = vmatpush.bf16.msrb.mxu3 %v9066_v0  ;;  %v9826_v0 = vor.u32 %v11678_v55, %v9823_v23  ;;  %v11902_v55 = vld [vmem:[#allocation2 + $0xcf4] sm:$0xf]  ;;  %v10719_v23 = vld [vmem:[#allocation2 + $0xcf8] sm:$0xf0] }
 0x7ed   : > { %8514 = vmatpush.bf16.msra.mxu0 %v10442_v38  ;;  %v9362_v38 = vor.u32 %v11562_v10, %v9359_v27  ;;  %8322 = vmatpush.bf16.msra.mxu1 %v9458_v30  ;;  %v10407_v10 = vld [vmem:[#allocation2 + $0xa88] sm:$0xf0]  ;;  %v11558_v27 = vld [vmem:[#allocation2 + $0x234] sm:$0xf]  ;;  %v8053_v44 = vadd.f32 %v15492_v41, %v8040_v33  ;;  %v11660_v30 = vld [vmem:[#allocation2 + $0x564] sm:$0xf] }
 0x7ee   : > { %v9346_v31 = vor.u32 %v11558_v27, %v9343_v51  ;;  %v11554_v33 = vld [vmem:[#allocation2 + $0x214] sm:$0xf]  ;;  %v10703_v51 = vld [vmem:[#allocation2 + $0xcd8] sm:$0xf0] }
 0x7ef   : > { %8246 = vmatmul.bf16.vlgmr.msrb.gmra.mxu3 %v15264_v7  ;;  %v9450_v7 = vor.u32 %v11584_v8, %v9447_v60  ;;  %8336 = vmatpush.bf16.msra.mxu2 %v9514_v47  ;;  %v9754_v47 = vor.u32 %v11660_v30, %v9751_v20  ;;  %v15512_v63 = vadd.f32 %v15498_v14, %v8053_v44  ;;  %v11658_v60 = vld [vmem:[#allocation2 + $0x554] sm:$0xf]  ;;  %v10711_v14 = vld [vmem:[#allocation2 + $0xce8] sm:$0xf0]  ;;  %v9791_v30 = vld [vmem:[#allocation2 + $0x5b8] sm:$0xf0] }
 0x7f0   : > { %8290 = vmatpush.bf16.msra.mxu3 %v9378_v17  ;;  %v9351_v17 = vld [vmem:[#allocation2 + $0x248] sm:$0xf0]  ;;  %v10722_v8 = vor.u32 %v11902_v55, %v10719_v23  ;;  %v9746_v4 = vor.u32 %v11658_v60, %v9743_v56  ;;  %v11898_v27 = vld [vmem:[#allocation2 + $0xcd4] sm:$0xf]  ;;  %v11552_v20 = vld [vmem:[#allocation2 + $0x204] sm:$0xf] }
 0x7f1   : > { %8515 = vmatpush.bf16.msra.mxu0 %v10434_v39  ;;  %v11824_v39 = vld [vmem:[#allocation2 + $0xa84] sm:$0xf]  ;;  %v9354_v1 = vor.u32 %v11560_v43, %v9351_v17  ;;  %8323 = vmatpush.bf16.msra.mxu1 %v9450_v7  ;;  %v15514_v17 = vpop.f32.mrf.mxu2  ;;  %v9319_v23 = vld [vmem:[#allocation2 + $0x208] sm:$0xf0] }
 0x7f2   : > { %8337 = vmatmul.bf16.vlgmr.msra.gmra.mxu2 %v15299_v28  ;;  %v10410_v41 = vor.u32 %v11824_v39, %v10407_v10  ;;  %v9335_v28 = vld [vmem:[#allocation2 + $0x228] sm:$0xf0]  ;;  %v11672_v7 = vld [vmem:[#allocation2 + $0x5c4] sm:$0xf]  ;;  %v9327_v39 = vld [vmem:[#allocation2 + $0x218] sm:$0xf0]  ;;  %v8106_v10 = vpop.f32.mrf.mxu1  ;;  %v9322_v56 = vor.u32 %v11552_v20, %v9319_v23 }
 0x7f3   : > { %8381 = vmatpush.bf16.msrb.mxu2 %v9826_v0  ;;  %v9807_v0 = vld [vmem:[#allocation2 + $0x5d8] sm:$0xf0]  ;;  %v9330_v55 = vor.u32 %v11554_v33, %v9327_v39  ;;  %v9783_v60 = vld [vmem:[#allocation2 + $0x5a8] sm:$0xf0]  ;;  %v11628_v33 = vld [vmem:[#allocation2 + $0x464] sm:$0xf] }
 0x7f4   : > { %8291 = vmatpush.bf16.msra.mxu3 %v9370_v61  ;;  %v9818_v61 = vor.u32 %v11676_v26, %v9815_v36  ;;  %v9810_v43 = vor.u32 %v11674_v52, %v9807_v0  ;;  %8324 = vmatmul.bf16.vlgmr.msra.gmra.mxu1 %v15303_v32  ;;  %v9799_v26 = vld [vmem:[#allocation2 + $0x5c8] sm:$0xf0]  ;;  %v11670_v32 = vld [vmem:[#allocation2 + $0x5b4] sm:$0xf] }
 0x7f5   : > { %8516 = vmatpush.bf16.msra.mxu0 %v10426_v50  ;;  %8368 = vmatpush.bf16.msrb.mxu1 %v9762_v35  ;;  %v11556_v50 = vld [vmem:[#allocation2 + $0x224] sm:$0xf]  ;;  %v9802_v35 = vor.u32 %v11672_v7, %v9799_v26  ;;  %v9794_v52 = vor.u32 %v11670_v32, %v9791_v30  ;;  %v10695_v0 = vld [vmem:[#allocation2 + $0xcc8] sm:$0xf0]  ;;  %v11894_v7 = vld [vmem:[#allocation2 + $0xcb4] sm:$0xf] }
 0x7f6   : > { %v9338_v36 = vor.u32 %v11556_v50, %v9335_v28  ;;  %v11668_v50 = vld [vmem:[#allocation2 + $0x5a4] sm:$0xf]  ;;  %v11630_v28 = vld [vmem:[#allocation2 + $0x474] sm:$0xf]  ;;  %v9623_v39 = vld [vmem:[#allocation2 + $0x468] sm:$0xf0] }
 0x7f7   : > { %8382 = vmatpush.bf16.msrb.mxu2 %v9818_v61  ;;  %v10714_v61 = vor.u32 %v11900_v48, %v10711_v14  ;;  %v10687_v48 = vld [vmem:[#allocation2 + $0xcb8] sm:$0xf0]  ;;  %v11652_v26 = vld [vmem:[#allocation2 + $0x524] sm:$0xf]  ;;  %v10679_v10 = vld [vmem:[#allocation2 + $0xca8] sm:$0xf0]  ;;  %v9626_v30 = vor.u32 %v11628_v33, %v9623_v39 }
 0x7f8   : > { %8292 = vmatpush.bf16.msra.mxu3 %v9362_v38  ;;  %v8028_v38 = vpop.f32.mrf.mxu3  ;;  %v11892_v32 = vld [vmem:[#allocation2 + $0xca4] sm:$0xf]  ;;  %v11650_v20 = vld [vmem:[#allocation2 + $0x514] sm:$0xf]  ;;  %v10071_v33 = vld [vmem:[#allocation2 + $0x7e8] sm:$0xf0] }
 0x7f9   : > { %8517 = vmatpush.bf16.msra.mxu0 %v10418_v16  ;;  %8369 = vmatpush.bf16.msrb.mxu1 %v9754_v47  ;;  %v11656_v16 = vld [vmem:[#allocation2 + $0x544] sm:$0xf]  ;;  %v8119_v2 = vpop.f32.mrf.mxu2  ;;  %v9631_v38 = vld [vmem:[#allocation2 + $0x478] sm:$0xf0] }
 0x7fa   : > { %v11896_v47 = vld [vmem:[#allocation2 + $0xcc4] sm:$0xf]  ;;  %v10079_v2 = vld [vmem:[#allocation2 + $0x7f8] sm:$0xf0] }
 0x7fb   : > { %8383 = vmatpush.bf16.msrb.mxu2 %v9810_v43  ;;  %v10706_v43 = vor.u32 %v11898_v27, %v10703_v51  ;;  %v10698_v14 = vor.u32 %v11896_v47, %v10695_v0  ;;  %v11626_v27 = vld [vmem:[#allocation2 + $0x454] sm:$0xf]  ;;  %v9615_v51 = vld [vmem:[#allocation2 + $0x458] sm:$0xf0]  ;;  %v9767_v47 = vld [vmem:[#allocation2 + $0x588] sm:$0xf0] }
 0x7fc   : > { %8293 = vmatpush.bf16.msra.mxu3 %v9354_v1  ;;  %v9735_v1 = vld [vmem:[#allocation2 + $0x548] sm:$0xf0]  ;;  %v11742_v0 = vld [vmem:[#allocation2 + $0x7f4] sm:$0xf] }
 0x7fd   : > { %8518 = vmatpush.bf16.msra.mxu0 %v10410_v41  ;;  %8370 = vmatpush.bf16.msrb.mxu1 %v9746_v4  ;;  %v9738_v44 = vor.u32 %v11656_v16, %v9735_v1  ;;  %v11654_v41 = vld [vmem:[#allocation2 + $0x534] sm:$0xf]  ;;  %v9634_v4 = vor.u32 %v11630_v28, %v9631_v38  ;;  %v9775_v16 = vld [vmem:[#allocation2 + $0x598] sm:$0xf0]  ;;  %v11624_v28 = vld [vmem:[#allocation2 + $0x444] sm:$0xf]  ;;  %v10082_v38 = vor.u32 %v11742_v0, %v10079_v2 }
 0x7ff   : > { %8384 = vmatpush.bf16.msrb.mxu2 %v9802_v35  ;;  %v9719_v35 = vld [vmem:[#allocation2 + $0x528] sm:$0xf0] }
 0x800   : > { %8294 = vmatpush.bf16.msra.mxu3 %v9346_v31  ;;  %8519 = vmatmul.bf16.vlgmr.msra.gmra.mxu0 %v15310_v15  ;;  %v9727_v31 = vld [vmem:[#allocation2 + $0x538] sm:$0xf0]  ;;  %v9786_v15 = vor.u32 %v11668_v50, %v9783_v60  ;;  %v10682_v60 = vor.u32 %v11892_v32, %v10679_v10  ;;  %v10663_v10 = vld [vmem:[#allocation2 + $0xc88] sm:$0xf0] }
 0x801   : > { %8563 = vmatpush.bf16.msrb.mxu0 %v10722_v8  ;;  %8371 = vmatpush.bf16.msrb.mxu1 %v9738_v44  ;;  %v9730_v8 = vor.u32 %v11654_v41, %v9727_v31  ;;  %v10690_v44 = vor.u32 %v11894_v7, %v10687_v48  ;;  %v15519_v41 = vpop.f32.mrf.mxu0  ;;  %v11890_v31 = vld [vmem:[#allocation2 + $0xc94] sm:$0xf]  ;;  %v10671_v50 = vld [vmem:[#allocation2 + $0xc98] sm:$0xf0]  ;;  %v11648_v7 = vld [vmem:[#allocation2 + $0x504] sm:$0xf] }
 0x802   : > { %v9703_v48 = vld [vmem:[#allocation2 + $0x508] sm:$0xf0] }
 0x803   : > { %8385 = vmatpush.bf16.msrb.mxu2 %v9794_v52  ;;  %v9711_v52 = vld [vmem:[#allocation2 + $0x518] sm:$0xf0] }
 0x804   : > { %8295 = vmatpush.bf16.msra.mxu3 %v9338_v36  ;;  %v11666_v36 = vld [vmem:[#allocation2 + $0x594] sm:$0xf]  ;;  %v9714_v23 = vor.u32 %v11650_v20, %v9711_v52  ;;  %v10007_v20 = vld [vmem:[#allocation2 + $0x768] sm:$0xf0] }
 0x805   : > { %8564 = vmatpush.bf16.msrb.mxu0 %v10714_v61  ;;  %8372 = vmatpush.bf16.msrb.mxu1 %v9730_v8  ;;  %v9722_v61 = vor.u32 %v11652_v26, %v9719_v35  ;;  %v9778_v1 = vor.u32 %v11666_v36, %v9775_v16  ;;  %v8078_v8 = vpop.f32.mrf.mxu3  ;;  %v10015_v26 = vld [vmem:[#allocation2 + $0x778] sm:$0xf0]  ;;  %v11740_v35 = vld [vmem:[#allocation2 + $0x7e4] sm:$0xf]  ;;  %v11966_v52 = vld [vmem:[#allocation2 + $0xef4] sm:$0xf] }
 0x806   : > { %v10074_v16 = vor.u32 %v11740_v35, %v10071_v33  ;;  %v9583_v35 = vld [vmem:[#allocation2 + $0x418] sm:$0xf0]  ;;  %v11720_v33 = vld [vmem:[#allocation2 + $0x744] sm:$0xf] }
 0x807   : > { %8386 = vmatpush.bf16.msrb.mxu2 %v9786_v15  ;;  %v9618_v15 = vor.u32 %v11626_v27, %v9615_v51  ;;  %v11622_v27 = vld [vmem:[#allocation2 + $0x434] sm:$0xf] }
 0x808   : > { %8296 = vmatpush.bf16.msra.mxu3 %v9330_v55  ;;  %v11664_v55 = vld [vmem:[#allocation2 + $0x584] sm:$0xf] }
 0x809   : > { %8565 = vmatpush.bf16.msrb.mxu0 %v10706_v43  ;;  %8373 = vmatpush.bf16.msrb.mxu1 %v9722_v61  ;;  %v9770_v43 = vor.u32 %v11664_v55, %v9767_v47  ;;  %v11888_v61 = vld [vmem:[#allocation2 + $0xc84] sm:$0xf]  ;;  %v10975_v55 = vld [vmem:[#allocation2 + $0xef8] sm:$0xf0]  ;;  %v8145_v0 = vpop.f32.mrf.mxu0 }
 0x80a   : > { %v10063_v47 = vld [vmem:[#allocation2 + $0x7d8] sm:$0xf0]  ;;  %v11732_v0 = vld [vmem:[#allocation2 + $0x7a4] sm:$0xf] }
 0x80b   : > { %8387 = vmatpush.bf16.msrb.mxu2 %v9778_v1  ;;  %v10674_v1 = vor.u32 %v11890_v31, %v10671_v50  ;;  %v9591_v50 = vld [vmem:[#allocation2 + $0x428] sm:$0xf0] }
 0x80c   : > { %8297 = vmatpush.bf16.msra.mxu3 %v9322_v56  ;;  %v9607_v56 = vld [vmem:[#allocation2 + $0x448] sm:$0xf0] }
 0x80d   : > { %8566 = vmatpush.bf16.msrb.mxu0 %v10698_v14  ;;  %v8079_v14 = vadd.f32 %v8078_v8, %v15512_v63  ;;  %8374 = vmatpush.bf16.msrb.mxu1 %v9714_v23  ;;  %v9610_v32 = vor.u32 %v11624_v28, %v9607_v56  ;;  %v9599_v63 = vld [vmem:[#allocation2 + $0x438] sm:$0xf0]  ;;  %v8080_v28 = vpop.f32.mrf.mxu3  ;;  %v10978_v8 = vor.u32 %v11966_v52, %v10975_v55  ;;  %v11736_v56 = vld [vmem:[#allocation2 + $0x7c4] sm:$0xf] }
 0x80e   : > { %v9602_v31 = vor.u32 %v11622_v27, %v9599_v63  ;;  %v11616_v27 = vld [vmem:[#allocation2 + $0x404] sm:$0xf]  ;;  %v11958_v28 = vld [vmem:[#allocation2 + $0xeb4] sm:$0xf] }
 0x80f   : > { %8298 = vmatmul.bf16.vlgmr.msra.gmra.mxu3 %v15308_v13  ;;  %v9706_v13 = vor.u32 %v11648_v7, %v9703_v48  ;;  %8388 = vmatpush.bf16.msrb.mxu2 %v9770_v43  ;;  %v8092_v39 = vadd.f32 %v15503_v34, %v8079_v14  ;;  %v11738_v34 = vld [vmem:[#allocation2 + $0x7d4] sm:$0xf]  ;;  %v11964_v7 = vld [vmem:[#allocation2 + $0xee4] sm:$0xf]  ;;  %v10055_v14 = vld [vmem:[#allocation2 + $0x7c8] sm:$0xf0] }
 0x810   : > { %8342 = vmatpush.bf16.msrb.mxu3 %v9634_v4  ;;  %v11726_v4 = vld [vmem:[#allocation2 + $0x774] sm:$0xf]  ;;  %v10066_v43 = vor.u32 %v11738_v34, %v10063_v47  ;;  %v10951_v34 = vld [vmem:[#allocation2 + $0xec8] sm:$0xf0]  ;;  %v9983_v47 = vld [vmem:[#allocation2 + $0x738] sm:$0xf0] }
 0x811   : > { %8567 = vmatpush.bf16.msrb.mxu0 %v10690_v44  ;;  %v10018_v36 = vor.u32 %v11726_v4, %v10015_v26  ;;  %v8105_v51 = vadd.f32 %v15508_v59, %v8092_v39  ;;  %v15524_v44 = vpop.f32.mrf.mxu1  ;;  %8375 = vmatpush.bf16.msrb.mxu1 %v9706_v13  ;;  %v10666_v59 = vor.u32 %v11888_v61, %v10663_v10  ;;  %v11618_v26 = vld [vmem:[#allocation2 + $0x414] sm:$0xf]  ;;  %v9991_v39 = vld [vmem:[#allocation2 + $0x748] sm:$0xf0]  ;;  %v10047_v10 = vld [vmem:[#allocation2 + $0x7b8] sm:$0xf0] }
 0x812   : > { %8389 = vmatmul.bf16.vlgmr.msrb.gmra.mxu2 %v15315_v11  ;;  %v11620_v11 = vld [vmem:[#allocation2 + $0x424] sm:$0xf]  ;;  %v10058_v13 = vor.u32 %v11736_v56, %v10055_v14  ;;  %v9879_v14 = vld [vmem:[#allocation2 + $0x668] sm:$0xf0] }
 0x813   : > { %8433 = vmatpush.bf16.msra.mxu2 %v10082_v38  ;;  %v15528_v2 = vadd.f32 %v15514_v17, %v8105_v51  ;;  %v15530_v38 = vpop.f32.mrf.mxu2  ;;  %v10967_v17 = vld [vmem:[#allocation2 + $0xee8] sm:$0xf0]  ;;  %v9594_v4 = vor.u32 %v11620_v11, %v9591_v50  ;;  %v9586_v51 = vor.u32 %v11618_v26, %v9583_v35  ;;  %v11716_v56 = vld [vmem:[#allocation2 + $0x724] sm:$0xf] }
 0x814   : > { %8343 = vmatpush.bf16.msrb.mxu3 %v9626_v30  ;;  %v11724_v30 = vld [vmem:[#allocation2 + $0x764] sm:$0xf]  ;;  %8376 = vmatmul.bf16.vlgmr.msrb.gmra.mxu1 %v15318_v54  ;;  %v11734_v54 = vld [vmem:[#allocation2 + $0x7b4] sm:$0xf]  ;;  %v10039_v11 = vld [vmem:[#allocation2 + $0x7a8] sm:$0xf0] }
 0x815   : > { %8568 = vmatpush.bf16.msrb.mxu0 %v10682_v60  ;;  %8420 = vmatpush.bf16.msra.mxu1 %v10018_v36  ;;  %v10010_v23 = vor.u32 %v11724_v30, %v10007_v20  ;;  %v11722_v60 = vld [vmem:[#allocation2 + $0x754] sm:$0xf]  ;;  %v10970_v36 = vor.u32 %v11964_v7, %v10967_v17  ;;  %v10050_v63 = vor.u32 %v11734_v54, %v10047_v10  ;;  %v9575_v30 = vld [vmem:[#allocation2 + $0x408] sm:$0xf0]  ;;  %v11960_v20 = vld [vmem:[#allocation2 + $0xec4] sm:$0xf] }
 0x816   : > { %v9578_v50 = vor.u32 %v11616_v27, %v9575_v30  ;;  %v9975_v7 = vld [vmem:[#allocation2 + $0x728] sm:$0xf0]  ;;  %v11730_v17 = vld [vmem:[#allocation2 + $0x794] sm:$0xf]  ;;  %v11956_v35 = vld [vmem:[#allocation2 + $0xea4] sm:$0xf] }
 0x817   : > { %8434 = vmatpush.bf16.msra.mxu2 %v10074_v16  ;;  %v11962_v16 = vld [vmem:[#allocation2 + $0xed4] sm:$0xf]  ;;  %v10023_v27 = vld [vmem:[#allocation2 + $0x788] sm:$0xf0] }
 0x818   : > { %8344 = vmatpush.bf16.msrb.mxu3 %v9618_v15  ;;  %v9999_v15 = vld [vmem:[#allocation2 + $0x758] sm:$0xf0] }
 0x819   : > { %8569 = vmatpush.bf16.msrb.mxu0 %v10674_v1  ;;  %8421 = vmatpush.bf16.msra.mxu1 %v10010_v23  ;;  %v10002_v48 = vor.u32 %v11722_v60, %v9999_v15  ;;  %v8158_v61 = vpop.f32.mrf.mxu1  ;;  %v10959_v1 = vld [vmem:[#allocation2 + $0xed8] sm:$0xf0]  ;;  %v11718_v23 = vld [vmem:[#allocation2 + $0x734] sm:$0xf]  ;;  %v10954_v60 = vor.u32 %v11960_v20, %v10951_v34  ;;  %v15535_v20 = vpop.f32.mrf.mxu0 }
 0x81a   : > { %v10962_v55 = vor.u32 %v11962_v16, %v10959_v1  ;;  %v11714_v16 = vld [vmem:[#allocation2 + $0x714] sm:$0xf]  ;;  %v9967_v1 = vld [vmem:[#allocation2 + $0x718] sm:$0xf0] }
 0x81b   : > { %8435 = vmatpush.bf16.msra.mxu2 %v10066_v43  ;;  %v8171_v52 = vpop.f32.mrf.mxu2  ;;  %v11694_v43 = vld [vmem:[#allocation2 + $0x674] sm:$0xf]  ;;  %v9970_v10 = vor.u32 %v11714_v16, %v9967_v1  ;;  %v10319_v16 = vld [vmem:[#allocation2 + $0x9d8] sm:$0xf0] }
 0x81c   : > { %8345 = vmatpush.bf16.msrb.mxu3 %v9610_v32  ;;  %v9994_v32 = vor.u32 %v11720_v33, %v9991_v39  ;;  %v11690_v33 = vld [vmem:[#allocation2 + $0x654] sm:$0xf]  ;;  %v9871_v39 = vld [vmem:[#allocation2 + $0x658] sm:$0xf0] }
 0x81d   : > { %8570 = vmatpush.bf16.msrb.mxu0 %v10666_v59  ;;  %8422 = vmatpush.bf16.msra.mxu1 %v10002_v48  ;;  %v9887_v59 = vld [vmem:[#allocation2 + $0x678] sm:$0xf0]  ;;  %v11692_v48 = vld [vmem:[#allocation2 + $0x664] sm:$0xf]  ;;  %v11954_v34 = vld [vmem:[#allocation2 + $0xe94] sm:$0xf] }
 0x81e   : > { %v9890_v15 = vor.u32 %v11694_v43, %v9887_v59  ;;  %v9882_v61 = vor.u32 %v11692_v48, %v9879_v14  ;;  %v10927_v52 = vld [vmem:[#allocation2 + $0xe98] sm:$0xf0]  ;;  %v9874_v43 = vor.u32 %v11690_v33, %v9871_v39  ;;  %v9863_v59 = vld [vmem:[#allocation2 + $0x648] sm:$0xf0]  ;;  %v12030_v39 = vld [vmem:[#allocation2 + $0x10f4] sm:$0xf] }
 0x81f   : > { %8436 = vmatpush.bf16.msra.mxu2 %v10058_v13  ;;  %v9978_v13 = vor.u32 %v11716_v56, %v9975_v7  ;;  %v11952_v7 = vld [vmem:[#allocation2 + $0xe84] sm:$0xf]  ;;  %v10930_v48 = vor.u32 %v11954_v34, %v10927_v52  ;;  %v10263_v33 = vld [vmem:[#allocation2 + $0x968] sm:$0xf0]  ;;  %v11786_v52 = vld [vmem:[#allocation2 + $0x954] sm:$0xf] }
 0x820   : > { %8346 = vmatpush.bf16.msrb.mxu3 %v9602_v31  ;;  %8571 = vmatmul.bf16.vlgmr.msrb.gmra.mxu0 %v15330_v22  ;;  %v9986_v31 = vor.u32 %v11718_v23, %v9983_v47  ;;  %v10042_v22 = vor.u32 %v11732_v0, %v10039_v11  ;;  %v9959_v11 = vld [vmem:[#allocation2 + $0x708] sm:$0xf0] }
 0x821   : > { %8615 = vmatpush.bf16.msra.mxu0 %v10978_v8  ;;  %8423 = vmatpush.bf16.msra.mxu1 %v9994_v32  ;;  %v10943_v8 = vld [vmem:[#allocation2 + $0xeb8] sm:$0xf0]  ;;  %v11728_v32 = vld [vmem:[#allocation2 + $0x784] sm:$0xf]  ;;  %v8197_v1 = vpop.f32.mrf.mxu0 }
 0x822   : > { %v10946_v54 = vor.u32 %v11958_v28, %v10943_v8  ;;  %v10026_v30 = vor.u32 %v11728_v32, %v10023_v27  ;;  %v8130_v47 = vpop.f32.mrf.mxu3  ;;  %v10271_v28 = vld [vmem:[#allocation2 + $0x978] sm:$0xf0]  ;;  %v11804_v8 = vld [vmem:[#allocation2 + $0x9e4] sm:$0xf]  ;;  %v10295_v1 = vld [vmem:[#allocation2 + $0x9a8] sm:$0xf0] }
 0x823   : > { %8437 = vmatpush.bf16.msra.mxu2 %v10050_v63  ;;  %v11806_v63 = vld [vmem:[#allocation2 + $0x9f4] sm:$0xf] }
 0x824   : > { %8347 = vmatpush.bf16.msrb.mxu3 %v9594_v4  ;;  %v10031_v4 = vld [vmem:[#allocation2 + $0x798] sm:$0xf0] }
 0x825   : > { %8616 = vmatpush.bf16.msra.mxu0 %v10970_v36  ;;  %8424 = vmatpush.bf16.msra.mxu1 %v9986_v31  ;;  %v10034_v26 = vor.u32 %v11730_v17, %v10031_v4  ;;  %v10935_v36 = vld [vmem:[#allocation2 + $0xea8] sm:$0xf0]  ;;  %v11712_v31 = vld [vmem:[#allocation2 + $0x704] sm:$0xf]  ;;  %v11686_v4 = vld [vmem:[#allocation2 + $0x634] sm:$0xf] }
 0x826   : > { %v10938_v0 = vor.u32 %v11956_v35, %v10935_v36  ;;  %v15540_v35 = vpop.f32.mrf.mxu1  ;;  %v11788_v36 = vld [vmem:[#allocation2 + $0x964] sm:$0xf] }
 0x827   : > { %8438 = vmatpush.bf16.msra.mxu2 %v10042_v22  ;;  %v8131_v22 = vadd.f32 %v8130_v47, %v15528_v2  ;;  %v9855_v2 = vld [vmem:[#allocation2 + $0x638] sm:$0xf0]  ;;  %v12028_v47 = vld [vmem:[#allocation2 + $0x10e4] sm:$0xf] }
 0x828   : > { %8348 = vmatpush.bf16.msrb.mxu3 %v9586_v51  ;;  %v10335_v51 = vld [vmem:[#allocation2 + $0x9f8] sm:$0xf0]  ;;  %v9858_v27 = vor.u32 %v11686_v4, %v9855_v2  ;;  %v12024_v4 = vld [vmem:[#allocation2 + $0x10c4] sm:$0xf]  ;;  %v11207_v2 = vld [vmem:[#allocation2 + $0x10c8] sm:$0xf0] }
 0x829   : > { %8617 = vmatpush.bf16.msra.mxu0 %v10962_v55  ;;  %8425 = vmatpush.bf16.msra.mxu1 %v9978_v13  ;;  %v11688_v55 = vld [vmem:[#allocation2 + $0x644] sm:$0xf]  ;;  %v10338_v23 = vor.u32 %v11806_v63, %v10335_v51  ;;  %v8144_v56 = vadd.f32 %v15519_v41, %v8131_v22  ;;  %v10919_v13 = vld [vmem:[#allocation2 + $0xe88] sm:$0xf0]  ;;  %v11802_v41 = vld [vmem:[#allocation2 + $0x9d4] sm:$0xf] }
 0x82a   : > { %v9866_v14 = vor.u32 %v11688_v55, %v9863_v59  ;;  %v9847_v63 = vld [vmem:[#allocation2 + $0x628] sm:$0xf0]  ;;  %v8132_v51 = vpop.f32.mrf.mxu3  ;;  %v10255_v55 = vld [vmem:[#allocation2 + $0x958] sm:$0xf0] }
 0x82b   : > { %8439 = vmatpush.bf16.msra.mxu2 %v10034_v26  ;;  %v8157_v26 = vadd.f32 %v15524_v44, %v8144_v56  ;;  %v10922_v44 = vor.u32 %v11952_v7, %v10919_v13  ;;  %v9839_v22 = vld [vmem:[#allocation2 + $0x618] sm:$0xf0]  ;;  %v9831_v13 = vld [vmem:[#allocation2 + $0x608] sm:$0xf0]  ;;  %v11780_v51 = vld [vmem:[#allocation2 + $0x924] sm:$0xf] }
 0x82c   : > { %8349 = vmatpush.bf16.msrb.mxu3 %v9578_v50  ;;  %v11790_v50 = vld [vmem:[#allocation2 + $0x974] sm:$0xf]  ;;  %v10303_v7 = vld [vmem:[#allocation2 + $0x9b8] sm:$0xf0] }
 0x82d   : > { %8618 = vmatpush.bf16.msra.mxu0 %v10954_v60  ;;  %8426 = vmatpush.bf16.msra.mxu1 %v9970_v10  ;;  %v10274_v60 = vor.u32 %v11790_v50, %v10271_v28  ;;  %v15544_v32 = vadd.f32 %v15530_v38, %v8157_v26  ;;  %v10322_v10 = vor.u32 %v11802_v41, %v10319_v16  ;;  %v11223_v38 = vld [vmem:[#allocation2 + $0x10e8] sm:$0xf0]  ;;  %v11784_v50 = vld [vmem:[#allocation2 + $0x944] sm:$0xf]  ;;  %v10239_v41 = vld [vmem:[#allocation2 + $0x938] sm:$0xf0] }
 0x82e   : > { %v10247_v28 = vld [vmem:[#allocation2 + $0x948] sm:$0xf0] }
 0x82f   : > { %8350 = vmatmul.bf16.vlgmr.msrb.gmra.mxu3 %v15328_v5  ;;  %v9962_v5 = vor.u32 %v11712_v31, %v9959_v11  ;;  %8440 = vmatpush.bf16.msra.mxu2 %v10026_v30  ;;  %v15546_v30 = vpop.f32.mrf.mxu2  ;;  %v11682_v11 = vld [vmem:[#allocation2 + $0x614] sm:$0xf]  ;;  %v10250_v56 = vor.u32 %v11784_v50, %v10247_v28 }
 0x830   : > { %8394 = vmatpush.bf16.msra.mxu3 %v9890_v15  ;;  %v10327_v15 = vld [vmem:[#allocation2 + $0x9e8] sm:$0xf0]  ;;  %v11778_v28 = vld [vmem:[#allocation2 + $0x914] sm:$0xf] }
 0x831   : > { %8619 = vmatpush.bf16.msra.mxu0 %v10946_v54  ;;  %v10330_v17 = vor.u32 %v11804_v8, %v10327_v15  ;;  %8427 = vmatpush.bf16.msra.mxu1 %v9962_v5  ;;  %v11231_v54 = vld [vmem:[#allocation2 + $0x10f8] sm:$0xf0]  ;;  %v11226_v5 = vor.u32 %v12028_v47, %v11223_v38  ;;  %v8210_v8 = vpop.f32.mrf.mxu1  ;;  %v15550_v47 = vpop.f32.mrf.mxu0 }
 0x832   : > { %8441 = vmatmul.bf16.vlgmr.msra.gmra.mxu2 %v15338_v6  ;;  %v11684_v6 = vld [vmem:[#allocation2 + $0x624] sm:$0xf]  ;;  %v11234_v34 = vor.u32 %v12030_v39, %v11231_v54  ;;  %v11215_v15 = vld [vmem:[#allocation2 + $0x10d8] sm:$0xf0]  ;;  %v11758_v54 = vld [vmem:[#allocation2 + $0x874] sm:$0xf] }
 0x833   : > { %8485 = vmatpush.bf16.msrb.mxu2 %v10338_v23  ;;  %v11800_v23 = vld [vmem:[#allocation2 + $0x9c4] sm:$0xf]  ;;  %v9850_v31 = vor.u32 %v11684_v6, %v9847_v63  ;;  %v11210_v6 = vor.u32 %v12024_v4, %v11207_v2 }
 0x834   : > { %8395 = vmatpush.bf16.msra.mxu3 %v9882_v61  ;;  %v10266_v61 = vor.u32 %v11788_v36, %v10263_v33  ;;  %8428 = vmatmul.bf16.vlgmr.msra.gmra.mxu1 %v15343_v29  ;;  %v11798_v29 = vld [vmem:[#allocation2 + $0x9b4] sm:$0xf]  ;;  %v11796_v39 = vld [vmem:[#allocation2 + $0x9a4] sm:$0xf] }
 0x835   : > { %8620 = vmatpush.bf16.msra.mxu0 %v10938_v0  ;;  %8472 = vmatpush.bf16.msrb.mxu1 %v10274_v60  ;;  %v10258_v0 = vor.u32 %v11786_v52, %v10255_v55  ;;  %v12026_v60 = vld [vmem:[#allocation2 + $0x10d4] sm:$0xf]  ;;  %v11756_v55 = vld [vmem:[#allocation2 + $0x864] sm:$0xf] }
 0x836   : > { %v11218_v36 = vor.u32 %v12026_v60, %v11215_v15  ;;  %v11782_v33 = vld [vmem:[#allocation2 + $0x934] sm:$0xf]  ;;  %v11792_v8 = vld [vmem:[#allocation2 + $0x984] sm:$0xf]  ;;  %v10279_v15 = vld [vmem:[#allocation2 + $0x988] sm:$0xf0] }
 0x837   : > { %8486 = vmatpush.bf16.msrb.mxu2 %v10330_v17  ;;  %v11680_v17 = vld [vmem:[#allocation2 + $0x604] sm:$0xf]  ;;  %v8223_v26 = vpop.f32.mrf.mxu2  ;;  %v10242_v16 = vor.u32 %v11782_v33, %v10239_v41  ;;  %v11794_v52 = vld [vmem:[#allocation2 + $0x994] sm:$0xf]  ;;  %v10119_v33 = vld [vmem:[#allocation2 + $0x848] sm:$0xf0] }
 0x838   : > { %8396 = vmatpush.bf16.msra.mxu3 %v9874_v43  ;;  %v10311_v43 = vld [vmem:[#allocation2 + $0x9c8] sm:$0xf0]  ;;  %v11776_v41 = vld [vmem:[#allocation2 + $0x904] sm:$0xf] }
 0x839   : > { %8621 = vmatpush.bf16.msra.mxu0 %v10930_v48  ;;  %8473 = vmatpush.bf16.msrb.mxu1 %v10266_v61  ;;  %v10314_v59 = vor.u32 %v11800_v23, %v10311_v43  ;;  %v10306_v48 = vor.u32 %v11798_v29, %v10303_v7  ;;  %v10143_v61 = vld [vmem:[#allocation2 + $0x878] sm:$0xf0]  ;;  %v10135_v23 = vld [vmem:[#allocation2 + $0x868] sm:$0xf0] }
 0x83a   : > { %v10146_v63 = vor.u32 %v11758_v54, %v10143_v61  ;;  %v10138_v50 = vor.u32 %v11756_v55, %v10135_v23  ;;  %v10223_v29 = vld [vmem:[#allocation2 + $0x918] sm:$0xf0]  ;;  %v8262_v54 = vpop.f32.mrf.mxu0  ;;  %v11852_v55 = vld [vmem:[#allocation2 + $0xb64] sm:$0xf]  ;;  %v10519_v23 = vld [vmem:[#allocation2 + $0xb68] sm:$0xf0] }
 0x83b   : > { %8487 = vmatpush.bf16.msrb.mxu2 %v10322_v10  ;;  %v9834_v10 = vor.u32 %v11680_v17, %v9831_v13  ;;  %v10226_v60 = vor.u32 %v11778_v28, %v10223_v29  ;;  %v10591_v7 = vld [vmem:[#allocation2 + $0xbf8] sm:$0xf0]  ;;  %v10282_v17 = vor.u32 %v11792_v8, %v10279_v15  ;;  %v11752_v13 = vld [vmem:[#allocation2 + $0x844] sm:$0xf]  ;;  %v11850_v29 = vld [vmem:[#allocation2 + $0xb54] sm:$0xf] }
 0x83c   : > { %8397 = vmatpush.bf16.msra.mxu3 %v9866_v14  ;;  %v9842_v14 = vor.u32 %v11682_v11, %v9839_v22  ;;  %v11754_v11 = vld [vmem:[#allocation2 + $0x854] sm:$0xf]  ;;  %v10127_v22 = vld [vmem:[#allocation2 + $0x858] sm:$0xf0] }
 0x83d   : > { %8622 = vmatpush.bf16.msra.mxu0 %v10922_v44  ;;  %8474 = vmatpush.bf16.msrb.mxu1 %v10258_v0  ;;  %v12022_v44 = vld [vmem:[#allocation2 + $0x10b4] sm:$0xf]  ;;  %v10287_v0 = vld [vmem:[#allocation2 + $0x998] sm:$0xf0] }
 0x83e   : > { %v10290_v43 = vor.u32 %v11794_v52, %v10287_v0  ;;  %v10111_v52 = vld [vmem:[#allocation2 + $0x838] sm:$0xf0]  ;;  %v10522_v0 = vor.u32 %v11852_v55, %v10519_v23  ;;  %v11844_v23 = vld [vmem:[#allocation2 + $0xb24] sm:$0xf] }
 0x83f   : > { %8488 = vmatpush.bf16.msrb.mxu2 %v10314_v59  ;;  %v12020_v59 = vld [vmem:[#allocation2 + $0x10a4] sm:$0xf]  ;;  %v10511_v8 = vld [vmem:[#allocation2 + $0xb58] sm:$0xf0] }
 0x840   : > { %8398 = vmatpush.bf16.msra.mxu3 %v9858_v27  ;;  %8623 = vmatmul.bf16.vlgmr.msra.gmra.mxu0 %v15354_v46  ;;  %v10298_v46 = vor.u32 %v11796_v39, %v10295_v1  ;;  %v11199_v27 = vld [vmem:[#allocation2 + $0x10b8] sm:$0xf0]  ;;  %v10215_v39 = vld [vmem:[#allocation2 + $0x908] sm:$0xf0]  ;;  %v11868_v1 = vld [vmem:[#allocation2 + $0xbe4] sm:$0xf]  ;;  %v10514_v15 = vor.u32 %v11850_v29, %v10511_v8 }
 0x841   : > { %8667 = vmatpush.bf16.msrb.mxu0 %v11234_v34  ;;  %8475 = vmatpush.bf16.msrb.mxu1 %v10250_v56  ;;  %v10231_v34 = vld [vmem:[#allocation2 + $0x928] sm:$0xf0]  ;;  %v11870_v56 = vld [vmem:[#allocation2 + $0xbf4] sm:$0xf]  ;;  %v10218_v61 = vor.u32 %v11776_v41, %v10215_v39 }
 0x842   : > { %v10234_v38 = vor.u32 %v11780_v51, %v10231_v34  ;;  %v10594_v4 = vor.u32 %v11870_v56, %v10591_v7  ;;  %v15553_v2 = vpop.f32.mrf.mxu3  ;;  %v11175_v51 = vld [vmem:[#allocation2 + $0x1088] sm:$0xf0]  ;;  %v11750_v34 = vld [vmem:[#allocation2 + $0x834] sm:$0xf]  ;;  %v15560_v28 = vpop.f32.mrf.mxu0 }
 0x843   : > { %8489 = vmatpush.bf16.msrb.mxu2 %v10306_v48  ;;  %v12018_v48 = vld [vmem:[#allocation2 + $0x1094] sm:$0xf]  ;;  %v10567_v56 = vld [vmem:[#allocation2 + $0xbc8] sm:$0xf0]  ;;  %v8183_v41 = vadd.f32 %v15553_v2, %v15544_v32  ;;  %v10399_v32 = vld [vmem:[#allocation2 + $0xa78] sm:$0xf0] }
 0x844   : > { %8399 = vmatpush.bf16.msra.mxu3 %v9850_v31  ;;  %v11191_v31 = vld [vmem:[#allocation2 + $0x10a8] sm:$0xf0] }
 0x845   : > { %8668 = vmatpush.bf16.msrb.mxu0 %v11226_v5  ;;  %8476 = vmatpush.bf16.msrb.mxu1 %v10242_v16  ;;  %v11202_v5 = vor.u32 %v12022_v44, %v11199_v27  ;;  %v11194_v26 = vor.u32 %v12020_v59, %v11191_v31  ;;  %v11854_v16 = vld [vmem:[#allocation2 + $0xb74] sm:$0xf]  ;;  %v12016_v44 = vld [vmem:[#allocation2 + $0x1084] sm:$0xf]  ;;  %v10551_v2 = vld [vmem:[#allocation2 + $0xba8] sm:$0xf0] }
 0x847   : > { %8490 = vmatpush.bf16.msrb.mxu2 %v10298_v46 }
 0x848   : > { %8400 = vmatpush.bf16.msra.mxu3 %v9842_v14  ;;  %v11183_v14 = vld [vmem:[#allocation2 + $0x1098] sm:$0xf0] }
 0x849   : > { %8669 = vmatpush.bf16.msrb.mxu0 %v11218_v36  ;;  %8477 = vmatpush.bf16.msrb.mxu1 %v10234_v38  ;;  %v10130_v36 = vor.u32 %v11754_v11, %v10127_v22  ;;  %v11866_v38 = vld [vmem:[#allocation2 + $0xbd4] sm:$0xf]  ;;  %v11178_v11 = vor.u32 %v12016_v44, %v11175_v51  ;;  %v10114_v22 = vor.u32 %v11750_v34, %v10111_v52  ;;  %v10495_v44 = vld [vmem:[#allocation2 + $0xb38] sm:$0xf0] }
 0x84a   : > { %v8184_v31 = vpop.f32.mrf.mxu3  ;;  %v12076_v52 = vld [vmem:[%s15732_s7 + $0x20] sm:$0xff] }
 0x84b   : > { %8491 = vmatpush.bf16.msrb.mxu2 %v10290_v43  ;;  %v10575_v43 = vld [vmem:[#allocation2 + $0xbd8] sm:$0xf0] }
 0x84c   : > { %8401 = vmatpush.bf16.msra.mxu3 %v9834_v10  ;;  %v10583_v10 = vld [vmem:[#allocation2 + $0xbe8] sm:$0xf0]  ;;  %v10578_v59 = vor.u32 %v11866_v38, %v10575_v43  ;;  %v11820_v43 = vld [vmem:[#allocation2 + $0xa64] sm:$0xf] }
 0x84d   : > { %8670 = vmatpush.bf16.msrb.mxu0 %v11210_v6  ;;  %8478 = vmatpush.bf16.msrb.mxu1 %v10226_v60  ;;  %v10586_v27 = vor.u32 %v11868_v1, %v10583_v10  ;;  %v11186_v6 = vor.u32 %v12018_v48, %v11183_v14  ;;  %v11864_v60 = vld [vmem:[#allocation2 + $0xbc4] sm:$0xf]  ;;  %v12078_v48 = vld [vmem:[%s15732_s7 + $0x30] sm:$0xff]  ;;  %v11746_v14 = vld [vmem:[#allocation2 + $0x814] sm:$0xf] }
 0x84e   : > { %v10570_v7 = vor.u32 %v11864_v60, %v10567_v56  ;;  %v10087_v1 = vld [vmem:[#allocation2 + $0x808] sm:$0xf0]  ;;  %v11846_v10 = vld [vmem:[#allocation2 + $0xb34] sm:$0xf]  ;;  %v10479_v56 = vld [vmem:[#allocation2 + $0xb18] sm:$0xf0] }
 0x84f   : > { %8402 = vmatmul.bf16.vlgmr.msra.gmra.mxu3 %v15352_v42  ;;  %v10527_v42 = vld [vmem:[#allocation2 + $0xb78] sm:$0xf0]  ;;  %8492 = vmatpush.bf16.msrb.mxu2 %v10282_v17  ;;  %v10487_v38 = vld [vmem:[#allocation2 + $0xb28] sm:$0xf0] }
 0x850   : > { %8446 = vmatpush.bf16.msrb.mxu3 %v10146_v63  ;;  %v10530_v46 = vor.u32 %v11854_v16, %v10527_v42  ;;  %v10122_v63 = vor.u32 %v11752_v13, %v10119_v33  ;;  %v10095_v13 = vld [vmem:[#allocation2 + $0x818] sm:$0xf0]  ;;  %v12077_v16 = vld [vmem:[%s15732_s7 + $0x28] sm:$0xff]  ;;  %v10490_v31 = vor.u32 %v11844_v23, %v10487_v38 }
 0x851   : > { %8671 = vmatpush.bf16.msrb.mxu0 %v11202_v5  ;;  %8479 = vmatpush.bf16.msrb.mxu1 %v10218_v61  ;;  %v12079_v5 = vld [vmem:[%s15732_s7 + $0x38] sm:$0xff]  ;;  %v10559_v33 = vld [vmem:[#allocation2 + $0xbb8] sm:$0xf0]  ;;  %v10098_v61 = vor.u32 %v11746_v14, %v10095_v13  ;;  %v11744_v42 = vld [vmem:[#allocation2 + $0x804] sm:$0xf] }
 0x852   : > { %8493 = vmatmul.bf16.vlgmr.msrb.gmra.mxu2 %v15359_v21  ;;  %v10103_v21 = vld [vmem:[#allocation2 + $0x828] sm:$0xf0]  ;;  %v8234_v54 = vpop.f32.mrf.mxu3  ;;  %v10090_v34 = vor.u32 %v11744_v42, %v10087_v1  ;;  %v10847_v14 = vld [vmem:[#allocation2 + $0xdf8] sm:$0xf0] }
 0x853   : > { %8537 = vmatpush.bf16.msra.mxu2 %v10594_v4  ;;  %v10503_v4 = vld [vmem:[#allocation2 + $0xb48] sm:$0xf0]  ;;  %v10783_v1 = vld [vmem:[#allocation2 + $0xd78] sm:$0xf0] }
 0x854   : > { %8447 = vmatpush.bf16.msrb.mxu3 %v10138_v50  ;;  %v11748_v50 = vld [vmem:[#allocation2 + $0x824] sm:$0xf]  ;;  %8480 = vmatmul.bf16.vlgmr.msrb.gmra.mxu1 %v15362_v9  ;;  %v10831_v23 = vld [vmem:[#allocation2 + $0xdd8] sm:$0xf0] }
 0x855   : > { %8672 = vmatpush.bf16.msrb.mxu0 %v11194_v26  ;;  %8524 = vmatpush.bf16.msra.mxu1 %v10530_v46  ;;  %v10106_v17 = vor.u32 %v11748_v50, %v10103_v21  ;;  %v11848_v9 = vld [vmem:[#allocation2 + $0xb44] sm:$0xf]  ;;  %v11862_v26 = vld [vmem:[#allocation2 + $0xbb4] sm:$0xf]  ;;  %v8314_v46 = vpop.f32.mrf.mxu0  ;;  %v10383_v21 = vld [vmem:[#allocation2 + $0xa58] sm:$0xf0] }
 0x856   : > { %v10562_v39 = vor.u32 %v11862_v26, %v10559_v33  ;;  %v11818_v50 = vld [vmem:[#allocation2 + $0xa54] sm:$0xf]  ;;  %v11816_v26 = vld [vmem:[#allocation2 + $0xa44] sm:$0xf]  ;;  %v15586_v46 = vpop.f32.mrf.mxu1 }
 0x857   : > { %8538 = vmatpush.bf16.msra.mxu2 %v10586_v27  ;;  %v11860_v27 = vld [vmem:[#allocation2 + $0xba4] sm:$0xf] }
 0x858   : > { %8448 = vmatpush.bf16.msrb.mxu3 %v10130_v36  ;;  %v10506_v36 = vor.u32 %v11848_v9, %v10503_v4  ;;  %v10554_v51 = vor.u32 %v11860_v27, %v10551_v2  ;;  %v12074_v4 = vld [vmem:[%s15732_s7 + $0x10] sm:$0xff] }
 0x859   : > { %8673 = vmatpush.bf16.msrb.mxu0 %v11186_v6  ;;  %8525 = vmatpush.bf16.msra.mxu1 %v10522_v0  ;;  %v11822_v6 = vld [vmem:[#allocation2 + $0xa74] sm:$0xf] }
 0x85a   : > { %v10402_v55 = vor.u32 %v11822_v6, %v10399_v32  ;;  %v11858_v0 = vld [vmem:[#allocation2 + $0xb94] sm:$0xf]  ;;  %v8236_v29 = vpop.f32.mrf.mxu3 }
 0x85b   : > { %8539 = vmatpush.bf16.msra.mxu2 %v10578_v59  ;;  %v10391_v59 = vld [vmem:[#allocation2 + $0xa68] sm:$0xf0]  ;;  %v11814_v32 = vld [vmem:[#allocation2 + $0xa34] sm:$0xf] }
 0x85c   : > { %8449 = vmatpush.bf16.msrb.mxu3 %v10122_v63  ;;  %v8196_v63 = vadd.f32 %v15535_v20, %v8183_v41  ;;  %v10394_v8 = vor.u32 %v11820_v43, %v10391_v59  ;;  %v10386_v41 = vor.u32 %v11818_v50, %v10383_v21  ;;  %v11812_v59 = vld [vmem:[#allocation2 + $0xa24] sm:$0xf]  ;;  %v12266_v50 = vld [vmem:[%s15731_s6] sm:$0x3] }
 0x85d   : > { %8674 = vmatpush.bf16.msrb.mxu0 %v11178_v11  ;;  %8526 = vmatpush.bf16.msra.mxu1 %v10514_v15  ;;  %v10543_v11 = vld [vmem:[#allocation2 + $0xb98] sm:$0xf0]  ;;  %v15579_v60 = vpop.f32.mrf.mxu0  ;;  %v11842_v15 = vld [vmem:[#allocation2 + $0xb14] sm:$0xf]  ;;  %v7751_v21 = vperm.slane %v12266_v50, 1 }
 0x85e   : > { %v8209_v20 = vadd.f32 %v15540_v35, %v8196_v63  ;;  %v10482_v35 = vor.u32 %v11842_v15, %v10479_v56  ;;  %v15592_v63 = vpop.f32.mrf.mxu2  ;;  %v11920_v50 = vld [vmem:[#allocation2 + $0xd84] sm:$0xf] }
 0x85f   : > { %8540 = vmatpush.bf16.msra.mxu2 %v10570_v7  ;;  %v11856_v7 = vld [vmem:[#allocation2 + $0xb84] sm:$0xf] }
 0x860   : > { %8450 = vmatpush.bf16.msrb.mxu3 %v10114_v22  ;;  %8675 = vmatmul.bf16.vlgmr.msrb.gmra.mxu0 %v15377_v57  ;;  %v10498_v57 = vor.u32 %v11846_v10, %v10495_v44  ;;  %v10546_v22 = vor.u32 %v11858_v0, %v10543_v11  ;;  %v8222_v13 = vadd.f32 %v15546_v30, %v8209_v20  ;;  %v11918_v30 = vld [vmem:[#allocation2 + $0xd74] sm:$0xf]  ;;  %v10839_v44 = vld [vmem:[#allocation2 + $0xde8] sm:$0xf0]  ;;  %v12072_v0 = vld [vmem:[%s15732_s7] sm:$0xff] }
 0x861   : > { %8852 = vmatpush.bf16.msra.mxu0 %v12079_v5  ;;  %8527 = vmatpush.bf16.msra.mxu1 %v10506_v36  ;;  %v12075_v5 = vld [vmem:[%s15732_s7 + $0x18] sm:$0xff]  ;;  %v10786_v10 = vor.u32 %v11918_v30, %v10783_v1  ;;  %v10767_v11 = vld [vmem:[#allocation2 + $0xd58] sm:$0xf0]  ;;  %v11928_v20 = vld [vmem:[#allocation2 + $0xdc4] sm:$0xf] }
 0x862   : > { %v8235_v33 = vadd.f32 %v8234_v54, %v8222_v13  ;;  %v12073_v54 = vld [vmem:[%s15732_s7 + $0x8] sm:$0xff]  ;;  %v11910_v30 = vld [vmem:[#allocation2 + $0xd34] sm:$0xf]  ;;  %v10751_v1 = vld [vmem:[#allocation2 + $0xd38] sm:$0xf0] }
 0x863   : > { %8541 = vmatpush.bf16.msra.mxu2 %v10562_v39  ;;  %v10375_v39 = vld [vmem:[#allocation2 + $0xa48] sm:$0xf0]  ;;  %v11912_v13 = vld [vmem:[#allocation2 + $0xd44] sm:$0xf] }
 0x864   : > { %8451 = vmatpush.bf16.msrb.mxu3 %v10106_v17  ;;  %v10535_v17 = vld [vmem:[#allocation2 + $0xb88] sm:$0xf0]  ;;  %12258 = vtanh.f32 %v8235_v33  ;;  %v10378_v6 = vor.u32 %v11816_v26, %v10375_v39  ;;  %v10815_v33 = vld [vmem:[#allocation2 + $0xdb8] sm:$0xf0] }
 0x865   : > { %8853 = vmatpush.bf16.msra.mxu0 %v12078_v48  ;;  %8528 = vmatpush.bf16.msra.mxu1 %v10498_v57  ;;  %v11934_v48 = vld [vmem:[#allocation2 + $0xdf4] sm:$0xf]  ;;  %v10538_v9 = vor.u32 %v11856_v7, %v10535_v17  ;;  %v10367_v57 = vld [vmem:[#allocation2 + $0xa38] sm:$0xf0]  ;;  %v8366_v2 = vpop.f32.mrf.mxu0 }
 0x866   : > { %v10850_v36 = vor.u32 %v11934_v48, %v10847_v14  ;;  %v10370_v43 = vor.u32 %v11814_v32, %v10367_v57  ;;  %v11810_v7 = vld [vmem:[#allocation2 + $0xa14] sm:$0xf]  ;;  %v8288_v14 = vpop.f32.mrf.mxu2 }
 0x867   : > { %8542 = vmatpush.bf16.msra.mxu2 %v10554_v51  ;;  %v11916_v51 = vld [vmem:[#allocation2 + $0xd64] sm:$0xf] }
 0x868   : > { %8452 = vmatpush.bf16.msrb.mxu3 %v10098_v61  ;;  %v11840_v61 = vld [vmem:[#allocation2 + $0xb04] sm:$0xf] }
 0x869   : > { %8854 = vmatpush.bf16.msra.mxu0 %v12077_v16  ;;  %8529 = vmatpush.bf16.msra.mxu1 %v10490_v31  ;;  %v10471_v16 = vld [vmem:[#allocation2 + $0xb08] sm:$0xf0]  ;;  %v11914_v31 = vld [vmem:[#allocation2 + $0xd54] sm:$0xf] }
 0x86a   : > { %v10474_v42 = vor.u32 %v11840_v61, %v10471_v16  ;;  %v10770_v29 = vor.u32 %v11914_v31, %v10767_v11  ;;  %v11808_v61 = vld [vmem:[#allocation2 + $0xa04] sm:$0xf]  ;;  %v10343_v16 = vld [vmem:[#allocation2 + $0xa08] sm:$0xf0]  ;;  %v11882_v11 = vld [vmem:[#allocation2 + $0xc54] sm:$0xf] }
 0x86b   : > { %8543 = vmatpush.bf16.msra.mxu2 %v10546_v22  ;;  %v8275_v22 = vpop.f32.mrf.mxu1  ;;  %v10346_v2 = vor.u32 %v11808_v61, %v10343_v16 }
 0x86c   : > { %8453 = vmatpush.bf16.msrb.mxu3 %v10090_v34  ;;  %v10775_v34 = vld [vmem:[#allocation2 + $0xd68] sm:$0xf0]  ;;  %v11906_v22 = vld [vmem:[#allocation2 + $0xd14] sm:$0xf] }
 0x86d   : > { %8855 = vmatpush.bf16.msra.mxu0 %v12076_v52  ;;  %8530 = vmatpush.bf16.msra.mxu1 %v10482_v35  ;;  %v11930_v52 = vld [vmem:[#allocation2 + $0xdd4] sm:$0xf]  ;;  %v15601_v35 = vpop.f32.mrf.mxu0 }
 0x86e   : > { %v10834_v38 = vor.u32 %v11930_v52, %v10831_v23  ;;  %v11908_v23 = vld [vmem:[#allocation2 + $0xd24] sm:$0xf] }
 0x86f   : > { %8454 = vmatmul.bf16.vlgmr.msrb.gmra.mxu3 %v15375_v40  ;;  %v11932_v40 = vld [vmem:[#allocation2 + $0xde4] sm:$0xf]  ;;  %8544 = vmatpush.bf16.msra.mxu2 %v10538_v9  ;;  %v10759_v9 = vld [vmem:[#allocation2 + $0xd48] sm:$0xf0] }
 0x870   : > { %8498 = vmatpush.bf16.msra.mxu3 %v10402_v55  ;;  %v10842_v27 = vor.u32 %v11932_v40, %v10839_v44  ;;  %v10778_v55 = vor.u32 %v11916_v51, %v10775_v34  ;;  %v11924_v40 = vld [vmem:[#allocation2 + $0xda4] sm:$0xf]  ;;  %v10655_v44 = vld [vmem:[#allocation2 + $0xc78] sm:$0xf0] }
 0x871   : > { %8856 = vmatpush.bf16.msra.mxu0 %v12075_v5  ;;  %8531 = vmatpush.bf16.msra.mxu1 %v10474_v42  ;;  %v12259_v5 = vpop.eup %12258 }
 0x872   : > { %8545 = vmatmul.bf16.vlgmr.msra.gmra.mxu2 %v15382_v62  ;;  %v10359_v62 = vld [vmem:[#allocation2 + $0xa28] sm:$0xf0]  ;;  %v8721_v17 = vpack.c.bf16 %v12259_v5, %v12259_v5  ;;  %v8247_v48 = vpop.f32.mrf.mxu3  ;;  %v10735_v5 = vld [vmem:[#allocation2 + $0xd18] sm:$0xf0] }
 0x873   : > { %8589 = vmatpush.bf16.msrb.mxu2 %v10850_v36  ;;  %v10362_v56 = vor.u32 %v11812_v59, %v10359_v62  ;;  %v8248_v26 = vadd.f32 %v8247_v48, %v7751_v21  ;;  %v10762_v36 = vor.u32 %v11912_v13, %v10759_v9  ;;  %v15605_v32 = vpop.f32.mrf.mxu1  ;;  %v10799_v62 = vld [vmem:[#allocation2 + $0xd98] sm:$0xf0]  ;;  %v10738_v21 = vor.u32 %v11906_v22, %v10735_v5  ;;  %v10631_v13 = vld [vmem:[#allocation2 + $0xc48] sm:$0xf0]  ;;  %v11904_v9 = vld [vmem:[#allocation2 + $0xd04] sm:$0xf] }
 0x874   : > { %8499 = vmatpush.bf16.msra.mxu3 %v10394_v8  ;;  %8532 = vmatmul.bf16.vlgmr.msra.gmra.mxu1 %v15385_v58  ;;  %v10823_v8 = vld [vmem:[#allocation2 + $0xdc8] sm:$0xf0]  ;;  %v10351_v58 = vld [vmem:[#allocation2 + $0xa18] sm:$0xf0] }
 0x875   : > { %8857 = vmatpush.bf16.msra.mxu0 %v12074_v4  ;;  %8576 = vmatpush.bf16.msrb.mxu1 %v10786_v10  ;;  %v10826_v15 = vor.u32 %v11928_v20, %v10823_v8  ;;  %v11926_v4 = vld [vmem:[#allocation2 + $0xdb4] sm:$0xf]  ;;  %v10354_v39 = vor.u32 %v11810_v7, %v10351_v58  ;;  %v8261_v42 = vadd.f32 %v15550_v47, %v8248_v26  ;;  %v8418_v47 = vpop.f32.mrf.mxu0  ;;  %v10639_v20 = vld [vmem:[#allocation2 + $0xc58] sm:$0xf0]  ;;  %v11880_v58 = vld [vmem:[#allocation2 + $0xc44] sm:$0xf] }
 0x876   : > { %v11886_v10 = vld [vmem:[#allocation2 + $0xc74] sm:$0xf]  ;;  %v10642_v14 = vor.u32 %v11882_v11, %v10639_v20  ;;  %v11876_v47 = vld [vmem:[#allocation2 + $0xc24] sm:$0xf]  ;;  %v11015_v20 = vld [vmem:[#allocation2 + $0xf48] sm:$0xf0] }
 0x877   : > { %8590 = vmatpush.bf16.msrb.mxu2 %v10842_v27  ;;  %v8274_v27 = vadd.f32 %v15586_v46, %v8261_v42  ;;  %v10658_v34 = vor.u32 %v11886_v10, %v10655_v44  ;;  %v11922_v46 = vld [vmem:[#allocation2 + $0xd94] sm:$0xf]  ;;  %v10634_v42 = vor.u32 %v11880_v58, %v10631_v13  ;;  %v11031_v10 = vld [vmem:[#allocation2 + $0xf68] sm:$0xf0]  ;;  %v11976_v11 = vld [vmem:[#allocation2 + $0xf44] sm:$0xf] }
 0x878   : > { %8500 = vmatpush.bf16.msra.mxu3 %v10386_v41  ;;  %v10818_v41 = vor.u32 %v11926_v4, %v10815_v33  ;;  %v10802_v31 = vor.u32 %v11922_v46, %v10799_v62  ;;  %v11998_v8 = vld [vmem:[#allocation2 + $0xff4] sm:$0xf]  ;;  %v10727_v4 = vld [vmem:[#allocation2 + $0xd08] sm:$0xf0]  ;;  %v10607_v62 = vld [vmem:[#allocation2 + $0xc18] sm:$0xf0] }
 0x879   : > { %8858 = vmatpush.bf16.msra.mxu0 %v12073_v54  ;;  %8577 = vmatpush.bf16.msrb.mxu1 %v10778_v55  ;;  %v10754_v54 = vor.u32 %v11910_v30, %v10751_v1  ;;  %v15608_v51 = vadd.f32 %v15592_v63, %v8274_v27  ;;  %v15610_v55 = vpop.f32.mrf.mxu2  ;;  %v11982_v33 = vld [vmem:[#allocation2 + $0xf74] sm:$0xf]  ;;  %v10623_v1 = vld [vmem:[#allocation2 + $0xc38] sm:$0xf0]  ;;  %v11079_v46 = vld [vmem:[#allocation2 + $0xfc8] sm:$0xf0] }
 0x87a   : > { %v8249_v52 = vpop.f32.mrf.mxu3  ;;  %v11878_v30 = vld [vmem:[#allocation2 + $0xc34] sm:$0xf]  ;;  %v11071_v5 = vld [vmem:[#allocation2 + $0xfb8] sm:$0xf0] }
 0x87b   : > { %8591 = vmatpush.bf16.msrb.mxu2 %v10834_v38  ;;  %v10743_v38 = vld [vmem:[#allocation2 + $0xd28] sm:$0xf0]  ;;  %v11994_v44 = vld [vmem:[#allocation2 + $0xfd4] sm:$0xf]  ;;  %v11007_v58 = vld [vmem:[#allocation2 + $0xf38] sm:$0xf0] }
 0x87c   : > { %8501 = vmatpush.bf16.msra.mxu3 %v10378_v6  ;;  %v10807_v6 = vld [vmem:[#allocation2 + $0xda8] sm:$0xf0]  ;;  %v10746_v59 = vor.u32 %v11908_v23, %v10743_v38  ;;  %v11978_v52 = vld [vmem:[#allocation2 + $0xf54] sm:$0xf]  ;;  %v11023_v23 = vld [vmem:[#allocation2 + $0xf58] sm:$0xf0] }
 0x87d   : > { %8859 = vmatpush.bf16.msra.mxu0 %v12072_v0  ;;  %8578 = vmatpush.bf16.msrb.mxu1 %v10770_v29  ;;  %v10810_v57 = vor.u32 %v11924_v40, %v10807_v6  ;;  %v11884_v0 = vld [vmem:[#allocation2 + $0xc64] sm:$0xf]  ;;  %v10791_v29 = vld [vmem:[#allocation2 + $0xd88] sm:$0xf0]  ;;  %v11950_v13 = vld [vmem:[#allocation2 + $0xe74] sm:$0xf] }
 0x87e   : > { %v10794_v7 = vor.u32 %v11920_v50, %v10791_v29  ;;  %v11980_v40 = vld [vmem:[#allocation2 + $0xf64] sm:$0xf] }
 0x87f   : > { %8592 = vmatpush.bf16.msrb.mxu2 %v10826_v15  ;;  %v11103_v15 = vld [vmem:[#allocation2 + $0xff8] sm:$0xf0]  ;;  %v11034_v27 = vor.u32 %v11980_v40, %v11031_v10  ;;  %v11992_v38 = vld [vmem:[#allocation2 + $0xfc4] sm:$0xf] }
 0x880   : > { %8502 = vmatpush.bf16.msra.mxu3 %v10370_v43  ;;  %8860 = vmatmul.bf16.vlgmr.msra.gmra.mxu0 %v8721_v17  ;;  %v10647_v43 = vld [vmem:[#allocation2 + $0xc68] sm:$0xf0]  ;;  %v15613_v17 = vpop.f32.mrf.mxu0  ;;  %v11106_v48 = vor.u32 %v11998_v8, %v11103_v15  ;;  %v11872_v15 = vld [vmem:[#allocation2 + $0xc04] sm:$0xf]  ;;  %v11055_v40 = vld [vmem:[#allocation2 + $0xf98] sm:$0xf0] }
 0x881   : > { %8579 = vmatpush.bf16.msrb.mxu1 %v10762_v36  ;;  %v10650_v63 = vor.u32 %v11884_v0, %v10647_v43  ;;  %v8340_v26 = vpop.f32.mrf.mxu2  ;;  %v10730_v36 = vor.u32 %v11904_v9, %v10727_v4  ;;  %v11082_v0 = vor.u32 %v11992_v38, %v11079_v46  ;;  %v11944_v46 = vld [vmem:[#allocation2 + $0xe44] sm:$0xf] }
 0x882   : > { %v11063_v26 = vld [vmem:[#allocation2 + $0xfa8] sm:$0xf0] }
 0x883   : > { %8593 = vmatpush.bf16.msrb.mxu2 %v10818_v41  ;;  %v11039_v41 = vld [vmem:[#allocation2 + $0xf78] sm:$0xf0] }
 0x884   : > { %8503 = vmatpush.bf16.msra.mxu3 %v10362_v56  ;;  %v8327_v56 = vpop.f32.mrf.mxu1  ;;  %v11042_v61 = vor.u32 %v11982_v33, %v11039_v41 }
 0x885   : > { %8580 = vmatpush.bf16.msrb.mxu1 %v10754_v54  ;;  %v11087_v54 = vld [vmem:[#allocation2 + $0xfd8] sm:$0xf0]  ;;  %v10599_v56 = vld [vmem:[#allocation2 + $0xc08] sm:$0xf0] }
 0x886   : > { %v10602_v33 = vor.u32 %v11872_v15, %v10599_v56  ;;  %v11942_v15 = vld [vmem:[#allocation2 + $0xe34] sm:$0xf]  ;;  %v10879_v56 = vld [vmem:[#allocation2 + $0xe38] sm:$0xf0] }
 0x887   : > { %8594 = vmatpush.bf16.msrb.mxu2 %v10810_v57  ;;  %v11090_v57 = vor.u32 %v11994_v44, %v11087_v54  ;;  %v10895_v54 = vld [vmem:[#allocation2 + $0xe58] sm:$0xf0] }
 0x888   : > { %8504 = vmatpush.bf16.msra.mxu3 %v10354_v39  ;;  %v11996_v39 = vld [vmem:[#allocation2 + $0xfe4] sm:$0xf]  ;;  %v8470_v6 = vpop.f32.mrf.mxu0 }
 0x889   : > { %8581 = vmatpush.bf16.msrb.mxu1 %v10746_v59  ;;  %v11874_v59 = vld [vmem:[#allocation2 + $0xc14] sm:$0xf] }
 0x88a   : > { %v10610_v29 = vor.u32 %v11874_v59, %v10607_v62  ;;  %v11970_v6 = vld [vmem:[#allocation2 + $0xf14] sm:$0xf]  ;;  %v10887_v62 = vld [vmem:[#allocation2 + $0xe48] sm:$0xf0] }
 0x88b   : > { %8595 = vmatpush.bf16.msrb.mxu2 %v10802_v31 }
 0x88c   : > { %8505 = vmatpush.bf16.msra.mxu3 %v10346_v2  ;;  %v10626_v2 = vor.u32 %v11878_v30, %v10623_v1  ;;  %v10903_v30 = vld [vmem:[#allocation2 + $0xe68] sm:$0xf0] }
 0x88d   : > { %8582 = vmatpush.bf16.msrb.mxu1 %v10738_v21 }
 0x88f   : > { %8506 = vmatmul.bf16.vlgmr.msra.gmra.mxu3 %v15399_v37  ;;  %8596 = vmatpush.bf16.msrb.mxu2 %v10794_v7  ;;  %v11095_v37 = vld [vmem:[#allocation2 + $0xfe8] sm:$0xf0]  ;;  %v11974_v7 = vld [vmem:[#allocation2 + $0xf34] sm:$0xf] }
 0x890   : > { %8550 = vmatpush.bf16.msrb.mxu3 %v10658_v34  ;;  %v11098_v16 = vor.u32 %v11996_v39, %v11095_v37  ;;  %v10615_v34 = vld [vmem:[#allocation2 + $0xc28] sm:$0xf0]  ;;  %v15618_v50 = vpop.f32.mrf.mxu0  ;;  %v11010_v4 = vor.u32 %v11974_v7, %v11007_v58  ;;  %v11972_v37 = vld [vmem:[#allocation2 + $0xf24] sm:$0xf] }
 0x891   : > { %8583 = vmatpush.bf16.msrb.mxu1 %v10730_v36  ;;  %v10618_v43 = vor.u32 %v11876_v47, %v10615_v34  ;;  %v15622_v9 = vpop.f32.mrf.mxu1  ;;  %v11047_v34 = vld [vmem:[#allocation2 + $0xf88] sm:$0xf0]  ;;  %v12044_v7 = vld [vmem:[#allocation2 + $0x1164] sm:$0xf] }
 0x892   : > { %8597 = vmatmul.bf16.vlgmr.msrb.gmra.mxu2 %v15404_v19  ;;  %v11026_v19 = vor.u32 %v11978_v52, %v11023_v23  ;;  %v8299_v31 = vpop.f32.mrf.mxu3  ;;  %v12062_v52 = vld [vmem:[#allocation2 + $0x11f4] sm:$0xf]  ;;  %v11359_v23 = vld [vmem:[#allocation2 + $0x11f8] sm:$0xf0]  ;;  %v11287_v58 = vld [vmem:[#allocation2 + $0x1168] sm:$0xf0] }
 0x893   : > { %8641 = vmatpush.bf16.msra.mxu2 %v11106_v48  ;;  %v8300_v22 = vadd.f32 %v8299_v31, %v15608_v51  ;;  %v11988_v48 = vld [vmem:[#allocation2 + $0xfa4] sm:$0xf]  ;;  %v10911_v51 = vld [vmem:[#allocation2 + $0xe78] sm:$0xf0] }
 0x894   : > { %8551 = vmatpush.bf16.msrb.mxu3 %v10650_v63  ;;  %8584 = vmatmul.bf16.vlgmr.msrb.gmra.mxu1 %v15407_v3  ;;  %v11990_v63 = vld [vmem:[#allocation2 + $0xfb4] sm:$0xf]  ;;  %v11018_v3 = vor.u32 %v11976_v11, %v11015_v20  ;;  %v11066_v36 = vor.u32 %v11988_v48, %v11063_v26  ;;  %v10914_v39 = vor.u32 %v11950_v13, %v10911_v51  ;;  %v11968_v31 = vld [vmem:[#allocation2 + $0xf04] sm:$0xf]  ;;  %v10983_v11 = vld [vmem:[#allocation2 + $0xf08] sm:$0xf0] }
 0x895   : > { %8628 = vmatpush.bf16.msra.mxu1 %v11042_v61  ;;  %v11074_v21 = vor.u32 %v11990_v63, %v11071_v5  ;;  %v8313_v8 = vadd.f32 %v15560_v28, %v8300_v22  ;;  %v15627_v41 = vpop.f32.mrf.mxu2  ;;  %v10986_v20 = vor.u32 %v11968_v31, %v10983_v11  ;;  %v12046_v63 = vld [vmem:[#allocation2 + $0x1174] sm:$0xf]  ;;  %v11295_v22 = vld [vmem:[#allocation2 + $0x1178] sm:$0xf0]  ;;  %v11940_v26 = vld [vmem:[#allocation2 + $0xe24] sm:$0xf] }
 0x896   : > { %v12058_v48 = vld [vmem:[#allocation2 + $0x11d4] sm:$0xf]  ;;  %v11343_v13 = vld [vmem:[#allocation2 + $0x11d8] sm:$0xf0]  ;;  %v11319_v31 = vld [vmem:[#allocation2 + $0x11a8] sm:$0xf0] }
 0x897   : > { %8642 = vmatpush.bf16.msra.mxu2 %v11098_v16  ;;  %v11986_v16 = vld [vmem:[#allocation2 + $0xf94] sm:$0xf]  ;;  %v11346_v51 = vor.u32 %v12058_v48, %v11343_v13  ;;  %v11247_v48 = vld [vmem:[#allocation2 + $0x1118] sm:$0xf0] }
 0x898   : > { %8552 = vmatpush.bf16.msrb.mxu3 %v10642_v14  ;;  %v8326_v14 = vadd.f32 %v15605_v32, %v8313_v8  ;;  %v10999_v32 = vld [vmem:[#allocation2 + $0xf28] sm:$0xf0]  ;;  %v8522_v10 = vpop.f32.mrf.mxu0  ;;  %v11058_v44 = vor.u32 %v11986_v16, %v11055_v40  ;;  %v10890_v8 = vor.u32 %v11944_v46, %v10887_v62  ;;  %v10863_v40 = vld [vmem:[#allocation2 + $0xe18] sm:$0xf0]  ;;  %v12052_v46 = vld [vmem:[#allocation2 + $0x11a4] sm:$0xf] }
 0x899   : > { %8629 = vmatpush.bf16.msra.mxu1 %v11034_v27  ;;  %v11002_v1 = vor.u32 %v11972_v37, %v10999_v32  ;;  %v11946_v27 = vld [vmem:[#allocation2 + $0xe54] sm:$0xf]  ;;  %v8379_v38 = vpop.f32.mrf.mxu1  ;;  %v12056_v37 = vld [vmem:[#allocation2 + $0x11c4] sm:$0xf]  ;;  %v11335_v16 = vld [vmem:[#allocation2 + $0x11c8] sm:$0xf0]  ;;  %v11322_v11 = vor.u32 %v12052_v46, %v11319_v31 }
 0x89a   : > { %v15625_v28 = vadd.f32 %v15610_v55, %v8326_v14  ;;  %v8301_v61 = vpop.f32.mrf.mxu3  ;;  %v10898_v59 = vor.u32 %v11946_v27, %v10895_v54  ;;  %v11290_v14 = vor.u32 %v12044_v7, %v11287_v58  ;;  %v11271_v27 = vld [vmem:[#allocation2 + $0x1148] sm:$0xf0]  ;;  %v12054_v54 = vld [vmem:[#allocation2 + $0x11b4] sm:$0xf]  ;;  %v11391_v46 = vld [vmem:[#allocation2 + $0x1238] sm:$0xf0] }
 0x89b   : > { %8643 = vmatpush.bf16.msra.mxu2 %v11090_v57  ;;  %v10991_v57 = vld [vmem:[#allocation2 + $0xf18] sm:$0xf0]  ;;  %v12038_v38 = vld [vmem:[#allocation2 + $0x1134] sm:$0xf] }
 0x89c   : > { %8553 = vmatpush.bf16.msrb.mxu3 %v10634_v42  ;;  %v11948_v42 = vld [vmem:[#allocation2 + $0xe64] sm:$0xf]  ;;  %v10994_v47 = vor.u32 %v11970_v6, %v10991_v57  ;;  %v11279_v61 = vld [vmem:[#allocation2 + $0x1158] sm:$0xf0] }
 0x89d   : > { %8630 = vmatpush.bf16.msra.mxu1 %v11026_v19  ;;  %v10906_v55 = vor.u32 %v11948_v42, %v10903_v30  ;;  %v11338_v42 = vor.u32 %v12056_v37, %v11335_v16  ;;  %v11327_v57 = vld [vmem:[#allocation2 + $0x11b8] sm:$0xf0]  ;;  %v11239_v37 = vld [vmem:[#allocation2 + $0x1108] sm:$0xf0]  ;;  %v12008_v16 = vld [vmem:[#allocation2 + $0x1044] sm:$0xf] }
 0x89f   : > { %8644 = vmatpush.bf16.msra.mxu2 %v11082_v0  ;;  %v11362_v0 = vor.u32 %v12062_v52, %v11359_v23  ;;  %v11936_v52 = vld [vmem:[#allocation2 + $0xe04] sm:$0xf]  ;;  %v10855_v23 = vld [vmem:[#allocation2 + $0xe08] sm:$0xf0] }
 0x8a0   : > { %8554 = vmatpush.bf16.msrb.mxu3 %v10626_v2  ;;  %v11984_v2 = vld [vmem:[#allocation2 + $0xf84] sm:$0xf]  ;;  %v15630_v5 = vpop.f32.mrf.mxu0 }
 0x8a1   : > { %8631 = vmatpush.bf16.msra.mxu1 %v11018_v3  ;;  %v11050_v19 = vor.u32 %v11984_v2, %v11047_v34  ;;  %v12060_v3 = vld [vmem:[#allocation2 + $0x11e4] sm:$0xf]  ;;  %v11330_v2 = vor.u32 %v12054_v54, %v11327_v57  ;;  %v11127_v54 = vld [vmem:[#allocation2 + $0x1028] sm:$0xf0]  ;;  %v12002_v57 = vld [vmem:[#allocation2 + $0x1014] sm:$0xf] }
 0x8a3   : > { %8645 = vmatpush.bf16.msra.mxu2 %v11074_v21  ;;  %v11298_v21 = vor.u32 %v12046_v63, %v11295_v22 }
 0x8a4   : > { %8555 = vmatpush.bf16.msrb.mxu3 %v10618_v43  ;;  %v8392_v43 = vpop.f32.mrf.mxu2 }
 0x8a5   : > { %8632 = vmatpush.bf16.msra.mxu1 %v11010_v4  ;;  %v10882_v4 = vor.u32 %v11942_v15, %v10879_v56  ;;  %v12014_v43 = vld [vmem:[#allocation2 + $0x1074] sm:$0xf]  ;;  %v11311_v56 = vld [vmem:[#allocation2 + $0x1198] sm:$0xf0] }
 0x8a7   : > { %8646 = vmatpush.bf16.msra.mxu2 %v11066_v36  ;;  %v10871_v36 = vld [vmem:[#allocation2 + $0xe28] sm:$0xf0] }
 0x8a8   : > { %8556 = vmatpush.bf16.msrb.mxu3 %v10610_v29  ;;  %v10874_v30 = vor.u32 %v11940_v26, %v10871_v36  ;;  %v11151_v26 = vld [vmem:[#allocation2 + $0x1058] sm:$0xf0] }
 0x8a9   : > { %8633 = vmatpush.bf16.msra.mxu1 %v11002_v1  ;;  %v11938_v1 = vld [vmem:[#allocation2 + $0xe14] sm:$0xf] }
 0x8aa   : > { %v10866_v34 = vor.u32 %v11938_v1, %v10863_v40 }
 0x8ab   : > { %8647 = vmatpush.bf16.msra.mxu2 %v11058_v44  ;;  %v12040_v44 = vld [vmem:[#allocation2 + $0x1144] sm:$0xf] }
 0x8ac   : > { %8557 = vmatpush.bf16.msrb.mxu3 %v10602_v33  ;;  %v15802_v33 = vld [vmem:[#allocation34_spill] sm:$0xff]  ;;  %v11274_v6 = vor.u32 %v12040_v44, %v11271_v27  ;;  %v11135_v44 = vld [vmem:[#allocation2 + $0x1038] sm:$0xf0] }
 0x8ad   : > { %8634 = vmatpush.bf16.msra.mxu1 %v10994_v47  ;;  %v12004_v27 = vld [vmem:[#allocation2 + $0x1024] sm:$0xf] }
 0x8af   : > { %8558 = vmatmul.bf16.vlgmr.msrb.gmra.mxu3 %v15426_v25  ;;  %8648 = vmatpush.bf16.msra.mxu2 %v11050_v19  ;;  %v11351_v25 = vld [vmem:[#allocation2 + $0x11e8] sm:$0xf0]  ;;  %v11263_v19 = vld [vmem:[#allocation2 + $0x1138] sm:$0xf0] }
 0x8b0   : > { %8602 = vmatpush.bf16.msra.mxu3 %v10914_v39  ;;  %v11354_v29 = vor.u32 %v12060_v3, %v11351_v25  ;;  %v12042_v39 = vld [vmem:[#allocation2 + $0x1154] sm:$0xf]  ;;  %v11255_v25 = vld [vmem:[#allocation2 + $0x1128] sm:$0xf0] }
 0x8b1   : > { %8635 = vmatpush.bf16.msra.mxu1 %v10986_v20  ;;  %v11282_v32 = vor.u32 %v12042_v39, %v11279_v61  ;;  %v15637_v62 = vpop.f32.mrf.mxu1  ;;  %v12032_v61 = vld [vmem:[#allocation2 + $0x1104] sm:$0xf] }
 0x8b2   : > { %8649 = vmatmul.bf16.vlgmr.msra.gmra.mxu2 %v15431_v49  ;;  %v8574_v49 = vpop.f32.mrf.mxu0  ;;  %v8351_v10 = vpop.f32.mrf.mxu3 }
 0x8b3   : > { %8693 = vmatpush.bf16.msrb.mxu2 %v11362_v0 }
 0x8b4   : > { %8603 = vmatpush.bf16.msra.mxu3 %v10906_v55  ;;  %8636 = vmatmul.bf16.vlgmr.msra.gmra.mxu1 %v15802_v33  ;;  %v8352_v55 = vadd.f32 %v8351_v10, %v15625_v28  ;;  %v11266_v28 = vor.u32 %v12038_v38, %v11263_v19  ;;  %v12006_v10 = vld [vmem:[#allocation2 + $0x1034] sm:$0xf]  ;;  %v11111_v38 = vld [vmem:[#allocation2 + $0x1008] sm:$0xf0] }
 0x8b5   : > { %8680 = vmatpush.bf16.msrb.mxu1 %v11298_v21  ;;  %v15640_v63 = vpop.f32.mrf.mxu2  ;;  %v12036_v21 = vld [vmem:[#allocation2 + $0x1124] sm:$0xf]  ;;  %v12070_v19 = vld [vmem:[#allocation2 + $0x1234] sm:$0xf] }
 0x8b6   : > { %v8365_v47 = vadd.f32 %v15579_v60, %v8352_v55  ;;  %v10858_v60 = vor.u32 %v11936_v52, %v10855_v23  ;;  %v11258_v15 = vor.u32 %v12036_v21, %v11255_v25  ;;  %v11130_v55 = vor.u32 %v12004_v27, %v11127_v54  ;;  %v12000_v23 = vld [vmem:[#allocation2 + $0x1004] sm:$0xf] }
 0x8b7   : > { %8694 = vmatpush.bf16.msrb.mxu2 %v11354_v29  ;;  %v12012_v29 = vld [vmem:[#allocation2 + $0x1064] sm:$0xf] }
 0x8b8   : > { %8604 = vmatpush.bf16.msra.mxu3 %v10898_v59  ;;  %v8378_v0 = vadd.f32 %v15622_v9, %v8365_v47  ;;  %v11167_v59 = vld [vmem:[#allocation2 + $0x1078] sm:$0xf0]  ;;  %v12050_v9 = vld [vmem:[#allocation2 + $0x1194] sm:$0xf]  ;;  %v12064_v25 = vld [vmem:[#allocation2 + $0x1204] sm:$0xf] }
 0x8b9   : > { %8681 = vmatpush.bf16.msrb.mxu1 %v11290_v14  ;;  %v11170_v22 = vor.u32 %v12014_v43, %v11167_v59  ;;  %v11314_v7 = vor.u32 %v12050_v9, %v11311_v56  ;;  %v12048_v14 = vld [vmem:[#allocation2 + $0x1184] sm:$0xf]  ;;  %v8431_v33 = vpop.f32.mrf.mxu1  ;;  %v11114_v43 = vor.u32 %v12000_v23, %v11111_v38  ;;  %v11367_v9 = vld [vmem:[#allocation2 + $0x1208] sm:$0xf0]  ;;  %v12083_v23 = vld [vmem:[%s15732_s7 + $0x58] sm:$0xff] }
 0x8ba   : > { %v8391_v20 = vadd.f32 %v15627_v41, %v8378_v0  ;;  %v8353_v3 = vpop.f32.mrf.mxu3  ;;  %v12034_v41 = vld [vmem:[#allocation2 + $0x1114] sm:$0xf] }
 0x8bb   : > { %8695 = vmatpush.bf16.msrb.mxu2 %v11346_v51  ;;  %v11303_v51 = vld [vmem:[#allocation2 + $0x1188] sm:$0xf0]  ;;  %v11250_v36 = vor.u32 %v12034_v41, %v11247_v48  ;;  %v11375_v3 = vld [vmem:[#allocation2 + $0x1218] sm:$0xf0] }
 0x8bc   : > { %8605 = vmatpush.bf16.msra.mxu3 %v10890_v8  ;;  %v11159_v8 = vld [vmem:[#allocation2 + $0x1068] sm:$0xf0]  ;;  %v11306_v39 = vor.u32 %v12048_v14, %v11303_v51 }
 0x8bd   : > { %8682 = vmatpush.bf16.msrb.mxu1 %v11282_v32  ;;  %v15642_v58 = vpop.f32.mrf.mxu0  ;;  %v11162_v13 = vor.u32 %v12012_v29, %v11159_v8  ;;  %v8444_v49 = vpop.f32.mrf.mxu2  ;;  %v11370_v8 = vor.u32 %v12064_v25, %v11367_v9 }
 0x8bf   : > { %8696 = vmatpush.bf16.msrb.mxu2 %v11338_v42  ;;  %v11143_v42 = vld [vmem:[#allocation2 + $0x1048] sm:$0xf0] }
 0x8c0   : > { %8606 = vmatpush.bf16.msra.mxu3 %v10882_v4  ;;  %v12010_v4 = vld [vmem:[#allocation2 + $0x1054] sm:$0xf]  ;;  %v11146_v40 = vor.u32 %v12008_v16, %v11143_v42 }
 0x8c1   : > { %8683 = vmatpush.bf16.msrb.mxu1 %v11274_v6  ;;  %v11154_v32 = vor.u32 %v12010_v4, %v11151_v26 }
 0x8c3   : > { %8697 = vmatpush.bf16.msrb.mxu2 %v11330_v2  ;;  %v11119_v2 = vld [vmem:[#allocation2 + $0x1018] sm:$0xf0] }
 0x8c4   : > { %8607 = vmatpush.bf16.msra.mxu3 %v10874_v30  ;;  %v11242_v30 = vor.u32 %v12032_v61, %v11239_v37  ;;  %v11122_v52 = vor.u32 %v12002_v57, %v11119_v2  ;;  %v12086_v57 = vld [vmem:[%s15732_s7 + $0x70] sm:$0xff] }
 0x8c5   : > { %8684 = vmatpush.bf16.msrb.mxu1 %v11266_v28  ;;  %v8626_v1 = vpop.f32.mrf.mxu0  ;;  %v11394_v28 = vor.u32 %v12070_v19, %v11391_v46  ;;  %v12082_v19 = vld [vmem:[%s15732_s7 + $0x50] sm:$0xff] }
 0x8c7   : > { %8698 = vmatpush.bf16.msrb.mxu2 %v11322_v11  ;;  %v12068_v11 = vld [vmem:[#allocation2 + $0x1224] sm:$0xf] }
 0x8c8   : > { %8608 = vmatpush.bf16.msra.mxu3 %v10866_v34 }
 0x8c9   : > { %8685 = vmatpush.bf16.msrb.mxu1 %v11258_v15 }
 0x8cb   : > { %8699 = vmatpush.bf16.msrb.mxu2 %v11314_v7 }
 0x8cc   : > { %8609 = vmatpush.bf16.msra.mxu3 %v10858_v60 }
 0x8cd   : > { %8686 = vmatpush.bf16.msrb.mxu1 %v11250_v36 }
 0x8cf   : > { %8610 = vmatmul.bf16.vlgmr.msra.gmra.mxu3 %v15451_v12  ;;  %8700 = vmatpush.bf16.msrb.mxu2 %v11306_v39  ;;  %v11138_v12 = vor.u32 %v12006_v10, %v11135_v44 }
 0x8d0   : > { %8654 = vmatpush.bf16.msrb.mxu3 %v11170_v22  ;;  %v12066_v22 = vld [vmem:[#allocation2 + $0x1214] sm:$0xf] }
 0x8d1   : > { %8687 = vmatpush.bf16.msrb.mxu1 %v11242_v30  ;;  %v8481_v0 = vpop.f32.mrf.mxu1 }
 0x8d2   : > { %8701 = vmatmul.bf16.vlgmr.msrb.gmra.mxu2 %v15456_v45  ;;  %v8403_v6 = vpop.f32.mrf.mxu3 }
 0x8d3   : > { %v8404_v47 = vadd.f32 %v8403_v6, %v8391_v20  ;;  %v11383_v20 = vld [vmem:[#allocation2 + $0x1228] sm:$0xf0] }
 0x8d4   : > { %8655 = vmatpush.bf16.msrb.mxu3 %v11162_v13  ;;  %8688 = vmatmul.bf16.vlgmr.msrb.gmra.mxu1 %v15459_v53 }
 0x8d5   : > { %v8417_v34 = vadd.f32 %v15601_v35, %v8404_v47  ;;  %v8494_v59 = vpop.f32.mrf.mxu2  ;;  %v11386_v35 = vor.u32 %v12068_v11, %v11383_v20 }
 0x8d7   : > { %v8430_v45 = vadd.f32 %v15637_v62, %v8417_v34  ;;  %v12084_v34 = vld [vmem:[%s15732_s7 + $0x60] sm:$0xff] }
 0x8d8   : > { %8656 = vmatpush.bf16.msrb.mxu3 %v11154_v32 }
 0x8d9   : > { %v8443_v53 = vadd.f32 %v15640_v63, %v8430_v45  ;;  %v8483_v62 = vpop.f32.mrf.mxu1  ;;  %v11378_v63 = vor.u32 %v12066_v22, %v11375_v3 }
 0x8da   : > { %v8405_v31 = vpop.f32.mrf.mxu3 }
 0x8dc   : > { %8657 = vmatpush.bf16.msrb.mxu3 %v11146_v40 }
 0x8dd   : > { %v15650_v60 = vpop.f32.mrf.mxu0  ;;  %v8496_v21 = vpop.f32.mrf.mxu2 }
 0x8e0   : > { %8658 = vmatpush.bf16.msrb.mxu3 %v11138_v12  ;;  %v12087_v12 = vld [vmem:[%s15732_s7 + $0x78] sm:$0xff] }
 0x8e1   : > { %8865 = vmatpush.bf16.msra.mxu1 %v12087_v12 }
 0x8e4   : > { %8659 = vmatpush.bf16.msrb.mxu3 %v11130_v55 }
 0x8e5   : > { %v8678_v29 = vpop.f32.mrf.mxu0  ;;  %8866 = vmatpush.bf16.msra.mxu1 %v12086_v57 }
 0x8e8   : > { %8660 = vmatpush.bf16.msrb.mxu3 %v11122_v52 }
 0x8ec   : > { %8661 = vmatpush.bf16.msrb.mxu3 %v11114_v43  ;;  %v12080_v43 = vld [vmem:[%s15732_s7 + $0x40] sm:$0xff] }
 0x8ef   : > { %8662 = vmatmul.bf16.vlgmr.msrb.gmra.mxu3 %v15478_v24 }
 0x8f0   : > { %8710 = vmatpush.bf16.msra.mxu3 %v11394_v28 }
 0x8f1   : > { %v8533_v48 = vpop.f32.mrf.mxu1 }
 0x8f2   : > { %v8455_v15 = vpop.f32.mrf.mxu3 }
 0x8f3   : > { %v8456_v56 = vadd.f32 %v8455_v15, %v8443_v53 }
 0x8f4   : > { %8711 = vmatpush.bf16.msra.mxu3 %v11386_v35 }
 0x8f5   : > { %v8469_v7 = vadd.f32 %v15613_v17, %v8456_v56  ;;  %v8546_v24 = vpop.f32.mrf.mxu2 }
 0x8f7   : > { %v8482_v41 = vadd.f32 %v8481_v0, %v8469_v7  ;;  %v12081_v0 = vld [vmem:[%s15732_s7 + $0x48] sm:$0xff] }
 0x8f8   : > { %8712 = vmatpush.bf16.msra.mxu3 %v11378_v63 }
 0x8f9   : > { %v8495_v14 = vadd.f32 %v8494_v59, %v8482_v41  ;;  %v8535_v4 = vpop.f32.mrf.mxu1 }
 0x8fa   : > { %v8457_v13 = vpop.f32.mrf.mxu3 }
 0x8fc   : > { %8713 = vmatpush.bf16.msra.mxu3 %v11370_v8 }
 0x8fd   : > { %v15656_v51 = vpop.f32.mrf.mxu0  ;;  %v8548_v26 = vpop.f32.mrf.mxu2 }
 0x8ff   : > { %11396 = vmatmul.msk.bf16.vlgmr.msra.gmra.mxu3 %vm3847_vm0, %v15483_v18 }
 0x905   : > { %v8863_v36 = vpop.f32.mrf.mxu0 }
 0x911   : > { %v8585_v37 = vpop.f32.mrf.mxu1 }
 0x912   : > { %v8507_v33 = vpop.f32.mrf.mxu3 }
 0x913   : > { %v8508_v39 = vadd.f32 %v8507_v33, %v8495_v14 }
 0x915   : > { %v8521_v61 = vadd.f32 %v15618_v50, %v8508_v39  ;;  %v8598_v18 = vpop.f32.mrf.mxu2 }
 0x917   : > { %v8534_v49 = vadd.f32 %v8533_v48, %v8521_v61 }
 0x919   : > { %v8547_v32 = vadd.f32 %v8546_v24, %v8534_v49  ;;  %v8587_v17 = vpop.f32.mrf.mxu1 }
 0x91a   : > { %v8509_v16 = vpop.f32.mrf.mxu3 }
 0x91d   : > { %v8600_v42 = vpop.f32.mrf.mxu2 }
 0x931   : > { %v8637_v10 = vpop.f32.mrf.mxu1 }
 0x932   : > { %v8559_v30 = vpop.f32.mrf.mxu3 }
 0x933   : > { %v8560_v1 = vadd.f32 %v8559_v30, %v8547_v32 }
 0x935   : > { %v8573_v40 = vadd.f32 %v15630_v5, %v8560_v1  ;;  %v8650_v54 = vpop.f32.mrf.mxu2  ;;  %v12085_v5 = vld [vmem:[%s15732_s7 + $0x68] sm:$0xff] }
 0x936   : > { %8867 = vmatpush.bf16.msra.mxu1 %v12085_v5 }
 0x937   : > { %v8586_v44 = vadd.f32 %v8585_v37, %v8573_v40 }
 0x939   : > { %v8599_v27 = vadd.f32 %v8598_v18, %v8586_v44  ;;  %v8639_v55 = vpop.f32.mrf.mxu1 }
 0x93a   : > { %v8561_v50 = vpop.f32.mrf.mxu3  ;;  %8868 = vmatpush.bf16.msra.mxu1 %v12084_v34 }
 0x93d   : > { %v8652_v6 = vpop.f32.mrf.mxu2 }
 0x93e   : > { %8869 = vmatpush.bf16.msra.mxu1 %v12083_v23 }
 0x942   : > { %8870 = vmatpush.bf16.msra.mxu1 %v12082_v19 }
 0x946   : > { %8871 = vmatpush.bf16.msra.mxu1 %v12081_v0 }
 0x94a   : > { %8872 = vmatpush.bf16.msra.mxu1 %v12080_v43 }
 0x951   : > { %v8689_v47 = vpop.f32.mrf.mxu1 }
 0x952   : > { %v8611_v2 = vpop.f32.mrf.mxu3 }
 0x953   : > { %v8612_v53 = vadd.f32 %v8611_v2, %v8599_v27 }
 0x955   : > { %v8702_v52 = vpop.f32.mrf.mxu2  ;;  %v8625_v59 = vadd.f32 %v15642_v58, %v8612_v53 }
 0x957   : > { %v8638_v28 = vadd.f32 %v8637_v10, %v8625_v59 }
 0x959   : > { %v8691_v45 = vpop.f32.mrf.mxu1  ;;  %v8651_v11 = vadd.f32 %v8650_v54, %v8638_v28 }
 0x95a   : > { %v8613_v38 = vpop.f32.mrf.mxu3 }
 0x95d   : > { %v8704_v46 = vpop.f32.mrf.mxu2 }
 0x972   : > { %v8663_v31 = vpop.f32.mrf.mxu3 }
 0x973   : > { %v8664_v20 = vadd.f32 %v8663_v31, %v8651_v11 }
 0x975   : > { %v8677_v35 = vadd.f32 %v15650_v60, %v8664_v20  ;;  %v8755_v60 = vld [vmem:[%s15733_s8] sm:$0x1] }
 0x976   : > { %v8862_v29 = vadd.f32 %v15656_v51, %v8755_v60 }
 0x977   : > { %v8690_v3 = vadd.f32 %v8689_v47, %v8677_v35 }
 0x979   : > { %v8703_v62 = vadd.f32 %v8702_v52, %v8690_v3 }
 0x97a   : > { %v8665_v22 = vpop.f32.mrf.mxu3 }
 0x982   : > { %v8715_v21 = vpop.f32.mrf.mxu3 }
 0x983   : > { %v8716_v63 = vadd.f32 %v8715_v21, %v8703_v62 }
 0x985   : > { %12260 = vtanh.f32 %v8716_v63 }
 0x98a   : > { %v8717_v25 = vpop.f32.mrf.mxu3 }
 0x98b   : > { %v12261_v9 = vpop.eup %12260 }
 0x98c   : > { %v8722_v58 = vpack.c.bf16 %v12261_v9, %v12261_v9 }
 0x98e   : > { %8873 = vmatmul.bf16.vlgmr.msra.gmra.mxu1 %v8722_v58 }
 0xa0b   : > { %v8874_v8 = vpop.f32.mrf.mxu1 }
 0xa0c   : > { %v8875_v15 = vadd.f32 %v8874_v8, %v8862_v29 }
 0xa0e   : > { %8879 = vst.msk [vmem:[%s14195_s28] sm:$0x1] %vm8878_vm4, %v8875_v15 }
 0xa0f   : > { %12294 = shalt.err (!%p12291_p3)
}
 0xa10   : > { %12089 = dma.vmem_to_hbm [thread:$0]  (%p12423_p5), %s8892_s29, 16, %s8894_s17, %s8881_s14  }
 0xa13   : > { %v8876_v56 = vpop.f32.mrf.mxu1 }
 0xa14 PF: > { %p12095_p4 = scmp.ge.s32.totalorder %s12331_s12, 2  ;;  %s8905_s28 = sand.u32 1, %s12319_s30  }
 0xa15   : > { %s8906_s16 = scalar_lea.sflag [#allocation9], %s8905_s28 }
 0xa16   : > { %p12092_p7 = pnand %p12095_p4, %p12427_p6 }
 0xa18   : > { %p12093_p8 = pneg %p12092_p7 }
 0xa1a   : > { %12314 = dma.done.wait (%p12093_p8), %s8906_s16, 16  }
 0xa1b   : > { %12316 = vsyncadd (%p12093_p8), %s8906_s16, 4294967280  ;;  %p19_p9 = scmp.ge.s32.totalorder %s12410_s15, 4   ;;  %s15804_s30 = smov %s12323_s10 }
 0xa1c   : > { %s15805_s10 = smov %s12327_s11  ;;  %s15806_s11 = smov %s12421_s18 }
 0xa1d   : > { %s15807_s12 = smov %s12410_s15  ;;  %21 = sbr.rel (!%p19_p9) target bundleno = 3 (0x3), region = 198 }
 0xa22   :  { %8911 = vsyncpa [#allocation9], 1 }
 0xa23   :  { %8913 = vsyncpa [#allocation9 + $0x1], 1 }
 0xa24   :  { %8914 = vsyncmov [#allocation7] }
 0xa27   :  { %s8915_s12 = vpop.sfrf %8914 }
 0xa28   :  { %p11463_p5 = scmp.ne.s32.totalorder %s8915_s12, 0 }
 0xa2a   :  { %8919 = shalt.err (%p11463_p5)  }

</bundles_post_ra>
